<compile_context>
chip_gen: v6e
topology: v6e:2x2x1
jax: 0.10.0
libtpu: 0.0.40
codegen_flags: <defaults>
</compile_context>

<pallas_src>
import jax
import jax.numpy as jnp
import numpy as np
from jax.experimental import pallas as pl
from jax.experimental.pallas import tpu as pltpu

EPS = 1e-3                   # BatchNorm eps of the reference module
C_PAD = 128                  # lane-dense channel width for every activation
MXU_DTYPE = jnp.bfloat16     # matmul operand dtype (accumulation is float32)


# --------------------------------------------------------------------------
# pallas_call plumbing
# --------------------------------------------------------------------------

def _batch_spec(shape):
    tail = (0,) * (len(shape) - 1)
    return pl.BlockSpec((1,) + tuple(shape[1:]), lambda n, _t=tail: (n,) + _t)


def _full_spec(shape):
    zeros = (0,) * len(shape)
    return pl.BlockSpec(tuple(shape), lambda n, _z=zeros: _z)


def _pcall(kernel, out_shape, batched, weights):
    """One fused kernel; grid over the batch dim (parallel across TCs)."""
    n = out_shape[0]
    return pl.pallas_call(
        kernel,
        out_shape=jax.ShapeDtypeStruct(tuple(out_shape), jnp.float32),
        grid=(n,),
        in_specs=([_batch_spec(a.shape) for a in batched]
                  + [_full_spec(w.shape) for w in weights]),
        out_specs=_batch_spec(out_shape),
        compiler_params=pltpu.CompilerParams(
            dimension_semantics=("parallel",)),
    )(*batched, *weights)


# --------------------------------------------------------------------------
# In-kernel helpers
# --------------------------------------------------------------------------

def _mm4(x4, w_ref):
    """1x1 conv: (1,h,w,Cin) @ (Cin,Cout) as ONE 2-D MXU matmul (M = h*w).

    When W is a multiple of 8 the (h,w)->(h*w) merge is sublane-aligned and
    free.  For the tiny tail stages (W = 4 or 2) fall back to the proven
    row-batched dot so no unaligned sublane reshape is required."""
    w = w_ref[...]
    n, h, ww, c = x4.shape
    if ww % 8 == 0:
        y = jnp.dot(x4.reshape(n * h * ww, c).astype(w.dtype), w,
                    preferred_element_type=jnp.float32)
        return y.reshape(n, h, ww, w.shape[-1])
    lhs = x4.reshape(n * h, ww, c).astype(w.dtype)
    rhs = jnp.broadcast_to(w, (n * h,) + w.shape)
    y = jax.lax.dot_general(lhs, rhs,
                            dimension_numbers=(((2,), (1,)), ((0,), (0,))),
                            preferred_element_type=jnp.float32)
    return y.reshape(n, h, ww, w.shape[-1])


def _dw_s1(z, w, b):
    """3x3 depthwise conv, stride 1, zero pad 1, on (1,h,w,C).  The two
    sublane (W) shifts are hoisted out of the 9-tap loop."""
    zcol = jnp.zeros_like(z[:, :, :1, :])
    zrow = jnp.zeros_like(z[:, :1, :, :])
    z_w = [jnp.concatenate([zcol, z[:, :, :-1, :]], axis=2),   # col j-1
           z,                                                  # col j
           jnp.concatenate([z[:, :, 1:, :], zcol], axis=2)]    # col j+1
    acc = None
    for di in range(3):
        for dj in range(3):
            a = z_w[dj]
            if di == 0:
                a = jnp.concatenate([zrow, a[:, :-1, :, :]], axis=1)
            elif di == 2:
                a = jnp.concatenate([a[:, 1:, :, :], zrow], axis=1)
            term = a * w[di, dj, :]
            acc = term if acc is None else acc + term
    return acc + b


def _dw_s2(P, w, b):
    """3x3 depthwise conv, stride 2, zero pad 1, computed directly at stride 2
    from the four parity phases P[row_par][col_par] (each (1,ho,wo,C))."""
    zcol = jnp.zeros_like(P[0][0][:, :, :1, :])
    zrow = jnp.zeros_like(P[0][0][:, :1, :, :])
    # Per row-parity: W-variants for dj = 0 (odd cols shifted), 1 (even), 2 (odd)
    V = []
    for a in (0, 1):
        shifted = jnp.concatenate([zcol, P[a][1][:, :, :-1, :]], axis=2)
        V.append([shifted, P[a][0], P[a][1]])
    acc = None
    for di in range(3):
        hp = 0 if di == 1 else 1
        for dj in range(3):
            arr = V[hp][dj]
            if di == 0:
                arr = jnp.concatenate([zrow, arr[:, :-1, :, :]], axis=1)
            term = arr * w[di, dj, :]
            acc = term if acc is None else acc + term
    return acc + b


def _maxpool_phases(P):
    """3x3/s2/pad1 max pool from four parity phases (inputs are post-ReLU,
    i.e. >= 0, so padding with 0 is exactly equivalent to -inf padding)."""
    zcol = jnp.zeros_like(P[0][0][:, :, :1, :])
    zrow = jnp.zeros_like(P[0][0][:, :1, :, :])
    V = []
    for a in (0, 1):
        shifted = jnp.concatenate([zcol, P[a][1][:, :, :-1, :]], axis=2)
        V.append([shifted, P[a][0], P[a][1]])
    m = None
    for di in range(3):
        hp = 0 if di == 1 else 1
        for dj in range(3):
            arr = V[hp][dj]
            if di == 0:
                arr = jnp.concatenate([zrow, arr[:, :-1, :, :]], axis=1)
            m = arr if m is None else jnp.maximum(m, arr)
    return m


# --------------------------------------------------------------------------
# Kernels
# --------------------------------------------------------------------------

def _conv1_pool_kernel(p00, p01, p10, p11, w_ref, b_ref, o_ref):
    """conv1 (3x3/s2 + BN + ReLU, as ONE im2col matmul per output phase)
    fused with the 3x3/s2 max pool."""
    bc = b_ref[...]
    P = [[p00, p01], [p10, p11]]
    Y = [[jnp.maximum(_mm4(P[a][bb][...], w_ref) + bc, 0.0) for bb in (0, 1)]
         for a in (0, 1)]
    o_ref[...] = _maxpool_phases(Y)


def _make_stage_kernel(n_s1, with_head, inv_hw):
    """Whole ShuffleNetV2 stage (stride-2 block + n_s1 stride-1 blocks),
    optionally fused with conv5 + global average pool + FC."""

    def kernel(*refs):
        o_ref = refs[-1]
        it = iter(refs[:-1])
        xr = [next(it) for _ in range(4)]
        X = [[xr[0][...], xr[1][...]], [xr[2][...], xr[3][...]]]

        (wdw1, bdw1, wp1, bp1, w1, b1,
         wdw2, bdw2, w2, b2) = [next(it) for _ in range(10)]

        # ---- stride-2 block: branch1 -> even (cols [0,cb)), branch2 -> odd
        t1 = _dw_s2(X, wdw1[...], bdw1[...])
        xa = jnp.maximum(_mm4(t1, wp1) + bp1[...], 0.0)
        Z = [[jnp.maximum(_mm4(X[a][bb], w1) + b1[...], 0.0)
              for bb in (0, 1)] for a in (0, 1)]
        t2 = _dw_s2(Z, wdw2[...], bdw2[...])
        xb = jnp.maximum(_mm4(t2, w2) + b2[...], 0.0)
        x = xa + xb                                   # lane-dense (1,h,w,128)

        # ---- stride-1 blocks: exact pass-through via 0/1 mask (no MXU)
        for _ in range(n_s1):
            w1k, b1k, wdwk, bdwk, w2k, b2k, maskk = [next(it) for _ in range(7)]
            z = jnp.maximum(_mm4(x, w1k) + b1k[...], 0.0)
            t = _dw_s1(z, wdwk[...], bdwk[...])
            x = x * maskk[...] + jnp.maximum(_mm4(t, w2k) + b2k[...], 0.0)

        if with_head:
            w5, b5, wfc, bfc = [next(it) for _ in range(4)]
            y = jnp.maximum(_mm4(x, w5) + b5[...], 0.0)
            s = jnp.sum(y, axis=1)
            s = jnp.sum(s, axis=1) * inv_hw           # (1,128) global mean
            w = wfc[...]
            logits = jnp.dot(s.astype(w.dtype), w,
                             preferred_element_type=jnp.float32) + bfc[...]
            o_ref[...] = logits.reshape(o_ref.shape)
        else:
            o_ref[...] = x

    return kernel


# --------------------------------------------------------------------------
# Forward wrapper (the only XLA glue left: input im2col + phase slices)
# --------------------------------------------------------------------------

def shufflenet_v2_forward(params, x_nchw, num_classes):
    x = jnp.transpose(x_nchw, (0, 2, 3, 1)).astype(jnp.float32)  # NCHW->NHWC
    n, h, w, _ = x.shape
    ho, wo = h // 2, w // 2                     # conv1 output spatial

    # one-time im2col of the raw image (stride-2, pad-1, K = 27)
    xp = jnp.pad(x, ((0, 0), (1, 1), (1, 1), (0, 0)))
    taps = [xp[:, di:di + 2 * ho - 1:2, dj:dj + 2 * wo - 1:2, :]
            for di in range(3) for dj in range(3)]
    patches = jnp.concatenate(taps, axis=-1)    # (n, ho, wo, 27)
    pphases = [patches[:, a::2, b::2, :] for a in (0, 1) for b in (0, 1)]

    hp_, wp_ = ho // 2, wo // 2                 # maxpool output spatial
    x = _pcall(_conv1_pool_kernel, (n, hp_, wp_, C_PAD),
               pphases, [params['conv1']['w'], params['conv1']['b']])

    for name in ('stage2', 'stage3', 'stage4'):
        st = params[name]
        n_, h_, w_, _c = x.shape
        phases = [x[:, a::2, b::2, :] for a in (0, 1) for b in (0, 1)]
        with_head = (name == 'stage4')
        hs, ws = h_ // 2, w_ // 2
        weights = st['weights'] + (params['head'] if with_head else [])
        kern = _make_stage_kernel(st['n_s1'], with_head,
                                  1.0 / float(hs * ws))
        out_shape = (n_, 1, C_PAD) if with_head else (n_, hs, ws, C_PAD)
        x = _pcall(kern, out_shape, phases, weights)

    return x[:, 0, :num_classes]


# --------------------------------------------------------------------------
# Deterministic synthetic parameters (mirrors the PyTorch module, eval BN)
# --------------------------------------------------------------------------

def _key_gen(key):
    while True:
        key, sub = jax.random.split(key)
        yield sub


def _init_bn(kg, c):
    gamma = 1.0 + 0.1 * jax.random.normal(next(kg), (c,), jnp.float32)
    beta = 0.1 * jax.random.normal(next(kg), (c,), jnp.float32)
    mean = 0.1 * jax.random.normal(next(kg), (c,), jnp.float32)
    var = 1.0 + 0.1 * jax.random.uniform(next(kg), (c,), jnp.float32)
    scale = gamma / jnp.sqrt(var + EPS)
    bias = beta - mean * scale
    return scale, bias


def _init_w(kg, shape):
    return 0.1 * jax.random.normal(next(kg), shape, jnp.float32)


def _init_block(kg, inp, oup, stride):
    bf = oup // 2
    p = {'stride': stride}
    if stride > 1:
        s1, b1 = _init_bn(kg, inp)
        s2, b2 = _init_bn(kg, bf)
        p['branch1'] = dict(dw_w=_init_w(kg, (3, 3, inp)), dw_scale=s1, dw_bias=b1,
                            pw_w=_init_w(kg, (inp, bf)), pw_scale=s2, pw_bias=b2)
    cin2 = inp if stride > 1 else bf
    s1, b1 = _init_bn(kg, bf)
    s2, b2 = _init_bn(kg, bf)
    s3, b3 = _init_bn(kg, bf)
    p['branch2'] = dict(pw1_w=_init_w(kg, (cin2, bf)), pw1_scale=s1, pw1_bias=b1,
                        dw_w=_init_w(kg, (3, 3, bf)), dw_scale=s2, dw_bias=b2,
                        pw2_w=_init_w(kg, (bf, bf)), pw2_scale=s3, pw2_bias=b3)
    return p


def init_shufflenet_v2(key, stages_repeats, stages_out_channels, num_classes=1):
    assert len(stages_repeats) == 3 and len(stages_out_channels) == 5
    kg = _key_gen(key)
    params = {}
    c0 = stages_out_channels[0]
    s, b = _init_bn(kg, c0)
    params['conv1'] = dict(w=_init_w(kg, (3, 3, 3, c0)), scale=s, bias=b)
    in_ch = c0
    for name, repeats, oc in zip(('stage2', 'stage3', 'stage4'),
                                 stages_repeats, stages_out_channels[1:]):
        blocks = [_init_block(kg, in_ch, oc, 2)]
        for _ in range(repeats - 1):
            blocks.append(_init_block(kg, oc, oc, 1))
        params[name] = blocks
        in_ch = oc
    c5 = stages_out_channels[-1]
    s, b = _init_bn(kg, c5)
    params['conv5'] = dict(w=_init_w(kg, (in_ch, c5)), scale=s, bias=b)
    params['fc'] = dict(w=_init_w(kg, (c5, num_classes)),
                        b=0.1 * jax.random.normal(next(kg), (num_classes,),
                                                  jnp.float32))
    return params


# --------------------------------------------------------------------------
# Parameter preparation (numpy): fold BN, fold concat + channel shuffle into
# the 1x1 weights via a lazy channel permutation, pad everything to 128 lanes.
# --------------------------------------------------------------------------

def _np(a):
    return np.asarray(a, dtype=np.float32)


def _prep_conv1(p):
    w = _np(p['w']) * _np(p['scale'])[None, None, None, :]      # (3,3,3,c0)
    c0 = w.shape[-1]
    wk = np.zeros((27, C_PAD), np.float32)
    wk[:, :c0] = w.reshape(27, c0)
    bk = np.zeros((1, C_PAD), np.float32)
    bk[0, :c0] = _np(p['bias'])
    return dict(w=jnp.asarray(wk, MXU_DTYPE), b=jnp.asarray(bk, jnp.float32))


def _prep_block_s2(p, inp, oup, perm_in):
    """Stride-2 block; branch1 -> physical lanes [0,cb), branch2 -> [cb,2cb).
    The input channel permutation perm_in is absorbed into the weight rows."""
    cb = oup // 2
    b1p, b2p = p['branch1'], p['branch2']
    # branch1 dw (+BN)
    dw = _np(b1p['dw_w']) * _np(b1p['dw_scale'])[None, None, :]
    wdw1 = np.zeros((3, 3, C_PAD), np.float32)
    wdw1[:, :, :inp] = dw[:, :, perm_in]
    bdw1 = np.zeros((1, C_PAD), np.float32)
    bdw1[0, :inp] = _np(b1p['dw_bias'])[perm_in]
    # branch1 1x1 (+BN+ReLU) -> cols [0, cb)
    pw = _np(b1p['pw_w']) * _np(b1p['pw_scale'])[None, :]
    wp1 = np.zeros((C_PAD, C_PAD), np.float32)
    wp1[:inp, :cb] = pw[perm_in, :]
    bp1 = np.zeros((1, C_PAD), np.float32)
    bp1[0, :cb] = _np(b1p['pw_bias'])
    # branch2 pw1 (+BN+ReLU) -> cols [0, cb)
    pw1 = _np(b2p['pw1_w']) * _np(b2p['pw1_scale'])[None, :]
    w1 = np.zeros((C_PAD, C_PAD), np.float32)
    w1[:inp, :cb] = pw1[perm_in, :]
    b1 = np.zeros((1, C_PAD), np.float32)
    b1[0, :cb] = _np(b2p['pw1_bias'])
    # branch2 dw (+BN)
    dw2 = _np(b2p['dw_w']) * _np(b2p['dw_scale'])[None, None, :]
    wdw2 = np.zeros((3, 3, C_PAD), np.float32)
    wdw2[:, :, :cb] = dw2
    bdw2 = np.zeros((1, C_PAD), np.float32)
    bdw2[0, :cb] = _np(b2p['dw_bias'])
    # branch2 pw2 (+BN+ReLU) -> cols [cb, 2cb)
    pw2 = _np(b2p['pw2_w']) * _np(b2p['pw2_scale'])[None, :]
    w2 = np.zeros((C_PAD, C_PAD), np.float32)
    w2[:cb, cb:oup] = pw2
    b2 = np.zeros((1, C_PAD), np.float32)
    b2[0, cb:oup] = _np(b2p['pw2_bias'])
    # physical lane p holds logical (shuffled) channel perm_out[p]
    perm_out = np.empty((oup,), np.int64)
    perm_out[:cb] = 2 * np.arange(cb)
    perm_out[cb:] = 2 * np.arange(cb) + 1
    weights = [jnp.asarray(wdw1), jnp.asarray(bdw1),
               jnp.asarray(wp1, MXU_DTYPE), jnp.asarray(bp1),
               jnp.asarray(w1, MXU_DTYPE), jnp.asarray(b1),
               jnp.asarray(wdw2), jnp.asarray(bdw2),
               jnp.asarray(w2, MXU_DTYPE), jnp.asarray(b2)]
    return weights, perm_out


def _prep_block_s1(p, oup, perm_in):
    """Stride-1 block.  The x1 half stays in its input lanes (exact VPU
    pass-through via mask); branch2 output columns are scattered into the
    lanes previously holding x2.  Shuffle is recorded in perm_out only."""
    cb = oup // 2
    b2p = p['branch2']
    pos_x1 = np.array([q for q in range(oup) if perm_in[q] < cb], np.int64)
    pos_x2 = np.array([q for q in range(oup) if perm_in[q] >= cb], np.int64)
    k_of = perm_in[pos_x2] - cb
    mask = np.zeros((1, C_PAD), np.float32)
    mask[0, pos_x1] = 1.0
    # pw1 (+BN+ReLU): rows at x2 lanes, cols [0, cb)
    pw1 = _np(b2p['pw1_w']) * _np(b2p['pw1_scale'])[None, :]
    w1 = np.zeros((C_PAD, C_PAD), np.float32)
    w1[pos_x2, :cb] = pw1[k_of, :]
    b1 = np.zeros((1, C_PAD), np.float32)
    b1[0, :cb] = _np(b2p['pw1_bias'])
    # dw (+BN)
    dw = _np(b2p['dw_w']) * _np(b2p['dw_scale'])[None, None, :]
    wdw = np.zeros((3, 3, C_PAD), np.float32)
    wdw[:, :, :cb] = dw
    bdw = np.zeros((1, C_PAD), np.float32)
    bdw[0, :cb] = _np(b2p['dw_bias'])
    # pw2 (+BN+ReLU): cols scattered to the x2 lanes
    pw2 = _np(b2p['pw2_w']) * _np(b2p['pw2_scale'])[None, :]
    w2 = np.zeros((C_PAD, C_PAD), np.float32)
    w2[:cb, pos_x2] = pw2
    b2 = np.zeros((1, C_PAD), np.float32)
    b2[0, pos_x2] = _np(b2p['pw2_bias'])
    perm_out = np.array(perm_in, np.int64).copy()
    perm_out[pos_x1] = 2 * perm_in[pos_x1]
    perm_out[pos_x2] = 2 * np.arange(cb) + 1
    weights = [jnp.asarray(w1, MXU_DTYPE), jnp.asarray(b1),
               jnp.asarray(wdw), jnp.asarray(bdw),
               jnp.asarray(w2, MXU_DTYPE), jnp.asarray(b2),
               jnp.asarray(mask)]
    return weights, perm_out


def _prep_head(p5, pfc, perm_in, in_ch, ncls):
    c5 = _np(p5['scale']).shape[0]
    w = _np(p5['w']) * _np(p5['scale'])[None, :]
    w5 = np.zeros((C_PAD, C_PAD), np.float32)
    w5[:in_ch, :c5] = w[perm_in, :]
    b5 = np.zeros((1, C_PAD), np.float32)
    b5[0, :c5] = _np(p5['bias'])
    wfc = np.zeros((C_PAD, C_PAD), np.float32)
    wfc[:c5, :ncls] = _np(pfc['w'])
    bfc = np.zeros((1, C_PAD), np.float32)
    bfc[0, :ncls] = _np(pfc['b'])
    return [jnp.asarray(w5, MXU_DTYPE), jnp.asarray(b5),
            jnp.asarray(wfc, MXU_DTYPE), jnp.asarray(bfc)]


def prepare_params(raw, stages_out_channels, num_classes):
    params = {'conv1': _prep_conv1(raw['conv1'])}
    in_ch = stages_out_channels[0]
    perm = np.arange(in_ch, dtype=np.int64)
    for name, oc in zip(('stage2', 'stage3', 'stage4'),
                        stages_out_channels[1:4]):
        blocks = raw[name]
        weights, perm = _prep_block_s2(blocks[0], in_ch, oc, perm)
        n_s1 = 0
        for blk in blocks[1:]:
            w_list, perm = _prep_block_s1(blk, oc, perm)
            weights = weights + w_list
            n_s1 += 1
        params[name] = {'n_s1': n_s1, 'weights': weights}
        in_ch = oc
    params['head'] = _prep_head(raw['conv5'], raw['fc'], perm, in_ch,
                                num_classes)
    return params
    # TODO(synk): training-mode BatchNorm (running-stats update, momentum) has
    # no Pallas equivalent here; this implements eval-mode BN folded weights.


# --------------------------------------------------------------------------

if __name__ == "__main__":
    key = jax.random.PRNGKey(0)
    pkey, xkey = jax.random.split(key)

    stages_repeats = [2, 2, 2]
    stages_out_channels = [8, 16, 32, 64, 64]
    num_classes = 1  # PyTorch default

    raw_params = init_shufflenet_v2(pkey, stages_repeats, stages_out_channels,
                                    num_classes=num_classes)
    params = prepare_params(raw_params, stages_out_channels, num_classes)

    # NCHW input, like the PyTorch module (3 input channels required by conv1).
    x = jax.random.normal(xkey, (2, 3, 64, 64), jnp.float32)

    fwd = jax.jit(lambda inp: shufflenet_v2_forward(params, inp, num_classes))
    out = jax.block_until_ready(fwd(x))
    assert out.shape == (2, num_classes), out.shape
    assert bool(jnp.all(jnp.isfinite(out)))
    print("KERNEL_OK")
</pallas_src>

<mosaic_0001>
module attributes {stable_mosaic.version = 11 : i64} {
  func.func @_conv1_pool_kernel(%arg0: i32, %arg1: memref<1x16x16x27xf32, #tpu.memory_space<vmem>>, %arg2: memref<1x16x16x27xf32, #tpu.memory_space<vmem>>, %arg3: memref<1x16x16x27xf32, #tpu.memory_space<vmem>>, %arg4: memref<1x16x16x27xf32, #tpu.memory_space<vmem>>, %arg5: memref<27x128xbf16, #tpu.memory_space<vmem>>, %arg6: memref<1x128xf32, #tpu.memory_space<vmem>>, %arg7: memref<1x16x16x128xf32, #tpu.memory_space<vmem>>) attributes {dimension_semantics = [#tpu.dimension_semantics<parallel>], iteration_bounds = array<i64: 2>, scalar_prefetch = 0 : i64, scratch_operands = 0 : i64, tpu.core_type = #tpu.core_type<tc>, window_params = [{transform_indices = @transform_0, window_bounds = array<i64: 1, 16, 16, 27>}, {transform_indices = @transform_1, window_bounds = array<i64: 1, 16, 16, 27>}, {transform_indices = @transform_2, window_bounds = array<i64: 1, 16, 16, 27>}, {transform_indices = @transform_3, window_bounds = array<i64: 1, 16, 16, 27>}, {pipeline_mode = #tpu.pipeline_mode<synchronous>, transform_indices = @transform_4, window_bounds = array<i64: 27, 128>}, {pipeline_mode = #tpu.pipeline_mode<synchronous>, transform_indices = @transform_5, window_bounds = array<i64: 1, 128>}, {transform_indices = @transform_6, window_bounds = array<i64: 1, 16, 16, 128>}]} {
    %c0 = arith.constant 0 : index
    %c0_0 = arith.constant 0 : index
    %0 = vector.load %arg6[%c0, %c0_0] : memref<1x128xf32, #tpu.memory_space<vmem>>, vector<1x128xf32>
    %c0_1 = arith.constant 0 : index
    %c0_2 = arith.constant 0 : index
    %c0_3 = arith.constant 0 : index
    %c0_4 = arith.constant 0 : index
    %1 = vector.load %arg1[%c0_1, %c0_2, %c0_3, %c0_4] : memref<1x16x16x27xf32, #tpu.memory_space<vmem>>, vector<1x16x16x27xf32>
    %c0_5 = arith.constant 0 : index
    %c0_6 = arith.constant 0 : index
    %2 = vector.load %arg5[%c0_5, %c0_6] : memref<27x128xbf16, #tpu.memory_space<vmem>>, vector<27x128xbf16>
    %3 = vector.shape_cast %1 : vector<1x16x16x27xf32> to vector<256x27xf32>
    %4 = arith.truncf %3 : vector<256x27xf32> to vector<256x27xbf16>
    %cst = arith.constant dense<0.000000e+00> : vector<256x128xf32>
    %5 = tpu.matmul %4, %2, %cst {dimension_numbers = #tpu.dot_dimension_numbers<[1], [0], [0], [1], [0, 0, 1, 1], [], []>} : vector<256x27xbf16>, vector<27x128xbf16>, vector<256x128xf32> -> vector<256x128xf32>
    %6 = vector.shape_cast %5 : vector<256x128xf32> to vector<1x16x16x128xf32>
    %7 = vector.shape_cast %0 : vector<1x128xf32> to vector<1x1x1x128xf32>
    %8 = vector.broadcast %7 : vector<1x1x1x128xf32> to vector<1x16x16x128xf32>
    %9 = arith.addf %6, %8 : vector<1x16x16x128xf32>
    %cst_7 = arith.constant 0.000000e+00 : f32
    %10 = vector.broadcast %cst_7 : f32 to vector<1x16x16x128xf32>
    %11 = arith.maximumf %9, %10 : vector<1x16x16x128xf32>
    %c0_8 = arith.constant 0 : index
    %c0_9 = arith.constant 0 : index
    %c0_10 = arith.constant 0 : index
    %c0_11 = arith.constant 0 : index
    %12 = vector.load %arg2[%c0_8, %c0_9, %c0_10, %c0_11] : memref<1x16x16x27xf32, #tpu.memory_space<vmem>>, vector<1x16x16x27xf32>
    %c0_12 = arith.constant 0 : index
    %c0_13 = arith.constant 0 : index
    %13 = vector.load %arg5[%c0_12, %c0_13] : memref<27x128xbf16, #tpu.memory_space<vmem>>, vector<27x128xbf16>
    %14 = vector.shape_cast %12 : vector<1x16x16x27xf32> to vector<256x27xf32>
    %15 = arith.truncf %14 : vector<256x27xf32> to vector<256x27xbf16>
    %cst_14 = arith.constant dense<0.000000e+00> : vector<256x128xf32>
    %16 = tpu.matmul %15, %13, %cst_14 {dimension_numbers = #tpu.dot_dimension_numbers<[1], [0], [0], [1], [0, 0, 1, 1], [], []>} : vector<256x27xbf16>, vector<27x128xbf16>, vector<256x128xf32> -> vector<256x128xf32>
    %17 = vector.shape_cast %16 : vector<256x128xf32> to vector<1x16x16x128xf32>
    %18 = vector.shape_cast %0 : vector<1x128xf32> to vector<1x1x1x128xf32>
    %19 = vector.broadcast %18 : vector<1x1x1x128xf32> to vector<1x16x16x128xf32>
    %20 = arith.addf %17, %19 : vector<1x16x16x128xf32>
    %cst_15 = arith.constant 0.000000e+00 : f32
    %21 = vector.broadcast %cst_15 : f32 to vector<1x16x16x128xf32>
    %22 = arith.maximumf %20, %21 : vector<1x16x16x128xf32>
    %c0_16 = arith.constant 0 : index
    %c0_17 = arith.constant 0 : index
    %c0_18 = arith.constant 0 : index
    %c0_19 = arith.constant 0 : index
    %23 = vector.load %arg3[%c0_16, %c0_17, %c0_18, %c0_19] : memref<1x16x16x27xf32, #tpu.memory_space<vmem>>, vector<1x16x16x27xf32>
    %c0_20 = arith.constant 0 : index
    %c0_21 = arith.constant 0 : index
    %24 = vector.load %arg5[%c0_20, %c0_21] : memref<27x128xbf16, #tpu.memory_space<vmem>>, vector<27x128xbf16>
    %25 = vector.shape_cast %23 : vector<1x16x16x27xf32> to vector<256x27xf32>
    %26 = arith.truncf %25 : vector<256x27xf32> to vector<256x27xbf16>
    %cst_22 = arith.constant dense<0.000000e+00> : vector<256x128xf32>
    %27 = tpu.matmul %26, %24, %cst_22 {dimension_numbers = #tpu.dot_dimension_numbers<[1], [0], [0], [1], [0, 0, 1, 1], [], []>} : vector<256x27xbf16>, vector<27x128xbf16>, vector<256x128xf32> -> vector<256x128xf32>
    %28 = vector.shape_cast %27 : vector<256x128xf32> to vector<1x16x16x128xf32>
    %29 = vector.shape_cast %0 : vector<1x128xf32> to vector<1x1x1x128xf32>
    %30 = vector.broadcast %29 : vector<1x1x1x128xf32> to vector<1x16x16x128xf32>
    %31 = arith.addf %28, %30 : vector<1x16x16x128xf32>
    %cst_23 = arith.constant 0.000000e+00 : f32
    %32 = vector.broadcast %cst_23 : f32 to vector<1x16x16x128xf32>
    %33 = arith.maximumf %31, %32 : vector<1x16x16x128xf32>
    %c0_24 = arith.constant 0 : index
    %c0_25 = arith.constant 0 : index
    %c0_26 = arith.constant 0 : index
    %c0_27 = arith.constant 0 : index
    %34 = vector.load %arg4[%c0_24, %c0_25, %c0_26, %c0_27] : memref<1x16x16x27xf32, #tpu.memory_space<vmem>>, vector<1x16x16x27xf32>
    %c0_28 = arith.constant 0 : index
    %c0_29 = arith.constant 0 : index
    %35 = vector.load %arg5[%c0_28, %c0_29] : memref<27x128xbf16, #tpu.memory_space<vmem>>, vector<27x128xbf16>
    %36 = vector.shape_cast %34 : vector<1x16x16x27xf32> to vector<256x27xf32>
    %37 = arith.truncf %36 : vector<256x27xf32> to vector<256x27xbf16>
    %cst_30 = arith.constant dense<0.000000e+00> : vector<256x128xf32>
    %38 = tpu.matmul %37, %35, %cst_30 {dimension_numbers = #tpu.dot_dimension_numbers<[1], [0], [0], [1], [0, 0, 1, 1], [], []>} : vector<256x27xbf16>, vector<27x128xbf16>, vector<256x128xf32> -> vector<256x128xf32>
    %39 = vector.shape_cast %38 : vector<256x128xf32> to vector<1x16x16x128xf32>
    %40 = vector.shape_cast %0 : vector<1x128xf32> to vector<1x1x1x128xf32>
    %41 = vector.broadcast %40 : vector<1x1x1x128xf32> to vector<1x16x16x128xf32>
    %42 = arith.addf %39, %41 : vector<1x16x16x128xf32>
    %cst_31 = arith.constant 0.000000e+00 : f32
    %43 = vector.broadcast %cst_31 : f32 to vector<1x16x16x128xf32>
    %44 = arith.maximumf %42, %43 : vector<1x16x16x128xf32>
    %cst_32 = arith.constant 0.000000e+00 : f32
    %45 = vector.broadcast %cst_32 : f32 to vector<1x16x1x128xf32>
    %cst_33 = arith.constant 0.000000e+00 : f32
    %46 = vector.broadcast %cst_33 : f32 to vector<1x1x16x128xf32>
    %47 = vector.extract_strided_slice %22 {offsets = [0, 0, 0, 0], sizes = [1, 16, 15, 128], strides = [1, 1, 1, 1]} : vector<1x16x16x128xf32> to vector<1x16x15x128xf32>
    %48 = tpu.concatenate %45, %47 in 2 : vector<1x16x1x128xf32>, vector<1x16x15x128xf32> -> vector<1x16x16x128xf32>
    %49 = vector.extract_strided_slice %44 {offsets = [0, 0, 0, 0], sizes = [1, 16, 15, 128], strides = [1, 1, 1, 1]} : vector<1x16x16x128xf32> to vector<1x16x15x128xf32>
    %50 = tpu.concatenate %45, %49 in 2 : vector<1x16x1x128xf32>, vector<1x16x15x128xf32> -> vector<1x16x16x128xf32>
    %51 = vector.extract_strided_slice %50 {offsets = [0, 0, 0, 0], sizes = [1, 15, 16, 128], strides = [1, 1, 1, 1]} : vector<1x16x16x128xf32> to vector<1x15x16x128xf32>
    %52 = tpu.concatenate %46, %51 in 1 : vector<1x1x16x128xf32>, vector<1x15x16x128xf32> -> vector<1x16x16x128xf32>
    %53 = vector.extract_strided_slice %33 {offsets = [0, 0, 0, 0], sizes = [1, 15, 16, 128], strides = [1, 1, 1, 1]} : vector<1x16x16x128xf32> to vector<1x15x16x128xf32>
    %54 = tpu.concatenate %46, %53 in 1 : vector<1x1x16x128xf32>, vector<1x15x16x128xf32> -> vector<1x16x16x128xf32>
    %55 = arith.maximumf %52, %54 : vector<1x16x16x128xf32>
    %56 = vector.extract_strided_slice %44 {offsets = [0, 0, 0, 0], sizes = [1, 15, 16, 128], strides = [1, 1, 1, 1]} : vector<1x16x16x128xf32> to vector<1x15x16x128xf32>
    %57 = tpu.concatenate %46, %56 in 1 : vector<1x1x16x128xf32>, vector<1x15x16x128xf32> -> vector<1x16x16x128xf32>
    %58 = arith.maximumf %55, %57 : vector<1x16x16x128xf32>
    %59 = arith.maximumf %58, %48 : vector<1x16x16x128xf32>
    %60 = arith.maximumf %59, %11 : vector<1x16x16x128xf32>
    %61 = arith.maximumf %60, %22 : vector<1x16x16x128xf32>
    %62 = arith.maximumf %61, %50 : vector<1x16x16x128xf32>
    %63 = arith.maximumf %62, %33 : vector<1x16x16x128xf32>
    %64 = arith.maximumf %63, %44 : vector<1x16x16x128xf32>
    %c0_34 = arith.constant 0 : index
    %c0_35 = arith.constant 0 : index
    %c0_36 = arith.constant 0 : index
    %c0_37 = arith.constant 0 : index
    %65 = vector.load %arg7[%c0_34, %c0_35, %c0_36, %c0_37] : memref<1x16x16x128xf32, #tpu.memory_space<vmem>>, vector<1x16x16x128xf32>
    tpu.vector_store %arg7[%c0_34, %c0_35, %c0_36, %c0_37], %64 {strides = array<i32>} : memref<1x16x16x128xf32, #tpu.memory_space<vmem>>, vector<1x16x16x128xf32>,
    return
  }
  func.func @transform_0(%arg0: i32) -> (i32, i32, i32, i32) {
    %c0_i32 = arith.constant 0 : i32
    %c0_i32_0 = arith.constant 0 : i32
    %c0_i32_1 = arith.constant 0 : i32
    %c0_i32_2 = arith.constant 0 : i32
    return %arg0, %c0_i32, %c0_i32_0, %c0_i32_1 : i32, i32, i32, i32
  }
  func.func @transform_1(%arg0: i32) -> (i32, i32, i32, i32) {
    %c0_i32 = arith.constant 0 : i32
    %c0_i32_0 = arith.constant 0 : i32
    %c0_i32_1 = arith.constant 0 : i32
    %c0_i32_2 = arith.constant 0 : i32
    return %arg0, %c0_i32, %c0_i32_0, %c0_i32_1 : i32, i32, i32, i32
  }
  func.func @transform_2(%arg0: i32) -> (i32, i32, i32, i32) {
    %c0_i32 = arith.constant 0 : i32
    %c0_i32_0 = arith.constant 0 : i32
    %c0_i32_1 = arith.constant 0 : i32
    %c0_i32_2 = arith.constant 0 : i32
    return %arg0, %c0_i32, %c0_i32_0, %c0_i32_1 : i32, i32, i32, i32
  }
  func.func @transform_3(%arg0: i32) -> (i32, i32, i32, i32) {
    %c0_i32 = arith.constant 0 : i32
    %c0_i32_0 = arith.constant 0 : i32
    %c0_i32_1 = arith.constant 0 : i32
    %c0_i32_2 = arith.constant 0 : i32
    return %arg0, %c0_i32, %c0_i32_0, %c0_i32_1 : i32, i32, i32, i32
  }
  func.func @transform_4(%arg0: i32) -> (i32, i32) {
    %c0_i32 = arith.constant 0 : i32
    %c0_i32_0 = arith.constant 0 : i32
    %c0_i32_1 = arith.constant 0 : i32
    return %c0_i32, %c0_i32_0 : i32, i32
  }
  func.func @transform_5(%arg0: i32) -> (i32, i32) {
    %c0_i32 = arith.constant 0 : i32
    %c0_i32_0 = arith.constant 0 : i32
    %c0_i32_1 = arith.constant 0 : i32
    return %c0_i32, %c0_i32_0 : i32, i32
  }
  func.func @transform_6(%arg0: i32) -> (i32, i32, i32, i32) {
    %c0_i32 = arith.constant 0 : i32
    %c0_i32_0 = arith.constant 0 : i32
    %c0_i32_1 = arith.constant 0 : i32
    %c0_i32_2 = arith.constant 0 : i32
    return %arg0, %c0_i32, %c0_i32_0, %c0_i32_1 : i32, i32, i32, i32
  }
}

module attributes {stable_mosaic.version = 11 : i64} {
  func.func @kernel(%arg0: i32, %arg1: memref<1x8x8x128xf32, #tpu.memory_space<vmem>>, %arg2: memref<1x8x8x128xf32, #tpu.memory_space<vmem>>, %arg3: memref<1x8x8x128xf32, #tpu.memory_space<vmem>>, %arg4: memref<1x8x8x128xf32, #tpu.memory_space<vmem>>, %arg5: memref<3x3x128xf32, #tpu.memory_space<vmem>>, %arg6: memref<1x128xf32, #tpu.memory_space<vmem>>, %arg7: memref<128x128xbf16, #tpu.memory_space<vmem>>, %arg8: memref<1x128xf32, #tpu.memory_space<vmem>>, %arg9: memref<128x128xbf16, #tpu.memory_space<vmem>>, %arg10: memref<1x128xf32, #tpu.memory_space<vmem>>, %arg11: memref<3x3x128xf32, #tpu.memory_space<vmem>>, %arg12: memref<1x128xf32, #tpu.memory_space<vmem>>, %arg13: memref<128x128xbf16, #tpu.memory_space<vmem>>, %arg14: memref<1x128xf32, #tpu.memory_space<vmem>>, %arg15: memref<128x128xbf16, #tpu.memory_space<vmem>>, %arg16: memref<1x128xf32, #tpu.memory_space<vmem>>, %arg17: memref<3x3x128xf32, #tpu.memory_space<vmem>>, %arg18: memref<1x128xf32, #tpu.memory_space<vmem>>, %arg19: memref<128x128xbf16, #tpu.memory_space<vmem>>, %arg20: memref<1x128xf32, #tpu.memory_space<vmem>>, %arg21: memref<1x128xf32, #tpu.memory_space<vmem>>, %arg22: memref<1x8x8x128xf32, #tpu.memory_space<vmem>>) attributes {dimension_semantics = [#tpu.dimension_semantics<parallel>], iteration_bounds = array<i64: 2>, scalar_prefetch = 0 : i64, scratch_operands = 0 : i64, tpu.core_type = #tpu.core_type<tc>, window_params = [{transform_indices = @transform_0, window_bounds = array<i64: 1, 8, 8, 128>}, {transform_indices = @transform_1, window_bounds = array<i64: 1, 8, 8, 128>}, {transform_indices = @transform_2, window_bounds = array<i64: 1, 8, 8, 128>}, {transform_indices = @transform_3, window_bounds = array<i64: 1, 8, 8, 128>}, {pipeline_mode = #tpu.pipeline_mode<synchronous>, transform_indices = @transform_4, window_bounds = array<i64: 3, 3, 128>}, {pipeline_mode = #tpu.pipeline_mode<synchronous>, transform_indices = @transform_5, window_bounds = array<i64: 1, 128>}, {pipeline_mode = #tpu.pipeline_mode<synchronous>, transform_indices = @transform_6, window_bounds = array<i64: 128, 128>}, {pipeline_mode = #tpu.pipeline_mode<synchronous>, transform_indices = @transform_7, window_bounds = array<i64: 1, 128>}, {pipeline_mode = #tpu.pipeline_mode<synchronous>, transform_indices = @transform_8, window_bounds = array<i64: 128, 128>}, {pipeline_mode = #tpu.pipeline_mode<synchronous>, transform_indices = @transform_9, window_bounds = array<i64: 1, 128>}, {pipeline_mode = #tpu.pipeline_mode<synchronous>, transform_indices = @transform_10, window_bounds = array<i64: 3, 3, 128>}, {pipeline_mode = #tpu.pipeline_mode<synchronous>, transform_indices = @transform_11, window_bounds = array<i64: 1, 128>}, {pipeline_mode = #tpu.pipeline_mode<synchronous>, transform_indices = @transform_12, window_bounds = array<i64: 128, 128>}, {pipeline_mode = #tpu.pipeline_mode<synchronous>, transform_indices = @transform_13, window_bounds = array<i64: 1, 128>}, {pipeline_mode = #tpu.pipeline_mode<synchronous>, transform_indices = @transform_14, window_bounds = array<i64: 128, 128>}, {pipeline_mode = #tpu.pipeline_mode<synchronous>, transform_indices = @transform_15, window_bounds = array<i64: 1, 128>}, {pipeline_mode = #tpu.pipeline_mode<synchronous>, transform_indices = @transform_16, window_bounds = array<i64: 3, 3, 128>}, {pipeline_mode = #tpu.pipeline_mode<synchronous>, transform_indices = @transform_17, window_bounds = array<i64: 1, 128>}, {pipeline_mode = #tpu.pipeline_mode<synchronous>, transform_indices = @transform_18, window_bounds = array<i64: 128, 128>}, {pipeline_mode = #tpu.pipeline_mode<synchronous>, transform_indices = @transform_19, window_bounds = array<i64: 1, 128>}, {pipeline_mode = #tpu.pipeline_mode<synchronous>, transform_indices = @transform_20, window_bounds = array<i64: 1, 128>}, {transform_indices = @transform_21, window_bounds = array<i64: 1, 8, 8, 128>}]} {
    %c0 = arith.constant 0 : index
    %c0_0 = arith.constant 0 : index
    %c0_1 = arith.constant 0 : index
    %c0_2 = arith.constant 0 : index
    %0 = vector.load %arg1[%c0, %c0_0, %c0_1, %c0_2] : memref<1x8x8x128xf32, #tpu.memory_space<vmem>>, vector<1x8x8x128xf32>
    %c0_3 = arith.constant 0 : index
    %c0_4 = arith.constant 0 : index
    %c0_5 = arith.constant 0 : index
    %c0_6 = arith.constant 0 : index
    %1 = vector.load %arg2[%c0_3, %c0_4, %c0_5, %c0_6] : memref<1x8x8x128xf32, #tpu.memory_space<vmem>>, vector<1x8x8x128xf32>
    %c0_7 = arith.constant 0 : index
    %c0_8 = arith.constant 0 : index
    %c0_9 = arith.constant 0 : index
    %c0_10 = arith.constant 0 : index
    %2 = vector.load %arg3[%c0_7, %c0_8, %c0_9, %c0_10] : memref<1x8x8x128xf32, #tpu.memory_space<vmem>>, vector<1x8x8x128xf32>
    %c0_11 = arith.constant 0 : index
    %c0_12 = arith.constant 0 : index
    %c0_13 = arith.constant 0 : index
    %c0_14 = arith.constant 0 : index
    %3 = vector.load %arg4[%c0_11, %c0_12, %c0_13, %c0_14] : memref<1x8x8x128xf32, #tpu.memory_space<vmem>>, vector<1x8x8x128xf32>
    %c0_15 = arith.constant 0 : index
    %c0_16 = arith.constant 0 : index
    %c0_17 = arith.constant 0 : index
    %4 = vector.load %arg5[%c0_15, %c0_16, %c0_17] : memref<3x3x128xf32, #tpu.memory_space<vmem>>, vector<3x3x128xf32>
    %c0_18 = arith.constant 0 : index
    %c0_19 = arith.constant 0 : index
    %5 = vector.load %arg6[%c0_18, %c0_19] : memref<1x128xf32, #tpu.memory_space<vmem>>, vector<1x128xf32>
    %cst = arith.constant 0.000000e+00 : f32
    %6 = vector.broadcast %cst : f32 to vector<1x8x1x128xf32>
    %cst_20 = arith.constant 0.000000e+00 : f32
    %7 = vector.broadcast %cst_20 : f32 to vector<1x1x8x128xf32>
    %8 = vector.extract_strided_slice %1 {offsets = [0, 0, 0, 0], sizes = [1, 8, 7, 128], strides = [1, 1, 1, 1]} : vector<1x8x8x128xf32> to vector<1x8x7x128xf32>
    %9 = tpu.concatenate %6, %8 in 2 : vector<1x8x1x128xf32>, vector<1x8x7x128xf32> -> vector<1x8x8x128xf32>
    %10 = vector.extract_strided_slice %3 {offsets = [0, 0, 0, 0], sizes = [1, 8, 7, 128], strides = [1, 1, 1, 1]} : vector<1x8x8x128xf32> to vector<1x8x7x128xf32>
    %11 = tpu.concatenate %6, %10 in 2 : vector<1x8x1x128xf32>, vector<1x8x7x128xf32> -> vector<1x8x8x128xf32>
    %12 = vector.extract_strided_slice %11 {offsets = [0, 0, 0, 0], sizes = [1, 7, 8, 128], strides = [1, 1, 1, 1]} : vector<1x8x8x128xf32> to vector<1x7x8x128xf32>
    %13 = tpu.concatenate %7, %12 in 1 : vector<1x1x8x128xf32>, vector<1x7x8x128xf32> -> vector<1x8x8x128xf32>
    %14 = vector.extract_strided_slice %4 {offsets = [0, 0, 0], sizes = [1, 1, 128], strides = [1, 1, 1]} : vector<3x3x128xf32> to vector<1x1x128xf32>
    %15 = vector.shape_cast %14 : vector<1x1x128xf32> to vector<128xf32>
    %16 = vector.shape_cast %15 : vector<128xf32> to vector<1x1x1x128xf32>
    %17 = vector.broadcast %16 : vector<1x1x1x128xf32> to vector<1x8x8x128xf32>
    %18 = arith.mulf %13, %17 : vector<1x8x8x128xf32>
    %19 = vector.extract_strided_slice %2 {offsets = [0, 0, 0, 0], sizes = [1, 7, 8, 128], strides = [1, 1, 1, 1]} : vector<1x8x8x128xf32> to vector<1x7x8x128xf32>
    %20 = tpu.concatenate %7, %19 in 1 : vector<1x1x8x128xf32>, vector<1x7x8x128xf32> -> vector<1x8x8x128xf32>
    %21 = vector.extract_strided_slice %4 {offsets = [0, 1, 0], sizes = [1, 1, 128], strides = [1, 1, 1]} : vector<3x3x128xf32> to vector<1x1x128xf32>
    %22 = vector.shape_cast %21 : vector<1x1x128xf32> to vector<128xf32>
    %23 = vector.shape_cast %22 : vector<128xf32> to vector<1x1x1x128xf32>
    %24 = vector.broadcast %23 : vector<1x1x1x128xf32> to vector<1x8x8x128xf32>
    %25 = arith.mulf %20, %24 : vector<1x8x8x128xf32>
    %26 = arith.addf %18, %25 : vector<1x8x8x128xf32>
    %27 = vector.extract_strided_slice %3 {offsets = [0, 0, 0, 0], sizes = [1, 7, 8, 128], strides = [1, 1, 1, 1]} : vector<1x8x8x128xf32> to vector<1x7x8x128xf32>
    %28 = tpu.concatenate %7, %27 in 1 : vector<1x1x8x128xf32>, vector<1x7x8x128xf32> -> vector<1x8x8x128xf32>
    %29 = vector.extract_strided_slice %4 {offsets = [0, 2, 0], sizes = [1, 1, 128], strides = [1, 1, 1]} : vector<3x3x128xf32> to vector<1x1x128xf32>
    %30 = vector.shape_cast %29 : vector<1x1x128xf32> to vector<128xf32>
    %31 = vector.shape_cast %30 : vector<128xf32> to vector<1x1x1x128xf32>
    %32 = vector.broadcast %31 : vector<1x1x1x128xf32> to vector<1x8x8x128xf32>
    %33 = arith.mulf %28, %32 : vector<1x8x8x128xf32>
    %34 = arith.addf %26, %33 : vector<1x8x8x128xf32>
    %35 = vector.extract_strided_slice %4 {offsets = [1, 0, 0], sizes = [1, 1, 128], strides = [1, 1, 1]} : vector<3x3x128xf32> to vector<1x1x128xf32>
    %36 = vector.shape_cast %35 : vector<1x1x128xf32> to vector<128xf32>
    %37 = vector.shape_cast %36 : vector<128xf32> to vector<1x1x1x128xf32>
    %38 = vector.broadcast %37 : vector<1x1x1x128xf32> to vector<1x8x8x128xf32>
    %39 = arith.mulf %9, %38 : vector<1x8x8x128xf32>
    %40 = arith.addf %34, %39 : vector<1x8x8x128xf32>
    %41 = vector.extract_strided_slice %4 {offsets = [1, 1, 0], sizes = [1, 1, 128], strides = [1, 1, 1]} : vector<3x3x128xf32> to vector<1x1x128xf32>
    %42 = vector.shape_cast %41 : vector<1x1x128xf32> to vector<128xf32>
    %43 = vector.shape_cast %42 : vector<128xf32> to vector<1x1x1x128xf32>
    %44 = vector.broadcast %43 : vector<1x1x1x128xf32> to vector<1x8x8x128xf32>
    %45 = arith.mulf %0, %44 : vector<1x8x8x128xf32>
    %46 = arith.addf %40, %45 : vector<1x8x8x128xf32>
    %47 = vector.extract_strided_slice %4 {offsets = [1, 2, 0], sizes = [1, 1, 128], strides = [1, 1, 1]} : vector<3x3x128xf32> to vector<1x1x128xf32>
    %48 = vector.shape_cast %47 : vector<1x1x128xf32> to vector<128xf32>
    %49 = vector.shape_cast %48 : vector<128xf32> to vector<1x1x1x128xf32>
    %50 = vector.broadcast %49 : vector<1x1x1x128xf32> to vector<1x8x8x128xf32>
    %51 = arith.mulf %1, %50 : vector<1x8x8x128xf32>
    %52 = arith.addf %46, %51 : vector<1x8x8x128xf32>
    %53 = vector.extract_strided_slice %4 {offsets = [2, 0, 0], sizes = [1, 1, 128], strides = [1, 1, 1]} : vector<3x3x128xf32> to vector<1x1x128xf32>
    %54 = vector.shape_cast %53 : vector<1x1x128xf32> to vector<128xf32>
    %55 = vector.shape_cast %54 : vector<128xf32> to vector<1x1x1x128xf32>
    %56 = vector.broadcast %55 : vector<1x1x1x128xf32> to vector<1x8x8x128xf32>
    %57 = arith.mulf %11, %56 : vector<1x8x8x128xf32>
    %58 = arith.addf %52, %57 : vector<1x8x8x128xf32>
    %59 = vector.extract_strided_slice %4 {offsets = [2, 1, 0], sizes = [1, 1, 128], strides = [1, 1, 1]} : vector<3x3x128xf32> to vector<1x1x128xf32>
    %60 = vector.shape_cast %59 : vector<1x1x128xf32> to vector<128xf32>
    %61 = vector.shape_cast %60 : vector<128xf32> to vector<1x1x1x128xf32>
    %62 = vector.broadcast %61 : vector<1x1x1x128xf32> to vector<1x8x8x128xf32>
    %63 = arith.mulf %2, %62 : vector<1x8x8x128xf32>
    %64 = arith.addf %58, %63 : vector<1x8x8x128xf32>
    %65 = vector.extract_strided_slice %4 {offsets = [2, 2, 0], sizes = [1, 1, 128], strides = [1, 1, 1]} : vector<3x3x128xf32> to vector<1x1x128xf32>
    %66 = vector.shape_cast %65 : vector<1x1x128xf32> to vector<128xf32>
    %67 = vector.shape_cast %66 : vector<128xf32> to vector<1x1x1x128xf32>
    %68 = vector.broadcast %67 : vector<1x1x1x128xf32> to vector<1x8x8x128xf32>
    %69 = arith.mulf %3, %68 : vector<1x8x8x128xf32>
    %70 = arith.addf %64, %69 : vector<1x8x8x128xf32>
    %71 = vector.shape_cast %5 : vector<1x128xf32> to vector<1x1x1x128xf32>
    %72 = vector.broadcast %71 : vector<1x1x1x128xf32> to vector<1x8x8x128xf32>
    %73 = arith.addf %70, %72 : vector<1x8x8x128xf32>
    %c0_21 = arith.constant 0 : index
    %c0_22 = arith.constant 0 : index
    %74 = vector.load %arg7[%c0_21, %c0_22] : memref<128x128xbf16, #tpu.memory_space<vmem>>, vector<128x128xbf16>
    %75 = vector.shape_cast %73 : vector<1x8x8x128xf32> to vector<64x128xf32>
    %76 = arith.truncf %75 : vector<64x128xf32> to vector<64x128xbf16>
    %cst_23 = arith.constant dense<0.000000e+00> : vector<64x128xf32>
    %77 = tpu.matmul %76, %74, %cst_23 {dimension_numbers = #tpu.dot_dimension_numbers<[1], [0], [0], [1], [0, 0, 1, 1], [], []>} : vector<64x128xbf16>, vector<128x128xbf16>, vector<64x128xf32> -> vector<64x128xf32>
    %78 = vector.shape_cast %77 : vector<64x128xf32> to vector<1x8x8x128xf32>
    %c0_24 = arith.constant 0 : index
    %c0_25 = arith.constant 0 : index
    %79 = vector.load %arg8[%c0_24, %c0_25] : memref<1x128xf32, #tpu.memory_space<vmem>>, vector<1x128xf32>
    %80 = vector.shape_cast %79 : vector<1x128xf32> to vector<1x1x1x128xf32>
    %81 = vector.broadcast %80 : vector<1x1x1x128xf32> to vector<1x8x8x128xf32>
    %82 = arith.addf %78, %81 : vector<1x8x8x128xf32>
    %cst_26 = arith.constant 0.000000e+00 : f32
    %83 = vector.broadcast %cst_26 : f32 to vector<1x8x8x128xf32>
    %84 = arith.maximumf %82, %83 : vector<1x8x8x128xf32>
    %c0_27 = arith.constant 0 : index
    %c0_28 = arith.constant 0 : index
    %85 = vector.load %arg9[%c0_27, %c0_28] : memref<128x128xbf16, #tpu.memory_space<vmem>>, vector<128x128xbf16>
    %86 = vector.shape_cast %0 : vector<1x8x8x128xf32> to vector<64x128xf32>
    %87 = arith.truncf %86 : vector<64x128xf32> to vector<64x128xbf16>
    %cst_29 = arith.constant dense<0.000000e+00> : vector<64x128xf32>
    %88 = tpu.matmul %87, %85, %cst_29 {dimension_numbers = #tpu.dot_dimension_numbers<[1], [0], [0], [1], [0, 0, 1, 1], [], []>} : vector<64x128xbf16>, vector<128x128xbf16>, vector<64x128xf32> -> vector<64x128xf32>
    %89 = vector.shape_cast %88 : vector<64x128xf32> to vector<1x8x8x128xf32>
    %c0_30 = arith.constant 0 : index
    %c0_31 = arith.constant 0 : index
    %90 = vector.load %arg10[%c0_30, %c0_31] : memref<1x128xf32, #tpu.memory_space<vmem>>, vector<1x128xf32>
    %91 = vector.shape_cast %90 : vector<1x128xf32> to vector<1x1x1x128xf32>
    %92 = vector.broadcast %91 : vector<1x1x1x128xf32> to vector<1x8x8x128xf32>
    %93 = arith.addf %89, %92 : vector<1x8x8x128xf32>
    %cst_32 = arith.constant 0.000000e+00 : f32
    %94 = vector.broadcast %cst_32 : f32 to vector<1x8x8x128xf32>
    %95 = arith.maximumf %93, %94 : vector<1x8x8x128xf32>
    %c0_33 = arith.constant 0 : index
    %c0_34 = arith.constant 0 : index
    %96 = vector.load %arg9[%c0_33, %c0_34] : memref<128x128xbf16, #tpu.memory_space<vmem>>, vector<128x128xbf16>
    %97 = vector.shape_cast %1 : vector<1x8x8x128xf32> to vector<64x128xf32>
    %98 = arith.truncf %97 : vector<64x128xf32> to vector<64x128xbf16>
    %cst_35 = arith.constant dense<0.000000e+00> : vector<64x128xf32>
    %99 = tpu.matmul %98, %96, %cst_35 {dimension_numbers = #tpu.dot_dimension_numbers<[1], [0], [0], [1], [0, 0, 1, 1], [], []>} : vector<64x128xbf16>, vector<128x128xbf16>, vector<64x128xf32> -> vector<64x128xf32>
    %100 = vector.shape_cast %99 : vector<64x128xf32> to vector<1x8x8x128xf32>
    %c0_36 = arith.constant 0 : index
    %c0_37 = arith.constant 0 : index
    %101 = vector.load %arg10[%c0_36, %c0_37] : memref<1x128xf32, #tpu.memory_space<vmem>>, vector<1x128xf32>
    %102 = vector.shape_cast %101 : vector<1x128xf32> to vector<1x1x1x128xf32>
    %103 = vector.broadcast %102 : vector<1x1x1x128xf32> to vector<1x8x8x128xf32>
    %104 = arith.addf %100, %103 : vector<1x8x8x128xf32>
    %cst_38 = arith.constant 0.000000e+00 : f32
    %105 = vector.broadcast %cst_38 : f32 to vector<1x8x8x128xf32>
    %106 = arith.maximumf %104, %105 : vector<1x8x8x128xf32>
    %c0_39 = arith.constant 0 : index
    %c0_40 = arith.constant 0 : index
    %107 = vector.load %arg9[%c0_39, %c0_40] : memref<128x128xbf16, #tpu.memory_space<vmem>>, vector<128x128xbf16>
    %108 = vector.shape_cast %2 : vector<1x8x8x128xf32> to vector<64x128xf32>
    %109 = arith.truncf %108 : vector<64x128xf32> to vector<64x128xbf16>
    %cst_41 = arith.constant dense<0.000000e+00> : vector<64x128xf32>
    %110 = tpu.matmul %109, %107, %cst_41 {dimension_numbers = #tpu.dot_dimension_numbers<[1], [0], [0], [1], [0, 0, 1, 1], [], []>} : vector<64x128xbf16>, vector<128x128xbf16>, vector<64x128xf32> -> vector<64x128xf32>
    %111 = vector.shape_cast %110 : vector<64x128xf32> to vector<1x8x8x128xf32>
    %c0_42 = arith.constant 0 : index
    %c0_43 = arith.constant 0 : index
    %112 = vector.load %arg10[%c0_42, %c0_43] : memref<1x128xf32, #tpu.memory_space<vmem>>, vector<1x128xf32>
    %113 = vector.shape_cast %112 : vector<1x128xf32> to vector<1x1x1x128xf32>
    %114 = vector.broadcast %113 : vector<1x1x1x128xf32> to vector<1x8x8x128xf32>
    %115 = arith.addf %111, %114 : vector<1x8x8x128xf32>
    %cst_44 = arith.constant 0.000000e+00 : f32
    %116 = vector.broadcast %cst_44 : f32 to vector<1x8x8x128xf32>
    %117 = arith.maximumf %115, %116 : vector<1x8x8x128xf32>
    %c0_45 = arith.constant 0 : index
    %c0_46 = arith.constant 0 : index
    %118 = vector.load %arg9[%c0_45, %c0_46] : memref<128x128xbf16, #tpu.memory_space<vmem>>, vector<128x128xbf16>
    %119 = vector.shape_cast %3 : vector<1x8x8x128xf32> to vector<64x128xf32>
    %120 = arith.truncf %119 : vector<64x128xf32> to vector<64x128xbf16>
    %cst_47 = arith.constant dense<0.000000e+00> : vector<64x128xf32>
    %121 = tpu.matmul %120, %118, %cst_47 {dimension_numbers = #tpu.dot_dimension_numbers<[1], [0], [0], [1], [0, 0, 1, 1], [], []>} : vector<64x128xbf16>, vector<128x128xbf16>, vector<64x128xf32> -> vector<64x128xf32>
    %122 = vector.shape_cast %121 : vector<64x128xf32> to vector<1x8x8x128xf32>
    %c0_48 = arith.constant 0 : index
    %c0_49 = arith.constant 0 : index
    %123 = vector.load %arg10[%c0_48, %c0_49] : memref<1x128xf32, #tpu.memory_space<vmem>>, vector<1x128xf32>
    %124 = vector.shape_cast %123 : vector<1x128xf32> to vector<1x1x1x128xf32>
    %125 = vector.broadcast %124 : vector<1x1x1x128xf32> to vector<1x8x8x128xf32>
    %126 = arith.addf %122, %125 : vector<1x8x8x128xf32>
    %cst_50 = arith.constant 0.000000e+00 : f32
    %127 = vector.broadcast %cst_50 : f32 to vector<1x8x8x128xf32>
    %128 = arith.maximumf %126, %127 : vector<1x8x8x128xf32>
    %c0_51 = arith.constant 0 : index
    %c0_52 = arith.constant 0 : index
    %c0_53 = arith.constant 0 : index
    %129 = vector.load %arg11[%c0_51, %c0_52, %c0_53] : memref<3x3x128xf32, #tpu.memory_space<vmem>>, vector<3x3x128xf32>
    %c0_54 = arith.constant 0 : index
    %c0_55 = arith.constant 0 : index
    %130 = vector.load %arg12[%c0_54, %c0_55] : memref<1x128xf32, #tpu.memory_space<vmem>>, vector<1x128xf32>
    %cst_56 = arith.constant 0.000000e+00 : f32
    %131 = vector.broadcast %cst_56 : f32 to vector<1x8x1x128xf32>
    %cst_57 = arith.constant 0.000000e+00 : f32
    %132 = vector.broadcast %cst_57 : f32 to vector<1x1x8x128xf32>
    %133 = vector.extract_strided_slice %106 {offsets = [0, 0, 0, 0], sizes = [1, 8, 7, 128], strides = [1, 1, 1, 1]} : vector<1x8x8x128xf32> to vector<1x8x7x128xf32>
    %134 = tpu.concatenate %131, %133 in 2 : vector<1x8x1x128xf32>, vector<1x8x7x128xf32> -> vector<1x8x8x128xf32>
    %135 = vector.extract_strided_slice %128 {offsets = [0, 0, 0, 0], sizes = [1, 8, 7, 128], strides = [1, 1, 1, 1]} : vector<1x8x8x128xf32> to vector<1x8x7x128xf32>
    %136 = tpu.concatenate %131, %135 in 2 : vector<1x8x1x128xf32>, vector<1x8x7x128xf32> -> vector<1x8x8x128xf32>
    %137 = vector.extract_strided_slice %136 {offsets = [0, 0, 0, 0], sizes = [1, 7, 8, 128], strides = [1, 1, 1, 1]} : vector<1x8x8x128xf32> to vector<1x7x8x128xf32>
    %138 = tpu.concatenate %132, %137 in 1 : vector<1x1x8x128xf32>, vector<1x7x8x128xf32> -> vector<1x8x8x128xf32>
    %139 = vector.extract_strided_slice %129 {offsets = [0, 0, 0], sizes = [1, 1, 128], strides = [1, 1, 1]} : vector<3x3x128xf32> to vector<1x1x128xf32>
    %140 = vector.shape_cast %139 : vector<1x1x128xf32> to vector<128xf32>
    %141 = vector.shape_cast %140 : vector<128xf32> to vector<1x1x1x128xf32>
    %142 = vector.broadcast %141 : vector<1x1x1x128xf32> to vector<1x8x8x128xf32>
    %143 = arith.mulf %138, %142 : vector<1x8x8x128xf32>
    %144 = vector.extract_strided_slice %117 {offsets = [0, 0, 0, 0], sizes = [1, 7, 8, 128], strides = [1, 1, 1, 1]} : vector<1x8x8x128xf32> to vector<1x7x8x128xf32>
    %145 = tpu.concatenate %132, %144 in 1 : vector<1x1x8x128xf32>, vector<1x7x8x128xf32> -> vector<1x8x8x128xf32>
    %146 = vector.extract_strided_slice %129 {offsets = [0, 1, 0], sizes = [1, 1, 128], strides = [1, 1, 1]} : vector<3x3x128xf32> to vector<1x1x128xf32>
    %147 = vector.shape_cast %146 : vector<1x1x128xf32> to vector<128xf32>
    %148 = vector.shape_cast %147 : vector<128xf32> to vector<1x1x1x128xf32>
    %149 = vector.broadcast %148 : vector<1x1x1x128xf32> to vector<1x8x8x128xf32>
    %150 = arith.mulf %145, %149 : vector<1x8x8x128xf32>
    %151 = arith.addf %143, %150 : vector<1x8x8x128xf32>
    %152 = vector.extract_strided_slice %128 {offsets = [0, 0, 0, 0], sizes = [1, 7, 8, 128], strides = [1, 1, 1, 1]} : vector<1x8x8x128xf32> to vector<1x7x8x128xf32>
    %153 = tpu.concatenate %132, %152 in 1 : vector<1x1x8x128xf32>, vector<1x7x8x128xf32> -> vector<1x8x8x128xf32>
    %154 = vector.extract_strided_slice %129 {offsets = [0, 2, 0], sizes = [1, 1, 128], strides = [1, 1, 1]} : vector<3x3x128xf32> to vector<1x1x128xf32>
    %155 = vector.shape_cast %154 : vector<1x1x128xf32> to vector<128xf32>
    %156 = vector.shape_cast %155 : vector<128xf32> to vector<1x1x1x128xf32>
    %157 = vector.broadcast %156 : vector<1x1x1x128xf32> to vector<1x8x8x128xf32>
    %158 = arith.mulf %153, %157 : vector<1x8x8x128xf32>
    %159 = arith.addf %151, %158 : vector<1x8x8x128xf32>
    %160 = vector.extract_strided_slice %129 {offsets = [1, 0, 0], sizes = [1, 1, 128], strides = [1, 1, 1]} : vector<3x3x128xf32> to vector<1x1x128xf32>
    %161 = vector.shape_cast %160 : vector<1x1x128xf32> to vector<128xf32>
    %162 = vector.shape_cast %161 : vector<128xf32> to vector<1x1x1x128xf32>
    %163 = vector.broadcast %162 : vector<1x1x1x128xf32> to vector<1x8x8x128xf32>
    %164 = arith.mulf %134, %163 : vector<1x8x8x128xf32>
    %165 = arith.addf %159, %164 : vector<1x8x8x128xf32>
    %166 = vector.extract_strided_slice %129 {offsets = [1, 1, 0], sizes = [1, 1, 128], strides = [1, 1, 1]} : vector<3x3x128xf32> to vector<1x1x128xf32>
    %167 = vector.shape_cast %166 : vector<1x1x128xf32> to vector<128xf32>
    %168 = vector.shape_cast %167 : vector<128xf32> to vector<1x1x1x128xf32>
    %169 = vector.broadcast %168 : vector<1x1x1x128xf32> to vector<1x8x8x128xf32>
    %170 = arith.mulf %95, %169 : vector<1x8x8x128xf32>
    %171 = arith.addf %165, %170 : vector<1x8x8x128xf32>
    %172 = vector.extract_strided_slice %129 {offsets = [1, 2, 0], sizes = [1, 1, 128], strides = [1, 1, 1]} : vector<3x3x128xf32> to vector<1x1x128xf32>
    %173 = vector.shape_cast %172 : vector<1x1x128xf32> to vector<128xf32>
    %174 = vector.shape_cast %173 : vector<128xf32> to vector<1x1x1x128xf32>
    %175 = vector.broadcast %174 : vector<1x1x1x128xf32> to vector<1x8x8x128xf32>
    %176 = arith.mulf %106, %175 : vector<1x8x8x128xf32>
    %177 = arith.addf %171, %176 : vector<1x8x8x128xf32>
    %178 = vector.extract_strided_slice %129 {offsets = [2, 0, 0], sizes = [1, 1, 128], strides = [1, 1, 1]} : vector<3x3x128xf32> to vector<1x1x128xf32>
    %179 = vector.shape_cast %178 : vector<1x1x128xf32> to vector<128xf32>
    %180 = vector.shape_cast %179 : vector<128xf32> to vector<1x1x1x128xf32>
    %181 = vector.broadcast %180 : vector<1x1x1x128xf32> to vector<1x8x8x128xf32>
    %182 = arith.mulf %136, %181 : vector<1x8x8x128xf32>
    %183 = arith.addf %177, %182 : vector<1x8x8x128xf32>
    %184 = vector.extract_strided_slice %129 {offsets = [2, 1, 0], sizes = [1, 1, 128], strides = [1, 1, 1]} : vector<3x3x128xf32> to vector<1x1x128xf32>
    %185 = vector.shape_cast %184 : vector<1x1x128xf32> to vector<128xf32>
    %186 = vector.shape_cast %185 : vector<128xf32> to vector<1x1x1x128xf32>
    %187 = vector.broadcast %186 : vector<1x1x1x128xf32> to vector<1x8x8x128xf32>
    %188 = arith.mulf %117, %187 : vector<1x8x8x128xf32>
    %189 = arith.addf %183, %188 : vector<1x8x8x128xf32>
    %190 = vector.extract_strided_slice %129 {offsets = [2, 2, 0], sizes = [1, 1, 128], strides = [1, 1, 1]} : vector<3x3x128xf32> to vector<1x1x128xf32>
    %191 = vector.shape_cast %190 : vector<1x1x128xf32> to vector<128xf32>
    %192 = vector.shape_cast %191 : vector<128xf32> to vector<1x1x1x128xf32>
    %193 = vector.broadcast %192 : vector<1x1x1x128xf32> to vector<1x8x8x128xf32>
    %194 = arith.mulf %128, %193 : vector<1x8x8x128xf32>
    %195 = arith.addf %189, %194 : vector<1x8x8x128xf32>
    %196 = vector.shape_cast %130 : vector<1x128xf32> to vector<1x1x1x128xf32>
    %197 = vector.broadcast %196 : vector<1x1x1x128xf32> to vector<1x8x8x128xf32>
    %198 = arith.addf %195, %197 : vector<1x8x8x128xf32>
    %c0_58 = arith.constant 0 : index
    %c0_59 = arith.constant 0 : index
    %199 = vector.load %arg13[%c0_58, %c0_59] : memref<128x128xbf16, #tpu.memory_space<vmem>>, vector<128x128xbf16>
    %200 = vector.shape_cast %198 : vector<1x8x8x128xf32> to vector<64x128xf32>
    %201 = arith.truncf %200 : vector<64x128xf32> to vector<64x128xbf16>
    %cst_60 = arith.constant dense<0.000000e+00> : vector<64x128xf32>
    %202 = tpu.matmul %201, %199, %cst_60 {dimension_numbers = #tpu.dot_dimension_numbers<[1], [0], [0], [1], [0, 0, 1, 1], [], []>} : vector<64x128xbf16>, vector<128x128xbf16>, vector<64x128xf32> -> vector<64x128xf32>
    %203 = vector.shape_cast %202 : vector<64x128xf32> to vector<1x8x8x128xf32>
    %c0_61 = arith.constant 0 : index
    %c0_62 = arith.constant 0 : index
    %204 = vector.load %arg14[%c0_61, %c0_62] : memref<1x128xf32, #tpu.memory_space<vmem>>, vector<1x128xf32>
    %205 = vector.shape_cast %204 : vector<1x128xf32> to vector<1x1x1x128xf32>
    %206 = vector.broadcast %205 : vector<1x1x1x128xf32> to vector<1x8x8x128xf32>
    %207 = arith.addf %203, %206 : vector<1x8x8x128xf32>
    %cst_63 = arith.constant 0.000000e+00 : f32
    %208 = vector.broadcast %cst_63 : f32 to vector<1x8x8x128xf32>
    %209 = arith.maximumf %207, %208 : vector<1x8x8x128xf32>
    %210 = arith.addf %84, %209 : vector<1x8x8x128xf32>
    %c0_64 = arith.constant 0 : index
    %c0_65 = arith.constant 0 : index
    %211 = vector.load %arg15[%c0_64, %c0_65] : memref<128x128xbf16, #tpu.memory_space<vmem>>, vector<128x128xbf16>
    %212 = vector.shape_cast %210 : vector<1x8x8x128xf32> to vector<64x128xf32>
    %213 = arith.truncf %212 : vector<64x128xf32> to vector<64x128xbf16>
    %cst_66 = arith.constant dense<0.000000e+00> : vector<64x128xf32>
    %214 = tpu.matmul %213, %211, %cst_66 {dimension_numbers = #tpu.dot_dimension_numbers<[1], [0], [0], [1], [0, 0, 1, 1], [], []>} : vector<64x128xbf16>, vector<128x128xbf16>, vector<64x128xf32> -> vector<64x128xf32>
    %215 = vector.shape_cast %214 : vector<64x128xf32> to vector<1x8x8x128xf32>
    %c0_67 = arith.constant 0 : index
    %c0_68 = arith.constant 0 : index
    %216 = vector.load %arg16[%c0_67, %c0_68] : memref<1x128xf32, #tpu.memory_space<vmem>>, vector<1x128xf32>
    %217 = vector.shape_cast %216 : vector<1x128xf32> to vector<1x1x1x128xf32>
    %218 = vector.broadcast %217 : vector<1x1x1x128xf32> to vector<1x8x8x128xf32>
    %219 = arith.addf %215, %218 : vector<1x8x8x128xf32>
    %cst_69 = arith.constant 0.000000e+00 : f32
    %220 = vector.broadcast %cst_69 : f32 to vector<1x8x8x128xf32>
    %221 = arith.maximumf %219, %220 : vector<1x8x8x128xf32>
    %c0_70 = arith.constant 0 : index
    %c0_71 = arith.constant 0 : index
    %c0_72 = arith.constant 0 : index
    %222 = vector.load %arg17[%c0_70, %c0_71, %c0_72] : memref<3x3x128xf32, #tpu.memory_space<vmem>>, vector<3x3x128xf32>
    %c0_73 = arith.constant 0 : index
    %c0_74 = arith.constant 0 : index
    %223 = vector.load %arg18[%c0_73, %c0_74] : memref<1x128xf32, #tpu.memory_space<vmem>>, vector<1x128xf32>
    %cst_75 = arith.constant 0.000000e+00 : f32
    %224 = vector.broadcast %cst_75 : f32 to vector<1x8x1x128xf32>
    %cst_76 = arith.constant 0.000000e+00 : f32
    %225 = vector.broadcast %cst_76 : f32 to vector<1x1x8x128xf32>
    %226 = vector.extract_strided_slice %221 {offsets = [0, 0, 0, 0], sizes = [1, 8, 7, 128], strides = [1, 1, 1, 1]} : vector<1x8x8x128xf32> to vector<1x8x7x128xf32>
    %227 = tpu.concatenate %224, %226 in 2 : vector<1x8x1x128xf32>, vector<1x8x7x128xf32> -> vector<1x8x8x128xf32>
    %228 = vector.extract_strided_slice %221 {offsets = [0, 0, 1, 0], sizes = [1, 8, 7, 128], strides = [1, 1, 1, 1]} : vector<1x8x8x128xf32> to vector<1x8x7x128xf32>
    %229 = tpu.concatenate %228, %224 in 2 : vector<1x8x7x128xf32>, vector<1x8x1x128xf32> -> vector<1x8x8x128xf32>
    %230 = vector.extract_strided_slice %227 {offsets = [0, 0, 0, 0], sizes = [1, 7, 8, 128], strides = [1, 1, 1, 1]} : vector<1x8x8x128xf32> to vector<1x7x8x128xf32>
    %231 = tpu.concatenate %225, %230 in 1 : vector<1x1x8x128xf32>, vector<1x7x8x128xf32> -> vector<1x8x8x128xf32>
    %232 = vector.extract_strided_slice %222 {offsets = [0, 0, 0], sizes = [1, 1, 128], strides = [1, 1, 1]} : vector<3x3x128xf32> to vector<1x1x128xf32>
    %233 = vector.shape_cast %232 : vector<1x1x128xf32> to vector<128xf32>
    %234 = vector.shape_cast %233 : vector<128xf32> to vector<1x1x1x128xf32>
    %235 = vector.broadcast %234 : vector<1x1x1x128xf32> to vector<1x8x8x128xf32>
    %236 = arith.mulf %231, %235 : vector<1x8x8x128xf32>
    %237 = vector.extract_strided_slice %221 {offsets = [0, 0, 0, 0], sizes = [1, 7, 8, 128], strides = [1, 1, 1, 1]} : vector<1x8x8x128xf32> to vector<1x7x8x128xf32>
    %238 = tpu.concatenate %225, %237 in 1 : vector<1x1x8x128xf32>, vector<1x7x8x128xf32> -> vector<1x8x8x128xf32>
    %239 = vector.extract_strided_slice %222 {offsets = [0, 1, 0], sizes = [1, 1, 128], strides = [1, 1, 1]} : vector<3x3x128xf32> to vector<1x1x128xf32>
    %240 = vector.shape_cast %239 : vector<1x1x128xf32> to vector<128xf32>
    %241 = vector.shape_cast %240 : vector<128xf32> to vector<1x1x1x128xf32>
    %242 = vector.broadcast %241 : vector<1x1x1x128xf32> to vector<1x8x8x128xf32>
    %243 = arith.mulf %238, %242 : vector<1x8x8x128xf32>
    %244 = arith.addf %236, %243 : vector<1x8x8x128xf32>
    %245 = vector.extract_strided_slice %229 {offsets = [0, 0, 0, 0], sizes = [1, 7, 8, 128], strides = [1, 1, 1, 1]} : vector<1x8x8x128xf32> to vector<1x7x8x128xf32>
    %246 = tpu.concatenate %225, %245 in 1 : vector<1x1x8x128xf32>, vector<1x7x8x128xf32> -> vector<1x8x8x128xf32>
    %247 = vector.extract_strided_slice %222 {offsets = [0, 2, 0], sizes = [1, 1, 128], strides = [1, 1, 1]} : vector<3x3x128xf32> to vector<1x1x128xf32>
    %248 = vector.shape_cast %247 : vector<1x1x128xf32> to vector<128xf32>
    %249 = vector.shape_cast %248 : vector<128xf32> to vector<1x1x1x128xf32>
    %250 = vector.broadcast %249 : vector<1x1x1x128xf32> to vector<1x8x8x128xf32>
    %251 = arith.mulf %246, %250 : vector<1x8x8x128xf32>
    %252 = arith.addf %244, %251 : vector<1x8x8x128xf32>
    %253 = vector.extract_strided_slice %222 {offsets = [1, 0, 0], sizes = [1, 1, 128], strides = [1, 1, 1]} : vector<3x3x128xf32> to vector<1x1x128xf32>
    %254 = vector.shape_cast %253 : vector<1x1x128xf32> to vector<128xf32>
    %255 = vector.shape_cast %254 : vector<128xf32> to vector<1x1x1x128xf32>
    %256 = vector.broadcast %255 : vector<1x1x1x128xf32> to vector<1x8x8x128xf32>
    %257 = arith.mulf %227, %256 : vector<1x8x8x128xf32>
    %258 = arith.addf %252, %257 : vector<1x8x8x128xf32>
    %259 = vector.extract_strided_slice %222 {offsets = [1, 1, 0], sizes = [1, 1, 128], strides = [1, 1, 1]} : vector<3x3x128xf32> to vector<1x1x128xf32>
    %260 = vector.shape_cast %259 : vector<1x1x128xf32> to vector<128xf32>
    %261 = vector.shape_cast %260 : vector<128xf32> to vector<1x1x1x128xf32>
    %262 = vector.broadcast %261 : vector<1x1x1x128xf32> to vector<1x8x8x128xf32>
    %263 = arith.mulf %221, %262 : vector<1x8x8x128xf32>
    %264 = arith.addf %258, %263 : vector<1x8x8x128xf32>
    %265 = vector.extract_strided_slice %222 {offsets = [1, 2, 0], sizes = [1, 1, 128], strides = [1, 1, 1]} : vector<3x3x128xf32> to vector<1x1x128xf32>
    %266 = vector.shape_cast %265 : vector<1x1x128xf32> to vector<128xf32>
    %267 = vector.shape_cast %266 : vector<128xf32> to vector<1x1x1x128xf32>
    %268 = vector.broadcast %267 : vector<1x1x1x128xf32> to vector<1x8x8x128xf32>
    %269 = arith.mulf %229, %268 : vector<1x8x8x128xf32>
    %270 = arith.addf %264, %269 : vector<1x8x8x128xf32>
    %271 = vector.extract_strided_slice %227 {offsets = [0, 1, 0, 0], sizes = [1, 7, 8, 128], strides = [1, 1, 1, 1]} : vector<1x8x8x128xf32> to vector<1x7x8x128xf32>
    %272 = tpu.concatenate %271, %225 in 1 : vector<1x7x8x128xf32>, vector<1x1x8x128xf32> -> vector<1x8x8x128xf32>
    %273 = vector.extract_strided_slice %222 {offsets = [2, 0, 0], sizes = [1, 1, 128], strides = [1, 1, 1]} : vector<3x3x128xf32> to vector<1x1x128xf32>
    %274 = vector.shape_cast %273 : vector<1x1x128xf32> to vector<128xf32>
    %275 = vector.shape_cast %274 : vector<128xf32> to vector<1x1x1x128xf32>
    %276 = vector.broadcast %275 : vector<1x1x1x128xf32> to vector<1x8x8x128xf32>
    %277 = arith.mulf %272, %276 : vector<1x8x8x128xf32>
    %278 = arith.addf %270, %277 : vector<1x8x8x128xf32>
    %279 = vector.extract_strided_slice %221 {offsets = [0, 1, 0, 0], sizes = [1, 7, 8, 128], strides = [1, 1, 1, 1]} : vector<1x8x8x128xf32> to vector<1x7x8x128xf32>
    %280 = tpu.concatenate %279, %225 in 1 : vector<1x7x8x128xf32>, vector<1x1x8x128xf32> -> vector<1x8x8x128xf32>
    %281 = vector.extract_strided_slice %222 {offsets = [2, 1, 0], sizes = [1, 1, 128], strides = [1, 1, 1]} : vector<3x3x128xf32> to vector<1x1x128xf32>
    %282 = vector.shape_cast %281 : vector<1x1x128xf32> to vector<128xf32>
    %283 = vector.shape_cast %282 : vector<128xf32> to vector<1x1x1x128xf32>
    %284 = vector.broadcast %283 : vector<1x1x1x128xf32> to vector<1x8x8x128xf32>
    %285 = arith.mulf %280, %284 : vector<1x8x8x128xf32>
    %286 = arith.addf %278, %285 : vector<1x8x8x128xf32>
    %287 = vector.extract_strided_slice %229 {offsets = [0, 1, 0, 0], sizes = [1, 7, 8, 128], strides = [1, 1, 1, 1]} : vector<1x8x8x128xf32> to vector<1x7x8x128xf32>
    %288 = tpu.concatenate %287, %225 in 1 : vector<1x7x8x128xf32>, vector<1x1x8x128xf32> -> vector<1x8x8x128xf32>
    %289 = vector.extract_strided_slice %222 {offsets = [2, 2, 0], sizes = [1, 1, 128], strides = [1, 1, 1]} : vector<3x3x128xf32> to vector<1x1x128xf32>
    %290 = vector.shape_cast %289 : vector<1x1x128xf32> to vector<128xf32>
    %291 = vector.shape_cast %290 : vector<128xf32> to vector<1x1x1x128xf32>
    %292 = vector.broadcast %291 : vector<1x1x1x128xf32> to vector<1x8x8x128xf32>
    %293 = arith.mulf %288, %292 : vector<1x8x8x128xf32>
    %294 = arith.addf %286, %293 : vector<1x8x8x128xf32>
    %295 = vector.shape_cast %223 : vector<1x128xf32> to vector<1x1x1x128xf32>
    %296 = vector.broadcast %295 : vector<1x1x1x128xf32> to vector<1x8x8x128xf32>
    %297 = arith.addf %294, %296 : vector<1x8x8x128xf32>
    %c0_77 = arith.constant 0 : index
    %c0_78 = arith.constant 0 : index
    %298 = vector.load %arg21[%c0_77, %c0_78] : memref<1x128xf32, #tpu.memory_space<vmem>>, vector<1x128xf32>
    %299 = vector.shape_cast %298 : vector<1x128xf32> to vector<1x1x1x128xf32>
    %300 = vector.broadcast %299 : vector<1x1x1x128xf32> to vector<1x8x8x128xf32>
    %301 = arith.mulf %210, %300 : vector<1x8x8x128xf32>
    %c0_79 = arith.constant 0 : index
    %c0_80 = arith.constant 0 : index
    %302 = vector.load %arg19[%c0_79, %c0_80] : memref<128x128xbf16, #tpu.memory_space<vmem>>, vector<128x128xbf16>
    %303 = vector.shape_cast %297 : vector<1x8x8x128xf32> to vector<64x128xf32>
    %304 = arith.truncf %303 : vector<64x128xf32> to vector<64x128xbf16>
    %cst_81 = arith.constant dense<0.000000e+00> : vector<64x128xf32>
    %305 = tpu.matmul %304, %302, %cst_81 {dimension_numbers = #tpu.dot_dimension_numbers<[1], [0], [0], [1], [0, 0, 1, 1], [], []>} : vector<64x128xbf16>, vector<128x128xbf16>, vector<64x128xf32> -> vector<64x128xf32>
    %306 = vector.shape_cast %305 : vector<64x128xf32> to vector<1x8x8x128xf32>
    %c0_82 = arith.constant 0 : index
    %c0_83 = arith.constant 0 : index
    %307 = vector.load %arg20[%c0_82, %c0_83] : memref<1x128xf32, #tpu.memory_space<vmem>>, vector<1x128xf32>
    %308 = vector.shape_cast %307 : vector<1x128xf32> to vector<1x1x1x128xf32>
    %309 = vector.broadcast %308 : vector<1x1x1x128xf32> to vector<1x8x8x128xf32>
    %310 = arith.addf %306, %309 : vector<1x8x8x128xf32>
    %cst_84 = arith.constant 0.000000e+00 : f32
    %311 = vector.broadcast %cst_84 : f32 to vector<1x8x8x128xf32>
    %312 = arith.maximumf %310, %311 : vector<1x8x8x128xf32>
    %313 = arith.addf %301, %312 : vector<1x8x8x128xf32>
    %c0_85 = arith.constant 0 : index
    %c0_86 = arith.constant 0 : index
    %c0_87 = arith.constant 0 : index
    %c0_88 = arith.constant 0 : index
    %314 = vector.load %arg22[%c0_85, %c0_86, %c0_87, %c0_88] : memref<1x8x8x128xf32, #tpu.memory_space<vmem>>, vector<1x8x8x128xf32>
    tpu.vector_store %arg22[%c0_85, %c0_86, %c0_87, %c0_88], %313 {strides = array<i32>} : memref<1x8x8x128xf32, #tpu.memory_space<vmem>>, vector<1x8x8x128xf32>,
    return
  }
  func.func @transform_0(%arg0: i32) -> (i32, i32, i32, i32) {
    %c0_i32 = arith.constant 0 : i32
    %c0_i32_0 = arith.constant 0 : i32
    %c0_i32_1 = arith.constant 0 : i32
    %c0_i32_2 = arith.constant 0 : i32
    return %arg0, %c0_i32, %c0_i32_0, %c0_i32_1 : i32, i32, i32, i32
  }
  func.func @transform_1(%arg0: i32) -> (i32, i32, i32, i32) {
    %c0_i32 = arith.constant 0 : i32
    %c0_i32_0 = arith.constant 0 : i32
    %c0_i32_1 = arith.constant 0 : i32
    %c0_i32_2 = arith.constant 0 : i32
    return %arg0, %c0_i32, %c0_i32_0, %c0_i32_1 : i32, i32, i32, i32
  }
  func.func @transform_2(%arg0: i32) -> (i32, i32, i32, i32) {
    %c0_i32 = arith.constant 0 : i32
    %c0_i32_0 = arith.constant 0 : i32
    %c0_i32_1 = arith.constant 0 : i32
    %c0_i32_2 = arith.constant 0 : i32
    return %arg0, %c0_i32, %c0_i32_0, %c0_i32_1 : i32, i32, i32, i32
  }
  func.func @transform_3(%arg0: i32) -> (i32, i32, i32, i32) {
    %c0_i32 = arith.constant 0 : i32
    %c0_i32_0 = arith.constant 0 : i32
    %c0_i32_1 = arith.constant 0 : i32
    %c0_i32_2 = arith.constant 0 : i32
    return %arg0, %c0_i32, %c0_i32_0, %c0_i32_1 : i32, i32, i32, i32
  }
  func.func @transform_4(%arg0: i32) -> (i32, i32, i32) {
    %c0_i32 = arith.constant 0 : i32
    %c0_i32_0 = arith.constant 0 : i32
    %c0_i32_1 = arith.constant 0 : i32
    %c0_i32_2 = arith.constant 0 : i32
    return %c0_i32, %c0_i32_0, %c0_i32_1 : i32, i32, i32
  }
  func.func @transform_5(%arg0: i32) -> (i32, i32) {
    %c0_i32 = arith.constant 0 : i32
    %c0_i32_0 = arith.constant 0 : i32
    %c0_i32_1 = arith.constant 0 : i32
    return %c0_i32, %c0_i32_0 : i32, i32
  }
  func.func @transform_6(%arg0: i32) -> (i32, i32) {
    %c0_i32 = arith.constant 0 : i32
    %c0_i32_0 = arith.constant 0 : i32
    %c0_i32_1 = arith.constant 0 : i32
    return %c0_i32, %c0_i32_0 : i32, i32
  }
  func.func @transform_7(%arg0: i32) -> (i32, i32) {
    %c0_i32 = arith.constant 0 : i32
    %c0_i32_0 = arith.constant 0 : i32
    %c0_i32_1 = arith.constant 0 : i32
    return %c0_i32, %c0_i32_0 : i32, i32
  }
  func.func @transform_8(%arg0: i32) -> (i32, i32) {
    %c0_i32 = arith.constant 0 : i32
    %c0_i32_0 = arith.constant 0 : i32
    %c0_i32_1 = arith.constant 0 : i32
    return %c0_i32, %c0_i32_0 : i32, i32
  }
  func.func @transform_9(%arg0: i32) -> (i32, i32) {
    %c0_i32 = arith.constant 0 : i32
    %c0_i32_0 = arith.constant 0 : i32
    %c0_i32_1 = arith.constant 0 : i32
    return %c0_i32, %c0_i32_0 : i32, i32
  }
  func.func @transform_10(%arg0: i32) -> (i32, i32, i32) {
    %c0_i32 = arith.constant 0 : i32
    %c0_i32_0 = arith.constant 0 : i32
    %c0_i32_1 = arith.constant 0 : i32
    %c0_i32_2 = arith.constant 0 : i32
    return %c0_i32, %c0_i32_0, %c0_i32_1 : i32, i32, i32
  }
  func.func @transform_11(%arg0: i32) -> (i32, i32) {
    %c0_i32 = arith.constant 0 : i32
    %c0_i32_0 = arith.constant 0 : i32
    %c0_i32_1 = arith.constant 0 : i32
    return %c0_i32, %c0_i32_0 : i32, i32
  }
  func.func @transform_12(%arg0: i32) -> (i32, i32) {
    %c0_i32 = arith.constant 0 : i32
    %c0_i32_0 = arith.constant 0 : i32
    %c0_i32_1 = arith.constant 0 : i32
    return %c0_i32, %c0_i32_0 : i32, i32
  }
  func.func @transform_13(%arg0: i32) -> (i32, i32) {
    %c0_i32 = arith.constant 0 : i32
    %c0_i32_0 = arith.constant 0 : i32
    %c0_i32_1 = arith.constant 0 : i32
    return %c0_i32, %c0_i32_0 : i32, i32
  }
  func.func @transform_14(%arg0: i32) -> (i32, i32) {
    %c0_i32 = arith.constant 0 : i32
    %c0_i32_0 = arith.constant 0 : i32
    %c0_i32_1 = arith.constant 0 : i32
    return %c0_i32, %c0_i32_0 : i32, i32
  }
  func.func @transform_15(%arg0: i32) -> (i32, i32) {
    %c0_i32 = arith.constant 0 : i32
    %c0_i32_0 = arith.constant 0 : i32
    %c0_i32_1 = arith.constant 0 : i32
    return %c0_i32, %c0_i32_0 : i32, i32
  }
  func.func @transform_16(%arg0: i32) -> (i32, i32, i32) {
    %c0_i32 = arith.constant 0 : i32
    %c0_i32_0 = arith.constant 0 : i32
    %c0_i32_1 = arith.constant 0 : i32
    %c0_i32_2 = arith.constant 0 : i32
    return %c0_i32, %c0_i32_0, %c0_i32_1 : i32, i32, i32
  }
  func.func @transform_17(%arg0: i32) -> (i32, i32) {
    %c0_i32 = arith.constant 0 : i32
    %c0_i32_0 = arith.constant 0 : i32
    %c0_i32_1 = arith.constant 0 : i32
    return %c0_i32, %c0_i32_0 : i32, i32
  }
  func.func @transform_18(%arg0: i32) -> (i32, i32) {
    %c0_i32 = arith.constant 0 : i32
    %c0_i32_0 = arith.constant 0 : i32
    %c0_i32_1 = arith.constant 0 : i32
    return %c0_i32, %c0_i32_0 : i32, i32
  }
  func.func @transform_19(%arg0: i32) -> (i32, i32) {
    %c0_i32 = arith.constant 0 : i32
    %c0_i32_0 = arith.constant 0 : i32
    %c0_i32_1 = arith.constant 0 : i32
    return %c0_i32, %c0_i32_0 : i32, i32
  }
  func.func @transform_20(%arg0: i32) -> (i32, i32) {
    %c0_i32 = arith.constant 0 : i32
    %c0_i32_0 = arith.constant 0 : i32
    %c0_i32_1 = arith.constant 0 : i32
    return %c0_i32, %c0_i32_0 : i32, i32
  }
  func.func @transform_21(%arg0: i32) -> (i32, i32, i32, i32) {
    %c0_i32 = arith.constant 0 : i32
    %c0_i32_0 = arith.constant 0 : i32
    %c0_i32_1 = arith.constant 0 : i32
    %c0_i32_2 = arith.constant 0 : i32
    return %arg0, %c0_i32, %c0_i32_0, %c0_i32_1 : i32, i32, i32, i32
  }
}

module attributes {stable_mosaic.version = 11 : i64} {
  func.func @kernel(%arg0: i32, %arg1: memref<1x4x4x128xf32, #tpu.memory_space<vmem>>, %arg2: memref<1x4x4x128xf32, #tpu.memory_space<vmem>>, %arg3: memref<1x4x4x128xf32, #tpu.memory_space<vmem>>, %arg4: memref<1x4x4x128xf32, #tpu.memory_space<vmem>>, %arg5: memref<3x3x128xf32, #tpu.memory_space<vmem>>, %arg6: memref<1x128xf32, #tpu.memory_space<vmem>>, %arg7: memref<128x128xbf16, #tpu.memory_space<vmem>>, %arg8: memref<1x128xf32, #tpu.memory_space<vmem>>, %arg9: memref<128x128xbf16, #tpu.memory_space<vmem>>, %arg10: memref<1x128xf32, #tpu.memory_space<vmem>>, %arg11: memref<3x3x128xf32, #tpu.memory_space<vmem>>, %arg12: memref<1x128xf32, #tpu.memory_space<vmem>>, %arg13: memref<128x128xbf16, #tpu.memory_space<vmem>>, %arg14: memref<1x128xf32, #tpu.memory_space<vmem>>, %arg15: memref<128x128xbf16, #tpu.memory_space<vmem>>, %arg16: memref<1x128xf32, #tpu.memory_space<vmem>>, %arg17: memref<3x3x128xf32, #tpu.memory_space<vmem>>, %arg18: memref<1x128xf32, #tpu.memory_space<vmem>>, %arg19: memref<128x128xbf16, #tpu.memory_space<vmem>>, %arg20: memref<1x128xf32, #tpu.memory_space<vmem>>, %arg21: memref<1x128xf32, #tpu.memory_space<vmem>>, %arg22: memref<1x4x4x128xf32, #tpu.memory_space<vmem>>) attributes {dimension_semantics = [#tpu.dimension_semantics<parallel>], iteration_bounds = array<i64: 2>, scalar_prefetch = 0 : i64, scratch_operands = 0 : i64, tpu.core_type = #tpu.core_type<tc>, window_params = [{transform_indices = @transform_0, window_bounds = array<i64: 1, 4, 4, 128>}, {transform_indices = @transform_1, window_bounds = array<i64: 1, 4, 4, 128>}, {transform_indices = @transform_2, window_bounds = array<i64: 1, 4, 4, 128>}, {transform_indices = @transform_3, window_bounds = array<i64: 1, 4, 4, 128>}, {pipeline_mode = #tpu.pipeline_mode<synchronous>, transform_indices = @transform_4, window_bounds = array<i64: 3, 3, 128>}, {pipeline_mode = #tpu.pipeline_mode<synchronous>, transform_indices = @transform_5, window_bounds = array<i64: 1, 128>}, {pipeline_mode = #tpu.pipeline_mode<synchronous>, transform_indices = @transform_6, window_bounds = array<i64: 128, 128>}, {pipeline_mode = #tpu.pipeline_mode<synchronous>, transform_indices = @transform_7, window_bounds = array<i64: 1, 128>}, {pipeline_mode = #tpu.pipeline_mode<synchronous>, transform_indices = @transform_8, window_bounds = array<i64: 128, 128>}, {pipeline_mode = #tpu.pipeline_mode<synchronous>, transform_indices = @transform_9, window_bounds = array<i64: 1, 128>}, {pipeline_mode = #tpu.pipeline_mode<synchronous>, transform_indices = @transform_10, window_bounds = array<i64: 3, 3, 128>}, {pipeline_mode = #tpu.pipeline_mode<synchronous>, transform_indices = @transform_11, window_bounds = array<i64: 1, 128>}, {pipeline_mode = #tpu.pipeline_mode<synchronous>, transform_indices = @transform_12, window_bounds = array<i64: 128, 128>}, {pipeline_mode = #tpu.pipeline_mode<synchronous>, transform_indices = @transform_13, window_bounds = array<i64: 1, 128>}, {pipeline_mode = #tpu.pipeline_mode<synchronous>, transform_indices = @transform_14, window_bounds = array<i64: 128, 128>}, {pipeline_mode = #tpu.pipeline_mode<synchronous>, transform_indices = @transform_15, window_bounds = array<i64: 1, 128>}, {pipeline_mode = #tpu.pipeline_mode<synchronous>, transform_indices = @transform_16, window_bounds = array<i64: 3, 3, 128>}, {pipeline_mode = #tpu.pipeline_mode<synchronous>, transform_indices = @transform_17, window_bounds = array<i64: 1, 128>}, {pipeline_mode = #tpu.pipeline_mode<synchronous>, transform_indices = @transform_18, window_bounds = array<i64: 128, 128>}, {pipeline_mode = #tpu.pipeline_mode<synchronous>, transform_indices = @transform_19, window_bounds = array<i64: 1, 128>}, {pipeline_mode = #tpu.pipeline_mode<synchronous>, transform_indices = @transform_20, window_bounds = array<i64: 1, 128>}, {transform_indices = @transform_21, window_bounds = array<i64: 1, 4, 4, 128>}]} {
    %c0 = arith.constant 0 : index
    %c0_0 = arith.constant 0 : index
    %c0_1 = arith.constant 0 : index
    %c0_2 = arith.constant 0 : index
    %0 = vector.load %arg1[%c0, %c0_0, %c0_1, %c0_2] : memref<1x4x4x128xf32, #tpu.memory_space<vmem>>, vector<1x4x4x128xf32>
    %c0_3 = arith.constant 0 : index
    %c0_4 = arith.constant 0 : index
    %c0_5 = arith.constant 0 : index
    %c0_6 = arith.constant 0 : index
    %1 = vector.load %arg2[%c0_3, %c0_4, %c0_5, %c0_6] : memref<1x4x4x128xf32, #tpu.memory_space<vmem>>, vector<1x4x4x128xf32>
    %c0_7 = arith.constant 0 : index
    %c0_8 = arith.constant 0 : index
    %c0_9 = arith.constant 0 : index
    %c0_10 = arith.constant 0 : index
    %2 = vector.load %arg3[%c0_7, %c0_8, %c0_9, %c0_10] : memref<1x4x4x128xf32, #tpu.memory_space<vmem>>, vector<1x4x4x128xf32>
    %c0_11 = arith.constant 0 : index
    %c0_12 = arith.constant 0 : index
    %c0_13 = arith.constant 0 : index
    %c0_14 = arith.constant 0 : index
    %3 = vector.load %arg4[%c0_11, %c0_12, %c0_13, %c0_14] : memref<1x4x4x128xf32, #tpu.memory_space<vmem>>, vector<1x4x4x128xf32>
    %c0_15 = arith.constant 0 : index
    %c0_16 = arith.constant 0 : index
    %c0_17 = arith.constant 0 : index
    %4 = vector.load %arg5[%c0_15, %c0_16, %c0_17] : memref<3x3x128xf32, #tpu.memory_space<vmem>>, vector<3x3x128xf32>
    %c0_18 = arith.constant 0 : index
    %c0_19 = arith.constant 0 : index
    %5 = vector.load %arg6[%c0_18, %c0_19] : memref<1x128xf32, #tpu.memory_space<vmem>>, vector<1x128xf32>
    %cst = arith.constant 0.000000e+00 : f32
    %6 = vector.broadcast %cst : f32 to vector<1x4x1x128xf32>
    %cst_20 = arith.constant 0.000000e+00 : f32
    %7 = vector.broadcast %cst_20 : f32 to vector<1x1x4x128xf32>
    %8 = vector.extract_strided_slice %1 {offsets = [0, 0, 0, 0], sizes = [1, 4, 3, 128], strides = [1, 1, 1, 1]} : vector<1x4x4x128xf32> to vector<1x4x3x128xf32>
    %9 = tpu.concatenate %6, %8 in 2 : vector<1x4x1x128xf32>, vector<1x4x3x128xf32> -> vector<1x4x4x128xf32>
    %10 = vector.extract_strided_slice %3 {offsets = [0, 0, 0, 0], sizes = [1, 4, 3, 128], strides = [1, 1, 1, 1]} : vector<1x4x4x128xf32> to vector<1x4x3x128xf32>
    %11 = tpu.concatenate %6, %10 in 2 : vector<1x4x1x128xf32>, vector<1x4x3x128xf32> -> vector<1x4x4x128xf32>
    %12 = vector.extract_strided_slice %11 {offsets = [0, 0, 0, 0], sizes = [1, 3, 4, 128], strides = [1, 1, 1, 1]} : vector<1x4x4x128xf32> to vector<1x3x4x128xf32>
    %13 = tpu.concatenate %7, %12 in 1 : vector<1x1x4x128xf32>, vector<1x3x4x128xf32> -> vector<1x4x4x128xf32>
    %14 = vector.extract_strided_slice %4 {offsets = [0, 0, 0], sizes = [1, 1, 128], strides = [1, 1, 1]} : vector<3x3x128xf32> to vector<1x1x128xf32>
    %15 = vector.shape_cast %14 : vector<1x1x128xf32> to vector<128xf32>
    %16 = vector.shape_cast %15 : vector<128xf32> to vector<1x1x1x128xf32>
    %17 = vector.broadcast %16 : vector<1x1x1x128xf32> to vector<1x4x4x128xf32>
    %18 = arith.mulf %13, %17 : vector<1x4x4x128xf32>
    %19 = vector.extract_strided_slice %2 {offsets = [0, 0, 0, 0], sizes = [1, 3, 4, 128], strides = [1, 1, 1, 1]} : vector<1x4x4x128xf32> to vector<1x3x4x128xf32>
    %20 = tpu.concatenate %7, %19 in 1 : vector<1x1x4x128xf32>, vector<1x3x4x128xf32> -> vector<1x4x4x128xf32>
    %21 = vector.extract_strided_slice %4 {offsets = [0, 1, 0], sizes = [1, 1, 128], strides = [1, 1, 1]} : vector<3x3x128xf32> to vector<1x1x128xf32>
    %22 = vector.shape_cast %21 : vector<1x1x128xf32> to vector<128xf32>
    %23 = vector.shape_cast %22 : vector<128xf32> to vector<1x1x1x128xf32>
    %24 = vector.broadcast %23 : vector<1x1x1x128xf32> to vector<1x4x4x128xf32>
    %25 = arith.mulf %20, %24 : vector<1x4x4x128xf32>
    %26 = arith.addf %18, %25 : vector<1x4x4x128xf32>
    %27 = vector.extract_strided_slice %3 {offsets = [0, 0, 0, 0], sizes = [1, 3, 4, 128], strides = [1, 1, 1, 1]} : vector<1x4x4x128xf32> to vector<1x3x4x128xf32>
    %28 = tpu.concatenate %7, %27 in 1 : vector<1x1x4x128xf32>, vector<1x3x4x128xf32> -> vector<1x4x4x128xf32>
    %29 = vector.extract_strided_slice %4 {offsets = [0, 2, 0], sizes = [1, 1, 128], strides = [1, 1, 1]} : vector<3x3x128xf32> to vector<1x1x128xf32>
    %30 = vector.shape_cast %29 : vector<1x1x128xf32> to vector<128xf32>
    %31 = vector.shape_cast %30 : vector<128xf32> to vector<1x1x1x128xf32>
    %32 = vector.broadcast %31 : vector<1x1x1x128xf32> to vector<1x4x4x128xf32>
    %33 = arith.mulf %28, %32 : vector<1x4x4x128xf32>
    %34 = arith.addf %26, %33 : vector<1x4x4x128xf32>
    %35 = vector.extract_strided_slice %4 {offsets = [1, 0, 0], sizes = [1, 1, 128], strides = [1, 1, 1]} : vector<3x3x128xf32> to vector<1x1x128xf32>
    %36 = vector.shape_cast %35 : vector<1x1x128xf32> to vector<128xf32>
    %37 = vector.shape_cast %36 : vector<128xf32> to vector<1x1x1x128xf32>
    %38 = vector.broadcast %37 : vector<1x1x1x128xf32> to vector<1x4x4x128xf32>
    %39 = arith.mulf %9, %38 : vector<1x4x4x128xf32>
    %40 = arith.addf %34, %39 : vector<1x4x4x128xf32>
    %41 = vector.extract_strided_slice %4 {offsets = [1, 1, 0], sizes = [1, 1, 128], strides = [1, 1, 1]} : vector<3x3x128xf32> to vector<1x1x128xf32>
    %42 = vector.shape_cast %41 : vector<1x1x128xf32> to vector<128xf32>
    %43 = vector.shape_cast %42 : vector<128xf32> to vector<1x1x1x128xf32>
    %44 = vector.broadcast %43 : vector<1x1x1x128xf32> to vector<1x4x4x128xf32>
    %45 = arith.mulf %0, %44 : vector<1x4x4x128xf32>
    %46 = arith.addf %40, %45 : vector<1x4x4x128xf32>
    %47 = vector.extract_strided_slice %4 {offsets = [1, 2, 0], sizes = [1, 1, 128], strides = [1, 1, 1]} : vector<3x3x128xf32> to vector<1x1x128xf32>
    %48 = vector.shape_cast %47 : vector<1x1x128xf32> to vector<128xf32>
    %49 = vector.shape_cast %48 : vector<128xf32> to vector<1x1x1x128xf32>
    %50 = vector.broadcast %49 : vector<1x1x1x128xf32> to vector<1x4x4x128xf32>
    %51 = arith.mulf %1, %50 : vector<1x4x4x128xf32>
    %52 = arith.addf %46, %51 : vector<1x4x4x128xf32>
    %53 = vector.extract_strided_slice %4 {offsets = [2, 0, 0], sizes = [1, 1, 128], strides = [1, 1, 1]} : vector<3x3x128xf32> to vector<1x1x128xf32>
    %54 = vector.shape_cast %53 : vector<1x1x128xf32> to vector<128xf32>
    %55 = vector.shape_cast %54 : vector<128xf32> to vector<1x1x1x128xf32>
    %56 = vector.broadcast %55 : vector<1x1x1x128xf32> to vector<1x4x4x128xf32>
    %57 = arith.mulf %11, %56 : vector<1x4x4x128xf32>
    %58 = arith.addf %52, %57 : vector<1x4x4x128xf32>
    %59 = vector.extract_strided_slice %4 {offsets = [2, 1, 0], sizes = [1, 1, 128], strides = [1, 1, 1]} : vector<3x3x128xf32> to vector<1x1x128xf32>
    %60 = vector.shape_cast %59 : vector<1x1x128xf32> to vector<128xf32>
    %61 = vector.shape_cast %60 : vector<128xf32> to vector<1x1x1x128xf32>
    %62 = vector.broadcast %61 : vector<1x1x1x128xf32> to vector<1x4x4x128xf32>
    %63 = arith.mulf %2, %62 : vector<1x4x4x128xf32>
    %64 = arith.addf %58, %63 : vector<1x4x4x128xf32>
    %65 = vector.extract_strided_slice %4 {offsets = [2, 2, 0], sizes = [1, 1, 128], strides = [1, 1, 1]} : vector<3x3x128xf32> to vector<1x1x128xf32>
    %66 = vector.shape_cast %65 : vector<1x1x128xf32> to vector<128xf32>
    %67 = vector.shape_cast %66 : vector<128xf32> to vector<1x1x1x128xf32>
    %68 = vector.broadcast %67 : vector<1x1x1x128xf32> to vector<1x4x4x128xf32>
    %69 = arith.mulf %3, %68 : vector<1x4x4x128xf32>
    %70 = arith.addf %64, %69 : vector<1x4x4x128xf32>
    %71 = vector.shape_cast %5 : vector<1x128xf32> to vector<1x1x1x128xf32>
    %72 = vector.broadcast %71 : vector<1x1x1x128xf32> to vector<1x4x4x128xf32>
    %73 = arith.addf %70, %72 : vector<1x4x4x128xf32>
    %c0_21 = arith.constant 0 : index
    %c0_22 = arith.constant 0 : index
    %74 = vector.load %arg7[%c0_21, %c0_22] : memref<128x128xbf16, #tpu.memory_space<vmem>>, vector<128x128xbf16>
    %75 = vector.shape_cast %73 : vector<1x4x4x128xf32> to vector<4x4x128xf32>
    %76 = arith.truncf %75 : vector<4x4x128xf32> to vector<4x4x128xbf16>
    %77 = vector.shape_cast %74 : vector<128x128xbf16> to vector<1x128x128xbf16>
    %78 = vector.broadcast %77 : vector<1x128x128xbf16> to vector<4x128x128xbf16>
    %cst_23 = arith.constant dense<0.000000e+00> : vector<4x4x128xf32>
    %79 = tpu.matmul %76, %78, %cst_23 {dimension_numbers = #tpu.dot_dimension_numbers<[2], [1], [1], [2], [0, 0, 0, 1, 1, 2], [0], [0]>} : vector<4x4x128xbf16>, vector<4x128x128xbf16>, vector<4x4x128xf32> -> vector<4x4x128xf32>
    %80 = vector.shape_cast %79 : vector<4x4x128xf32> to vector<1x4x4x128xf32>
    %c0_24 = arith.constant 0 : index
    %c0_25 = arith.constant 0 : index
    %81 = vector.load %arg8[%c0_24, %c0_25] : memref<1x128xf32, #tpu.memory_space<vmem>>, vector<1x128xf32>
    %82 = vector.shape_cast %81 : vector<1x128xf32> to vector<1x1x1x128xf32>
    %83 = vector.broadcast %82 : vector<1x1x1x128xf32> to vector<1x4x4x128xf32>
    %84 = arith.addf %80, %83 : vector<1x4x4x128xf32>
    %cst_26 = arith.constant 0.000000e+00 : f32
    %85 = vector.broadcast %cst_26 : f32 to vector<1x4x4x128xf32>
    %86 = arith.maximumf %84, %85 : vector<1x4x4x128xf32>
    %c0_27 = arith.constant 0 : index
    %c0_28 = arith.constant 0 : index
    %87 = vector.load %arg9[%c0_27, %c0_28] : memref<128x128xbf16, #tpu.memory_space<vmem>>, vector<128x128xbf16>
    %88 = vector.shape_cast %0 : vector<1x4x4x128xf32> to vector<4x4x128xf32>
    %89 = arith.truncf %88 : vector<4x4x128xf32> to vector<4x4x128xbf16>
    %90 = vector.shape_cast %87 : vector<128x128xbf16> to vector<1x128x128xbf16>
    %91 = vector.broadcast %90 : vector<1x128x128xbf16> to vector<4x128x128xbf16>
    %cst_29 = arith.constant dense<0.000000e+00> : vector<4x4x128xf32>
    %92 = tpu.matmul %89, %91, %cst_29 {dimension_numbers = #tpu.dot_dimension_numbers<[2], [1], [1], [2], [0, 0, 0, 1, 1, 2], [0], [0]>} : vector<4x4x128xbf16>, vector<4x128x128xbf16>, vector<4x4x128xf32> -> vector<4x4x128xf32>
    %93 = vector.shape_cast %92 : vector<4x4x128xf32> to vector<1x4x4x128xf32>
    %c0_30 = arith.constant 0 : index
    %c0_31 = arith.constant 0 : index
    %94 = vector.load %arg10[%c0_30, %c0_31] : memref<1x128xf32, #tpu.memory_space<vmem>>, vector<1x128xf32>
    %95 = vector.shape_cast %94 : vector<1x128xf32> to vector<1x1x1x128xf32>
    %96 = vector.broadcast %95 : vector<1x1x1x128xf32> to vector<1x4x4x128xf32>
    %97 = arith.addf %93, %96 : vector<1x4x4x128xf32>
    %cst_32 = arith.constant 0.000000e+00 : f32
    %98 = vector.broadcast %cst_32 : f32 to vector<1x4x4x128xf32>
    %99 = arith.maximumf %97, %98 : vector<1x4x4x128xf32>
    %c0_33 = arith.constant 0 : index
    %c0_34 = arith.constant 0 : index
    %100 = vector.load %arg9[%c0_33, %c0_34] : memref<128x128xbf16, #tpu.memory_space<vmem>>, vector<128x128xbf16>
    %101 = vector.shape_cast %1 : vector<1x4x4x128xf32> to vector<4x4x128xf32>
    %102 = arith.truncf %101 : vector<4x4x128xf32> to vector<4x4x128xbf16>
    %103 = vector.shape_cast %100 : vector<128x128xbf16> to vector<1x128x128xbf16>
    %104 = vector.broadcast %103 : vector<1x128x128xbf16> to vector<4x128x128xbf16>
    %cst_35 = arith.constant dense<0.000000e+00> : vector<4x4x128xf32>
    %105 = tpu.matmul %102, %104, %cst_35 {dimension_numbers = #tpu.dot_dimension_numbers<[2], [1], [1], [2], [0, 0, 0, 1, 1, 2], [0], [0]>} : vector<4x4x128xbf16>, vector<4x128x128xbf16>, vector<4x4x128xf32> -> vector<4x4x128xf32>
    %106 = vector.shape_cast %105 : vector<4x4x128xf32> to vector<1x4x4x128xf32>
    %c0_36 = arith.constant 0 : index
    %c0_37 = arith.constant 0 : index
    %107 = vector.load %arg10[%c0_36, %c0_37] : memref<1x128xf32, #tpu.memory_space<vmem>>, vector<1x128xf32>
    %108 = vector.shape_cast %107 : vector<1x128xf32> to vector<1x1x1x128xf32>
    %109 = vector.broadcast %108 : vector<1x1x1x128xf32> to vector<1x4x4x128xf32>
    %110 = arith.addf %106, %109 : vector<1x4x4x128xf32>
    %cst_38 = arith.constant 0.000000e+00 : f32
    %111 = vector.broadcast %cst_38 : f32 to vector<1x4x4x128xf32>
    %112 = arith.maximumf %110, %111 : vector<1x4x4x128xf32>
    %c0_39 = arith.constant 0 : index
    %c0_40 = arith.constant 0 : index
    %113 = vector.load %arg9[%c0_39, %c0_40] : memref<128x128xbf16, #tpu.memory_space<vmem>>, vector<128x128xbf16>
    %114 = vector.shape_cast %2 : vector<1x4x4x128xf32> to vector<4x4x128xf32>
    %115 = arith.truncf %114 : vector<4x4x128xf32> to vector<4x4x128xbf16>
    %116 = vector.shape_cast %113 : vector<128x128xbf16> to vector<1x128x128xbf16>
    %117 = vector.broadcast %116 : vector<1x128x128xbf16> to vector<4x128x128xbf16>
    %cst_41 = arith.constant dense<0.000000e+00> : vector<4x4x128xf32>
    %118 = tpu.matmul %115, %117, %cst_41 {dimension_numbers = #tpu.dot_dimension_numbers<[2], [1], [1], [2], [0, 0, 0, 1, 1, 2], [0], [0]>} : vector<4x4x128xbf16>, vector<4x128x128xbf16>, vector<4x4x128xf32> -> vector<4x4x128xf32>
    %119 = vector.shape_cast %118 : vector<4x4x128xf32> to vector<1x4x4x128xf32>
    %c0_42 = arith.constant 0 : index
    %c0_43 = arith.constant 0 : index
    %120 = vector.load %arg10[%c0_42, %c0_43] : memref<1x128xf32, #tpu.memory_space<vmem>>, vector<1x128xf32>
    %121 = vector.shape_cast %120 : vector<1x128xf32> to vector<1x1x1x128xf32>
    %122 = vector.broadcast %121 : vector<1x1x1x128xf32> to vector<1x4x4x128xf32>
    %123 = arith.addf %119, %122 : vector<1x4x4x128xf32>
    %cst_44 = arith.constant 0.000000e+00 : f32
    %124 = vector.broadcast %cst_44 : f32 to vector<1x4x4x128xf32>
    %125 = arith.maximumf %123, %124 : vector<1x4x4x128xf32>
    %c0_45 = arith.constant 0 : index
    %c0_46 = arith.constant 0 : index
    %126 = vector.load %arg9[%c0_45, %c0_46] : memref<128x128xbf16, #tpu.memory_space<vmem>>, vector<128x128xbf16>
    %127 = vector.shape_cast %3 : vector<1x4x4x128xf32> to vector<4x4x128xf32>
    %128 = arith.truncf %127 : vector<4x4x128xf32> to vector<4x4x128xbf16>
    %129 = vector.shape_cast %126 : vector<128x128xbf16> to vector<1x128x128xbf16>
    %130 = vector.broadcast %129 : vector<1x128x128xbf16> to vector<4x128x128xbf16>
    %cst_47 = arith.constant dense<0.000000e+00> : vector<4x4x128xf32>
    %131 = tpu.matmul %128, %130, %cst_47 {dimension_numbers = #tpu.dot_dimension_numbers<[2], [1], [1], [2], [0, 0, 0, 1, 1, 2], [0], [0]>} : vector<4x4x128xbf16>, vector<4x128x128xbf16>, vector<4x4x128xf32> -> vector<4x4x128xf32>
    %132 = vector.shape_cast %131 : vector<4x4x128xf32> to vector<1x4x4x128xf32>
    %c0_48 = arith.constant 0 : index
    %c0_49 = arith.constant 0 : index
    %133 = vector.load %arg10[%c0_48, %c0_49] : memref<1x128xf32, #tpu.memory_space<vmem>>, vector<1x128xf32>
    %134 = vector.shape_cast %133 : vector<1x128xf32> to vector<1x1x1x128xf32>
    %135 = vector.broadcast %134 : vector<1x1x1x128xf32> to vector<1x4x4x128xf32>
    %136 = arith.addf %132, %135 : vector<1x4x4x128xf32>
    %cst_50 = arith.constant 0.000000e+00 : f32
    %137 = vector.broadcast %cst_50 : f32 to vector<1x4x4x128xf32>
    %138 = arith.maximumf %136, %137 : vector<1x4x4x128xf32>
    %c0_51 = arith.constant 0 : index
    %c0_52 = arith.constant 0 : index
    %c0_53 = arith.constant 0 : index
    %139 = vector.load %arg11[%c0_51, %c0_52, %c0_53] : memref<3x3x128xf32, #tpu.memory_space<vmem>>, vector<3x3x128xf32>
    %c0_54 = arith.constant 0 : index
    %c0_55 = arith.constant 0 : index
    %140 = vector.load %arg12[%c0_54, %c0_55] : memref<1x128xf32, #tpu.memory_space<vmem>>, vector<1x128xf32>
    %cst_56 = arith.constant 0.000000e+00 : f32
    %141 = vector.broadcast %cst_56 : f32 to vector<1x4x1x128xf32>
    %cst_57 = arith.constant 0.000000e+00 : f32
    %142 = vector.broadcast %cst_57 : f32 to vector<1x1x4x128xf32>
    %143 = vector.extract_strided_slice %112 {offsets = [0, 0, 0, 0], sizes = [1, 4, 3, 128], strides = [1, 1, 1, 1]} : vector<1x4x4x128xf32> to vector<1x4x3x128xf32>
    %144 = tpu.concatenate %141, %143 in 2 : vector<1x4x1x128xf32>, vector<1x4x3x128xf32> -> vector<1x4x4x128xf32>
    %145 = vector.extract_strided_slice %138 {offsets = [0, 0, 0, 0], sizes = [1, 4, 3, 128], strides = [1, 1, 1, 1]} : vector<1x4x4x128xf32> to vector<1x4x3x128xf32>
    %146 = tpu.concatenate %141, %145 in 2 : vector<1x4x1x128xf32>, vector<1x4x3x128xf32> -> vector<1x4x4x128xf32>
    %147 = vector.extract_strided_slice %146 {offsets = [0, 0, 0, 0], sizes = [1, 3, 4, 128], strides = [1, 1, 1, 1]} : vector<1x4x4x128xf32> to vector<1x3x4x128xf32>
    %148 = tpu.concatenate %142, %147 in 1 : vector<1x1x4x128xf32>, vector<1x3x4x128xf32> -> vector<1x4x4x128xf32>
    %149 = vector.extract_strided_slice %139 {offsets = [0, 0, 0], sizes = [1, 1, 128], strides = [1, 1, 1]} : vector<3x3x128xf32> to vector<1x1x128xf32>
    %150 = vector.shape_cast %149 : vector<1x1x128xf32> to vector<128xf32>
    %151 = vector.shape_cast %150 : vector<128xf32> to vector<1x1x1x128xf32>
    %152 = vector.broadcast %151 : vector<1x1x1x128xf32> to vector<1x4x4x128xf32>
    %153 = arith.mulf %148, %152 : vector<1x4x4x128xf32>
    %154 = vector.extract_strided_slice %125 {offsets = [0, 0, 0, 0], sizes = [1, 3, 4, 128], strides = [1, 1, 1, 1]} : vector<1x4x4x128xf32> to vector<1x3x4x128xf32>
    %155 = tpu.concatenate %142, %154 in 1 : vector<1x1x4x128xf32>, vector<1x3x4x128xf32> -> vector<1x4x4x128xf32>
    %156 = vector.extract_strided_slice %139 {offsets = [0, 1, 0], sizes = [1, 1, 128], strides = [1, 1, 1]} : vector<3x3x128xf32> to vector<1x1x128xf32>
    %157 = vector.shape_cast %156 : vector<1x1x128xf32> to vector<128xf32>
    %158 = vector.shape_cast %157 : vector<128xf32> to vector<1x1x1x128xf32>
    %159 = vector.broadcast %158 : vector<1x1x1x128xf32> to vector<1x4x4x128xf32>
    %160 = arith.mulf %155, %159 : vector<1x4x4x128xf32>
    %161 = arith.addf %153, %160 : vector<1x4x4x128xf32>
    %162 = vector.extract_strided_slice %138 {offsets = [0, 0, 0, 0], sizes = [1, 3, 4, 128], strides = [1, 1, 1, 1]} : vector<1x4x4x128xf32> to vector<1x3x4x128xf32>
    %163 = tpu.concatenate %142, %162 in 1 : vector<1x1x4x128xf32>, vector<1x3x4x128xf32> -> vector<1x4x4x128xf32>
    %164 = vector.extract_strided_slice %139 {offsets = [0, 2, 0], sizes = [1, 1, 128], strides = [1, 1, 1]} : vector<3x3x128xf32> to vector<1x1x128xf32>
    %165 = vector.shape_cast %164 : vector<1x1x128xf32> to vector<128xf32>
    %166 = vector.shape_cast %165 : vector<128xf32> to vector<1x1x1x128xf32>
    %167 = vector.broadcast %166 : vector<1x1x1x128xf32> to vector<1x4x4x128xf32>
    %168 = arith.mulf %163, %167 : vector<1x4x4x128xf32>
    %169 = arith.addf %161, %168 : vector<1x4x4x128xf32>
    %170 = vector.extract_strided_slice %139 {offsets = [1, 0, 0], sizes = [1, 1, 128], strides = [1, 1, 1]} : vector<3x3x128xf32> to vector<1x1x128xf32>
    %171 = vector.shape_cast %170 : vector<1x1x128xf32> to vector<128xf32>
    %172 = vector.shape_cast %171 : vector<128xf32> to vector<1x1x1x128xf32>
    %173 = vector.broadcast %172 : vector<1x1x1x128xf32> to vector<1x4x4x128xf32>
    %174 = arith.mulf %144, %173 : vector<1x4x4x128xf32>
    %175 = arith.addf %169, %174 : vector<1x4x4x128xf32>
    %176 = vector.extract_strided_slice %139 {offsets = [1, 1, 0], sizes = [1, 1, 128], strides = [1, 1, 1]} : vector<3x3x128xf32> to vector<1x1x128xf32>
    %177 = vector.shape_cast %176 : vector<1x1x128xf32> to vector<128xf32>
    %178 = vector.shape_cast %177 : vector<128xf32> to vector<1x1x1x128xf32>
    %179 = vector.broadcast %178 : vector<1x1x1x128xf32> to vector<1x4x4x128xf32>
    %180 = arith.mulf %99, %179 : vector<1x4x4x128xf32>
    %181 = arith.addf %175, %180 : vector<1x4x4x128xf32>
    %182 = vector.extract_strided_slice %139 {offsets = [1, 2, 0], sizes = [1, 1, 128], strides = [1, 1, 1]} : vector<3x3x128xf32> to vector<1x1x128xf32>
    %183 = vector.shape_cast %182 : vector<1x1x128xf32> to vector<128xf32>
    %184 = vector.shape_cast %183 : vector<128xf32> to vector<1x1x1x128xf32>
    %185 = vector.broadcast %184 : vector<1x1x1x128xf32> to vector<1x4x4x128xf32>
    %186 = arith.mulf %112, %185 : vector<1x4x4x128xf32>
    %187 = arith.addf %181, %186 : vector<1x4x4x128xf32>
    %188 = vector.extract_strided_slice %139 {offsets = [2, 0, 0], sizes = [1, 1, 128], strides = [1, 1, 1]} : vector<3x3x128xf32> to vector<1x1x128xf32>
    %189 = vector.shape_cast %188 : vector<1x1x128xf32> to vector<128xf32>
    %190 = vector.shape_cast %189 : vector<128xf32> to vector<1x1x1x128xf32>
    %191 = vector.broadcast %190 : vector<1x1x1x128xf32> to vector<1x4x4x128xf32>
    %192 = arith.mulf %146, %191 : vector<1x4x4x128xf32>
    %193 = arith.addf %187, %192 : vector<1x4x4x128xf32>
    %194 = vector.extract_strided_slice %139 {offsets = [2, 1, 0], sizes = [1, 1, 128], strides = [1, 1, 1]} : vector<3x3x128xf32> to vector<1x1x128xf32>
    %195 = vector.shape_cast %194 : vector<1x1x128xf32> to vector<128xf32>
    %196 = vector.shape_cast %195 : vector<128xf32> to vector<1x1x1x128xf32>
    %197 = vector.broadcast %196 : vector<1x1x1x128xf32> to vector<1x4x4x128xf32>
    %198 = arith.mulf %125, %197 : vector<1x4x4x128xf32>
    %199 = arith.addf %193, %198 : vector<1x4x4x128xf32>
    %200 = vector.extract_strided_slice %139 {offsets = [2, 2, 0], sizes = [1, 1, 128], strides = [1, 1, 1]} : vector<3x3x128xf32> to vector<1x1x128xf32>
    %201 = vector.shape_cast %200 : vector<1x1x128xf32> to vector<128xf32>
    %202 = vector.shape_cast %201 : vector<128xf32> to vector<1x1x1x128xf32>
    %203 = vector.broadcast %202 : vector<1x1x1x128xf32> to vector<1x4x4x128xf32>
    %204 = arith.mulf %138, %203 : vector<1x4x4x128xf32>
    %205 = arith.addf %199, %204 : vector<1x4x4x128xf32>
    %206 = vector.shape_cast %140 : vector<1x128xf32> to vector<1x1x1x128xf32>
    %207 = vector.broadcast %206 : vector<1x1x1x128xf32> to vector<1x4x4x128xf32>
    %208 = arith.addf %205, %207 : vector<1x4x4x128xf32>
    %c0_58 = arith.constant 0 : index
    %c0_59 = arith.constant 0 : index
    %209 = vector.load %arg13[%c0_58, %c0_59] : memref<128x128xbf16, #tpu.memory_space<vmem>>, vector<128x128xbf16>
    %210 = vector.shape_cast %208 : vector<1x4x4x128xf32> to vector<4x4x128xf32>
    %211 = arith.truncf %210 : vector<4x4x128xf32> to vector<4x4x128xbf16>
    %212 = vector.shape_cast %209 : vector<128x128xbf16> to vector<1x128x128xbf16>
    %213 = vector.broadcast %212 : vector<1x128x128xbf16> to vector<4x128x128xbf16>
    %cst_60 = arith.constant dense<0.000000e+00> : vector<4x4x128xf32>
    %214 = tpu.matmul %211, %213, %cst_60 {dimension_numbers = #tpu.dot_dimension_numbers<[2], [1], [1], [2], [0, 0, 0, 1, 1, 2], [0], [0]>} : vector<4x4x128xbf16>, vector<4x128x128xbf16>, vector<4x4x128xf32> -> vector<4x4x128xf32>
    %215 = vector.shape_cast %214 : vector<4x4x128xf32> to vector<1x4x4x128xf32>
    %c0_61 = arith.constant 0 : index
    %c0_62 = arith.constant 0 : index
    %216 = vector.load %arg14[%c0_61, %c0_62] : memref<1x128xf32, #tpu.memory_space<vmem>>, vector<1x128xf32>
    %217 = vector.shape_cast %216 : vector<1x128xf32> to vector<1x1x1x128xf32>
    %218 = vector.broadcast %217 : vector<1x1x1x128xf32> to vector<1x4x4x128xf32>
    %219 = arith.addf %215, %218 : vector<1x4x4x128xf32>
    %cst_63 = arith.constant 0.000000e+00 : f32
    %220 = vector.broadcast %cst_63 : f32 to vector<1x4x4x128xf32>
    %221 = arith.maximumf %219, %220 : vector<1x4x4x128xf32>
    %222 = arith.addf %86, %221 : vector<1x4x4x128xf32>
    %c0_64 = arith.constant 0 : index
    %c0_65 = arith.constant 0 : index
    %223 = vector.load %arg15[%c0_64, %c0_65] : memref<128x128xbf16, #tpu.memory_space<vmem>>, vector<128x128xbf16>
    %224 = vector.shape_cast %222 : vector<1x4x4x128xf32> to vector<4x4x128xf32>
    %225 = arith.truncf %224 : vector<4x4x128xf32> to vector<4x4x128xbf16>
    %226 = vector.shape_cast %223 : vector<128x128xbf16> to vector<1x128x128xbf16>
    %227 = vector.broadcast %226 : vector<1x128x128xbf16> to vector<4x128x128xbf16>
    %cst_66 = arith.constant dense<0.000000e+00> : vector<4x4x128xf32>
    %228 = tpu.matmul %225, %227, %cst_66 {dimension_numbers = #tpu.dot_dimension_numbers<[2], [1], [1], [2], [0, 0, 0, 1, 1, 2], [0], [0]>} : vector<4x4x128xbf16>, vector<4x128x128xbf16>, vector<4x4x128xf32> -> vector<4x4x128xf32>
    %229 = vector.shape_cast %228 : vector<4x4x128xf32> to vector<1x4x4x128xf32>
    %c0_67 = arith.constant 0 : index
    %c0_68 = arith.constant 0 : index
    %230 = vector.load %arg16[%c0_67, %c0_68] : memref<1x128xf32, #tpu.memory_space<vmem>>, vector<1x128xf32>
    %231 = vector.shape_cast %230 : vector<1x128xf32> to vector<1x1x1x128xf32>
    %232 = vector.broadcast %231 : vector<1x1x1x128xf32> to vector<1x4x4x128xf32>
    %233 = arith.addf %229, %232 : vector<1x4x4x128xf32>
    %cst_69 = arith.constant 0.000000e+00 : f32
    %234 = vector.broadcast %cst_69 : f32 to vector<1x4x4x128xf32>
    %235 = arith.maximumf %233, %234 : vector<1x4x4x128xf32>
    %c0_70 = arith.constant 0 : index
    %c0_71 = arith.constant 0 : index
    %c0_72 = arith.constant 0 : index
    %236 = vector.load %arg17[%c0_70, %c0_71, %c0_72] : memref<3x3x128xf32, #tpu.memory_space<vmem>>, vector<3x3x128xf32>
    %c0_73 = arith.constant 0 : index
    %c0_74 = arith.constant 0 : index
    %237 = vector.load %arg18[%c0_73, %c0_74] : memref<1x128xf32, #tpu.memory_space<vmem>>, vector<1x128xf32>
    %cst_75 = arith.constant 0.000000e+00 : f32
    %238 = vector.broadcast %cst_75 : f32 to vector<1x4x1x128xf32>
    %cst_76 = arith.constant 0.000000e+00 : f32
    %239 = vector.broadcast %cst_76 : f32 to vector<1x1x4x128xf32>
    %240 = vector.extract_strided_slice %235 {offsets = [0, 0, 0, 0], sizes = [1, 4, 3, 128], strides = [1, 1, 1, 1]} : vector<1x4x4x128xf32> to vector<1x4x3x128xf32>
    %241 = tpu.concatenate %238, %240 in 2 : vector<1x4x1x128xf32>, vector<1x4x3x128xf32> -> vector<1x4x4x128xf32>
    %242 = vector.extract_strided_slice %235 {offsets = [0, 0, 1, 0], sizes = [1, 4, 3, 128], strides = [1, 1, 1, 1]} : vector<1x4x4x128xf32> to vector<1x4x3x128xf32>
    %243 = tpu.concatenate %242, %238 in 2 : vector<1x4x3x128xf32>, vector<1x4x1x128xf32> -> vector<1x4x4x128xf32>
    %244 = vector.extract_strided_slice %241 {offsets = [0, 0, 0, 0], sizes = [1, 3, 4, 128], strides = [1, 1, 1, 1]} : vector<1x4x4x128xf32> to vector<1x3x4x128xf32>
    %245 = tpu.concatenate %239, %244 in 1 : vector<1x1x4x128xf32>, vector<1x3x4x128xf32> -> vector<1x4x4x128xf32>
    %246 = vector.extract_strided_slice %236 {offsets = [0, 0, 0], sizes = [1, 1, 128], strides = [1, 1, 1]} : vector<3x3x128xf32> to vector<1x1x128xf32>
    %247 = vector.shape_cast %246 : vector<1x1x128xf32> to vector<128xf32>
    %248 = vector.shape_cast %247 : vector<128xf32> to vector<1x1x1x128xf32>
    %249 = vector.broadcast %248 : vector<1x1x1x128xf32> to vector<1x4x4x128xf32>
    %250 = arith.mulf %245, %249 : vector<1x4x4x128xf32>
    %251 = vector.extract_strided_slice %235 {offsets = [0, 0, 0, 0], sizes = [1, 3, 4, 128], strides = [1, 1, 1, 1]} : vector<1x4x4x128xf32> to vector<1x3x4x128xf32>
    %252 = tpu.concatenate %239, %251 in 1 : vector<1x1x4x128xf32>, vector<1x3x4x128xf32> -> vector<1x4x4x128xf32>
    %253 = vector.extract_strided_slice %236 {offsets = [0, 1, 0], sizes = [1, 1, 128], strides = [1, 1, 1]} : vector<3x3x128xf32> to vector<1x1x128xf32>
    %254 = vector.shape_cast %253 : vector<1x1x128xf32> to vector<128xf32>
    %255 = vector.shape_cast %254 : vector<128xf32> to vector<1x1x1x128xf32>
    %256 = vector.broadcast %255 : vector<1x1x1x128xf32> to vector<1x4x4x128xf32>
    %257 = arith.mulf %252, %256 : vector<1x4x4x128xf32>
    %258 = arith.addf %250, %257 : vector<1x4x4x128xf32>
    %259 = vector.extract_strided_slice %243 {offsets = [0, 0, 0, 0], sizes = [1, 3, 4, 128], strides = [1, 1, 1, 1]} : vector<1x4x4x128xf32> to vector<1x3x4x128xf32>
    %260 = tpu.concatenate %239, %259 in 1 : vector<1x1x4x128xf32>, vector<1x3x4x128xf32> -> vector<1x4x4x128xf32>
    %261 = vector.extract_strided_slice %236 {offsets = [0, 2, 0], sizes = [1, 1, 128], strides = [1, 1, 1]} : vector<3x3x128xf32> to vector<1x1x128xf32>
    %262 = vector.shape_cast %261 : vector<1x1x128xf32> to vector<128xf32>
    %263 = vector.shape_cast %262 : vector<128xf32> to vector<1x1x1x128xf32>
    %264 = vector.broadcast %263 : vector<1x1x1x128xf32> to vector<1x4x4x128xf32>
    %265 = arith.mulf %260, %264 : vector<1x4x4x128xf32>
    %266 = arith.addf %258, %265 : vector<1x4x4x128xf32>
    %267 = vector.extract_strided_slice %236 {offsets = [1, 0, 0], sizes = [1, 1, 128], strides = [1, 1, 1]} : vector<3x3x128xf32> to vector<1x1x128xf32>
    %268 = vector.shape_cast %267 : vector<1x1x128xf32> to vector<128xf32>
    %269 = vector.shape_cast %268 : vector<128xf32> to vector<1x1x1x128xf32>
    %270 = vector.broadcast %269 : vector<1x1x1x128xf32> to vector<1x4x4x128xf32>
    %271 = arith.mulf %241, %270 : vector<1x4x4x128xf32>
    %272 = arith.addf %266, %271 : vector<1x4x4x128xf32>
    %273 = vector.extract_strided_slice %236 {offsets = [1, 1, 0], sizes = [1, 1, 128], strides = [1, 1, 1]} : vector<3x3x128xf32> to vector<1x1x128xf32>
    %274 = vector.shape_cast %273 : vector<1x1x128xf32> to vector<128xf32>
    %275 = vector.shape_cast %274 : vector<128xf32> to vector<1x1x1x128xf32>
    %276 = vector.broadcast %275 : vector<1x1x1x128xf32> to vector<1x4x4x128xf32>
    %277 = arith.mulf %235, %276 : vector<1x4x4x128xf32>
    %278 = arith.addf %272, %277 : vector<1x4x4x128xf32>
    %279 = vector.extract_strided_slice %236 {offsets = [1, 2, 0], sizes = [1, 1, 128], strides = [1, 1, 1]} : vector<3x3x128xf32> to vector<1x1x128xf32>
    %280 = vector.shape_cast %279 : vector<1x1x128xf32> to vector<128xf32>
    %281 = vector.shape_cast %280 : vector<128xf32> to vector<1x1x1x128xf32>
    %282 = vector.broadcast %281 : vector<1x1x1x128xf32> to vector<1x4x4x128xf32>
    %283 = arith.mulf %243, %282 : vector<1x4x4x128xf32>
    %284 = arith.addf %278, %283 : vector<1x4x4x128xf32>
    %285 = vector.extract_strided_slice %241 {offsets = [0, 1, 0, 0], sizes = [1, 3, 4, 128], strides = [1, 1, 1, 1]} : vector<1x4x4x128xf32> to vector<1x3x4x128xf32>
    %286 = tpu.concatenate %285, %239 in 1 : vector<1x3x4x128xf32>, vector<1x1x4x128xf32> -> vector<1x4x4x128xf32>
    %287 = vector.extract_strided_slice %236 {offsets = [2, 0, 0], sizes = [1, 1, 128], strides = [1, 1, 1]} : vector<3x3x128xf32> to vector<1x1x128xf32>
    %288 = vector.shape_cast %287 : vector<1x1x128xf32> to vector<128xf32>
    %289 = vector.shape_cast %288 : vector<128xf32> to vector<1x1x1x128xf32>
    %290 = vector.broadcast %289 : vector<1x1x1x128xf32> to vector<1x4x4x128xf32>
    %291 = arith.mulf %286, %290 : vector<1x4x4x128xf32>
    %292 = arith.addf %284, %291 : vector<1x4x4x128xf32>
    %293 = vector.extract_strided_slice %235 {offsets = [0, 1, 0, 0], sizes = [1, 3, 4, 128], strides = [1, 1, 1, 1]} : vector<1x4x4x128xf32> to vector<1x3x4x128xf32>
    %294 = tpu.concatenate %293, %239 in 1 : vector<1x3x4x128xf32>, vector<1x1x4x128xf32> -> vector<1x4x4x128xf32>
    %295 = vector.extract_strided_slice %236 {offsets = [2, 1, 0], sizes = [1, 1, 128], strides = [1, 1, 1]} : vector<3x3x128xf32> to vector<1x1x128xf32>
    %296 = vector.shape_cast %295 : vector<1x1x128xf32> to vector<128xf32>
    %297 = vector.shape_cast %296 : vector<128xf32> to vector<1x1x1x128xf32>
    %298 = vector.broadcast %297 : vector<1x1x1x128xf32> to vector<1x4x4x128xf32>
    %299 = arith.mulf %294, %298 : vector<1x4x4x128xf32>
    %300 = arith.addf %292, %299 : vector<1x4x4x128xf32>
    %301 = vector.extract_strided_slice %243 {offsets = [0, 1, 0, 0], sizes = [1, 3, 4, 128], strides = [1, 1, 1, 1]} : vector<1x4x4x128xf32> to vector<1x3x4x128xf32>
    %302 = tpu.concatenate %301, %239 in 1 : vector<1x3x4x128xf32>, vector<1x1x4x128xf32> -> vector<1x4x4x128xf32>
    %303 = vector.extract_strided_slice %236 {offsets = [2, 2, 0], sizes = [1, 1, 128], strides = [1, 1, 1]} : vector<3x3x128xf32> to vector<1x1x128xf32>
    %304 = vector.shape_cast %303 : vector<1x1x128xf32> to vector<128xf32>
    %305 = vector.shape_cast %304 : vector<128xf32> to vector<1x1x1x128xf32>
    %306 = vector.broadcast %305 : vector<1x1x1x128xf32> to vector<1x4x4x128xf32>
    %307 = arith.mulf %302, %306 : vector<1x4x4x128xf32>
    %308 = arith.addf %300, %307 : vector<1x4x4x128xf32>
    %309 = vector.shape_cast %237 : vector<1x128xf32> to vector<1x1x1x128xf32>
    %310 = vector.broadcast %309 : vector<1x1x1x128xf32> to vector<1x4x4x128xf32>
    %311 = arith.addf %308, %310 : vector<1x4x4x128xf32>
    %c0_77 = arith.constant 0 : index
    %c0_78 = arith.constant 0 : index
    %312 = vector.load %arg21[%c0_77, %c0_78] : memref<1x128xf32, #tpu.memory_space<vmem>>, vector<1x128xf32>
    %313 = vector.shape_cast %312 : vector<1x128xf32> to vector<1x1x1x128xf32>
    %314 = vector.broadcast %313 : vector<1x1x1x128xf32> to vector<1x4x4x128xf32>
    %315 = arith.mulf %222, %314 : vector<1x4x4x128xf32>
    %c0_79 = arith.constant 0 : index
    %c0_80 = arith.constant 0 : index
    %316 = vector.load %arg19[%c0_79, %c0_80] : memref<128x128xbf16, #tpu.memory_space<vmem>>, vector<128x128xbf16>
    %317 = vector.shape_cast %311 : vector<1x4x4x128xf32> to vector<4x4x128xf32>
    %318 = arith.truncf %317 : vector<4x4x128xf32> to vector<4x4x128xbf16>
    %319 = vector.shape_cast %316 : vector<128x128xbf16> to vector<1x128x128xbf16>
    %320 = vector.broadcast %319 : vector<1x128x128xbf16> to vector<4x128x128xbf16>
    %cst_81 = arith.constant dense<0.000000e+00> : vector<4x4x128xf32>
    %321 = tpu.matmul %318, %320, %cst_81 {dimension_numbers = #tpu.dot_dimension_numbers<[2], [1], [1], [2], [0, 0, 0, 1, 1, 2], [0], [0]>} : vector<4x4x128xbf16>, vector<4x128x128xbf16>, vector<4x4x128xf32> -> vector<4x4x128xf32>
    %322 = vector.shape_cast %321 : vector<4x4x128xf32> to vector<1x4x4x128xf32>
    %c0_82 = arith.constant 0 : index
    %c0_83 = arith.constant 0 : index
    %323 = vector.load %arg20[%c0_82, %c0_83] : memref<1x128xf32, #tpu.memory_space<vmem>>, vector<1x128xf32>
    %324 = vector.shape_cast %323 : vector<1x128xf32> to vector<1x1x1x128xf32>
    %325 = vector.broadcast %324 : vector<1x1x1x128xf32> to vector<1x4x4x128xf32>
    %326 = arith.addf %322, %325 : vector<1x4x4x128xf32>
    %cst_84 = arith.constant 0.000000e+00 : f32
    %327 = vector.broadcast %cst_84 : f32 to vector<1x4x4x128xf32>
    %328 = arith.maximumf %326, %327 : vector<1x4x4x128xf32>
    %329 = arith.addf %315, %328 : vector<1x4x4x128xf32>
    %c0_85 = arith.constant 0 : index
    %c0_86 = arith.constant 0 : index
    %c0_87 = arith.constant 0 : index
    %c0_88 = arith.constant 0 : index
    %330 = vector.load %arg22[%c0_85, %c0_86, %c0_87, %c0_88] : memref<1x4x4x128xf32, #tpu.memory_space<vmem>>, vector<1x4x4x128xf32>
    tpu.vector_store %arg22[%c0_85, %c0_86, %c0_87, %c0_88], %329 {strides = array<i32>} : memref<1x4x4x128xf32, #tpu.memory_space<vmem>>, vector<1x4x4x128xf32>,
    return
  }
  func.func @transform_0(%arg0: i32) -> (i32, i32, i32, i32) {
    %c0_i32 = arith.constant 0 : i32
    %c0_i32_0 = arith.constant 0 : i32
    %c0_i32_1 = arith.constant 0 : i32
    %c0_i32_2 = arith.constant 0 : i32
    return %arg0, %c0_i32, %c0_i32_0, %c0_i32_1 : i32, i32, i32, i32
  }
  func.func @transform_1(%arg0: i32) -> (i32, i32, i32, i32) {
    %c0_i32 = arith.constant 0 : i32
    %c0_i32_0 = arith.constant 0 : i32
    %c0_i32_1 = arith.constant 0 : i32
    %c0_i32_2 = arith.constant 0 : i32
    return %arg0, %c0_i32, %c0_i32_0, %c0_i32_1 : i32, i32, i32, i32
  }
  func.func @transform_2(%arg0: i32) -> (i32, i32, i32, i32) {
    %c0_i32 = arith.constant 0 : i32
    %c0_i32_0 = arith.constant 0 : i32
    %c0_i32_1 = arith.constant 0 : i32
    %c0_i32_2 = arith.constant 0 : i32
    return %arg0, %c0_i32, %c0_i32_0, %c0_i32_1 : i32, i32, i32, i32
  }
  func.func @transform_3(%arg0: i32) -> (i32, i32, i32, i32) {
    %c0_i32 = arith.constant 0 : i32
    %c0_i32_0 = arith.constant 0 : i32
    %c0_i32_1 = arith.constant 0 : i32
    %c0_i32_2 = arith.constant 0 : i32
    return %arg0, %c0_i32, %c0_i32_0, %c0_i32_1 : i32, i32, i32, i32
  }
  func.func @transform_4(%arg0: i32) -> (i32, i32, i32) {
    %c0_i32 = arith.constant 0 : i32
    %c0_i32_0 = arith.constant 0 : i32
    %c0_i32_1 = arith.constant 0 : i32
    %c0_i32_2 = arith.constant 0 : i32
    return %c0_i32, %c0_i32_0, %c0_i32_1 : i32, i32, i32
  }
  func.func @transform_5(%arg0: i32) -> (i32, i32) {
    %c0_i32 = arith.constant 0 : i32
    %c0_i32_0 = arith.constant 0 : i32
    %c0_i32_1 = arith.constant 0 : i32
    return %c0_i32, %c0_i32_0 : i32, i32
  }
  func.func @transform_6(%arg0: i32) -> (i32, i32) {
    %c0_i32 = arith.constant 0 : i32
    %c0_i32_0 = arith.constant 0 : i32
    %c0_i32_1 = arith.constant 0 : i32
    return %c0_i32, %c0_i32_0 : i32, i32
  }
  func.func @transform_7(%arg0: i32) -> (i32, i32) {
    %c0_i32 = arith.constant 0 : i32
    %c0_i32_0 = arith.constant 0 : i32
    %c0_i32_1 = arith.constant 0 : i32
    return %c0_i32, %c0_i32_0 : i32, i32
  }
  func.func @transform_8(%arg0: i32) -> (i32, i32) {
    %c0_i32 = arith.constant 0 : i32
    %c0_i32_0 = arith.constant 0 : i32
    %c0_i32_1 = arith.constant 0 : i32
    return %c0_i32, %c0_i32_0 : i32, i32
  }
  func.func @transform_9(%arg0: i32) -> (i32, i32) {
    %c0_i32 = arith.constant 0 : i32
    %c0_i32_0 = arith.constant 0 : i32
    %c0_i32_1 = arith.constant 0 : i32
    return %c0_i32, %c0_i32_0 : i32, i32
  }
  func.func @transform_10(%arg0: i32) -> (i32, i32, i32) {
    %c0_i32 = arith.constant 0 : i32
    %c0_i32_0 = arith.constant 0 : i32
    %c0_i32_1 = arith.constant 0 : i32
    %c0_i32_2 = arith.constant 0 : i32
    return %c0_i32, %c0_i32_0, %c0_i32_1 : i32, i32, i32
  }
  func.func @transform_11(%arg0: i32) -> (i32, i32) {
    %c0_i32 = arith.constant 0 : i32
    %c0_i32_0 = arith.constant 0 : i32
    %c0_i32_1 = arith.constant 0 : i32
    return %c0_i32, %c0_i32_0 : i32, i32
  }
  func.func @transform_12(%arg0: i32) -> (i32, i32) {
    %c0_i32 = arith.constant 0 : i32
    %c0_i32_0 = arith.constant 0 : i32
    %c0_i32_1 = arith.constant 0 : i32
    return %c0_i32, %c0_i32_0 : i32, i32
  }
  func.func @transform_13(%arg0: i32) -> (i32, i32) {
    %c0_i32 = arith.constant 0 : i32
    %c0_i32_0 = arith.constant 0 : i32
    %c0_i32_1 = arith.constant 0 : i32
    return %c0_i32, %c0_i32_0 : i32, i32
  }
  func.func @transform_14(%arg0: i32) -> (i32, i32) {
    %c0_i32 = arith.constant 0 : i32
    %c0_i32_0 = arith.constant 0 : i32
    %c0_i32_1 = arith.constant 0 : i32
    return %c0_i32, %c0_i32_0 : i32, i32
  }
  func.func @transform_15(%arg0: i32) -> (i32, i32) {
    %c0_i32 = arith.constant 0 : i32
    %c0_i32_0 = arith.constant 0 : i32
    %c0_i32_1 = arith.constant 0 : i32
    return %c0_i32, %c0_i32_0 : i32, i32
  }
  func.func @transform_16(%arg0: i32) -> (i32, i32, i32) {
    %c0_i32 = arith.constant 0 : i32
    %c0_i32_0 = arith.constant 0 : i32
    %c0_i32_1 = arith.constant 0 : i32
    %c0_i32_2 = arith.constant 0 : i32
    return %c0_i32, %c0_i32_0, %c0_i32_1 : i32, i32, i32
  }
  func.func @transform_17(%arg0: i32) -> (i32, i32) {
    %c0_i32 = arith.constant 0 : i32
    %c0_i32_0 = arith.constant 0 : i32
    %c0_i32_1 = arith.constant 0 : i32
    return %c0_i32, %c0_i32_0 : i32, i32
  }
  func.func @transform_18(%arg0: i32) -> (i32, i32) {
    %c0_i32 = arith.constant 0 : i32
    %c0_i32_0 = arith.constant 0 : i32
    %c0_i32_1 = arith.constant 0 : i32
    return %c0_i32, %c0_i32_0 : i32, i32
  }
  func.func @transform_19(%arg0: i32) -> (i32, i32) {
    %c0_i32 = arith.constant 0 : i32
    %c0_i32_0 = arith.constant 0 : i32
    %c0_i32_1 = arith.constant 0 : i32
    return %c0_i32, %c0_i32_0 : i32, i32
  }
  func.func @transform_20(%arg0: i32) -> (i32, i32) {
    %c0_i32 = arith.constant 0 : i32
    %c0_i32_0 = arith.constant 0 : i32
    %c0_i32_1 = arith.constant 0 : i32
    return %c0_i32, %c0_i32_0 : i32, i32
  }
  func.func @transform_21(%arg0: i32) -> (i32, i32, i32, i32) {
    %c0_i32 = arith.constant 0 : i32
    %c0_i32_0 = arith.constant 0 : i32
    %c0_i32_1 = arith.constant 0 : i32
    %c0_i32_2 = arith.constant 0 : i32
    return %arg0, %c0_i32, %c0_i32_0, %c0_i32_1 : i32, i32, i32, i32
  }
}

module attributes {stable_mosaic.version = 11 : i64} {
  func.func @kernel(%arg0: i32, %arg1: memref<1x2x2x128xf32, #tpu.memory_space<vmem>>, %arg2: memref<1x2x2x128xf32, #tpu.memory_space<vmem>>, %arg3: memref<1x2x2x128xf32, #tpu.memory_space<vmem>>, %arg4: memref<1x2x2x128xf32, #tpu.memory_space<vmem>>, %arg5: memref<3x3x128xf32, #tpu.memory_space<vmem>>, %arg6: memref<1x128xf32, #tpu.memory_space<vmem>>, %arg7: memref<128x128xbf16, #tpu.memory_space<vmem>>, %arg8: memref<1x128xf32, #tpu.memory_space<vmem>>, %arg9: memref<128x128xbf16, #tpu.memory_space<vmem>>, %arg10: memref<1x128xf32, #tpu.memory_space<vmem>>, %arg11: memref<3x3x128xf32, #tpu.memory_space<vmem>>, %arg12: memref<1x128xf32, #tpu.memory_space<vmem>>, %arg13: memref<128x128xbf16, #tpu.memory_space<vmem>>, %arg14: memref<1x128xf32, #tpu.memory_space<vmem>>, %arg15: memref<128x128xbf16, #tpu.memory_space<vmem>>, %arg16: memref<1x128xf32, #tpu.memory_space<vmem>>, %arg17: memref<3x3x128xf32, #tpu.memory_space<vmem>>, %arg18: memref<1x128xf32, #tpu.memory_space<vmem>>, %arg19: memref<128x128xbf16, #tpu.memory_space<vmem>>, %arg20: memref<1x128xf32, #tpu.memory_space<vmem>>, %arg21: memref<1x128xf32, #tpu.memory_space<vmem>>, %arg22: memref<128x128xbf16, #tpu.memory_space<vmem>>, %arg23: memref<1x128xf32, #tpu.memory_space<vmem>>, %arg24: memref<128x128xbf16, #tpu.memory_space<vmem>>, %arg25: memref<1x128xf32, #tpu.memory_space<vmem>>, %arg26: memref<1x1x128xf32, #tpu.memory_space<vmem>>) attributes {dimension_semantics = [#tpu.dimension_semantics<parallel>], iteration_bounds = array<i64: 2>, scalar_prefetch = 0 : i64, scratch_operands = 0 : i64, tpu.core_type = #tpu.core_type<tc>, window_params = [{transform_indices = @transform_0, window_bounds = array<i64: 1, 2, 2, 128>}, {transform_indices = @transform_1, window_bounds = array<i64: 1, 2, 2, 128>}, {transform_indices = @transform_2, window_bounds = array<i64: 1, 2, 2, 128>}, {transform_indices = @transform_3, window_bounds = array<i64: 1, 2, 2, 128>}, {pipeline_mode = #tpu.pipeline_mode<synchronous>, transform_indices = @transform_4, window_bounds = array<i64: 3, 3, 128>}, {pipeline_mode = #tpu.pipeline_mode<synchronous>, transform_indices = @transform_5, window_bounds = array<i64: 1, 128>}, {pipeline_mode = #tpu.pipeline_mode<synchronous>, transform_indices = @transform_6, window_bounds = array<i64: 128, 128>}, {pipeline_mode = #tpu.pipeline_mode<synchronous>, transform_indices = @transform_7, window_bounds = array<i64: 1, 128>}, {pipeline_mode = #tpu.pipeline_mode<synchronous>, transform_indices = @transform_8, window_bounds = array<i64: 128, 128>}, {pipeline_mode = #tpu.pipeline_mode<synchronous>, transform_indices = @transform_9, window_bounds = array<i64: 1, 128>}, {pipeline_mode = #tpu.pipeline_mode<synchronous>, transform_indices = @transform_10, window_bounds = array<i64: 3, 3, 128>}, {pipeline_mode = #tpu.pipeline_mode<synchronous>, transform_indices = @transform_11, window_bounds = array<i64: 1, 128>}, {pipeline_mode = #tpu.pipeline_mode<synchronous>, transform_indices = @transform_12, window_bounds = array<i64: 128, 128>}, {pipeline_mode = #tpu.pipeline_mode<synchronous>, transform_indices = @transform_13, window_bounds = array<i64: 1, 128>}, {pipeline_mode = #tpu.pipeline_mode<synchronous>, transform_indices = @transform_14, window_bounds = array<i64: 128, 128>}, {pipeline_mode = #tpu.pipeline_mode<synchronous>, transform_indices = @transform_15, window_bounds = array<i64: 1, 128>}, {pipeline_mode = #tpu.pipeline_mode<synchronous>, transform_indices = @transform_16, window_bounds = array<i64: 3, 3, 128>}, {pipeline_mode = #tpu.pipeline_mode<synchronous>, transform_indices = @transform_17, window_bounds = array<i64: 1, 128>}, {pipeline_mode = #tpu.pipeline_mode<synchronous>, transform_indices = @transform_18, window_bounds = array<i64: 128, 128>}, {pipeline_mode = #tpu.pipeline_mode<synchronous>, transform_indices = @transform_19, window_bounds = array<i64: 1, 128>}, {pipeline_mode = #tpu.pipeline_mode<synchronous>, transform_indices = @transform_20, window_bounds = array<i64: 1, 128>}, {pipeline_mode = #tpu.pipeline_mode<synchronous>, transform_indices = @transform_21, window_bounds = array<i64: 128, 128>}, {pipeline_mode = #tpu.pipeline_mode<synchronous>, transform_indices = @transform_22, window_bounds = array<i64: 1, 128>}, {pipeline_mode = #tpu.pipeline_mode<synchronous>, transform_indices = @transform_23, window_bounds = array<i64: 128, 128>}, {pipeline_mode = #tpu.pipeline_mode<synchronous>, transform_indices = @transform_24, window_bounds = array<i64: 1, 128>}, {transform_indices = @transform_25, window_bounds = array<i64: 1, 1, 128>}]} {
    %c0 = arith.constant 0 : index
    %c0_0 = arith.constant 0 : index
    %c0_1 = arith.constant 0 : index
    %c0_2 = arith.constant 0 : index
    %0 = vector.load %arg1[%c0, %c0_0, %c0_1, %c0_2] : memref<1x2x2x128xf32, #tpu.memory_space<vmem>>, vector<1x2x2x128xf32>
    %c0_3 = arith.constant 0 : index
    %c0_4 = arith.constant 0 : index
    %c0_5 = arith.constant 0 : index
    %c0_6 = arith.constant 0 : index
    %1 = vector.load %arg2[%c0_3, %c0_4, %c0_5, %c0_6] : memref<1x2x2x128xf32, #tpu.memory_space<vmem>>, vector<1x2x2x128xf32>
    %c0_7 = arith.constant 0 : index
    %c0_8 = arith.constant 0 : index
    %c0_9 = arith.constant 0 : index
    %c0_10 = arith.constant 0 : index
    %2 = vector.load %arg3[%c0_7, %c0_8, %c0_9, %c0_10] : memref<1x2x2x128xf32, #tpu.memory_space<vmem>>, vector<1x2x2x128xf32>
    %c0_11 = arith.constant 0 : index
    %c0_12 = arith.constant 0 : index
    %c0_13 = arith.constant 0 : index
    %c0_14 = arith.constant 0 : index
    %3 = vector.load %arg4[%c0_11, %c0_12, %c0_13, %c0_14] : memref<1x2x2x128xf32, #tpu.memory_space<vmem>>, vector<1x2x2x128xf32>
    %c0_15 = arith.constant 0 : index
    %c0_16 = arith.constant 0 : index
    %c0_17 = arith.constant 0 : index
    %4 = vector.load %arg5[%c0_15, %c0_16, %c0_17] : memref<3x3x128xf32, #tpu.memory_space<vmem>>, vector<3x3x128xf32>
    %c0_18 = arith.constant 0 : index
    %c0_19 = arith.constant 0 : index
    %5 = vector.load %arg6[%c0_18, %c0_19] : memref<1x128xf32, #tpu.memory_space<vmem>>, vector<1x128xf32>
    %cst = arith.constant 0.000000e+00 : f32
    %6 = vector.broadcast %cst : f32 to vector<1x2x1x128xf32>
    %cst_20 = arith.constant 0.000000e+00 : f32
    %7 = vector.broadcast %cst_20 : f32 to vector<1x1x2x128xf32>
    %8 = vector.extract_strided_slice %1 {offsets = [0, 0, 0, 0], sizes = [1, 2, 1, 128], strides = [1, 1, 1, 1]} : vector<1x2x2x128xf32> to vector<1x2x1x128xf32>
    %9 = tpu.concatenate %6, %8 in 2 : vector<1x2x1x128xf32>, vector<1x2x1x128xf32> -> vector<1x2x2x128xf32>
    %10 = vector.extract_strided_slice %3 {offsets = [0, 0, 0, 0], sizes = [1, 2, 1, 128], strides = [1, 1, 1, 1]} : vector<1x2x2x128xf32> to vector<1x2x1x128xf32>
    %11 = tpu.concatenate %6, %10 in 2 : vector<1x2x1x128xf32>, vector<1x2x1x128xf32> -> vector<1x2x2x128xf32>
    %12 = vector.extract_strided_slice %11 {offsets = [0, 0, 0, 0], sizes = [1, 1, 2, 128], strides = [1, 1, 1, 1]} : vector<1x2x2x128xf32> to vector<1x1x2x128xf32>
    %13 = tpu.concatenate %7, %12 in 1 : vector<1x1x2x128xf32>, vector<1x1x2x128xf32> -> vector<1x2x2x128xf32>
    %14 = vector.extract_strided_slice %4 {offsets = [0, 0, 0], sizes = [1, 1, 128], strides = [1, 1, 1]} : vector<3x3x128xf32> to vector<1x1x128xf32>
    %15 = vector.shape_cast %14 : vector<1x1x128xf32> to vector<128xf32>
    %16 = vector.shape_cast %15 : vector<128xf32> to vector<1x1x1x128xf32>
    %17 = vector.broadcast %16 : vector<1x1x1x128xf32> to vector<1x2x2x128xf32>
    %18 = arith.mulf %13, %17 : vector<1x2x2x128xf32>
    %19 = vector.extract_strided_slice %2 {offsets = [0, 0, 0, 0], sizes = [1, 1, 2, 128], strides = [1, 1, 1, 1]} : vector<1x2x2x128xf32> to vector<1x1x2x128xf32>
    %20 = tpu.concatenate %7, %19 in 1 : vector<1x1x2x128xf32>, vector<1x1x2x128xf32> -> vector<1x2x2x128xf32>
    %21 = vector.extract_strided_slice %4 {offsets = [0, 1, 0], sizes = [1, 1, 128], strides = [1, 1, 1]} : vector<3x3x128xf32> to vector<1x1x128xf32>
    %22 = vector.shape_cast %21 : vector<1x1x128xf32> to vector<128xf32>
    %23 = vector.shape_cast %22 : vector<128xf32> to vector<1x1x1x128xf32>
    %24 = vector.broadcast %23 : vector<1x1x1x128xf32> to vector<1x2x2x128xf32>
    %25 = arith.mulf %20, %24 : vector<1x2x2x128xf32>
    %26 = arith.addf %18, %25 : vector<1x2x2x128xf32>
    %27 = vector.extract_strided_slice %3 {offsets = [0, 0, 0, 0], sizes = [1, 1, 2, 128], strides = [1, 1, 1, 1]} : vector<1x2x2x128xf32> to vector<1x1x2x128xf32>
    %28 = tpu.concatenate %7, %27 in 1 : vector<1x1x2x128xf32>, vector<1x1x2x128xf32> -> vector<1x2x2x128xf32>
    %29 = vector.extract_strided_slice %4 {offsets = [0, 2, 0], sizes = [1, 1, 128], strides = [1, 1, 1]} : vector<3x3x128xf32> to vector<1x1x128xf32>
    %30 = vector.shape_cast %29 : vector<1x1x128xf32> to vector<128xf32>
    %31 = vector.shape_cast %30 : vector<128xf32> to vector<1x1x1x128xf32>
    %32 = vector.broadcast %31 : vector<1x1x1x128xf32> to vector<1x2x2x128xf32>
    %33 = arith.mulf %28, %32 : vector<1x2x2x128xf32>
    %34 = arith.addf %26, %33 : vector<1x2x2x128xf32>
    %35 = vector.extract_strided_slice %4 {offsets = [1, 0, 0], sizes = [1, 1, 128], strides = [1, 1, 1]} : vector<3x3x128xf32> to vector<1x1x128xf32>
    %36 = vector.shape_cast %35 : vector<1x1x128xf32> to vector<128xf32>
    %37 = vector.shape_cast %36 : vector<128xf32> to vector<1x1x1x128xf32>
    %38 = vector.broadcast %37 : vector<1x1x1x128xf32> to vector<1x2x2x128xf32>
    %39 = arith.mulf %9, %38 : vector<1x2x2x128xf32>
    %40 = arith.addf %34, %39 : vector<1x2x2x128xf32>
    %41 = vector.extract_strided_slice %4 {offsets = [1, 1, 0], sizes = [1, 1, 128], strides = [1, 1, 1]} : vector<3x3x128xf32> to vector<1x1x128xf32>
    %42 = vector.shape_cast %41 : vector<1x1x128xf32> to vector<128xf32>
    %43 = vector.shape_cast %42 : vector<128xf32> to vector<1x1x1x128xf32>
    %44 = vector.broadcast %43 : vector<1x1x1x128xf32> to vector<1x2x2x128xf32>
    %45 = arith.mulf %0, %44 : vector<1x2x2x128xf32>
    %46 = arith.addf %40, %45 : vector<1x2x2x128xf32>
    %47 = vector.extract_strided_slice %4 {offsets = [1, 2, 0], sizes = [1, 1, 128], strides = [1, 1, 1]} : vector<3x3x128xf32> to vector<1x1x128xf32>
    %48 = vector.shape_cast %47 : vector<1x1x128xf32> to vector<128xf32>
    %49 = vector.shape_cast %48 : vector<128xf32> to vector<1x1x1x128xf32>
    %50 = vector.broadcast %49 : vector<1x1x1x128xf32> to vector<1x2x2x128xf32>
    %51 = arith.mulf %1, %50 : vector<1x2x2x128xf32>
    %52 = arith.addf %46, %51 : vector<1x2x2x128xf32>
    %53 = vector.extract_strided_slice %4 {offsets = [2, 0, 0], sizes = [1, 1, 128], strides = [1, 1, 1]} : vector<3x3x128xf32> to vector<1x1x128xf32>
    %54 = vector.shape_cast %53 : vector<1x1x128xf32> to vector<128xf32>
    %55 = vector.shape_cast %54 : vector<128xf32> to vector<1x1x1x128xf32>
    %56 = vector.broadcast %55 : vector<1x1x1x128xf32> to vector<1x2x2x128xf32>
    %57 = arith.mulf %11, %56 : vector<1x2x2x128xf32>
    %58 = arith.addf %52, %57 : vector<1x2x2x128xf32>
    %59 = vector.extract_strided_slice %4 {offsets = [2, 1, 0], sizes = [1, 1, 128], strides = [1, 1, 1]} : vector<3x3x128xf32> to vector<1x1x128xf32>
    %60 = vector.shape_cast %59 : vector<1x1x128xf32> to vector<128xf32>
    %61 = vector.shape_cast %60 : vector<128xf32> to vector<1x1x1x128xf32>
    %62 = vector.broadcast %61 : vector<1x1x1x128xf32> to vector<1x2x2x128xf32>
    %63 = arith.mulf %2, %62 : vector<1x2x2x128xf32>
    %64 = arith.addf %58, %63 : vector<1x2x2x128xf32>
    %65 = vector.extract_strided_slice %4 {offsets = [2, 2, 0], sizes = [1, 1, 128], strides = [1, 1, 1]} : vector<3x3x128xf32> to vector<1x1x128xf32>
    %66 = vector.shape_cast %65 : vector<1x1x128xf32> to vector<128xf32>
    %67 = vector.shape_cast %66 : vector<128xf32> to vector<1x1x1x128xf32>
    %68 = vector.broadcast %67 : vector<1x1x1x128xf32> to vector<1x2x2x128xf32>
    %69 = arith.mulf %3, %68 : vector<1x2x2x128xf32>
    %70 = arith.addf %64, %69 : vector<1x2x2x128xf32>
    %71 = vector.shape_cast %5 : vector<1x128xf32> to vector<1x1x1x128xf32>
    %72 = vector.broadcast %71 : vector<1x1x1x128xf32> to vector<1x2x2x128xf32>
    %73 = arith.addf %70, %72 : vector<1x2x2x128xf32>
    %c0_21 = arith.constant 0 : index
    %c0_22 = arith.constant 0 : index
    %74 = vector.load %arg7[%c0_21, %c0_22] : memref<128x128xbf16, #tpu.memory_space<vmem>>, vector<128x128xbf16>
    %75 = vector.shape_cast %73 : vector<1x2x2x128xf32> to vector<2x2x128xf32>
    %76 = arith.truncf %75 : vector<2x2x128xf32> to vector<2x2x128xbf16>
    %77 = vector.shape_cast %74 : vector<128x128xbf16> to vector<1x128x128xbf16>
    %78 = vector.broadcast %77 : vector<1x128x128xbf16> to vector<2x128x128xbf16>
    %cst_23 = arith.constant dense<0.000000e+00> : vector<2x2x128xf32>
    %79 = tpu.matmul %76, %78, %cst_23 {dimension_numbers = #tpu.dot_dimension_numbers<[2], [1], [1], [2], [0, 0, 0, 1, 1, 2], [0], [0]>} : vector<2x2x128xbf16>, vector<2x128x128xbf16>, vector<2x2x128xf32> -> vector<2x2x128xf32>
    %80 = vector.shape_cast %79 : vector<2x2x128xf32> to vector<1x2x2x128xf32>
    %c0_24 = arith.constant 0 : index
    %c0_25 = arith.constant 0 : index
    %81 = vector.load %arg8[%c0_24, %c0_25] : memref<1x128xf32, #tpu.memory_space<vmem>>, vector<1x128xf32>
    %82 = vector.shape_cast %81 : vector<1x128xf32> to vector<1x1x1x128xf32>
    %83 = vector.broadcast %82 : vector<1x1x1x128xf32> to vector<1x2x2x128xf32>
    %84 = arith.addf %80, %83 : vector<1x2x2x128xf32>
    %cst_26 = arith.constant 0.000000e+00 : f32
    %85 = vector.broadcast %cst_26 : f32 to vector<1x2x2x128xf32>
    %86 = arith.maximumf %84, %85 : vector<1x2x2x128xf32>
    %c0_27 = arith.constant 0 : index
    %c0_28 = arith.constant 0 : index
    %87 = vector.load %arg9[%c0_27, %c0_28] : memref<128x128xbf16, #tpu.memory_space<vmem>>, vector<128x128xbf16>
    %88 = vector.shape_cast %0 : vector<1x2x2x128xf32> to vector<2x2x128xf32>
    %89 = arith.truncf %88 : vector<2x2x128xf32> to vector<2x2x128xbf16>
    %90 = vector.shape_cast %87 : vector<128x128xbf16> to vector<1x128x128xbf16>
    %91 = vector.broadcast %90 : vector<1x128x128xbf16> to vector<2x128x128xbf16>
    %cst_29 = arith.constant dense<0.000000e+00> : vector<2x2x128xf32>
    %92 = tpu.matmul %89, %91, %cst_29 {dimension_numbers = #tpu.dot_dimension_numbers<[2], [1], [1], [2], [0, 0, 0, 1, 1, 2], [0], [0]>} : vector<2x2x128xbf16>, vector<2x128x128xbf16>, vector<2x2x128xf32> -> vector<2x2x128xf32>
    %93 = vector.shape_cast %92 : vector<2x2x128xf32> to vector<1x2x2x128xf32>
    %c0_30 = arith.constant 0 : index
    %c0_31 = arith.constant 0 : index
    %94 = vector.load %arg10[%c0_30, %c0_31] : memref<1x128xf32, #tpu.memory_space<vmem>>, vector<1x128xf32>
    %95 = vector.shape_cast %94 : vector<1x128xf32> to vector<1x1x1x128xf32>
    %96 = vector.broadcast %95 : vector<1x1x1x128xf32> to vector<1x2x2x128xf32>
    %97 = arith.addf %93, %96 : vector<1x2x2x128xf32>
    %cst_32 = arith.constant 0.000000e+00 : f32
    %98 = vector.broadcast %cst_32 : f32 to vector<1x2x2x128xf32>
    %99 = arith.maximumf %97, %98 : vector<1x2x2x128xf32>
    %c0_33 = arith.constant 0 : index
    %c0_34 = arith.constant 0 : index
    %100 = vector.load %arg9[%c0_33, %c0_34] : memref<128x128xbf16, #tpu.memory_space<vmem>>, vector<128x128xbf16>
    %101 = vector.shape_cast %1 : vector<1x2x2x128xf32> to vector<2x2x128xf32>
    %102 = arith.truncf %101 : vector<2x2x128xf32> to vector<2x2x128xbf16>
    %103 = vector.shape_cast %100 : vector<128x128xbf16> to vector<1x128x128xbf16>
    %104 = vector.broadcast %103 : vector<1x128x128xbf16> to vector<2x128x128xbf16>
    %cst_35 = arith.constant dense<0.000000e+00> : vector<2x2x128xf32>
    %105 = tpu.matmul %102, %104, %cst_35 {dimension_numbers = #tpu.dot_dimension_numbers<[2], [1], [1], [2], [0, 0, 0, 1, 1, 2], [0], [0]>} : vector<2x2x128xbf16>, vector<2x128x128xbf16>, vector<2x2x128xf32> -> vector<2x2x128xf32>
    %106 = vector.shape_cast %105 : vector<2x2x128xf32> to vector<1x2x2x128xf32>
    %c0_36 = arith.constant 0 : index
    %c0_37 = arith.constant 0 : index
    %107 = vector.load %arg10[%c0_36, %c0_37] : memref<1x128xf32, #tpu.memory_space<vmem>>, vector<1x128xf32>
    %108 = vector.shape_cast %107 : vector<1x128xf32> to vector<1x1x1x128xf32>
    %109 = vector.broadcast %108 : vector<1x1x1x128xf32> to vector<1x2x2x128xf32>
    %110 = arith.addf %106, %109 : vector<1x2x2x128xf32>
    %cst_38 = arith.constant 0.000000e+00 : f32
    %111 = vector.broadcast %cst_38 : f32 to vector<1x2x2x128xf32>
    %112 = arith.maximumf %110, %111 : vector<1x2x2x128xf32>
    %c0_39 = arith.constant 0 : index
    %c0_40 = arith.constant 0 : index
    %113 = vector.load %arg9[%c0_39, %c0_40] : memref<128x128xbf16, #tpu.memory_space<vmem>>, vector<128x128xbf16>
    %114 = vector.shape_cast %2 : vector<1x2x2x128xf32> to vector<2x2x128xf32>
    %115 = arith.truncf %114 : vector<2x2x128xf32> to vector<2x2x128xbf16>
    %116 = vector.shape_cast %113 : vector<128x128xbf16> to vector<1x128x128xbf16>
    %117 = vector.broadcast %116 : vector<1x128x128xbf16> to vector<2x128x128xbf16>
    %cst_41 = arith.constant dense<0.000000e+00> : vector<2x2x128xf32>
    %118 = tpu.matmul %115, %117, %cst_41 {dimension_numbers = #tpu.dot_dimension_numbers<[2], [1], [1], [2], [0, 0, 0, 1, 1, 2], [0], [0]>} : vector<2x2x128xbf16>, vector<2x128x128xbf16>, vector<2x2x128xf32> -> vector<2x2x128xf32>
    %119 = vector.shape_cast %118 : vector<2x2x128xf32> to vector<1x2x2x128xf32>
    %c0_42 = arith.constant 0 : index
    %c0_43 = arith.constant 0 : index
    %120 = vector.load %arg10[%c0_42, %c0_43] : memref<1x128xf32, #tpu.memory_space<vmem>>, vector<1x128xf32>
    %121 = vector.shape_cast %120 : vector<1x128xf32> to vector<1x1x1x128xf32>
    %122 = vector.broadcast %121 : vector<1x1x1x128xf32> to vector<1x2x2x128xf32>
    %123 = arith.addf %119, %122 : vector<1x2x2x128xf32>
    %cst_44 = arith.constant 0.000000e+00 : f32
    %124 = vector.broadcast %cst_44 : f32 to vector<1x2x2x128xf32>
    %125 = arith.maximumf %123, %124 : vector<1x2x2x128xf32>
    %c0_45 = arith.constant 0 : index
    %c0_46 = arith.constant 0 : index
    %126 = vector.load %arg9[%c0_45, %c0_46] : memref<128x128xbf16, #tpu.memory_space<vmem>>, vector<128x128xbf16>
    %127 = vector.shape_cast %3 : vector<1x2x2x128xf32> to vector<2x2x128xf32>
    %128 = arith.truncf %127 : vector<2x2x128xf32> to vector<2x2x128xbf16>
    %129 = vector.shape_cast %126 : vector<128x128xbf16> to vector<1x128x128xbf16>
    %130 = vector.broadcast %129 : vector<1x128x128xbf16> to vector<2x128x128xbf16>
    %cst_47 = arith.constant dense<0.000000e+00> : vector<2x2x128xf32>
    %131 = tpu.matmul %128, %130, %cst_47 {dimension_numbers = #tpu.dot_dimension_numbers<[2], [1], [1], [2], [0, 0, 0, 1, 1, 2], [0], [0]>} : vector<2x2x128xbf16>, vector<2x128x128xbf16>, vector<2x2x128xf32> -> vector<2x2x128xf32>
    %132 = vector.shape_cast %131 : vector<2x2x128xf32> to vector<1x2x2x128xf32>
    %c0_48 = arith.constant 0 : index
    %c0_49 = arith.constant 0 : index
    %133 = vector.load %arg10[%c0_48, %c0_49] : memref<1x128xf32, #tpu.memory_space<vmem>>, vector<1x128xf32>
    %134 = vector.shape_cast %133 : vector<1x128xf32> to vector<1x1x1x128xf32>
    %135 = vector.broadcast %134 : vector<1x1x1x128xf32> to vector<1x2x2x128xf32>
    %136 = arith.addf %132, %135 : vector<1x2x2x128xf32>
    %cst_50 = arith.constant 0.000000e+00 : f32
    %137 = vector.broadcast %cst_50 : f32 to vector<1x2x2x128xf32>
    %138 = arith.maximumf %136, %137 : vector<1x2x2x128xf32>
    %c0_51 = arith.constant 0 : index
    %c0_52 = arith.constant 0 : index
    %c0_53 = arith.constant 0 : index
    %139 = vector.load %arg11[%c0_51, %c0_52, %c0_53] : memref<3x3x128xf32, #tpu.memory_space<vmem>>, vector<3x3x128xf32>
    %c0_54 = arith.constant 0 : index
    %c0_55 = arith.constant 0 : index
    %140 = vector.load %arg12[%c0_54, %c0_55] : memref<1x128xf32, #tpu.memory_space<vmem>>, vector<1x128xf32>
    %cst_56 = arith.constant 0.000000e+00 : f32
    %141 = vector.broadcast %cst_56 : f32 to vector<1x2x1x128xf32>
    %cst_57 = arith.constant 0.000000e+00 : f32
    %142 = vector.broadcast %cst_57 : f32 to vector<1x1x2x128xf32>
    %143 = vector.extract_strided_slice %112 {offsets = [0, 0, 0, 0], sizes = [1, 2, 1, 128], strides = [1, 1, 1, 1]} : vector<1x2x2x128xf32> to vector<1x2x1x128xf32>
    %144 = tpu.concatenate %141, %143 in 2 : vector<1x2x1x128xf32>, vector<1x2x1x128xf32> -> vector<1x2x2x128xf32>
    %145 = vector.extract_strided_slice %138 {offsets = [0, 0, 0, 0], sizes = [1, 2, 1, 128], strides = [1, 1, 1, 1]} : vector<1x2x2x128xf32> to vector<1x2x1x128xf32>
    %146 = tpu.concatenate %141, %145 in 2 : vector<1x2x1x128xf32>, vector<1x2x1x128xf32> -> vector<1x2x2x128xf32>
    %147 = vector.extract_strided_slice %146 {offsets = [0, 0, 0, 0], sizes = [1, 1, 2, 128], strides = [1, 1, 1, 1]} : vector<1x2x2x128xf32> to vector<1x1x2x128xf32>
    %148 = tpu.concatenate %142, %147 in 1 : vector<1x1x2x128xf32>, vector<1x1x2x128xf32> -> vector<1x2x2x128xf32>
    %149 = vector.extract_strided_slice %139 {offsets = [0, 0, 0], sizes = [1, 1, 128], strides = [1, 1, 1]} : vector<3x3x128xf32> to vector<1x1x128xf32>
    %150 = vector.shape_cast %149 : vector<1x1x128xf32> to vector<128xf32>
    %151 = vector.shape_cast %150 : vector<128xf32> to vector<1x1x1x128xf32>
    %152 = vector.broadcast %151 : vector<1x1x1x128xf32> to vector<1x2x2x128xf32>
    %153 = arith.mulf %148, %152 : vector<1x2x2x128xf32>
    %154 = vector.extract_strided_slice %125 {offsets = [0, 0, 0, 0], sizes = [1, 1, 2, 128], strides = [1, 1, 1, 1]} : vector<1x2x2x128xf32> to vector<1x1x2x128xf32>
    %155 = tpu.concatenate %142, %154 in 1 : vector<1x1x2x128xf32>, vector<1x1x2x128xf32> -> vector<1x2x2x128xf32>
    %156 = vector.extract_strided_slice %139 {offsets = [0, 1, 0], sizes = [1, 1, 128], strides = [1, 1, 1]} : vector<3x3x128xf32> to vector<1x1x128xf32>
    %157 = vector.shape_cast %156 : vector<1x1x128xf32> to vector<128xf32>
    %158 = vector.shape_cast %157 : vector<128xf32> to vector<1x1x1x128xf32>
    %159 = vector.broadcast %158 : vector<1x1x1x128xf32> to vector<1x2x2x128xf32>
    %160 = arith.mulf %155, %159 : vector<1x2x2x128xf32>
    %161 = arith.addf %153, %160 : vector<1x2x2x128xf32>
    %162 = vector.extract_strided_slice %138 {offsets = [0, 0, 0, 0], sizes = [1, 1, 2, 128], strides = [1, 1, 1, 1]} : vector<1x2x2x128xf32> to vector<1x1x2x128xf32>
    %163 = tpu.concatenate %142, %162 in 1 : vector<1x1x2x128xf32>, vector<1x1x2x128xf32> -> vector<1x2x2x128xf32>
    %164 = vector.extract_strided_slice %139 {offsets = [0, 2, 0], sizes = [1, 1, 128], strides = [1, 1, 1]} : vector<3x3x128xf32> to vector<1x1x128xf32>
    %165 = vector.shape_cast %164 : vector<1x1x128xf32> to vector<128xf32>
    %166 = vector.shape_cast %165 : vector<128xf32> to vector<1x1x1x128xf32>
    %167 = vector.broadcast %166 : vector<1x1x1x128xf32> to vector<1x2x2x128xf32>
    %168 = arith.mulf %163, %167 : vector<1x2x2x128xf32>
    %169 = arith.addf %161, %168 : vector<1x2x2x128xf32>
    %170 = vector.extract_strided_slice %139 {offsets = [1, 0, 0], sizes = [1, 1, 128], strides = [1, 1, 1]} : vector<3x3x128xf32> to vector<1x1x128xf32>
    %171 = vector.shape_cast %170 : vector<1x1x128xf32> to vector<128xf32>
    %172 = vector.shape_cast %171 : vector<128xf32> to vector<1x1x1x128xf32>
    %173 = vector.broadcast %172 : vector<1x1x1x128xf32> to vector<1x2x2x128xf32>
    %174 = arith.mulf %144, %173 : vector<1x2x2x128xf32>
    %175 = arith.addf %169, %174 : vector<1x2x2x128xf32>
    %176 = vector.extract_strided_slice %139 {offsets = [1, 1, 0], sizes = [1, 1, 128], strides = [1, 1, 1]} : vector<3x3x128xf32> to vector<1x1x128xf32>
    %177 = vector.shape_cast %176 : vector<1x1x128xf32> to vector<128xf32>
    %178 = vector.shape_cast %177 : vector<128xf32> to vector<1x1x1x128xf32>
    %179 = vector.broadcast %178 : vector<1x1x1x128xf32> to vector<1x2x2x128xf32>
    %180 = arith.mulf %99, %179 : vector<1x2x2x128xf32>
    %181 = arith.addf %175, %180 : vector<1x2x2x128xf32>
    %182 = vector.extract_strided_slice %139 {offsets = [1, 2, 0], sizes = [1, 1, 128], strides = [1, 1, 1]} : vector<3x3x128xf32> to vector<1x1x128xf32>
    %183 = vector.shape_cast %182 : vector<1x1x128xf32> to vector<128xf32>
    %184 = vector.shape_cast %183 : vector<128xf32> to vector<1x1x1x128xf32>
    %185 = vector.broadcast %184 : vector<1x1x1x128xf32> to vector<1x2x2x128xf32>
    %186 = arith.mulf %112, %185 : vector<1x2x2x128xf32>
    %187 = arith.addf %181, %186 : vector<1x2x2x128xf32>
    %188 = vector.extract_strided_slice %139 {offsets = [2, 0, 0], sizes = [1, 1, 128], strides = [1, 1, 1]} : vector<3x3x128xf32> to vector<1x1x128xf32>
    %189 = vector.shape_cast %188 : vector<1x1x128xf32> to vector<128xf32>
    %190 = vector.shape_cast %189 : vector<128xf32> to vector<1x1x1x128xf32>
    %191 = vector.broadcast %190 : vector<1x1x1x128xf32> to vector<1x2x2x128xf32>
    %192 = arith.mulf %146, %191 : vector<1x2x2x128xf32>
    %193 = arith.addf %187, %192 : vector<1x2x2x128xf32>
    %194 = vector.extract_strided_slice %139 {offsets = [2, 1, 0], sizes = [1, 1, 128], strides = [1, 1, 1]} : vector<3x3x128xf32> to vector<1x1x128xf32>
    %195 = vector.shape_cast %194 : vector<1x1x128xf32> to vector<128xf32>
    %196 = vector.shape_cast %195 : vector<128xf32> to vector<1x1x1x128xf32>
    %197 = vector.broadcast %196 : vector<1x1x1x128xf32> to vector<1x2x2x128xf32>
    %198 = arith.mulf %125, %197 : vector<1x2x2x128xf32>
    %199 = arith.addf %193, %198 : vector<1x2x2x128xf32>
    %200 = vector.extract_strided_slice %139 {offsets = [2, 2, 0], sizes = [1, 1, 128], strides = [1, 1, 1]} : vector<3x3x128xf32> to vector<1x1x128xf32>
    %201 = vector.shape_cast %200 : vector<1x1x128xf32> to vector<128xf32>
    %202 = vector.shape_cast %201 : vector<128xf32> to vector<1x1x1x128xf32>
    %203 = vector.broadcast %202 : vector<1x1x1x128xf32> to vector<1x2x2x128xf32>
    %204 = arith.mulf %138, %203 : vector<1x2x2x128xf32>
    %205 = arith.addf %199, %204 : vector<1x2x2x128xf32>
    %206 = vector.shape_cast %140 : vector<1x128xf32> to vector<1x1x1x128xf32>
    %207 = vector.broadcast %206 : vector<1x1x1x128xf32> to vector<1x2x2x128xf32>
    %208 = arith.addf %205, %207 : vector<1x2x2x128xf32>
    %c0_58 = arith.constant 0 : index
    %c0_59 = arith.constant 0 : index
    %209 = vector.load %arg13[%c0_58, %c0_59] : memref<128x128xbf16, #tpu.memory_space<vmem>>, vector<128x128xbf16>
    %210 = vector.shape_cast %208 : vector<1x2x2x128xf32> to vector<2x2x128xf32>
    %211 = arith.truncf %210 : vector<2x2x128xf32> to vector<2x2x128xbf16>
    %212 = vector.shape_cast %209 : vector<128x128xbf16> to vector<1x128x128xbf16>
    %213 = vector.broadcast %212 : vector<1x128x128xbf16> to vector<2x128x128xbf16>
    %cst_60 = arith.constant dense<0.000000e+00> : vector<2x2x128xf32>
    %214 = tpu.matmul %211, %213, %cst_60 {dimension_numbers = #tpu.dot_dimension_numbers<[2], [1], [1], [2], [0, 0, 0, 1, 1, 2], [0], [0]>} : vector<2x2x128xbf16>, vector<2x128x128xbf16>, vector<2x2x128xf32> -> vector<2x2x128xf32>
    %215 = vector.shape_cast %214 : vector<2x2x128xf32> to vector<1x2x2x128xf32>
    %c0_61 = arith.constant 0 : index
    %c0_62 = arith.constant 0 : index
    %216 = vector.load %arg14[%c0_61, %c0_62] : memref<1x128xf32, #tpu.memory_space<vmem>>, vector<1x128xf32>
    %217 = vector.shape_cast %216 : vector<1x128xf32> to vector<1x1x1x128xf32>
    %218 = vector.broadcast %217 : vector<1x1x1x128xf32> to vector<1x2x2x128xf32>
    %219 = arith.addf %215, %218 : vector<1x2x2x128xf32>
    %cst_63 = arith.constant 0.000000e+00 : f32
    %220 = vector.broadcast %cst_63 : f32 to vector<1x2x2x128xf32>
    %221 = arith.maximumf %219, %220 : vector<1x2x2x128xf32>
    %222 = arith.addf %86, %221 : vector<1x2x2x128xf32>
    %c0_64 = arith.constant 0 : index
    %c0_65 = arith.constant 0 : index
    %223 = vector.load %arg15[%c0_64, %c0_65] : memref<128x128xbf16, #tpu.memory_space<vmem>>, vector<128x128xbf16>
    %224 = vector.shape_cast %222 : vector<1x2x2x128xf32> to vector<2x2x128xf32>
    %225 = arith.truncf %224 : vector<2x2x128xf32> to vector<2x2x128xbf16>
    %226 = vector.shape_cast %223 : vector<128x128xbf16> to vector<1x128x128xbf16>
    %227 = vector.broadcast %226 : vector<1x128x128xbf16> to vector<2x128x128xbf16>
    %cst_66 = arith.constant dense<0.000000e+00> : vector<2x2x128xf32>
    %228 = tpu.matmul %225, %227, %cst_66 {dimension_numbers = #tpu.dot_dimension_numbers<[2], [1], [1], [2], [0, 0, 0, 1, 1, 2], [0], [0]>} : vector<2x2x128xbf16>, vector<2x128x128xbf16>, vector<2x2x128xf32> -> vector<2x2x128xf32>
    %229 = vector.shape_cast %228 : vector<2x2x128xf32> to vector<1x2x2x128xf32>
    %c0_67 = arith.constant 0 : index
    %c0_68 = arith.constant 0 : index
    %230 = vector.load %arg16[%c0_67, %c0_68] : memref<1x128xf32, #tpu.memory_space<vmem>>, vector<1x128xf32>
    %231 = vector.shape_cast %230 : vector<1x128xf32> to vector<1x1x1x128xf32>
    %232 = vector.broadcast %231 : vector<1x1x1x128xf32> to vector<1x2x2x128xf32>
    %233 = arith.addf %229, %232 : vector<1x2x2x128xf32>
    %cst_69 = arith.constant 0.000000e+00 : f32
    %234 = vector.broadcast %cst_69 : f32 to vector<1x2x2x128xf32>
    %235 = arith.maximumf %233, %234 : vector<1x2x2x128xf32>
    %c0_70 = arith.constant 0 : index
    %c0_71 = arith.constant 0 : index
    %c0_72 = arith.constant 0 : index
    %236 = vector.load %arg17[%c0_70, %c0_71, %c0_72] : memref<3x3x128xf32, #tpu.memory_space<vmem>>, vector<3x3x128xf32>
    %c0_73 = arith.constant 0 : index
    %c0_74 = arith.constant 0 : index
    %237 = vector.load %arg18[%c0_73, %c0_74] : memref<1x128xf32, #tpu.memory_space<vmem>>, vector<1x128xf32>
    %cst_75 = arith.constant 0.000000e+00 : f32
    %238 = vector.broadcast %cst_75 : f32 to vector<1x2x1x128xf32>
    %cst_76 = arith.constant 0.000000e+00 : f32
    %239 = vector.broadcast %cst_76 : f32 to vector<1x1x2x128xf32>
    %240 = vector.extract_strided_slice %235 {offsets = [0, 0, 0, 0], sizes = [1, 2, 1, 128], strides = [1, 1, 1, 1]} : vector<1x2x2x128xf32> to vector<1x2x1x128xf32>
    %241 = tpu.concatenate %238, %240 in 2 : vector<1x2x1x128xf32>, vector<1x2x1x128xf32> -> vector<1x2x2x128xf32>
    %242 = vector.extract_strided_slice %235 {offsets = [0, 0, 1, 0], sizes = [1, 2, 1, 128], strides = [1, 1, 1, 1]} : vector<1x2x2x128xf32> to vector<1x2x1x128xf32>
    %243 = tpu.concatenate %242, %238 in 2 : vector<1x2x1x128xf32>, vector<1x2x1x128xf32> -> vector<1x2x2x128xf32>
    %244 = vector.extract_strided_slice %241 {offsets = [0, 0, 0, 0], sizes = [1, 1, 2, 128], strides = [1, 1, 1, 1]} : vector<1x2x2x128xf32> to vector<1x1x2x128xf32>
    %245 = tpu.concatenate %239, %244 in 1 : vector<1x1x2x128xf32>, vector<1x1x2x128xf32> -> vector<1x2x2x128xf32>
    %246 = vector.extract_strided_slice %236 {offsets = [0, 0, 0], sizes = [1, 1, 128], strides = [1, 1, 1]} : vector<3x3x128xf32> to vector<1x1x128xf32>
    %247 = vector.shape_cast %246 : vector<1x1x128xf32> to vector<128xf32>
    %248 = vector.shape_cast %247 : vector<128xf32> to vector<1x1x1x128xf32>
    %249 = vector.broadcast %248 : vector<1x1x1x128xf32> to vector<1x2x2x128xf32>
    %250 = arith.mulf %245, %249 : vector<1x2x2x128xf32>
    %251 = vector.extract_strided_slice %235 {offsets = [0, 0, 0, 0], sizes = [1, 1, 2, 128], strides = [1, 1, 1, 1]} : vector<1x2x2x128xf32> to vector<1x1x2x128xf32>
    %252 = tpu.concatenate %239, %251 in 1 : vector<1x1x2x128xf32>, vector<1x1x2x128xf32> -> vector<1x2x2x128xf32>
    %253 = vector.extract_strided_slice %236 {offsets = [0, 1, 0], sizes = [1, 1, 128], strides = [1, 1, 1]} : vector<3x3x128xf32> to vector<1x1x128xf32>
    %254 = vector.shape_cast %253 : vector<1x1x128xf32> to vector<128xf32>
    %255 = vector.shape_cast %254 : vector<128xf32> to vector<1x1x1x128xf32>
    %256 = vector.broadcast %255 : vector<1x1x1x128xf32> to vector<1x2x2x128xf32>
    %257 = arith.mulf %252, %256 : vector<1x2x2x128xf32>
    %258 = arith.addf %250, %257 : vector<1x2x2x128xf32>
    %259 = vector.extract_strided_slice %243 {offsets = [0, 0, 0, 0], sizes = [1, 1, 2, 128], strides = [1, 1, 1, 1]} : vector<1x2x2x128xf32> to vector<1x1x2x128xf32>
    %260 = tpu.concatenate %239, %259 in 1 : vector<1x1x2x128xf32>, vector<1x1x2x128xf32> -> vector<1x2x2x128xf32>
    %261 = vector.extract_strided_slice %236 {offsets = [0, 2, 0], sizes = [1, 1, 128], strides = [1, 1, 1]} : vector<3x3x128xf32> to vector<1x1x128xf32>
    %262 = vector.shape_cast %261 : vector<1x1x128xf32> to vector<128xf32>
    %263 = vector.shape_cast %262 : vector<128xf32> to vector<1x1x1x128xf32>
    %264 = vector.broadcast %263 : vector<1x1x1x128xf32> to vector<1x2x2x128xf32>
    %265 = arith.mulf %260, %264 : vector<1x2x2x128xf32>
    %266 = arith.addf %258, %265 : vector<1x2x2x128xf32>
    %267 = vector.extract_strided_slice %236 {offsets = [1, 0, 0], sizes = [1, 1, 128], strides = [1, 1, 1]} : vector<3x3x128xf32> to vector<1x1x128xf32>
    %268 = vector.shape_cast %267 : vector<1x1x128xf32> to vector<128xf32>
    %269 = vector.shape_cast %268 : vector<128xf32> to vector<1x1x1x128xf32>
    %270 = vector.broadcast %269 : vector<1x1x1x128xf32> to vector<1x2x2x128xf32>
    %271 = arith.mulf %241, %270 : vector<1x2x2x128xf32>
    %272 = arith.addf %266, %271 : vector<1x2x2x128xf32>
    %273 = vector.extract_strided_slice %236 {offsets = [1, 1, 0], sizes = [1, 1, 128], strides = [1, 1, 1]} : vector<3x3x128xf32> to vector<1x1x128xf32>
    %274 = vector.shape_cast %273 : vector<1x1x128xf32> to vector<128xf32>
    %275 = vector.shape_cast %274 : vector<128xf32> to vector<1x1x1x128xf32>
    %276 = vector.broadcast %275 : vector<1x1x1x128xf32> to vector<1x2x2x128xf32>
    %277 = arith.mulf %235, %276 : vector<1x2x2x128xf32>
    %278 = arith.addf %272, %277 : vector<1x2x2x128xf32>
    %279 = vector.extract_strided_slice %236 {offsets = [1, 2, 0], sizes = [1, 1, 128], strides = [1, 1, 1]} : vector<3x3x128xf32> to vector<1x1x128xf32>
    %280 = vector.shape_cast %279 : vector<1x1x128xf32> to vector<128xf32>
    %281 = vector.shape_cast %280 : vector<128xf32> to vector<1x1x1x128xf32>
    %282 = vector.broadcast %281 : vector<1x1x1x128xf32> to vector<1x2x2x128xf32>
    %283 = arith.mulf %243, %282 : vector<1x2x2x128xf32>
    %284 = arith.addf %278, %283 : vector<1x2x2x128xf32>
    %285 = vector.extract_strided_slice %241 {offsets = [0, 1, 0, 0], sizes = [1, 1, 2, 128], strides = [1, 1, 1, 1]} : vector<1x2x2x128xf32> to vector<1x1x2x128xf32>
    %286 = tpu.concatenate %285, %239 in 1 : vector<1x1x2x128xf32>, vector<1x1x2x128xf32> -> vector<1x2x2x128xf32>
    %287 = vector.extract_strided_slice %236 {offsets = [2, 0, 0], sizes = [1, 1, 128], strides = [1, 1, 1]} : vector<3x3x128xf32> to vector<1x1x128xf32>
    %288 = vector.shape_cast %287 : vector<1x1x128xf32> to vector<128xf32>
    %289 = vector.shape_cast %288 : vector<128xf32> to vector<1x1x1x128xf32>
    %290 = vector.broadcast %289 : vector<1x1x1x128xf32> to vector<1x2x2x128xf32>
    %291 = arith.mulf %286, %290 : vector<1x2x2x128xf32>
    %292 = arith.addf %284, %291 : vector<1x2x2x128xf32>
    %293 = vector.extract_strided_slice %235 {offsets = [0, 1, 0, 0], sizes = [1, 1, 2, 128], strides = [1, 1, 1, 1]} : vector<1x2x2x128xf32> to vector<1x1x2x128xf32>
    %294 = tpu.concatenate %293, %239 in 1 : vector<1x1x2x128xf32>, vector<1x1x2x128xf32> -> vector<1x2x2x128xf32>
    %295 = vector.extract_strided_slice %236 {offsets = [2, 1, 0], sizes = [1, 1, 128], strides = [1, 1, 1]} : vector<3x3x128xf32> to vector<1x1x128xf32>
    %296 = vector.shape_cast %295 : vector<1x1x128xf32> to vector<128xf32>
    %297 = vector.shape_cast %296 : vector<128xf32> to vector<1x1x1x128xf32>
    %298 = vector.broadcast %297 : vector<1x1x1x128xf32> to vector<1x2x2x128xf32>
    %299 = arith.mulf %294, %298 : vector<1x2x2x128xf32>
    %300 = arith.addf %292, %299 : vector<1x2x2x128xf32>
    %301 = vector.extract_strided_slice %243 {offsets = [0, 1, 0, 0], sizes = [1, 1, 2, 128], strides = [1, 1, 1, 1]} : vector<1x2x2x128xf32> to vector<1x1x2x128xf32>
    %302 = tpu.concatenate %301, %239 in 1 : vector<1x1x2x128xf32>, vector<1x1x2x128xf32> -> vector<1x2x2x128xf32>
    %303 = vector.extract_strided_slice %236 {offsets = [2, 2, 0], sizes = [1, 1, 128], strides = [1, 1, 1]} : vector<3x3x128xf32> to vector<1x1x128xf32>
    %304 = vector.shape_cast %303 : vector<1x1x128xf32> to vector<128xf32>
    %305 = vector.shape_cast %304 : vector<128xf32> to vector<1x1x1x128xf32>
    %306 = vector.broadcast %305 : vector<1x1x1x128xf32> to vector<1x2x2x128xf32>
    %307 = arith.mulf %302, %306 : vector<1x2x2x128xf32>
    %308 = arith.addf %300, %307 : vector<1x2x2x128xf32>
    %309 = vector.shape_cast %237 : vector<1x128xf32> to vector<1x1x1x128xf32>
    %310 = vector.broadcast %309 : vector<1x1x1x128xf32> to vector<1x2x2x128xf32>
    %311 = arith.addf %308, %310 : vector<1x2x2x128xf32>
    %c0_77 = arith.constant 0 : index
    %c0_78 = arith.constant 0 : index
    %312 = vector.load %arg21[%c0_77, %c0_78] : memref<1x128xf32, #tpu.memory_space<vmem>>, vector<1x128xf32>
    %313 = vector.shape_cast %312 : vector<1x128xf32> to vector<1x1x1x128xf32>
    %314 = vector.broadcast %313 : vector<1x1x1x128xf32> to vector<1x2x2x128xf32>
    %315 = arith.mulf %222, %314 : vector<1x2x2x128xf32>
    %c0_79 = arith.constant 0 : index
    %c0_80 = arith.constant 0 : index
    %316 = vector.load %arg19[%c0_79, %c0_80] : memref<128x128xbf16, #tpu.memory_space<vmem>>, vector<128x128xbf16>
    %317 = vector.shape_cast %311 : vector<1x2x2x128xf32> to vector<2x2x128xf32>
    %318 = arith.truncf %317 : vector<2x2x128xf32> to vector<2x2x128xbf16>
    %319 = vector.shape_cast %316 : vector<128x128xbf16> to vector<1x128x128xbf16>
    %320 = vector.broadcast %319 : vector<1x128x128xbf16> to vector<2x128x128xbf16>
    %cst_81 = arith.constant dense<0.000000e+00> : vector<2x2x128xf32>
    %321 = tpu.matmul %318, %320, %cst_81 {dimension_numbers = #tpu.dot_dimension_numbers<[2], [1], [1], [2], [0, 0, 0, 1, 1, 2], [0], [0]>} : vector<2x2x128xbf16>, vector<2x128x128xbf16>, vector<2x2x128xf32> -> vector<2x2x128xf32>
    %322 = vector.shape_cast %321 : vector<2x2x128xf32> to vector<1x2x2x128xf32>
    %c0_82 = arith.constant 0 : index
    %c0_83 = arith.constant 0 : index
    %323 = vector.load %arg20[%c0_82, %c0_83] : memref<1x128xf32, #tpu.memory_space<vmem>>, vector<1x128xf32>
    %324 = vector.shape_cast %323 : vector<1x128xf32> to vector<1x1x1x128xf32>
    %325 = vector.broadcast %324 : vector<1x1x1x128xf32> to vector<1x2x2x128xf32>
    %326 = arith.addf %322, %325 : vector<1x2x2x128xf32>
    %cst_84 = arith.constant 0.000000e+00 : f32
    %327 = vector.broadcast %cst_84 : f32 to vector<1x2x2x128xf32>
    %328 = arith.maximumf %326, %327 : vector<1x2x2x128xf32>
    %329 = arith.addf %315, %328 : vector<1x2x2x128xf32>
    %c0_85 = arith.constant 0 : index
    %c0_86 = arith.constant 0 : index
    %330 = vector.load %arg22[%c0_85, %c0_86] : memref<128x128xbf16, #tpu.memory_space<vmem>>, vector<128x128xbf16>
    %331 = vector.shape_cast %329 : vector<1x2x2x128xf32> to vector<2x2x128xf32>
    %332 = arith.truncf %331 : vector<2x2x128xf32> to vector<2x2x128xbf16>
    %333 = vector.shape_cast %330 : vector<128x128xbf16> to vector<1x128x128xbf16>
    %334 = vector.broadcast %333 : vector<1x128x128xbf16> to vector<2x128x128xbf16>
    %cst_87 = arith.constant dense<0.000000e+00> : vector<2x2x128xf32>
    %335 = tpu.matmul %332, %334, %cst_87 {dimension_numbers = #tpu.dot_dimension_numbers<[2], [1], [1], [2], [0, 0, 0, 1, 1, 2], [0], [0]>} : vector<2x2x128xbf16>, vector<2x128x128xbf16>, vector<2x2x128xf32> -> vector<2x2x128xf32>
    %336 = vector.shape_cast %335 : vector<2x2x128xf32> to vector<1x2x2x128xf32>
    %c0_88 = arith.constant 0 : index
    %c0_89 = arith.constant 0 : index
    %337 = vector.load %arg23[%c0_88, %c0_89] : memref<1x128xf32, #tpu.memory_space<vmem>>, vector<1x128xf32>
    %338 = vector.shape_cast %337 : vector<1x128xf32> to vector<1x1x1x128xf32>
    %339 = vector.broadcast %338 : vector<1x1x1x128xf32> to vector<1x2x2x128xf32>
    %340 = arith.addf %336, %339 : vector<1x2x2x128xf32>
    %cst_90 = arith.constant 0.000000e+00 : f32
    %341 = vector.broadcast %cst_90 : f32 to vector<1x2x2x128xf32>
    %342 = arith.maximumf %340, %341 : vector<1x2x2x128xf32>
    %cst_91 = arith.constant dense<0.000000e+00> : vector<1x2x128xf32>
    %343 = vector.multi_reduction <add>, %342, %cst_91 [1] : vector<1x2x2x128xf32> to vector<1x2x128xf32>
    %cst_92 = arith.constant dense<0.000000e+00> : vector<1x128xf32>
    %344 = vector.multi_reduction <add>, %343, %cst_92 [1] : vector<1x2x128xf32> to vector<1x128xf32>
    %cst_93 = arith.constant 2.500000e-01 : f32
    %345 = vector.broadcast %cst_93 : f32 to vector<1x128xf32>
    %346 = arith.mulf %344, %345 : vector<1x128xf32>
    %c0_94 = arith.constant 0 : index
    %c0_95 = arith.constant 0 : index
    %347 = vector.load %arg24[%c0_94, %c0_95] : memref<128x128xbf16, #tpu.memory_space<vmem>>, vector<128x128xbf16>
    %348 = arith.truncf %346 : vector<1x128xf32> to vector<1x128xbf16>
    %cst_96 = arith.constant dense<0.000000e+00> : vector<1x128xf32>
    %349 = tpu.matmul %348, %347, %cst_96 {dimension_numbers = #tpu.dot_dimension_numbers<[1], [0], [0], [1], [0, 0, 1, 1], [], []>} : vector<1x128xbf16>, vector<128x128xbf16>, vector<1x128xf32> -> vector<1x128xf32>
    %c0_97 = arith.constant 0 : index
    %c0_98 = arith.constant 0 : index
    %350 = vector.load %arg25[%c0_97, %c0_98] : memref<1x128xf32, #tpu.memory_space<vmem>>, vector<1x128xf32>
    %351 = arith.addf %349, %350 : vector<1x128xf32>
    %352 = vector.shape_cast %351 : vector<1x128xf32> to vector<1x1x128xf32>
    %c0_99 = arith.constant 0 : index
    %c0_100 = arith.constant 0 : index
    %c0_101 = arith.constant 0 : index
    %353 = vector.load %arg26[%c0_99, %c0_100, %c0_101] : memref<1x1x128xf32, #tpu.memory_space<vmem>>, vector<1x1x128xf32>
    tpu.vector_store %arg26[%c0_99, %c0_100, %c0_101], %352 {strides = array<i32>} : memref<1x1x128xf32, #tpu.memory_space<vmem>>, vector<1x1x128xf32>,
    return
  }
  func.func @transform_0(%arg0: i32) -> (i32, i32, i32, i32) {
    %c0_i32 = arith.constant 0 : i32
    %c0_i32_0 = arith.constant 0 : i32
    %c0_i32_1 = arith.constant 0 : i32
    %c0_i32_2 = arith.constant 0 : i32
    return %arg0, %c0_i32, %c0_i32_0, %c0_i32_1 : i32, i32, i32, i32
  }
  func.func @transform_1(%arg0: i32) -> (i32, i32, i32, i32) {
    %c0_i32 = arith.constant 0 : i32
    %c0_i32_0 = arith.constant 0 : i32
    %c0_i32_1 = arith.constant 0 : i32
    %c0_i32_2 = arith.constant 0 : i32
    return %arg0, %c0_i32, %c0_i32_0, %c0_i32_1 : i32, i32, i32, i32
  }
  func.func @transform_2(%arg0: i32) -> (i32, i32, i32, i32) {
    %c0_i32 = arith.constant 0 : i32
    %c0_i32_0 = arith.constant 0 : i32
    %c0_i32_1 = arith.constant 0 : i32
    %c0_i32_2 = arith.constant 0 : i32
    return %arg0, %c0_i32, %c0_i32_0, %c0_i32_1 : i32, i32, i32, i32
  }
  func.func @transform_3(%arg0: i32) -> (i32, i32, i32, i32) {
    %c0_i32 = arith.constant 0 : i32
    %c0_i32_0 = arith.constant 0 : i32
    %c0_i32_1 = arith.constant 0 : i32
    %c0_i32_2 = arith.constant 0 : i32
    return %arg0, %c0_i32, %c0_i32_0, %c0_i32_1 : i32, i32, i32, i32
  }
  func.func @transform_4(%arg0: i32) -> (i32, i32, i32) {
    %c0_i32 = arith.constant 0 : i32
    %c0_i32_0 = arith.constant 0 : i32
    %c0_i32_1 = arith.constant 0 : i32
    %c0_i32_2 = arith.constant 0 : i32
    return %c0_i32, %c0_i32_0, %c0_i32_1 : i32, i32, i32
  }
  func.func @transform_5(%arg0: i32) -> (i32, i32) {
    %c0_i32 = arith.constant 0 : i32
    %c0_i32_0 = arith.constant 0 : i32
    %c0_i32_1 = arith.constant 0 : i32
    return %c0_i32, %c0_i32_0 : i32, i32
  }
  func.func @transform_6(%arg0: i32) -> (i32, i32) {
    %c0_i32 = arith.constant 0 : i32
    %c0_i32_0 = arith.constant 0 : i32
    %c0_i32_1 = arith.constant 0 : i32
    return %c0_i32, %c0_i32_0 : i32, i32
  }
  func.func @transform_7(%arg0: i32) -> (i32, i32) {
    %c0_i32 = arith.constant 0 : i32
    %c0_i32_0 = arith.constant 0 : i32
    %c0_i32_1 = arith.constant 0 : i32
    return %c0_i32, %c0_i32_0 : i32, i32
  }
  func.func @transform_8(%arg0: i32) -> (i32, i32) {
    %c0_i32 = arith.constant 0 : i32
    %c0_i32_0 = arith.constant 0 : i32
    %c0_i32_1 = arith.constant 0 : i32
    return %c0_i32, %c0_i32_0 : i32, i32
  }
  func.func @transform_9(%arg0: i32) -> (i32, i32) {
    %c0_i32 = arith.constant 0 : i32
    %c0_i32_0 = arith.constant 0 : i32
    %c0_i32_1 = arith.constant 0 : i32
    return %c0_i32, %c0_i32_0 : i32, i32
  }
  func.func @transform_10(%arg0: i32) -> (i32, i32, i32) {
    %c0_i32 = arith.constant 0 : i32
    %c0_i32_0 = arith.constant 0 : i32
    %c0_i32_1 = arith.constant 0 : i32
    %c0_i32_2 = arith.constant 0 : i32
    return %c0_i32, %c0_i32_0, %c0_i32_1 : i32, i32, i32
  }
  func.func @transform_11(%arg0: i32) -> (i32, i32) {
    %c0_i32 = arith.constant 0 : i32
    %c0_i32_0 = arith.constant 0 : i32
    %c0_i32_1 = arith.constant 0 : i32
    return %c0_i32, %c0_i32_0 : i32, i32
  }
  func.func @transform_12(%arg0: i32) -> (i32, i32) {
    %c0_i32 = arith.constant 0 : i32
    %c0_i32_0 = arith.constant 0 : i32
    %c0_i32_1 = arith.constant 0 : i32
    return %c0_i32, %c0_i32_0 : i32, i32
  }
  func.func @transform_13(%arg0: i32) -> (i32, i32) {
    %c0_i32 = arith.constant 0 : i32
    %c0_i32_0 = arith.constant 0 : i32
    %c0_i32_1 = arith.constant 0 : i32
    return %c0_i32, %c0_i32_0 : i32, i32
  }
  func.func @transform_14(%arg0: i32) -> (i32, i32) {
    %c0_i32 = arith.constant 0 : i32
    %c0_i32_0 = arith.constant 0 : i32
    %c0_i32_1 = arith.constant 0 : i32
    return %c0_i32, %c0_i32_0 : i32, i32
  }
  func.func @transform_15(%arg0: i32) -> (i32, i32) {
    %c0_i32 = arith.constant 0 : i32
    %c0_i32_0 = arith.constant 0 : i32
    %c0_i32_1 = arith.constant 0 : i32
    return %c0_i32, %c0_i32_0 : i32, i32
  }
  func.func @transform_16(%arg0: i32) -> (i32, i32, i32) {
    %c0_i32 = arith.constant 0 : i32
    %c0_i32_0 = arith.constant 0 : i32
    %c0_i32_1 = arith.constant 0 : i32
    %c0_i32_2 = arith.constant 0 : i32
    return %c0_i32, %c0_i32_0, %c0_i32_1 : i32, i32, i32
  }
  func.func @transform_17(%arg0: i32) -> (i32, i32) {
    %c0_i32 = arith.constant 0 : i32
    %c0_i32_0 = arith.constant 0 : i32
    %c0_i32_1 = arith.constant 0 : i32
    return %c0_i32, %c0_i32_0 : i32, i32
  }
  func.func @transform_18(%arg0: i32) -> (i32, i32) {
    %c0_i32 = arith.constant 0 : i32
    %c0_i32_0 = arith.constant 0 : i32
    %c0_i32_1 = arith.constant 0 : i32
    return %c0_i32, %c0_i32_0 : i32, i32
  }
  func.func @transform_19(%arg0: i32) -> (i32, i32) {
    %c0_i32 = arith.constant 0 : i32
    %c0_i32_0 = arith.constant 0 : i32
    %c0_i32_1 = arith.constant 0 : i32
    return %c0_i32, %c0_i32_0 : i32, i32
  }
  func.func @transform_20(%arg0: i32) -> (i32, i32) {
    %c0_i32 = arith.constant 0 : i32
    %c0_i32_0 = arith.constant 0 : i32
    %c0_i32_1 = arith.constant 0 : i32
    return %c0_i32, %c0_i32_0 : i32, i32
  }
  func.func @transform_21(%arg0: i32) -> (i32, i32) {
    %c0_i32 = arith.constant 0 : i32
    %c0_i32_0 = arith.constant 0 : i32
    %c0_i32_1 = arith.constant 0 : i32
    return %c0_i32, %c0_i32_0 : i32, i32
  }
  func.func @transform_22(%arg0: i32) -> (i32, i32) {
    %c0_i32 = arith.constant 0 : i32
    %c0_i32_0 = arith.constant 0 : i32
    %c0_i32_1 = arith.constant 0 : i32
    return %c0_i32, %c0_i32_0 : i32, i32
  }
  func.func @transform_23(%arg0: i32) -> (i32, i32) {
    %c0_i32 = arith.constant 0 : i32
    %c0_i32_0 = arith.constant 0 : i32
    %c0_i32_1 = arith.constant 0 : i32
    return %c0_i32, %c0_i32_0 : i32, i32
  }
  func.func @transform_24(%arg0: i32) -> (i32, i32) {
    %c0_i32 = arith.constant 0 : i32
    %c0_i32_0 = arith.constant 0 : i32
    %c0_i32_1 = arith.constant 0 : i32
    return %c0_i32, %c0_i32_0 : i32, i32
  }
  func.func @transform_25(%arg0: i32) -> (i32, i32, i32) {
    %c0_i32 = arith.constant 0 : i32
    %c0_i32_0 = arith.constant 0 : i32
    %c0_i32_1 = arith.constant 0 : i32
    return %arg0, %c0_i32, %c0_i32_0 : i32, i32, i32
  }
}

</mosaic_0001>

<bundles_post_ra>
// kernel: _lambda_.4
= control target key start
LH: loop header
LB: loop body
LE: loop exit
PB: predicated region body
PF: predicated region fallthrough
CT: control target
= control target key end

     0   :  { %11 = vsyncpa [#allocation3], 0  ;;  %s2689_s21 = smov 0   ;;  %s3987_s0 = inlined_call_operand.vmem [shape: f32[2,16,16,27], index: 0, kind: input, shape index: {}]   ;;  %s3988_s1 = inlined_call_operand.vmem [shape: f32[2,16,16,27], index: 1, kind: input, shape index: {}]   ;;  %s3989_s2 = inlined_call_operand.vmem [shape: f32[2,16,16,27], index: 2, kind: input, shape index: {}]   ;;  %s3990_s3 = inlined_call_operand.vmem [shape: f32[2,16,16,27], index: 3, kind: input, shape index: {}]   ;;  %s3991_s4 = inlined_call_operand.vmem [shape: bf16[27,128], index: 4, kind: input, shape index: {}]   ;;  %s3992_s5 = inlined_call_operand.hbm [shape: f32[1,128], index: 5, kind: input, shape index: {}]   ;;  %s3993_s6 = inlined_call_operand.vmem [shape: f32[2,16,16,128], index: 6, kind: output, shape index: {}]  }
   0x1 LB: > { %s2284_s22 = sadd.s32 4294967295, %s2650_s21   ;;  %p2286_p0 = scmp.ge.s32.totalorder %s2650_s21, 1  ;;  %s2650_s21 = sphi %s2689_s21, %s17_s21  }
   0x2   : > { %p194_p1 = scmp.lt.s32.totalorder %s2650_s21, 3  ;;  %p2599_p3 = scmp.eq.s32.totalorder %s2284_s22, 0 }
   0x3   : > { %s2652_s24 = smov [#allocation2]  }
   0x4   : > { %p2697_p2 = pnand %p2286_p0, %p194_p1  ;;  %s210_s25 = sshll.u32 %s2652_s24, 4  ;;  %s211_s25 = int_to_ptr.vmem [resolvable:$true] %s210_s25 }
   0x5   : > { %s2625_s26 = scalar_lea.vmem %s211_s25, 16  ;;  %s2632_s27 = scalar_lea.vmem %s211_s25, 32 }
   0x6   : > { %p2595_p4 = pneg %p2697_p2  ;;  %p2626_p7 = scmp.ne.s32.totalorder %s211_s25, %s2625_s26 }
   0x7   : > { %p2633_p10 = scmp.lt.s32.totalorder %s211_s25, %s211_s25  ;;  %p2634_p11 = scmp.lt.s32.totalorder %s2632_s27, %s2625_s26 }
   0x8   : > { %p2596_p5 = pnand %p2599_p3, %p2595_p4 }
   0x9   : > { %p2635_p12 = por %p2634_p11, %p2633_p10 }
   0xa   : > { %p2616_p6 = pneg %p2596_p5 }
   0xc   : > { %p2628_p8 = pnand %p2626_p7, %p2616_p6 }
   0xe   : > { %p2629_p9 = pneg %p2628_p8 }
  0x10   : > { %p2636_p13 = pnand %p2635_p12, %p2629_p9 }
  0x12   : > { %2639 = shalt.err (!%p2636_p13)
}
  0x13   : > { %2598 = dma.hbm_to_vmem [thread:$0]  (!%p2596_p5), %s3992_s5, 16, %s211_s25, [#allocation3]  }
  0x14   : > { %255 = sbr.rel (%p2697_p2) target bundleno = 439 (0x1b7), region = 44 }
  0x19   : > { %2645 = dma.done.wait (%p2599_p3), [#allocation3], 16  }
  0x1a   : > { %2647 = vsyncadd (%p2599_p3), [#allocation3], 4294967280  ;;  %vm439_vm0 = vcmask 1044480   ;;  %p300_p0 = scmp.lt.s32.totalorder %s2284_s22, 1  ;;  %vm440_vm1 = vcmask 1045504   ;;  %v2653_v0 = vmov 65535  }
  0x1b   : > { %v441_v1 = vsel %vm439_vm0, 4294967295, %v2653_v0  ;;  %v2611_v3 = vld [vmem:[%s3991_s4 + $0x8] sm:$0x3f]   ;;  %v2612_v4 = vld [vmem:[%s3991_s4] sm:$0xff]   ;;  %vm390_vm2 = vcmask 220160   ;;  %vm1672_vm3 = vcmask 1040384  }
  0x1c   : > { %s4260_s22 = smov (!%p300_p0, %s2284_s22), 1  ;;  %v442_v2 = vsel %vm440_vm1, %v441_v1, 0 }
  0x1d   : > { %s2711_s30 = sshll.u32 %s4260_s22, 8  ;;  %v444_v5 = vand.u32 %v2611_v3, %v442_v2 }
  0x1e   : > { %s2717_s9 = scalar_lea.vmem %s3987_s0, %s2711_s30  ;;  %s2723_s12 = scalar_lea.vmem %s3988_s1, %s2711_s30 }
  0x1f   : > { %v327_v6 = vld [vmem:[%s2717_s9] sm:$0xff]  ;;  %v328_v7 = vld [vmem:[%s2717_s9 + $0x8] sm:$0xff]  ;;  %2447 = vmatprep.subr.bf16.mxu0 %v444_v5  ;;  %2483 = vmatprep.subr.bf16.mxu1 %v444_v5  ;;  %v329_v12 = vld [vmem:[%s2717_s9 + $0x10] sm:$0xff]  ;;  %s2821_s19 = scalar_lea.vmem %s3989_s2, %s2711_s30  ;;  %s2827_s23 = scalar_lea.vmem %s3990_s3, %s2711_s30 }
  0x20   : > { %v677_v8 = vld [vmem:[%s2723_s12] sm:$0xff]  ;;  %v363_v9 = vpack.c.bf16 %v328_v7, %v327_v6  ;;  %v678_v10 = vld [vmem:[%s2723_s12 + $0x8] sm:$0xff]  ;;  %2448 = vmatpush3.bf16.msra.mxu0 %v444_v5  ;;  %2484 = vmatpush3.bf16.msra.mxu1 %v444_v5  ;;  %v330_v13 = vld [vmem:[%s2717_s9 + $0x18] sm:$0xff]  ;;  %s3515_s26 = scalar_lea.vmem %s3993_s6, %s2711_s30 }
  0x21   : > { %v709_v11 = vpack.c.bf16 %v678_v10, %v677_v8  ;;  %v679_v14 = vld [vmem:[%s2723_s12 + $0x10] sm:$0xff]  ;;  %v680_v15 = vld [vmem:[%s2723_s12 + $0x18] sm:$0xff]  ;;  %2449 = vmatprep.subr.bf16.mxu0 %v2612_v4  ;;  %2485 = vmatprep.subr.bf16.mxu1 %v2612_v4  ;;  %v331_v16 = vld [vmem:[%s2717_s9 + $0x20] sm:$0xff]  ;;  %v364_v20 = vpack.c.bf16 %v330_v13, %v329_v12 }
  0x22   : > { %2451 = vmatprep.mubr.msk.bf16.mxu0 %vm390_vm2, %v363_v9  ;;  %v332_v17 = vld [vmem:[%s2717_s9 + $0x28] sm:$0xff]  ;;  %v681_v18 = vld [vmem:[%s2723_s12 + $0x20] sm:$0xff]  ;;  %v710_v21 = vpack.c.bf16 %v680_v15, %v679_v14  ;;  %v333_v24 = vld [vmem:[%s2717_s9 + $0x30] sm:$0xff] }
  0x23   : > { %2487 = vmatprep.mubr.msk.bf16.mxu1 %vm390_vm2, %v709_v11  ;;  %v682_v19 = vld [vmem:[%s2723_s12 + $0x28] sm:$0xff]  ;;  %v365_v22 = vpack.c.bf16 %v332_v17, %v331_v16  ;;  %v334_v25 = vld [vmem:[%s2717_s9 + $0x38] sm:$0xff]  ;;  %v683_v26 = vld [vmem:[%s2723_s12 + $0x30] sm:$0xff] }
  0x24   : > { %2450 = vmatpush3.bf16.msra.mxu0 %v2612_v4  ;;  %2486 = vmatpush3.bf16.msra.mxu1 %v2612_v4  ;;  %v711_v23 = vpack.c.bf16 %v682_v19, %v681_v18  ;;  %v684_v27 = vld [vmem:[%s2723_s12 + $0x38] sm:$0xff]  ;;  %v335_v28 = vld [vmem:[%s2717_s9 + $0x40] sm:$0xff]  ;;  %v336_v29 = vld [vmem:[%s2717_s9 + $0x48] sm:$0xff]  ;;  %v366_v32 = vpack.c.bf16 %v334_v25, %v333_v24 }
  0x25   : > { %2555 = vmatprep.subr.bf16.mxu1 %v444_v5  ;;  %2519 = vmatprep.subr.bf16.mxu0 %v444_v5  ;;  %v685_v30 = vld [vmem:[%s2723_s12 + $0x40] sm:$0xff]  ;;  %v686_v31 = vld [vmem:[%s2723_s12 + $0x48] sm:$0xff]  ;;  %v712_v33 = vpack.c.bf16 %v684_v27, %v683_v26  ;;  %v367_v34 = vpack.c.bf16 %v336_v29, %v335_v28  ;;  %v337_v36 = vld [vmem:[%s2717_s9 + $0x50] sm:$0xff] }
  0x26   : > { %v713_v35 = vpack.c.bf16 %v686_v31, %v685_v30  ;;  %v338_v37 = vld [vmem:[%s2717_s9 + $0x58] sm:$0xff]  ;;  %v687_v38 = vld [vmem:[%s2723_s12 + $0x50] sm:$0xff]  ;;  %v339_v40 = vld [vmem:[%s2717_s9 + $0x60] sm:$0xff] }
  0x27   : > { %2452 = vmatmul.mubr.msk.bf16.vlgmr.msra.gmra.mxu0 %vm390_vm2, %v364_v20  ;;  %2488 = vmatmul.mubr.msk.bf16.vlgmr.msra.gmra.mxu1 %vm390_vm2, %v710_v21  ;;  %v688_v39 = vld [vmem:[%s2723_s12 + $0x58] sm:$0xff]  ;;  %v340_v41 = vld [vmem:[%s2717_s9 + $0x68] sm:$0xff]  ;;  %v689_v42 = vld [vmem:[%s2723_s12 + $0x60] sm:$0xff]  ;;  %v368_v44 = vpack.c.bf16 %v338_v37, %v337_v36 }
  0x28   : > { %2556 = vmatpush3.bf16.msra.mxu1 %v444_v5  ;;  %2520 = vmatpush3.bf16.msra.mxu0 %v444_v5  ;;  %v690_v43 = vld [vmem:[%s2723_s12 + $0x68] sm:$0xff]  ;;  %v714_v45 = vpack.c.bf16 %v688_v39, %v687_v38  ;;  %v369_v46 = vpack.c.bf16 %v340_v41, %v339_v40  ;;  %v341_v48 = vld [vmem:[%s2717_s9 + $0x70] sm:$0xff]  ;;  %v342_v49 = vld [vmem:[%s2717_s9 + $0x78] sm:$0xff] }
  0x29   : > { %2455 = vmatprep.mubr.msk.bf16.mxu0 %vm390_vm2, %v365_v22  ;;  %2491 = vmatprep.mubr.msk.bf16.mxu1 %vm390_vm2, %v711_v23  ;;  %v715_v47 = vpack.c.bf16 %v690_v43, %v689_v42  ;;  %v691_v50 = vld [vmem:[%s2723_s12 + $0x70] sm:$0xff]  ;;  %v692_v51 = vld [vmem:[%s2723_s12 + $0x78] sm:$0xff]  ;;  %v343_v52 = vld [vmem:[%s2717_s9 + $0x80] sm:$0xff]  ;;  %v370_v56 = vpack.c.bf16 %v342_v49, %v341_v48 }
  0x2a   : > { %2557 = vmatprep.subr.bf16.mxu1 %v2612_v4  ;;  %2521 = vmatprep.subr.bf16.mxu0 %v2612_v4  ;;  %v344_v53 = vld [vmem:[%s2717_s9 + $0x88] sm:$0xff]  ;;  %v693_v54 = vld [vmem:[%s2723_s12 + $0x80] sm:$0xff]  ;;  %v716_v57 = vpack.c.bf16 %v692_v51, %v691_v50  ;;  %v345_v60 = vld [vmem:[%s2717_s9 + $0x90] sm:$0xff] }
  0x2b   : > { %v694_v55 = vld [vmem:[%s2723_s12 + $0x88] sm:$0xff]  ;;  %v371_v58 = vpack.c.bf16 %v344_v53, %v343_v52  ;;  %v346_v61 = vld [vmem:[%s2717_s9 + $0x98] sm:$0xff]  ;;  %v695_v62 = vld [vmem:[%s2723_s12 + $0x90] sm:$0xff] }
  0x2c   : > { %2558 = vmatpush3.bf16.msra.mxu1 %v2612_v4  ;;  %2522 = vmatpush3.bf16.msra.mxu0 %v2612_v4  ;;  %v717_v59 = vpack.c.bf16 %v694_v55, %v693_v54  ;;  %v696_v63 = vld [vmem:[%s2723_s12 + $0x98] sm:$0xff]  ;;  %v347_v0 = vld [vmem:[%s2717_s9 + $0xa0] sm:$0xff]  ;;  %v348_v1 = vld [vmem:[%s2717_s9 + $0xa8] sm:$0xff]  ;;  %v372_v4 = vpack.c.bf16 %v346_v61, %v345_v60 }
  0x2d   : > { %v697_v2 = vld [vmem:[%s2723_s12 + $0xa0] sm:$0xff]  ;;  %v698_v3 = vld [vmem:[%s2723_s12 + $0xa8] sm:$0xff]  ;;  %v718_v5 = vpack.c.bf16 %v696_v63, %v695_v62  ;;  %v373_v6 = vpack.c.bf16 %v348_v1, %v347_v0  ;;  %v349_v8 = vld [vmem:[%s2717_s9 + $0xb0] sm:$0xff] }
  0x2e   : > { %v719_v7 = vpack.c.bf16 %v698_v3, %v697_v2  ;;  %v350_v9 = vld [vmem:[%s2717_s9 + $0xb8] sm:$0xff]  ;;  %v699_v10 = vld [vmem:[%s2723_s12 + $0xb0] sm:$0xff]  ;;  %v351_v12 = vld [vmem:[%s2717_s9 + $0xc0] sm:$0xff] }
  0x2f   : > { %2456 = vmatmul.mubr.msk.bf16.gmra.mxu0 %vm390_vm2, %v366_v32  ;;  %2492 = vmatmul.mubr.msk.bf16.gmra.mxu1 %vm390_vm2, %v712_v33  ;;  %v700_v11 = vld [vmem:[%s2723_s12 + $0xb8] sm:$0xff]  ;;  %v352_v13 = vld [vmem:[%s2717_s9 + $0xc8] sm:$0xff]  ;;  %v701_v14 = vld [vmem:[%s2723_s12 + $0xc0] sm:$0xff]  ;;  %v374_v16 = vpack.c.bf16 %v350_v9, %v349_v8 }
  0x30   : > { %2459 = vmatprep.mubr.msk.bf16.mxu0 %vm390_vm2, %v367_v34  ;;  %2495 = vmatprep.mubr.msk.bf16.mxu1 %vm390_vm2, %v713_v35  ;;  %v702_v15 = vld [vmem:[%s2723_s12 + $0xc8] sm:$0xff]  ;;  %v720_v17 = vpack.c.bf16 %v700_v11, %v699_v10  ;;  %v375_v18 = vpack.c.bf16 %v352_v13, %v351_v12  ;;  %v353_v20 = vld [vmem:[%s2717_s9 + $0xd0] sm:$0xff]  ;;  %v354_v21 = vld [vmem:[%s2717_s9 + $0xd8] sm:$0xff] }
  0x31   : > { %v721_v19 = vpack.c.bf16 %v702_v15, %v701_v14  ;;  %v703_v22 = vld [vmem:[%s2723_s12 + $0xd0] sm:$0xff]  ;;  %v704_v23 = vld [vmem:[%s2723_s12 + $0xd8] sm:$0xff]  ;;  %v355_v24 = vld [vmem:[%s2717_s9 + $0xe0] sm:$0xff]  ;;  %v376_v28 = vpack.c.bf16 %v354_v21, %v353_v20 }
  0x32   : > { %v356_v25 = vld [vmem:[%s2717_s9 + $0xe8] sm:$0xff]  ;;  %v705_v26 = vld [vmem:[%s2723_s12 + $0xe0] sm:$0xff]  ;;  %v722_v29 = vpack.c.bf16 %v704_v23, %v703_v22  ;;  %v357_v32 = vld [vmem:[%s2717_s9 + $0xf0] sm:$0xff] }
  0x33   : > { %v706_v27 = vld [vmem:[%s2723_s12 + $0xe8] sm:$0xff]  ;;  %v377_v30 = vpack.c.bf16 %v356_v25, %v355_v24  ;;  %v358_v33 = vld [vmem:[%s2717_s9 + $0xf8] sm:$0xff]  ;;  %v707_v34 = vld [vmem:[%s2723_s12 + $0xf0] sm:$0xff] }
  0x34   : > { %v723_v31 = vpack.c.bf16 %v706_v27, %v705_v26  ;;  %v708_v35 = vld [vmem:[%s2723_s12 + $0xf8] sm:$0xff]  ;;  %v998_v36 = vld [vmem:[%s2821_s19] sm:$0xff]  ;;  %v999_v37 = vld [vmem:[%s2821_s19 + $0x8] sm:$0xff]  ;;  %v378_v40 = vpack.c.bf16 %v358_v33, %v357_v32 }
  0x35   : > { %v1319_v38 = vld [vmem:[%s2827_s23] sm:$0xff]  ;;  %v1320_v39 = vld [vmem:[%s2827_s23 + $0x8] sm:$0xff]  ;;  %v724_v41 = vpack.c.bf16 %v708_v35, %v707_v34  ;;  %v1030_v42 = vpack.c.bf16 %v999_v37, %v998_v36 }
  0x36   : > { %v1351_v43 = vpack.c.bf16 %v1320_v39, %v1319_v38  ;;  %v1002_v48 = vld [vmem:[%s2821_s19 + $0x20] sm:$0xff]  ;;  %v1003_v49 = vld [vmem:[%s2821_s19 + $0x28] sm:$0xff] }
  0x37   : > { %2460 = vmatmul.mubr.msk.bf16.gmra.mxu0 %vm390_vm2, %v368_v44  ;;  %2496 = vmatmul.mubr.msk.bf16.gmra.mxu1 %vm390_vm2, %v714_v45  ;;  %v1000_v44 = vld [vmem:[%s2821_s19 + $0x10] sm:$0xff]  ;;  %v1001_v45 = vld [vmem:[%s2821_s19 + $0x18] sm:$0xff]  ;;  %v1323_v50 = vld [vmem:[%s2827_s23 + $0x20] sm:$0xff]  ;;  %v1032_v54 = vpack.c.bf16 %v1003_v49, %v1002_v48 }
  0x38   : > { %2463 = vmatprep.mubr.msk.bf16.mxu0 %vm390_vm2, %v369_v46  ;;  %2499 = vmatprep.mubr.msk.bf16.mxu1 %vm390_vm2, %v715_v47  ;;  %v1321_v46 = vld [vmem:[%s2827_s23 + $0x10] sm:$0xff]  ;;  %v1322_v47 = vld [vmem:[%s2827_s23 + $0x18] sm:$0xff]  ;;  %v1324_v51 = vld [vmem:[%s2827_s23 + $0x28] sm:$0xff]  ;;  %v1031_v52 = vpack.c.bf16 %v1001_v45, %v1000_v44 }
  0x39   : > { %v1352_v53 = vpack.c.bf16 %v1322_v47, %v1321_v46  ;;  %v1353_v55 = vpack.c.bf16 %v1324_v51, %v1323_v50  ;;  %v1006_v60 = vld [vmem:[%s2821_s19 + $0x40] sm:$0xff]  ;;  %v1007_v61 = vld [vmem:[%s2821_s19 + $0x48] sm:$0xff] }
  0x3a   : > { %v1327_v62 = vld [vmem:[%s2827_s23 + $0x40] sm:$0xff]  ;;  %v1328_v63 = vld [vmem:[%s2827_s23 + $0x48] sm:$0xff]  ;;  %v1034_v2 = vpack.c.bf16 %v1007_v61, %v1006_v60 }
  0x3b   : > { %v1355_v3 = vpack.c.bf16 %v1328_v63, %v1327_v62  ;;  %v1010_v8 = vld [vmem:[%s2821_s19 + $0x60] sm:$0xff]  ;;  %v1011_v9 = vld [vmem:[%s2821_s19 + $0x68] sm:$0xff] }
  0x3c   : > { %v1331_v10 = vld [vmem:[%s2827_s23 + $0x60] sm:$0xff]  ;;  %v1332_v11 = vld [vmem:[%s2827_s23 + $0x68] sm:$0xff]  ;;  %v1036_v14 = vpack.c.bf16 %v1011_v9, %v1010_v8 }
  0x3d   : > { %v1357_v15 = vpack.c.bf16 %v1332_v11, %v1331_v10  ;;  %v1014_v20 = vld [vmem:[%s2821_s19 + $0x80] sm:$0xff]  ;;  %v1015_v21 = vld [vmem:[%s2821_s19 + $0x88] sm:$0xff] }
  0x3e   : > { %v1335_v22 = vld [vmem:[%s2827_s23 + $0x80] sm:$0xff]  ;;  %v1336_v23 = vld [vmem:[%s2827_s23 + $0x88] sm:$0xff]  ;;  %v1038_v26 = vpack.c.bf16 %v1015_v21, %v1014_v20 }
  0x3f   : > { %2464 = vmatmul.mubr.msk.bf16.gmra.mxu0 %vm390_vm2, %v370_v56  ;;  %2500 = vmatmul.mubr.msk.bf16.gmra.mxu1 %vm390_vm2, %v716_v57  ;;  %v1004_v56 = vld [vmem:[%s2821_s19 + $0x30] sm:$0xff]  ;;  %v1005_v57 = vld [vmem:[%s2821_s19 + $0x38] sm:$0xff]  ;;  %v1359_v27 = vpack.c.bf16 %v1336_v23, %v1335_v22  ;;  %v1018_v32 = vld [vmem:[%s2821_s19 + $0xa0] sm:$0xff] }
  0x40   : > { %2467 = vmatprep.mubr.msk.bf16.mxu0 %vm390_vm2, %v371_v58  ;;  %2503 = vmatprep.mubr.msk.bf16.mxu1 %vm390_vm2, %v717_v59  ;;  %v1325_v58 = vld [vmem:[%s2827_s23 + $0x30] sm:$0xff]  ;;  %v1326_v59 = vld [vmem:[%s2827_s23 + $0x38] sm:$0xff]  ;;  %v1033_v0 = vpack.c.bf16 %v1005_v57, %v1004_v56  ;;  %v1019_v33 = vld [vmem:[%s2821_s19 + $0xa8] sm:$0xff] }
  0x41   : > { %v1354_v1 = vpack.c.bf16 %v1326_v59, %v1325_v58  ;;  %v1339_v34 = vld [vmem:[%s2827_s23 + $0xa0] sm:$0xff]  ;;  %v1340_v35 = vld [vmem:[%s2827_s23 + $0xa8] sm:$0xff]  ;;  %v1040_v38 = vpack.c.bf16 %v1019_v33, %v1018_v32 }
  0x42   : > { %v1361_v39 = vpack.c.bf16 %v1340_v35, %v1339_v34  ;;  %v1022_v44 = vld [vmem:[%s2821_s19 + $0xc0] sm:$0xff]  ;;  %v1023_v45 = vld [vmem:[%s2821_s19 + $0xc8] sm:$0xff] }
  0x43   : > { %v1343_v46 = vld [vmem:[%s2827_s23 + $0xc0] sm:$0xff]  ;;  %v1344_v47 = vld [vmem:[%s2827_s23 + $0xc8] sm:$0xff]  ;;  %v1042_v50 = vpack.c.bf16 %v1023_v45, %v1022_v44 }
  0x44   : > { %v1363_v51 = vpack.c.bf16 %v1344_v47, %v1343_v46  ;;  %v1026_v56 = vld [vmem:[%s2821_s19 + $0xe0] sm:$0xff]  ;;  %v1027_v57 = vld [vmem:[%s2821_s19 + $0xe8] sm:$0xff] }
  0x45   : > { %v1347_v58 = vld [vmem:[%s2827_s23 + $0xe0] sm:$0xff]  ;;  %v1348_v59 = vld [vmem:[%s2827_s23 + $0xe8] sm:$0xff]  ;;  %v1044_v62 = vpack.c.bf16 %v1027_v57, %v1026_v56 }
  0x46   : > { %v1365_v63 = vpack.c.bf16 %v1348_v59, %v1347_v58 }
  0x47   : > { %2468 = vmatmul.mubr.msk.bf16.gmra.mxu0 %vm390_vm2, %v372_v4  ;;  %2504 = vmatmul.mubr.msk.bf16.gmra.mxu1 %vm390_vm2, %v718_v5  ;;  %v1008_v4 = vld [vmem:[%s2821_s19 + $0x50] sm:$0xff]  ;;  %v1009_v5 = vld [vmem:[%s2821_s19 + $0x58] sm:$0xff] }
  0x48   : > { %2471 = vmatprep.mubr.msk.bf16.mxu0 %vm390_vm2, %v373_v6  ;;  %2507 = vmatprep.mubr.msk.bf16.mxu1 %vm390_vm2, %v719_v7  ;;  %v1329_v6 = vld [vmem:[%s2827_s23 + $0x50] sm:$0xff]  ;;  %v1330_v7 = vld [vmem:[%s2827_s23 + $0x58] sm:$0xff]  ;;  %v1035_v12 = vpack.c.bf16 %v1009_v5, %v1008_v4 }
  0x49   : > { %v1356_v13 = vpack.c.bf16 %v1330_v7, %v1329_v6  ;;  %v2935_v6 = vld [vmem:[#allocation2] ss:$0 sm:$0xff] }
  0x4f   : > { %2472 = vmatmul.mubr.msk.bf16.gmra.mxu0 %vm390_vm2, %v374_v16  ;;  %2508 = vmatmul.mubr.msk.bf16.gmra.mxu1 %vm390_vm2, %v720_v17  ;;  %v1012_v16 = vld [vmem:[%s2821_s19 + $0x70] sm:$0xff]  ;;  %v1013_v17 = vld [vmem:[%s2821_s19 + $0x78] sm:$0xff] }
  0x50   : > { %2475 = vmatprep.mubr.msk.bf16.mxu0 %vm390_vm2, %v375_v18  ;;  %2511 = vmatprep.mubr.msk.bf16.mxu1 %vm390_vm2, %v721_v19  ;;  %v1333_v18 = vld [vmem:[%s2827_s23 + $0x70] sm:$0xff]  ;;  %v1334_v19 = vld [vmem:[%s2827_s23 + $0x78] sm:$0xff]  ;;  %v1037_v24 = vpack.c.bf16 %v1013_v17, %v1012_v16 }
  0x51   : > { %v1358_v25 = vpack.c.bf16 %v1334_v19, %v1333_v18 }
  0x57   : > { %2476 = vmatmul.mubr.msk.bf16.gmra.mxu0 %vm390_vm2, %v376_v28  ;;  %2512 = vmatmul.mubr.msk.bf16.gmra.mxu1 %vm390_vm2, %v722_v29  ;;  %v1016_v28 = vld [vmem:[%s2821_s19 + $0x90] sm:$0xff]  ;;  %v1017_v29 = vld [vmem:[%s2821_s19 + $0x98] sm:$0xff] }
  0x58   : > { %2479 = vmatprep.mubr.msk.bf16.mxu0 %vm390_vm2, %v377_v30  ;;  %2515 = vmatprep.mubr.msk.bf16.mxu1 %vm390_vm2, %v723_v31  ;;  %v1337_v30 = vld [vmem:[%s2827_s23 + $0x90] sm:$0xff]  ;;  %v1338_v31 = vld [vmem:[%s2827_s23 + $0x98] sm:$0xff]  ;;  %v1039_v36 = vpack.c.bf16 %v1017_v29, %v1016_v28 }
  0x59   : > { %v1360_v37 = vpack.c.bf16 %v1338_v31, %v1337_v30 }
  0x5f   : > { %2480 = vmatmul.mubr.msk.bf16.gmra.mxu0 %vm390_vm2, %v378_v40  ;;  %2516 = vmatmul.mubr.msk.bf16.gmra.mxu1 %vm390_vm2, %v724_v41  ;;  %v1020_v40 = vld [vmem:[%s2821_s19 + $0xb0] sm:$0xff]  ;;  %v1021_v41 = vld [vmem:[%s2821_s19 + $0xb8] sm:$0xff] }
  0x60   : > { %2523 = vmatprep.mubr.msk.bf16.mxu0 %vm390_vm2, %v1030_v42  ;;  %2559 = vmatprep.mubr.msk.bf16.mxu1 %vm390_vm2, %v1351_v43  ;;  %v1341_v42 = vld [vmem:[%s2827_s23 + $0xb0] sm:$0xff]  ;;  %v1342_v43 = vld [vmem:[%s2827_s23 + $0xb8] sm:$0xff]  ;;  %v1041_v48 = vpack.c.bf16 %v1021_v41, %v1020_v40 }
  0x61   : > { %v1362_v49 = vpack.c.bf16 %v1342_v43, %v1341_v42 }
  0x67   : > { %2524 = vmatmul.mubr.msk.bf16.vlgmr.msra.gmra.mxu0 %vm390_vm2, %v1031_v52  ;;  %2560 = vmatmul.mubr.msk.bf16.vlgmr.msra.gmra.mxu1 %vm390_vm2, %v1352_v53  ;;  %v1024_v52 = vld [vmem:[%s2821_s19 + $0xd0] sm:$0xff]  ;;  %v1025_v53 = vld [vmem:[%s2821_s19 + $0xd8] sm:$0xff] }
  0x68   : > { %2527 = vmatprep.mubr.msk.bf16.mxu0 %vm390_vm2, %v1032_v54  ;;  %2563 = vmatprep.mubr.msk.bf16.mxu1 %vm390_vm2, %v1353_v55  ;;  %v1345_v54 = vld [vmem:[%s2827_s23 + $0xd0] sm:$0xff]  ;;  %v1346_v55 = vld [vmem:[%s2827_s23 + $0xd8] sm:$0xff]  ;;  %v1043_v60 = vpack.c.bf16 %v1025_v53, %v1024_v52 }
  0x69   : > { %v1364_v61 = vpack.c.bf16 %v1346_v55, %v1345_v54 }
  0x6f   : > { %2528 = vmatmul.mubr.msk.bf16.gmra.mxu0 %vm390_vm2, %v1033_v0  ;;  %2564 = vmatmul.mubr.msk.bf16.gmra.mxu1 %vm390_vm2, %v1354_v1  ;;  %v1028_v0 = vld [vmem:[%s2821_s19 + $0xf0] sm:$0xff]  ;;  %v1029_v1 = vld [vmem:[%s2821_s19 + $0xf8] sm:$0xff] }
  0x70   : > { %2531 = vmatprep.mubr.msk.bf16.mxu0 %vm390_vm2, %v1034_v2  ;;  %2567 = vmatprep.mubr.msk.bf16.mxu1 %vm390_vm2, %v1355_v3  ;;  %v1349_v2 = vld [vmem:[%s2827_s23 + $0xf0] sm:$0xff]  ;;  %v1350_v3 = vld [vmem:[%s2827_s23 + $0xf8] sm:$0xff]  ;;  %v1045_v4 = vpack.c.bf16 %v1029_v1, %v1028_v0 }
  0x71   : > { %v1366_v5 = vpack.c.bf16 %v1350_v3, %v1349_v2 }
  0x77   : > { %2532 = vmatmul.mubr.msk.bf16.gmra.mxu0 %vm390_vm2, %v1035_v12  ;;  %2568 = vmatmul.mubr.msk.bf16.gmra.mxu1 %vm390_vm2, %v1356_v13 }
  0x78   : > { %2535 = vmatprep.mubr.msk.bf16.mxu0 %vm390_vm2, %v1036_v14  ;;  %2571 = vmatprep.mubr.msk.bf16.mxu1 %vm390_vm2, %v1357_v15 }
  0x7f   : > { %2536 = vmatmul.mubr.msk.bf16.gmra.mxu0 %vm390_vm2, %v1037_v24  ;;  %2572 = vmatmul.mubr.msk.bf16.gmra.mxu1 %vm390_vm2, %v1358_v25 }
  0x80   : > { %2539 = vmatprep.mubr.msk.bf16.mxu0 %vm390_vm2, %v1038_v26  ;;  %2575 = vmatprep.mubr.msk.bf16.mxu1 %vm390_vm2, %v1359_v27 }
  0x87   : > { %2540 = vmatmul.mubr.msk.bf16.gmra.mxu0 %vm390_vm2, %v1039_v36  ;;  %2576 = vmatmul.mubr.msk.bf16.gmra.mxu1 %vm390_vm2, %v1360_v37 }
  0x88   : > { %2543 = vmatprep.mubr.msk.bf16.mxu0 %vm390_vm2, %v1040_v38  ;;  %2579 = vmatprep.mubr.msk.bf16.mxu1 %vm390_vm2, %v1361_v39 }
  0x8f   : > { %2544 = vmatmul.mubr.msk.bf16.gmra.mxu0 %vm390_vm2, %v1041_v48  ;;  %2580 = vmatmul.mubr.msk.bf16.gmra.mxu1 %vm390_vm2, %v1362_v49 }
  0x90   : > { %2547 = vmatprep.mubr.msk.bf16.mxu0 %vm390_vm2, %v1042_v50  ;;  %2583 = vmatprep.mubr.msk.bf16.mxu1 %vm390_vm2, %v1363_v51 }
  0x97   : > { %2548 = vmatmul.mubr.msk.bf16.gmra.mxu0 %vm390_vm2, %v1043_v60  ;;  %2584 = vmatmul.mubr.msk.bf16.gmra.mxu1 %vm390_vm2, %v1364_v61 }
  0x98   : > { %2551 = vmatprep.mubr.msk.bf16.mxu0 %vm390_vm2, %v1044_v62  ;;  %2587 = vmatprep.mubr.msk.bf16.mxu1 %vm390_vm2, %v1365_v63 }
  0x9f   : > { %2552 = vmatmul.mubr.msk.bf16.gmra.mxu0 %vm390_vm2, %v1045_v4  ;;  %2588 = vmatmul.mubr.msk.bf16.gmra.mxu1 %vm390_vm2, %v1366_v5 }
  0xe7   : > { %v2453_v7 = vpop.f32.mrf.mxu0  ;;  %v2489_v8 = vpop.f32.mrf.mxu1 }
  0xe8   : > { %v2938_v9 = vadd.f32 %v2489_v8, %v2935_v6  ;;  %v3036_v63 = vadd.f32 %v2453_v7, %v2935_v6 }
  0xe9   : > { %v2940_v10 = vpop.f32.mrf.mxu0  ;;  %v807_v11 = vpop.f32.mrf.mxu1 }
  0xea   : > { %v4005_v14 = vmax.f32 %v2938_v9, 0.0  ;;  %v2995_v41 = vadd.f32 %v2935_v6, %v807_v11 }
  0xeb   : > { %v2942_v12 = vpop.f32.mrf.mxu0  ;;  %v2490_v13 = vpop.f32.mrf.mxu1 }
  0xec   : > { %v2946_v15 = vadd.f32 %v2490_v13, %v2935_v6  ;;  %v2955_v21 = vrot.slane %v4005_v14, 7  ;;  %v4007_v50 = vmax.f32 %v2995_v41, 0.0 }
  0xed   : > { %v2948_v16 = vpop.f32.mrf.mxu0  ;;  %v810_v17 = vpop.f32.mrf.mxu1 }
  0xee   : > { %v4002_v18 = vmax.f32 %v2946_v15, 0.0  ;;  %v3015_v52 = vadd.f32 %v2935_v6, %v810_v17  ;;  %v1673_v0 = vrot.slane %v4007_v50, 7 }
  0xef   : > { %v2951_v19 = vpop.f32.mrf.mxu0  ;;  %v2493_v20 = vpop.f32.mrf.mxu1 }
  0xf0   : > { %v1677_v22 = vrot.slane %v4002_v18, 7  ;;  %v2960_v23 = vadd.f32 %v2493_v20, %v2935_v6  ;;  %v4006_v2 = vmax.f32 %v3015_v52, 0.0  ;;  %v3127_v18 = vsel %vm1672_vm3, 0.0, %v2955_v21 }
  0xf1   : > { %v2962_v24 = vpop.f32.mrf.mxu0  ;;  %v2964_v25 = vpop.f32.mrf.mxu1 }
  0xf2   : > { %v2968_v26 = vsel %vm1672_vm3, %v2955_v21, %v1677_v22  ;;  %v4001_v29 = vmax.f32 %v2960_v23, 0.0 }
  0xf3   : > { %v2970_v27 = vpop.f32.mrf.mxu0  ;;  %v2494_v28 = vpop.f32.mrf.mxu1 }
  0xf4   : > { %v2974_v30 = vadd.f32 %v2494_v28, %v2935_v6  ;;  %v2988_v37 = vrot.slane %v4001_v29, 7 }
  0xf5   : > { %v2976_v31 = vpop.f32.mrf.mxu0  ;;  %v2978_v32 = vpop.f32.mrf.mxu1 }
  0xf6   : > { %v3998_v33 = vmax.f32 %v2974_v30, 0.0 }
  0xf7   : > { %v2981_v34 = vpop.f32.mrf.mxu0  ;;  %v2497_v35 = vpop.f32.mrf.mxu1 }
  0xf8   : > { %v2984_v36 = vadd.f32 %v2497_v35, %v2935_v6  ;;  %v1683_v38 = vrot.slane %v3998_v33, 7 }
  0xf9   : > { %v2992_v39 = vpop.f32.mrf.mxu0  ;;  %v839_v40 = vpop.f32.mrf.mxu1 }
  0xfa   : > { %4055 = vst [vmem:[#allocation5_spill] sm:$0xff] %v2984_v36  ;;  %v2999_v42 = vsel %vm1672_vm3, %v2988_v37, %v1683_v38  ;;  %v3002_v43 = vadd.f32 %v2935_v6, %v839_v40  ;;  %v3995_v46 = vmax.f32 %v2984_v36, 0.0  ;;  %v1753_v38 = vsel %vm1672_vm3, 0.0, %v1673_v0 }
  0xfb   : > { %v3004_v44 = vpop.f32.mrf.mxu0  ;;  %v2498_v45 = vpop.f32.mrf.mxu1  ;;  %v1674_v40 = vrot.slane %v4006_v2, 7 }
  0xfc   : > { %v3008_v47 = vadd.f32 %v2498_v45, %v2935_v6  ;;  %v4000_v53 = vmax.f32 %v3002_v43, 0.0  ;;  %v3025_v57 = vrot.slane %v3995_v46, 7  ;;  %v614_v46 = vadd.f32 %v2935_v6, %v2948_v16 }
  0xfd   : > { %v3010_v48 = vpop.f32.mrf.mxu0  ;;  %v842_v49 = vpop.f32.mrf.mxu1 }
  0xfe   : > { %4056 = vst [vmem:[#allocation6_spill] sm:$0xff] %v3008_v47  ;;  %v3994_v51 = vmax.f32 %v3008_v47, 0.0  ;;  %v3019_v54 = vadd.f32 %v2935_v6, %v842_v49  ;;  %v3047_v3 = vrot.slane %v4000_v53, 7  ;;  %v646_v2 = vmax.f32 %v614_v46, 0.0 }
  0xff   : > { %v3021_v55 = vpop.f32.mrf.mxu0  ;;  %v2501_v56 = vpop.f32.mrf.mxu1  ;;  %v3232_v47 = vadd.f32 %v3004_v44, %v2935_v6 }
 0x100   : > { %v1689_v58 = vrot.slane %v3994_v51, 7  ;;  %v3030_v59 = vadd.f32 %v2501_v56, %v2935_v6  ;;  %v3997_v60 = vmax.f32 %v3019_v54, 0.0  ;;  %v3248_v44 = vadd.f32 %v3021_v55, %v2935_v6 }
 0x101   : > { %v3033_v61 = vpop.f32.mrf.mxu0  ;;  %v855_v62 = vpop.f32.mrf.mxu1  ;;  %4081 = vst [vmem:[#allocation24_spill] sm:$0xff] %v3232_v47 }
 0x102   : > { %4057 = vst [vmem:[#allocation7_spill] sm:$0xff] %v3030_v59  ;;  %v3042_v1 = vsel %vm1672_vm3, %v3025_v57, %v1689_v58  ;;  %v1686_v4 = vrot.slane %v3997_v60, 7  ;;  %v3052_v5 = vadd.f32 %v2935_v6, %v855_v62  ;;  %v3996_v11 = vmax.f32 %v3030_v59, 0.0  ;;  %4083 = vst [vmem:[#allocation26_spill] sm:$0xff] %v3248_v44 }
 0x103   : > { %4058 = vst [vmem:[#allocation8_spill] sm:$0xff] %v3042_v1  ;;  %v3054_v7 = vpop.f32.mrf.mxu0  ;;  %v2502_v8 = vpop.f32.mrf.mxu1  ;;  %v613_v62 = vadd.f32 %v2935_v6, %v2940_v10  ;;  %v3096_v10 = vadd.f32 %v2935_v6, %v2964_v25  ;;  %v1675_v25 = vsel %vm1672_vm3, %v1673_v0, %v1674_v40  ;;  %v3183_v59 = vadd.f32 %v2981_v34, %v2935_v6 }
 0x104   : > { %4059 = vst [vmem:[#allocation9_spill] sm:$0xff] %v3052_v5  ;;  %v3058_v13 = vadd.f32 %v2502_v8, %v2935_v6  ;;  %v3062_v17 = vsel %vm1672_vm3, %v3047_v3, %v1686_v4  ;;  %v4003_v45 = vmax.f32 %v3052_v5, 0.0  ;;  %v3081_v4 = vrot.slane %v3996_v11, 7 }
 0x105   : > { %v3064_v20 = vpop.f32.mrf.mxu0  ;;  %v858_v22 = vpop.f32.mrf.mxu1  ;;  %v1958_v50 = vmax.f32 %v1675_v25, 0.0  ;;  %4072 = vst [vmem:[#allocation19_spill] sm:$0xff] %v3183_v59  ;;  %v3268_v55 = vadd.f32 %v2935_v6, %v3033_v61 }
 0x106   : > { %4060 = vst [vmem:[#allocation10_spill] sm:$0xff] %v3058_v13  ;;  %v3999_v35 = vmax.f32 %v3058_v13, 0.0  ;;  %v3073_v49 = vadd.f32 %v2935_v6, %v858_v22  ;;  %v3090_v22 = vadd.f32 %v2942_v12, %v2935_v6  ;;  %v3107_v12 = vadd.f32 %v2935_v6, %v2962_v24 }
 0x107   : > { %v3075_v56 = vpop.f32.mrf.mxu0  ;;  %v2505_v58 = vpop.f32.mrf.mxu1  ;;  %v3116_v53 = vrot.slane %v4003_v45, 7 }
 0x108   : > { %4061 = vst [vmem:[#allocation11_spill] sm:$0xff] %v3073_v49  ;;  %v1695_v8 = vrot.slane %v3999_v35, 7  ;;  %v3086_v51 = vadd.f32 %v2505_v58, %v2935_v6  ;;  %v4004_v11 = vmax.f32 %v3073_v49, 0.0  ;;  %v1957_v35 = vmax.f32 %v1753_v38, 0.0 }
 0x109   : > { %v3099_v60 = vpop.f32.mrf.mxu0  ;;  %v871_v33 = vpop.f32.mrf.mxu1  ;;  %v3103_v58 = vadd.f32 %v2951_v19, %v2935_v6 }
 0x10a   : > { %4062 = vst [vmem:[#allocation12_spill] sm:$0xff] %v3086_v51  ;;  %v3111_v16 = vsel %vm1672_vm3, %v3081_v4, %v1695_v8  ;;  %v1692_v38 = vrot.slane %v4004_v11, 7  ;;  %v3121_v19 = vadd.f32 %v2935_v6, %v871_v33  ;;  %v645_v8 = vmax.f32 %v613_v62, 0.0 }
 0x10b   : > { %4063 = vst [vmem:[#allocation13_spill] sm:$0xff] %v3111_v16  ;;  %v3123_v29 = vpop.f32.mrf.mxu0  ;;  %v2506_v24 = vpop.f32.mrf.mxu1  ;;  %v3137_v33 = vadd.f32 %v2935_v6, %v2978_v32  ;;  %v3156_v16 = vadd.f32 %v2970_v27, %v2935_v6  ;;  %v4068_v46 = vmax.f32 %v3086_v51, 0.0  ;;  %v3171_v11 = vadd.f32 %v2935_v6, %v2976_v31 }
 0x10c   : > { %4064 = vst [vmem:[#allocation14_spill] sm:$0xff] %v3121_v19  ;;  %v3131_v40 = vadd.f32 %v2506_v24, %v2935_v6  ;;  %v3141_v14 = vsel %vm1672_vm3, %v3116_v53, %v1692_v38  ;;  %v1989_v28 = vmax.f32 %v1957_v35, %v645_v8  ;;  %v4074_v27 = vmax.f32 %v3121_v19, 0.0 }
 0x10d   : > { %4066 = vst [vmem:[#allocation16_spill] sm:$0xff] %v3141_v14  ;;  %v3143_v21 = vpop.f32.mrf.mxu0  ;;  %v874_v62 = vpop.f32.mrf.mxu1  ;;  %v3160_v35 = vrot.slane %v4068_v46, 7  ;;  %v3300_v14 = vsel %vm1672_vm3, 0.0, %v3047_v3 }
 0x10e   : > { %4065 = vst [vmem:[#allocation15_spill] sm:$0xff] %v3131_v40  ;;  %v4011_v24 = vmax.f32 %v3131_v40, 0.0  ;;  %v3150_v32 = vadd.f32 %v2935_v6, %v874_v62  ;;  %v4070_v62 = vmax.f32 %v3096_v10, 0.0  ;;  %v4071_v40 = vmax.f32 %v2995_v41, 0.0 }
 0x10f   : > { %v3152_v13 = vpop.f32.mrf.mxu0  ;;  %v2509_v38 = vpop.f32.mrf.mxu1  ;;  %v3195_v0 = vrot.slane %v4074_v27, 7  ;;  %v3343_v61 = vadd.f32 %v2935_v6, %v3143_v21 }
 0x110   : > { %4067 = vst [vmem:[#allocation17_spill] sm:$0xff] %v3150_v32  ;;  %v1701_v25 = vrot.slane %v4011_v24, 7  ;;  %v3165_v8 = vadd.f32 %v2509_v38, %v2935_v6  ;;  %v1679_v45 = vrot.slane %v4070_v62, 7  ;;  %v3179_v24 = vmax.f32 %v1989_v28, %v4071_v40 }
 0x111   : > { %v3175_v51 = vpop.f32.mrf.mxu0  ;;  %v887_v46 = vpop.f32.mrf.mxu1  ;;  %v1990_v38 = vmax.f32 %v1958_v50, %v646_v2  ;;  %v3191_v62 = vadd.f32 %v2935_v6, %v2992_v39  ;;  %v4075_v41 = vmax.f32 %v3150_v32, 0.0  ;;  %v3206_v40 = vsel %vm1672_vm3, 0.0, %v2988_v37  ;;  %4102 = vst [vmem:[#allocation41_spill] sm:$0xff] %v3343_v61 }
 0x112   : > { %4069 = vst [vmem:[#allocation18_spill] sm:$0xff] %v3165_v8  ;;  %v3187_v31 = vsel %vm1672_vm3, %v3160_v35, %v1701_v25  ;;  %v3200_v50 = vadd.f32 %v2935_v6, %v887_v46  ;;  %v4080_v25 = vmax.f32 %v3015_v52, 0.0 }
 0x113   : > { %4073 = vst [vmem:[#allocation20_spill] sm:$0xff] %v3187_v31  ;;  %v1698_v28 = vrot.slane %v4075_v41, 7  ;;  %v3202_v34 = vpop.f32.mrf.mxu0  ;;  %v2510_v2 = vpop.f32.mrf.mxu1  ;;  %v3214_v31 = vsel %vm1672_vm3, 0.0, %v1679_v45  ;;  %v4078_v41 = vmax.f32 %v3137_v33, 0.0 }
 0x114   : > { %4076 = vst [vmem:[#allocation21_spill] sm:$0xff] %v3200_v50  ;;  %v3211_v27 = vadd.f32 %v2510_v2, %v2935_v6  ;;  %v3227_v49 = vmax.f32 %v1990_v38, %v4080_v25  ;;  %v4084_v2 = vmax.f32 %v3165_v8, 0.0 }
 0x115   : > { %v1680_v32 = vrot.slane %v4078_v41, 7  ;;  %v3221_v19 = vsel %vm1672_vm3, %v3195_v0, %v1698_v28  ;;  %v3223_v37 = vpop.f32.mrf.mxu0  ;;  %v890_v39 = vpop.f32.mrf.mxu1  ;;  %v3238_v28 = vadd.f32 %v2935_v6, %v3010_v48 }
 0x116   : > { %4077 = vst [vmem:[#allocation22_spill] sm:$0xff] %v3211_v27  ;;  %4079 = vst [vmem:[#allocation23_spill] sm:$0xff] %v3221_v19  ;;  %v3242_v52 = vadd.f32 %v2935_v6, %v890_v39  ;;  %v3252_v46 = vrot.slane %v4084_v2, 7  ;;  %v4085_v41 = vmax.f32 %v3211_v27, 0.0  ;;  %v3264_v19 = vsel %vm1672_vm3, 0.0, %v3025_v57 }
 0x117   : > { %v3244_v38 = vpop.f32.mrf.mxu0  ;;  %v2513_v25 = vpop.f32.mrf.mxu1  ;;  %v3260_v39 = vsel %vm1672_vm3, %v1679_v45, %v1680_v32  ;;  %v3280_v45 = vadd.f32 %v2935_v6, %v3064_v20  ;;  %v4090_v32 = vmax.f32 %v3200_v50, 0.0 }
 0x118   : > { %4082 = vst [vmem:[#allocation25_spill] sm:$0xff] %v3242_v52  ;;  %v1707_v48 = vrot.slane %v4085_v41, 7  ;;  %v3257_v1 = vadd.f32 %v2513_v25, %v2935_v6  ;;  %v3276_v25 = vadd.f32 %v3054_v7, %v2935_v6  ;;  %v4091_v41 = vmax.f32 %v3242_v52, 0.0 }
 0x119   : > { %v3271_v8 = vpop.f32.mrf.mxu0  ;;  %v903_v27 = vpop.f32.mrf.mxu1  ;;  %4088 = vst [vmem:[#allocation29_spill] sm:$0xff] %v3280_v45  ;;  %v3289_v2 = vrot.slane %v4090_v32, 7 }
 0x11a   : > { %4086 = vst [vmem:[#allocation27_spill] sm:$0xff] %v3257_v1  ;;  %4087 = vst [vmem:[#allocation28_spill] sm:$0xff] %v3276_v25  ;;  %v3284_v57 = vsel %vm1672_vm3, %v3252_v46, %v1707_v48  ;;  %v1704_v47 = vrot.slane %v4091_v41, 7  ;;  %v3294_v7 = vadd.f32 %v2935_v6, %v903_v27  ;;  %v3310_v27 = vadd.f32 %v3075_v56, %v2935_v6 }
 0x11b   : > { %4089 = vst [vmem:[#allocation30_spill] sm:$0xff] %v3284_v57  ;;  %v3296_v5 = vpop.f32.mrf.mxu0  ;;  %v2514_v20 = vpop.f32.mrf.mxu1  ;;  %v3314_v41 = vadd.f32 %v2935_v6, %v3099_v60  ;;  %v3329_v60 = vsel %vm1672_vm3, 0.0, %v3116_v53  ;;  %v4103_v56 = vmax.f32 %v3257_v1, 0.0 }
 0x11c   : > { %4092 = vst [vmem:[#allocation31_spill] sm:$0xff] %v3294_v7  ;;  %4093 = vst [vmem:[#allocation32_spill] sm:$0xff] %v3296_v5  ;;  %v3305_v32 = vadd.f32 %v2514_v20, %v2935_v6  ;;  %v3318_v3 = vsel %vm1672_vm3, %v3289_v2, %v1704_v47  ;;  %v3322_v20 = vsel %vm1672_vm3, 0.0, %v3081_v4  ;;  %v3333_v47 = vadd.f32 %v3123_v29, %v2935_v6 }
 0x11d   : > { %4095 = vst [vmem:[#allocation34_spill] sm:$0xff] %v3310_v27  ;;  %4096 = vst [vmem:[#allocation35_spill] sm:$0xff] %v3314_v41  ;;  %v579_v48 = vpop.f32.mrf.mxu0  ;;  %v906_v5 = vpop.f32.mrf.mxu1  ;;  %v3347_v53 = vrot.slane %v4103_v56, 7  ;;  %v3363_v56 = vsel %vm1672_vm3, 0.0, %v3160_v35  ;;  %v4113_v52 = vmax.f32 %v3294_v7, 0.0 }
 0x11e   : > { %4094 = vst [vmem:[#allocation33_spill] sm:$0xff] %v3305_v32  ;;  %4097 = vst [vmem:[#allocation36_spill] sm:$0xff] %v3318_v3  ;;  %v3337_v50 = vadd.f32 %v2935_v6, %v906_v5  ;;  %v4105_v3 = vmax.f32 %v3305_v32, 0.0  ;;  %v3379_v5 = vadd.f32 %v2935_v6, %v3223_v37 }
 0x11f   : > { %4098 = vst [vmem:[#allocation37_spill] sm:$0xff] %v3322_v20  ;;  %4099 = vst [vmem:[#allocation38_spill] sm:$0xff] %v3333_v47  ;;  %v3339_v4 = vpop.f32.mrf.mxu0  ;;  %v2517_v57 = vpop.f32.mrf.mxu1  ;;  %v1709_v35 = vrot.slane %v4113_v52, 7  ;;  %v3398_v52 = vsel %vm1672_vm3, 0.0, %v3195_v0 }
 0x120   : > { %4100 = vst [vmem:[#allocation39_spill] sm:$0xff] %v3337_v50  ;;  %4101 = vst [vmem:[#allocation40_spill] sm:$0xff] %v3339_v4  ;;  %v1713_v29 = vrot.slane %v4105_v3, 7  ;;  %v3352_v25 = vadd.f32 %v2517_v57, %v2935_v6  ;;  %v3358_v4 = vadd.f32 %v3152_v13, %v2935_v6  ;;  %v4028_v21 = vmax.f32 %v3337_v50, 0.0 }
 0x121   : > { %4104 = vst [vmem:[#allocation42_spill] sm:$0xff] %v3347_v53  ;;  %v592_v44 = vpop.f32.mrf.mxu0  ;;  %v919_v1 = vpop.f32.mrf.mxu1  ;;  %4108 = vst [vmem:[#allocation45_spill] sm:$0xff] %v3363_v56  ;;  %v3367_v57 = vadd.f32 %v2935_v6, %v3175_v51  ;;  %v3371_v3 = vadd.f32 %v3202_v34, %v2935_v6 }
 0x122   : > { %4106 = vst [vmem:[#allocation43_spill] sm:$0xff] %v3352_v25  ;;  %4107 = vst [vmem:[#allocation44_spill] sm:$0xff] %v3358_v4  ;;  %v3375_v13 = vsel %vm1672_vm3, %v3347_v53, %v1713_v29  ;;  %v1710_v32 = vrot.slane %v4028_v21, 7  ;;  %v3386_v51 = vadd.f32 %v2935_v6, %v919_v1  ;;  %v3403_v1 = vadd.f32 %v3244_v38, %v2935_v6 }
 0x123   : > { %4109 = vst [vmem:[#allocation46_spill] sm:$0xff] %v3367_v57  ;;  %4110 = vst [vmem:[#allocation47_spill] sm:$0xff] %v3371_v3  ;;  %v3388_v27 = vpop.f32.mrf.mxu0  ;;  %v2518_v34 = vpop.f32.mrf.mxu1  ;;  %v4124_v7 = vmax.f32 %v3352_v25, 0.0  ;;  %v3442_v3 = vadd.f32 %v2935_v6, %v579_v48 }
 0x124   : > { %4111 = vst [vmem:[#allocation48_spill] sm:$0xff] %v3375_v13  ;;  %4112 = vst [vmem:[#allocation49_spill] sm:$0xff] %v3379_v5  ;;  %v3394_v37 = vadd.f32 %v2518_v34, %v2935_v6  ;;  %v3412_v34 = vsel %vm1672_vm3, 0.0, %v3252_v46 }
 0x125   : > { %4114 = vst [vmem:[#allocation50_spill] sm:$0xff] %v3386_v51  ;;  %4115 = vst [vmem:[#allocation51_spill] sm:$0xff] %v3388_v27  ;;  %v3406_v27 = vsel %vm1672_vm3, %v1709_v35, %v1710_v32  ;;  %v3408_v56 = vpop.f32.mrf.mxu0  ;;  %v922_v29 = vpop.f32.mrf.mxu1  ;;  %v3421_v32 = vadd.f32 %v2935_v6, %v3271_v8  ;;  %v3428_v13 = vrot.slane %v4124_v7, 7  ;;  %v3438_v8 = vsel %vm1672_vm3, 0.0, %v3289_v2 }
 0x126   : > { %4116 = vst [vmem:[#allocation52_spill] sm:$0xff] %v3394_v37  ;;  %4117 = vst [vmem:[#allocation53_spill] sm:$0xff] %v3398_v52  ;;  %v4034_v21 = vmax.f32 %v3394_v37, 0.0 }
 0x127   : > { %4118 = vst [vmem:[#allocation54_spill] sm:$0xff] %v3403_v1  ;;  %4119 = vst [vmem:[#allocation55_spill] sm:$0xff] %v3406_v27  ;;  %v2525_v50 = vpop.f32.mrf.mxu0  ;;  %v2561_v46 = vpop.f32.mrf.mxu1 }
 0x128   : > { %4120 = vst [vmem:[#allocation56_spill] sm:$0xff] %v3408_v56  ;;  %4121 = vst [vmem:[#allocation57_spill] sm:$0xff] %v3412_v34  ;;  %v3424_v56 = vadd.f32 %v2935_v6, %v922_v29  ;;  %v1719_v0 = vrot.slane %v4034_v21, 7  ;;  %v3433_v53 = vadd.f32 %v2525_v50, %v2935_v6  ;;  %v1578_v38 = vadd.f32 %v2561_v46, %v2935_v6 }
 0x129   : > { %4122 = vst [vmem:[#allocation58_spill] sm:$0xff] %v3421_v32  ;;  %4125 = vst [vmem:[#allocation60_spill] sm:$0xff] %v3428_v13  ;;  %v1128_v25 = vpop.f32.mrf.mxu0  ;;  %v1449_v27 = vpop.f32.mrf.mxu1  ;;  %v3446_v21 = vadd.f32 %v2935_v6, %v592_v44  ;;  %v4129_v50 = vmax.f32 %v3386_v51, 0.0 }
 0x12a   : > { %4123 = vst [vmem:[#allocation59_spill] sm:$0xff] %v3424_v56  ;;  %4126 = vst [vmem:[#allocation61_spill] sm:$0xff] %v3438_v8  ;;  %v4039_v7 = vmax.f32 %v3424_v56, 0.0  ;;  %v3454_v2 = vsel %vm1672_vm3, %v3428_v13, %v1719_v0  ;;  %v3456_v46 = vmax.f32 %v1578_v38, 0.0  ;;  %v1255_v1 = vadd.f32 %v2935_v6, %v1128_v25 }
 0x12b   : > { %4127 = vst [vmem:[#allocation62_spill] sm:$0xff] %v3442_v3  ;;  %4128 = vst [vmem:[#allocation63_spill] sm:$0xff] %v3446_v21  ;;  %v3450_v37 = vrot.slane %v4129_v50, 7  ;;  %v1576_v44 = vadd.f32 %v2935_v6, %v1449_v27  ;;  %v2526_v4 = vpop.f32.mrf.mxu0  ;;  %v2562_v34 = vpop.f32.mrf.mxu1 }
 0x12c   : > { %4131 = vst [vmem:[#allocation65_spill] sm:$0xff] %v3454_v2  ;;  %v1716_v48 = vrot.slane %v4039_v7, 7  ;;  %v1804_v51 = vrot.slane %v3456_v46, 7  ;;  %v3466_v0 = vadd.f32 %v2526_v4, %v2935_v6  ;;  %v1579_v38 = vadd.f32 %v2562_v34, %v2935_v6 }
 0x12d   : > { %4130 = vst [vmem:[#allocation64_spill] sm:$0xff] %v3450_v37  ;;  %v3470_v2 = vsel %vm1672_vm3, 0.0, %v1709_v35  ;;  %v1608_v27 = vmax.f32 %v1576_v44, 0.0  ;;  %v1131_v29 = vpop.f32.mrf.mxu0  ;;  %v1452_v13 = vpop.f32.mrf.mxu1  ;;  %v4134_v35 = vmax.f32 %v3433_v53, 0.0  ;;  %v1287_v3 = vmax.f32 %v1255_v1, 0.0 }
 0x12e   : > { %4132 = vst [vmem:[#allocation66_spill] sm:$0xff] %v3470_v2  ;;  %v3475_v25 = vsel %vm1672_vm3, %v3450_v37, %v1716_v48  ;;  %v3479_v56 = vsel %vm1672_vm3, 0.0, %v1804_v51  ;;  %v3481_v4 = vmax.f32 %v1579_v38, 0.0  ;;  %v1256_v34 = vadd.f32 %v2935_v6, %v1131_v29 }
 0x12f   : > { %4133 = vst [vmem:[#allocation67_spill] sm:$0xff] %v3475_v25  ;;  %v1899_v7 = vmax.f32 %v3479_v56, %v4134_v35  ;;  %v1801_v32 = vrot.slane %v1608_v27, 7  ;;  %v1577_v48 = vadd.f32 %v2935_v6, %v1452_v13  ;;  %v2529_v44 = vpop.f32.mrf.mxu0  ;;  %v2565_v25 = vpop.f32.mrf.mxu1 }
 0x130   : > { %v1805_v50 = vrot.slane %v3481_v4, 7  ;;  %v3491_v21 = vadd.f32 %v2529_v44, %v2935_v6  ;;  %v1582_v38 = vadd.f32 %v2565_v25, %v2935_v6  ;;  %v1288_v35 = vmax.f32 %v1256_v34, 0.0 }
 0x131   : > { %v1929_v29 = vmax.f32 %v1899_v7, %v3456_v46  ;;  %v1881_v2 = vsel %vm1672_vm3, 0.0, %v1801_v32  ;;  %v1609_v1 = vmax.f32 %v1577_v48, 0.0  ;;  %v1144_v47 = vpop.f32.mrf.mxu0  ;;  %v1465_v5 = vpop.f32.mrf.mxu1  ;;  %v4135_v25 = vmax.f32 %v3466_v0, 0.0 }
 0x132   : > { %v1897_v13 = vmax.f32 %v1881_v2, %v1287_v3  ;;  %v2053_v57 = vmax.f32 %v3179_v24, %v1881_v2  ;;  %v3498_v37 = vsel %vm1672_vm3, %v1804_v51, %v1805_v50  ;;  %v3505_v34 = vmax.f32 %v1582_v38, 0.0 }
 0x133   : > { %v1961_v8 = vmax.f32 %v1929_v29, %v3214_v31  ;;  %v1900_v7 = vmax.f32 %v3498_v37, %v4135_v25  ;;  %v1802_v61 = vrot.slane %v1609_v1, 7  ;;  %v2530_v48 = vpop.f32.mrf.mxu0  ;;  %v2566_v20 = vpop.f32.mrf.mxu1  ;;  %v1259_v24 = vadd.f32 %v2935_v6, %v1144_v47 }
 0x134   : > { %v1927_v41 = vmax.f32 %v1897_v13, %v1608_v27  ;;  %v2085_v52 = vmax.f32 %v2053_v57, %v1287_v3  ;;  %v1580_v51 = vadd.f32 %v2935_v6, %v1465_v5  ;;  %v4136_v2 = vmax.f32 %v3107_v12, 0.0 }
 0x135   : > { %v1930_v31 = vmax.f32 %v1900_v7, %v3481_v4  ;;  %v1803_v38 = vsel %vm1672_vm3, %v1801_v32, %v1802_v61  ;;  %v1810_v29 = vrot.slane %v3505_v34, 7  ;;  %v1147_v57 = vpop.f32.mrf.mxu0  ;;  %v1468_v3 = vpop.f32.mrf.mxu1  ;;  %v4137_v61 = vmax.f32 %v3036_v63, 0.0 }
 0x136   : > { %v1993_v50 = vmax.f32 %v1961_v8, %v4136_v2  ;;  %v1959_v47 = vmax.f32 %v1927_v41, %v3127_v18  ;;  %v2117_v5 = vmax.f32 %v2085_v52, %v1608_v27  ;;  %v1898_v13 = vmax.f32 %v1803_v38, %v1288_v35 }
 0x137   : > { %v2054_v12 = vmax.f32 %v3227_v49, %v1803_v38  ;;  %v1962_v8 = vmax.f32 %v1930_v31, %v3260_v39  ;;  %v3524_v25 = vsel %vm1672_vm3, 0.0, %v1810_v29  ;;  %v1291_v2 = vmax.f32 %v1259_v24, 0.0  ;;  %v2533_v44 = vpop.f32.mrf.mxu0  ;;  %v2569_v45 = vpop.f32.mrf.mxu1 }
 0x138   : > { %v1612_v7 = vmax.f32 %v1580_v51, 0.0  ;;  %v1991_v32 = vmax.f32 %v1959_v47, %v4137_v61  ;;  %2149 = vst [vmem:[%s3515_s26] sm:$0xff] %v2117_v5  ;;  %v1928_v36 = vmax.f32 %v1898_v13, %v1609_v1  ;;  %v4138_v18 = vmax.f32 %v3491_v21, 0.0 }
 0x139   : > { %v2086_v59 = vmax.f32 %v2054_v12, %v1288_v35  ;;  %v4139_v49 = vmax.f32 %v3171_v11, 0.0  ;;  %v4140_v27 = vmax.f32 %v3096_v10, 0.0  ;;  %v3537_v51 = vadd.f32 %v2530_v48, %v2935_v6  ;;  %v1160_v63 = vpop.f32.mrf.mxu0  ;;  %v1481_v31 = vpop.f32.mrf.mxu1 }
 0x13a   : > { %v1903_v41 = vmax.f32 %v3524_v25, %v4138_v18  ;;  %v1807_v52 = vrot.slane %v1612_v7, 7  ;;  %v4141_v38 = vmax.f32 %v2938_v9, 0.0  ;;  %v1960_v47 = vmax.f32 %v1928_v36, %v2968_v26 }
 0x13b   : > { %v1994_v39 = vmax.f32 %v1962_v8, %v4139_v49  ;;  %v2025_v24 = vmax.f32 %v1993_v50, %v4140_v27  ;;  %v2118_v5 = vmax.f32 %v2086_v59, %v1609_v1  ;;  %v1294_v12 = vmax.f32 %v3537_v51, 0.0  ;;  %v2534_v48 = vpop.f32.mrf.mxu0  ;;  %v3547_v8 = vpop.f32.mrf.mxu1 }
 0x13c   : > { %v2023_v35 = vmax.f32 %v1991_v32, %v4141_v38  ;;  %v1933_v13 = vmax.f32 %v1903_v41, %v3505_v34  ;;  %v1883_v11 = vsel %vm1672_vm3, 0.0, %v1807_v52  ;;  %v1583_v10 = vadd.f32 %v2566_v20, %v2935_v6 }
 0x13d   : > { %v1260_v50 = vadd.f32 %v2935_v6, %v1147_v57  ;;  %v4142_v9 = vmax.f32 %v3090_v22, 0.0  ;;  %2150 = vst [vmem:[%s3515_s26 + $0x8] sm:$0xff] %v2118_v5  ;;  %v1901_v36 = vmax.f32 %v1883_v11, %v1291_v2  ;;  %v2057_v59 = vmax.f32 %v2025_v24, %v1883_v11 }
 0x13e   : > { %v2055_v61 = vmax.f32 %v2023_v35, %v3479_v56  ;;  %v1965_v26 = vmax.f32 %v1933_v13, %v3300_v14  ;;  %v3554_v1 = vmax.f32 %v1583_v10, 0.0  ;;  %v1581_v20 = vadd.f32 %v2935_v6, %v1468_v3  ;;  %v1163_v35 = vpop.f32.mrf.mxu0  ;;  %v1484_v14 = vpop.f32.mrf.mxu1 }
 0x13f   : > { %v1992_v32 = vmax.f32 %v1960_v47, %v4142_v9  ;;  %v1292_v18 = vmax.f32 %v1260_v50, 0.0  ;;  %v4143_v57 = vmax.f32 %v3433_v53, 0.0  ;;  %v4144_v49 = vmax.f32 %v2946_v15, 0.0 }
 0x140   : > { %v4145_v56 = vmax.f32 %v3191_v62, 0.0  ;;  %v1931_v38 = vmax.f32 %v1901_v36, %v1612_v7  ;;  %v2089_v47 = vmax.f32 %v2057_v59, %v1291_v2  ;;  %v1811_v24 = vrot.slane %v3554_v1, 7 }
 0x141   : > { %v2087_v41 = vmax.f32 %v2055_v61, %v4143_v57  ;;  %v2024_v27 = vmax.f32 %v1992_v32, %v4144_v49  ;;  %v1613_v5 = vmax.f32 %v1581_v20, 0.0  ;;  %v4146_v13 = vmax.f32 %v3137_v33, 0.0 }
 0x142   : > { %v1997_v22 = vmax.f32 %v1965_v26, %v4145_v56  ;;  %v1963_v11 = vmax.f32 %v1931_v38, %v3206_v40  ;;  %v3570_v62 = vadd.f32 %v2533_v44, %v2935_v6  ;;  %v2121_v10 = vmax.f32 %v2089_v47, %v1612_v7  ;;  %v2537_v44 = vpop.f32.mrf.mxu0 }
 0x143   : > { %v2026_v3 = vmax.f32 %v1994_v39, %v4146_v13  ;;  %v2119_v53 = vmax.f32 %v2087_v41, %v3456_v46  ;;  %v2056_v15 = vmax.f32 %v2024_v27, %v3498_v37  ;;  %v3573_v50 = vsel %vm1672_vm3, %v1810_v29, %v1811_v24  ;;  %v2573_v29 = vpop.f32.mrf.mxu1 }
 0x144   : > { %v1808_v2 = vrot.slane %v1613_v5, 7  ;;  %v1586_v61 = vadd.f32 %v2569_v45, %v2935_v6  ;;  %v4147_v33 = vmax.f32 %v3466_v0, 0.0  ;;  %v4148_v46 = vmax.f32 %v3103_v58, 0.0  ;;  %2153 = vst [vmem:[%s3515_s26 + $0x20] sm:$0xff] %v2121_v10  ;;  %v1176_v38 = vpop.f32.mrf.mxu0 }
 0x145   : > { %2151 = vst [vmem:[%s3515_s26 + $0x10] sm:$0xff] %v2119_v53  ;;  %v1904_v40 = vmax.f32 %v3573_v50, %v1294_v12  ;;  %v1297_v37 = vmax.f32 %v3570_v62, 0.0  ;;  %v1263_v0 = vadd.f32 %v2935_v6, %v1160_v63  ;;  %v1584_v32 = vadd.f32 %v2935_v6, %v1481_v31 }
 0x146   : > { %v2088_v39 = vmax.f32 %v2056_v15, %v4147_v33  ;;  %v1995_v9 = vmax.f32 %v1963_v11, %v4148_v46  ;;  %v1809_v7 = vsel %vm1672_vm3, %v1807_v52, %v1808_v2  ;;  %v3587_v45 = vmax.f32 %v1586_v61, 0.0  ;;  %v2538_v33 = vpop.f32.mrf.mxu0 }
 0x147   : > { %v4149_v26 = vmax.f32 %v2960_v23, 0.0  ;;  %v1934_v59 = vmax.f32 %v1904_v40, %v3554_v1  ;;  %v1902_v20 = vmax.f32 %v1809_v7, %v1292_v18  ;;  %v2058_v57 = vmax.f32 %v2026_v3, %v1809_v7  ;;  %v1497_v23 = vpop.f32.mrf.mxu1 }
 0x148   : > { %v2120_v58 = vmax.f32 %v2088_v39, %v3481_v4  ;;  %v1816_v41 = vrot.slane %v3587_v45, 7  ;;  %v1295_v49 = vmax.f32 %v1263_v0, 0.0  ;;  %v1616_v27 = vmax.f32 %v1584_v32, 0.0 }
 0x149   : > { %v2027_v36 = vmax.f32 %v1995_v9, %v4149_v26  ;;  %v1966_v63 = vmax.f32 %v1934_v59, %v3062_v17  ;;  %v1932_v56 = vmax.f32 %v1902_v20, %v1613_v5  ;;  %v4150_v31 = vmax.f32 %v3002_v43, 0.0  ;;  %v2574_v39 = vpop.f32.mrf.mxu1 }
 0x14a   : > { %2152 = vst [vmem:[%s3515_s26 + $0x18] sm:$0xff] %v2120_v58  ;;  %v2090_v47 = vmax.f32 %v2058_v57, %v1292_v18  ;;  %v3602_v24 = vsel %vm1672_vm3, 0.0, %v1816_v41  ;;  %v1813_v13 = vrot.slane %v1616_v27, 7  ;;  %v3605_v3 = vadd.f32 %v2534_v48, %v2935_v6 }
 0x14b   : > { %v2059_v52 = vmax.f32 %v2027_v36, %v3524_v25  ;;  %v2029_v4 = vmax.f32 %v1997_v22, %v4150_v31  ;;  %v4151_v53 = vmax.f32 %v3491_v21, 0.0  ;;  %v4152_v17 = vmax.f32 %v3238_v28, 0.0  ;;  %v4157_v31 = vld [vmem:[#allocation19_spill] sm:$0xff] }
 0x14c   : > { %v1964_v43 = vmax.f32 %v1932_v56, %v2999_v42  ;;  %v1907_v18 = vmax.f32 %v3602_v24, %v1297_v37  ;;  %v2122_v22 = vmax.f32 %v2090_v47, %v1613_v5  ;;  %v1885_v11 = vsel %vm1672_vm3, 0.0, %v1813_v13  ;;  %v4159_v47 = vld [vmem:[#allocation5_spill] sm:$0xff] }
 0x14d   : > { %v2091_v25 = vmax.f32 %v2059_v52, %v4151_v53  ;;  %v1998_v15 = vmax.f32 %v1966_v63, %v4152_v17  ;;  %v1298_v10 = vmax.f32 %v3605_v3, 0.0  ;;  %v1587_v48 = vadd.f32 %v3547_v8, %v2935_v6  ;;  %v1500_v52 = vpop.f32.mrf.mxu1 }
 0x14e   : > { %v4153_v28 = vmax.f32 %v3156_v16, 0.0  ;;  %v1937_v42 = vmax.f32 %v1907_v18, %v3587_v45  ;;  %v1905_v61 = vmax.f32 %v1885_v11, %v1295_v49  ;;  %2154 = vst [vmem:[%s3515_s26 + $0x28] sm:$0xff] %v2122_v22  ;;  %v2061_v46 = vmax.f32 %v2029_v4, %v1885_v11 }
 0x14f   : > { %v2123_v21 = vmax.f32 %v2091_v25, %v3505_v34  ;;  %v3624_v5 = vmax.f32 %v1587_v48, 0.0  ;;  %v1264_v9 = vadd.f32 %v2935_v6, %v1163_v35  ;;  %v1585_v40 = vadd.f32 %v2935_v6, %v1484_v14  ;;  %v2577_v18 = vpop.f32.mrf.mxu1 }
 0x150   : > { %v1996_v2 = vmax.f32 %v1964_v43, %v4153_v28  ;;  %v4154_v8 = vmax.f32 %v2974_v30, 0.0  ;;  %v1969_v16 = vmax.f32 %v1937_v42, %v3329_v60  ;;  %v1935_v7 = vmax.f32 %v1905_v61, %v1616_v27  ;;  %v1179_v60 = vpop.f32.mrf.mxu0 }
 0x151   : > { %2155 = vst [vmem:[%s3515_s26 + $0x30] sm:$0xff] %v2123_v21  ;;  %v4155_v0 = vmax.f32 %v3019_v54, 0.0  ;;  %v2093_v58 = vmax.f32 %v2061_v46, %v1295_v49  ;;  %v1817_v26 = vrot.slane %v3624_v5, 7  ;;  %v1296_v36 = vmax.f32 %v1264_v9, 0.0  ;;  %v4161_v21 = vld [vmem:[#allocation16_spill] sm:$0xff] }
 0x152   : > { %v2028_v34 = vmax.f32 %v1996_v2, %v4154_v8  ;;  %v1617_v59 = vmax.f32 %v1585_v40, 0.0  ;;  %v4156_v14 = vmax.f32 %v3268_v55, 0.0  ;;  %v1967_v30 = vmax.f32 %v1935_v7, %v3264_v19  ;;  %v2541_v43 = vpop.f32.mrf.mxu0  ;;  %v4166_v7 = vld [vmem:[#allocation8_spill] sm:$0xff] }
 0x153   : > { %v2030_v32 = vmax.f32 %v1998_v15, %v4155_v0  ;;  %v3640_v57 = vadd.f32 %v2537_v44, %v2935_v6  ;;  %v2125_v54 = vmax.f32 %v2093_v58, %v1616_v27  ;;  %v3643_v49 = vsel %vm1672_vm3, %v1816_v41, %v1817_v26  ;;  %v1513_v26 = vpop.f32.mrf.mxu1 }
 0x154   : > { %v2060_v35 = vmax.f32 %v2028_v34, %v3573_v50  ;;  %v2001_v20 = vmax.f32 %v1969_v16, %v4156_v14  ;;  %v1814_v63 = vrot.slane %v1617_v59, 7  ;;  %v1590_v56 = vadd.f32 %v2573_v29, %v2935_v6  ;;  %v4164_v34 = vld [vmem:[#allocation29_spill] sm:$0xff]  ;;  %v1192_v58 = vpop.f32.mrf.mxu0  ;;  %v4167_v14 = vld [vmem:[#allocation24_spill] sm:$0xff] }
 0x155   : > { %v4158_v55 = vmax.f32 %v4157_v31, 0.0  ;;  %v1908_v19 = vmax.f32 %v3643_v49, %v1298_v10  ;;  %v1301_v44 = vmax.f32 %v3640_v57, 0.0  ;;  %2157 = vst [vmem:[%s3515_s26 + $0x40] sm:$0xff] %v2125_v54  ;;  %v1267_v29 = vadd.f32 %v2935_v6, %v1176_v38 }
 0x156   : > { %v2092_v50 = vmax.f32 %v2060_v35, %v1294_v12  ;;  %v1815_v41 = vsel %vm1672_vm3, %v1813_v13, %v1814_v63  ;;  %v3656_v27 = vmax.f32 %v1590_v56, 0.0  ;;  %v1588_v51 = vadd.f32 %v2935_v6, %v1497_v23 }
 0x157   : > { %v1999_v4 = vmax.f32 %v1967_v30, %v4158_v55  ;;  %v4160_v53 = vmax.f32 %v4159_v47, 0.0  ;;  %v1938_v17 = vmax.f32 %v1908_v19, %v3624_v5  ;;  %v1906_v15 = vmax.f32 %v1815_v41, %v1296_v36  ;;  %v4169_v55 = vld [vmem:[#allocation6_spill] sm:$0xff]  ;;  %v4171_v19 = vld [vmem:[#allocation53_spill] sm:$0xff]  ;;  %v2542_v47 = vpop.f32.mrf.mxu0 }
 0x158   : > { %v2124_v12 = vmax.f32 %v2092_v50, %v3554_v1  ;;  %v2062_v22 = vmax.f32 %v2030_v32, %v1815_v41  ;;  %v1822_v11 = vrot.slane %v3656_v27, 7  ;;  %v1299_v13 = vmax.f32 %v1267_v29, 0.0  ;;  %v4162_v1 = vld [vmem:[#allocation9_spill] sm:$0xff]  ;;  %v4172_v29 = vld [vmem:[#allocation11_spill] sm:$0xff] }
 0x159   : > { %v2031_v25 = vmax.f32 %v1999_v4, %v4160_v53  ;;  %v1620_v48 = vmax.f32 %v1588_v51, 0.0  ;;  %v1970_v23 = vmax.f32 %v1938_v17, %v4161_v21  ;;  %v1936_v28 = vmax.f32 %v1906_v15, %v1617_v59  ;;  %v2578_v53 = vpop.f32.mrf.mxu1 }
 0x15a   : > { %2156 = vst [vmem:[%s3515_s26 + $0x38] sm:$0xff] %v2124_v12  ;;  %v4163_v2 = vmax.f32 %v4162_v1, 0.0  ;;  %v2094_v61 = vmax.f32 %v2062_v22, %v1296_v36  ;;  %v3671_v46 = vsel %vm1672_vm3, 0.0, %v1822_v11  ;;  %v3674_v40 = vadd.f32 %v2538_v33, %v2935_v6  ;;  %v4174_v22 = vld [vmem:[#allocation35_spill] sm:$0xff] }
 0x15b   : > { %v2063_v38 = vmax.f32 %v2031_v25, %v3602_v24  ;;  %v1819_v9 = vrot.slane %v1620_v48, 7  ;;  %v4165_v24 = vmax.f32 %v4164_v34, 0.0  ;;  %v1968_v0 = vmax.f32 %v1936_v28, %v4166_v7  ;;  %v4177_v34 = vld [vmem:[#allocation26_spill] sm:$0xff]  ;;  %v1195_v7 = vpop.f32.mrf.mxu0 }
 0x15c   : > { %v2033_v42 = vmax.f32 %v2001_v20, %v4163_v2  ;;  %v1911_v32 = vmax.f32 %v3671_v46, %v1301_v44  ;;  %v2126_v36 = vmax.f32 %v2094_v61, %v1617_v59  ;;  %v1302_v33 = vmax.f32 %v3674_v40, 0.0 }
 0x15d   : > { %v2095_v8 = vmax.f32 %v2063_v38, %v1297_v37  ;;  %v2002_v16 = vmax.f32 %v1970_v23, %v4165_v24  ;;  %v1887_v35 = vsel %vm1672_vm3, 0.0, %v1819_v9  ;;  %v1591_v62 = vadd.f32 %v2574_v39, %v2935_v6  ;;  %v4176_v23 = vld [vmem:[#allocation37_spill] sm:$0xff] }
 0x15e   : > { %v4168_v20 = vmax.f32 %v4167_v14, 0.0  ;;  %v1941_v54 = vmax.f32 %v1911_v32, %v3656_v27  ;;  %v1909_v63 = vmax.f32 %v1887_v35, %v1299_v13  ;;  %2158 = vst [vmem:[%s3515_s26 + $0x48] sm:$0xff] %v2126_v36  ;;  %v2065_v56 = vmax.f32 %v2033_v42, %v1887_v35  ;;  %v4179_v32 = vld [vmem:[#allocation7_spill] sm:$0xff] }
 0x15f   : > { %v2127_v37 = vmax.f32 %v2095_v8, %v3587_v45  ;;  %v3692_v50 = vmax.f32 %v1591_v62, 0.0  ;;  %v1268_v59 = vadd.f32 %v2935_v6, %v1179_v60  ;;  %v1589_v31 = vadd.f32 %v2935_v6, %v1500_v52 }
 0x160   : > { %v2000_v30 = vmax.f32 %v1968_v0, %v4168_v20  ;;  %v4170_v4 = vmax.f32 %v4169_v55, 0.0  ;;  %v1973_v45 = vmax.f32 %v1941_v54, %v4171_v19  ;;  %v1939_v41 = vmax.f32 %v1909_v63, %v1620_v48  ;;  %v4181_v63 = vld [vmem:[#allocation23_spill] sm:$0xff] }
 0x161   : > { %2159 = vst [vmem:[%s3515_s26 + $0x50] sm:$0xff] %v2127_v37  ;;  %v4173_v51 = vmax.f32 %v4172_v29, 0.0  ;;  %v2097_v25 = vmax.f32 %v2065_v56, %v1299_v13  ;;  %v1823_v17 = vrot.slane %v3692_v50, 7  ;;  %v1300_v15 = vmax.f32 %v1268_v59, 0.0 }
 0x162   : > { %v2032_v39 = vmax.f32 %v2000_v30, %v4170_v4  ;;  %v1621_v60 = vmax.f32 %v1589_v31, 0.0  ;;  %v4175_v38 = vmax.f32 %v4174_v22, 0.0  ;;  %v1971_v28 = vmax.f32 %v1939_v41, %v4176_v23  ;;  %v2545_v31 = vpop.f32.mrf.mxu0  ;;  %v4184_v41 = vld [vmem:[#allocation41_spill] sm:$0xff] }
 0x163   : > { %v2034_v12 = vmax.f32 %v2002_v16, %v4173_v51  ;;  %v3708_v1 = vadd.f32 %v2541_v43, %v2935_v6  ;;  %v2129_v2 = vmax.f32 %v2097_v25, %v1620_v48  ;;  %v3711_v42 = vsel %vm1672_vm3, %v1822_v11, %v1823_v17  ;;  %v1516_v48 = vpop.f32.mrf.mxu1 }
 0x164   : > { %v2064_v52 = vmax.f32 %v2032_v39, %v3643_v49  ;;  %v2005_v21 = vmax.f32 %v1973_v45, %v4175_v38  ;;  %v1820_v13 = vrot.slane %v1621_v60, 7  ;;  %v1594_v61 = vadd.f32 %v2577_v18, %v2935_v6  ;;  %v3726_v6 = vld [vmem:[#allocation2] ss:$0 sm:$0xff] }
 0x165   : > { %v4178_v49 = vmax.f32 %v4177_v34, 0.0  ;;  %v1912_v16 = vmax.f32 %v3711_v42, %v1302_v33  ;;  %v1305_v43 = vmax.f32 %v3708_v1, 0.0  ;;  %2161 = vst [vmem:[%s3515_s26 + $0x60] sm:$0xff] %v2129_v2  ;;  %v1271_v3 = vadd.f32 %v3726_v6, %v1192_v58  ;;  %v2581_v55 = vpop.f32.mrf.mxu1  ;;  %v1208_v2 = vpop.f32.mrf.mxu0 }
 0x166   : > { %v2096_v8 = vmax.f32 %v2064_v52, %v1298_v10  ;;  %v1821_v11 = vsel %vm1672_vm3, %v1819_v9, %v1820_v13  ;;  %v3724_v0 = vmax.f32 %v1594_v61, 0.0  ;;  %v1592_v10 = vadd.f32 %v3726_v6, %v1513_v26  ;;  %v4182_v26 = vld [vmem:[#allocation14_spill] sm:$0xff] }
 0x167   : > { %v2003_v24 = vmax.f32 %v1971_v28, %v4178_v49  ;;  %v4180_v36 = vmax.f32 %v4179_v32, 0.0  ;;  %v1942_v62 = vmax.f32 %v1912_v16, %v3692_v50  ;;  %v1910_v37 = vmax.f32 %v1821_v11, %v1300_v15  ;;  %v1529_v13 = vpop.f32.mrf.mxu1 }
 0x168   : > { %v2128_v18 = vmax.f32 %v2096_v8, %v3624_v5  ;;  %v2066_v14 = vmax.f32 %v2034_v12, %v1821_v11  ;;  %v1828_v20 = vrot.slane %v3724_v0, 7  ;;  %v1303_v9 = vmax.f32 %v1271_v3, 0.0  ;;  %v4186_v12 = vld [vmem:[#allocation13_spill] sm:$0xff] }
 0x169   : > { %v2035_v35 = vmax.f32 %v2003_v24, %v4180_v36  ;;  %v1624_v30 = vmax.f32 %v1592_v10, 0.0  ;;  %v1974_v58 = vmax.f32 %v1942_v62, %v4181_v63  ;;  %v1940_v56 = vmax.f32 %v1910_v37, %v1621_v60  ;;  %v4191_v24 = vld [vmem:[#allocation61_spill] sm:$0xff]  ;;  %v4194_v37 = vld [vmem:[#allocation46_spill] sm:$0xff] }
 0x16a   : > { %2160 = vst [vmem:[%s3515_s26 + $0x58] sm:$0xff] %v2128_v18  ;;  %v4183_v59 = vmax.f32 %v4182_v26, 0.0  ;;  %v2098_v4 = vmax.f32 %v2066_v14, %v1300_v15  ;;  %v3741_v39 = vsel %vm1672_vm3, 0.0, %v1828_v20  ;;  %v3744_v45 = vadd.f32 %v3726_v6, %v2542_v47  ;;  %v4192_v3 = vld [vmem:[#allocation17_spill] sm:$0xff]  ;;  %v2582_v26 = vpop.f32.mrf.mxu1 }
 0x16b   : > { %v2067_v54 = vmax.f32 %v2035_v35, %v3671_v46  ;;  %v1825_v19 = vrot.slane %v1624_v30, 7  ;;  %v4185_v29 = vmax.f32 %v4184_v41, 0.0  ;;  %v1972_v25 = vmax.f32 %v1940_v56, %v4186_v12  ;;  %v2546_v56 = vpop.f32.mrf.mxu0  ;;  %v4199_v12 = vld [vmem:[#allocation12_spill] sm:$0xff] }
 0x16c   : > { %v2037_v5 = vmax.f32 %v2005_v21, %v4183_v59  ;;  %v1915_v17 = vmax.f32 %v3741_v39, %v1305_v43  ;;  %v2130_v15 = vmax.f32 %v2098_v4, %v1621_v60  ;;  %v1306_v22 = vmax.f32 %v3744_v45, 0.0 }
 0x16d   : > { %v2099_v46 = vmax.f32 %v2067_v54, %v1301_v44  ;;  %v2006_v51 = vmax.f32 %v1974_v58, %v4185_v29  ;;  %v1889_v52 = vsel %vm1672_vm3, 0.0, %v1825_v19  ;;  %v1595_v47 = vadd.f32 %v3726_v6, %v2578_v53  ;;  %v4187_v44 = vld [vmem:[#allocation28_spill] sm:$0xff]  ;;  %v4189_v53 = vld [vmem:[#allocation10_spill] sm:$0xff]  ;;  %v4196_v54 = vld [vmem:[#allocation45_spill] sm:$0xff] }
 0x16e   : > { %v4188_v38 = vmax.f32 %v4187_v44, 0.0  ;;  %v1945_v23 = vmax.f32 %v1915_v17, %v3724_v0  ;;  %v1913_v28 = vmax.f32 %v1889_v52, %v1303_v9  ;;  %2162 = vst [vmem:[%s3515_s26 + $0x68] sm:$0xff] %v2130_v15  ;;  %v2069_v61 = vmax.f32 %v2037_v5, %v1889_v52 }
 0x16f   : > { %v2131_v57 = vmax.f32 %v2099_v46, %v3656_v27  ;;  %v3762_v8 = vmax.f32 %v1595_v47, 0.0  ;;  %v1272_v60 = vadd.f32 %v3726_v6, %v1195_v7  ;;  %v1593_v34 = vadd.f32 %v3726_v6, %v1516_v48  ;;  %v4197_v46 = vld [vmem:[#allocation34_spill] sm:$0xff]  ;;  %v1211_v47 = vpop.f32.mrf.mxu0 }
 0x170   : > { %v2004_v21 = vmax.f32 %v1972_v25, %v4188_v38  ;;  %v4190_v49 = vmax.f32 %v4189_v53, 0.0  ;;  %v1977_v16 = vmax.f32 %v1945_v23, %v4191_v24  ;;  %v1943_v11 = vmax.f32 %v1913_v28, %v1624_v30  ;;  %v4201_v28 = vld [vmem:[#allocation36_spill] sm:$0xff] }
 0x171   : > { %2163 = vst [vmem:[%s3515_s26 + $0x70] sm:$0xff] %v2131_v57  ;;  %v4193_v10 = vmax.f32 %v4192_v3, 0.0  ;;  %v2101_v32 = vmax.f32 %v2069_v61, %v1303_v9  ;;  %v1829_v36 = vrot.slane %v3762_v8, 7  ;;  %v1304_v35 = vmax.f32 %v1272_v60, 0.0  ;;  %v1532_v57 = vpop.f32.mrf.mxu1  ;;  %v4206_v3 = vld [vmem:[#allocation20_spill] sm:$0xff] }
 0x172   : > { %v2036_v27 = vmax.f32 %v2004_v21, %v4190_v49  ;;  %v1625_v62 = vmax.f32 %v1593_v34, 0.0  ;;  %v4195_v48 = vmax.f32 %v4194_v37, 0.0  ;;  %v1975_v63 = vmax.f32 %v1943_v11, %v4196_v54 }
 0x173   : > { %v2038_v18 = vmax.f32 %v2006_v51, %v4193_v10  ;;  %v3778_v58 = vadd.f32 %v3726_v6, %v2545_v31  ;;  %v2133_v59 = vmax.f32 %v2101_v32, %v1624_v30  ;;  %v3781_v9 = vsel %vm1672_vm3, %v1828_v20, %v1829_v36  ;;  %v2549_v32 = vpop.f32.mrf.mxu0  ;;  %v2585_v36 = vpop.f32.mrf.mxu1 }
 0x174   : > { %v2068_v7 = vmax.f32 %v2036_v27, %v3711_v42  ;;  %v2009_v14 = vmax.f32 %v1977_v16, %v4195_v48  ;;  %v1826_v5 = vrot.slane %v1625_v62, 7  ;;  %v1598_v4 = vadd.f32 %v3726_v6, %v2581_v55  ;;  %v4204_v16 = vld [vmem:[#allocation49_spill] sm:$0xff]  ;;  %v4207_v48 = vld [vmem:[#allocation38_spill] sm:$0xff] }
 0x175   : > { %v4198_v41 = vmax.f32 %v4197_v46, 0.0  ;;  %v1916_v31 = vmax.f32 %v3781_v9, %v1306_v22  ;;  %v1309_v51 = vmax.f32 %v3778_v58, 0.0  ;;  %2165 = vst [vmem:[%s3515_s26 + $0x80] sm:$0xff] %v2133_v59  ;;  %v1275_v55 = vadd.f32 %v3726_v6, %v1208_v2 }
 0x176   : > { %v2100_v42 = vmax.f32 %v2068_v7, %v1302_v33  ;;  %v1827_v20 = vsel %vm1672_vm3, %v1825_v19, %v1826_v5  ;;  %v3794_v30 = vmax.f32 %v1598_v4, 0.0  ;;  %v1596_v40 = vadd.f32 %v3726_v6, %v1529_v13 }
 0x177   : > { %v2007_v29 = vmax.f32 %v1975_v63, %v4198_v41  ;;  %v4200_v25 = vmax.f32 %v4199_v12, 0.0  ;;  %v1946_v15 = vmax.f32 %v1916_v31, %v3762_v8  ;;  %v1914_v52 = vmax.f32 %v1827_v20, %v1304_v35  ;;  %v4211_v41 = vld [vmem:[#allocation66_spill] sm:$0xff]  ;;  %v4212_v31 = vld [vmem:[#allocation25_spill] sm:$0xff] }
 0x178   : > { %v2132_v33 = vmax.f32 %v2100_v42, %v3692_v50  ;;  %v2070_v44 = vmax.f32 %v2038_v18, %v1827_v20  ;;  %v1834_v38 = vrot.slane %v3794_v30, 7  ;;  %v1307_v19 = vmax.f32 %v1275_v55, 0.0  ;;  %v4202_v50 = vld [vmem:[#allocation21_spill] sm:$0xff]  ;;  %v4209_v42 = vld [vmem:[#allocation15_spill] sm:$0xff] }
 0x179   : > { %v2039_v17 = vmax.f32 %v2007_v29, %v4200_v25  ;;  %v1628_v21 = vmax.f32 %v1596_v40, 0.0  ;;  %v1978_v2 = vmax.f32 %v1946_v15, %v4201_v28  ;;  %v1944_v13 = vmax.f32 %v1914_v52, %v1625_v62  ;;  %v1224_v40 = vpop.f32.mrf.mxu0 }
 0x17a   : > { %2164 = vst [vmem:[%s3515_s26 + $0x78] sm:$0xff] %v2132_v33  ;;  %v4203_v61 = vmax.f32 %v4202_v50, 0.0  ;;  %v2102_v34 = vmax.f32 %v2070_v44, %v1304_v35  ;;  %v3809_v53 = vsel %vm1672_vm3, 0.0, %v1834_v38  ;;  %v3812_v27 = vadd.f32 %v3726_v6, %v2546_v56  ;;  %v1545_v33 = vpop.f32.mrf.mxu1 }
 0x17b   : > { %v2071_v23 = vmax.f32 %v2039_v17, %v3741_v39  ;;  %v1831_v49 = vrot.slane %v1628_v21, 7  ;;  %v4205_v39 = vmax.f32 %v4204_v16, 0.0  ;;  %v1976_v10 = vmax.f32 %v1944_v13, %v4206_v3 }
 0x17c   : > { %v2041_v60 = vmax.f32 %v2009_v14, %v4203_v61  ;;  %v1919_v18 = vmax.f32 %v3809_v53, %v1309_v51  ;;  %v2134_v35 = vmax.f32 %v2102_v34, %v1625_v62  ;;  %v1310_v37 = vmax.f32 %v3812_v27, 0.0  ;;  %v4217_v34 = vld [vmem:[#allocation44_spill] sm:$0xff] }
 0x17d   : > { %v2103_v24 = vmax.f32 %v2071_v23, %v1305_v43  ;;  %v2010_v11 = vmax.f32 %v1978_v2, %v4205_v39  ;;  %v1891_v7 = vsel %vm1672_vm3, 0.0, %v1831_v49  ;;  %v1599_v1 = vadd.f32 %v3726_v6, %v2582_v26  ;;  %v4216_v23 = vld [vmem:[#allocation57_spill] sm:$0xff] }
 0x17e   : > { %v4208_v14 = vmax.f32 %v4207_v48, 0.0  ;;  %v1949_v63 = vmax.f32 %v1919_v18, %v3794_v30  ;;  %v1917_v56 = vmax.f32 %v1891_v7, %v1307_v19  ;;  %2166 = vst [vmem:[%s3515_s26 + $0x88] sm:$0xff] %v2134_v35  ;;  %v2073_v59 = vmax.f32 %v2041_v60, %v1891_v7  ;;  %v4219_v18 = vld [vmem:[#allocation18_spill] sm:$0xff] }
 0x17f   : > { %v2135_v43 = vmax.f32 %v2103_v24, %v3724_v0  ;;  %v3830_v5 = vmax.f32 %v1599_v1, 0.0  ;;  %v1276_v62 = vadd.f32 %v3726_v6, %v1211_v47  ;;  %v1597_v4 = vadd.f32 %v3726_v6, %v1532_v57  ;;  %v4214_v47 = vld [vmem:[#allocation58_spill] sm:$0xff]  ;;  %v4221_v1 = vld [vmem:[#allocation64_spill] sm:$0xff] }
 0x180   : > { %v2008_v54 = vmax.f32 %v1976_v10, %v4208_v14  ;;  %v4210_v46 = vmax.f32 %v4209_v42, 0.0  ;;  %v1981_v0 = vmax.f32 %v1949_v63, %v4211_v41  ;;  %v1947_v29 = vmax.f32 %v1917_v56, %v1628_v21  ;;  %v4222_v63 = vld [vmem:[#allocation55_spill] sm:$0xff] }
 0x181   : > { %2167 = vst [vmem:[%s3515_s26 + $0x90] sm:$0xff] %v2135_v43  ;;  %v4213_v20 = vmax.f32 %v4212_v31, 0.0  ;;  %v2105_v12 = vmax.f32 %v2073_v59, %v1307_v19  ;;  %v1835_v25 = vrot.slane %v3830_v5, 7  ;;  %v1308_v17 = vmax.f32 %v1276_v62, 0.0 }
 0x182   : > { %v2040_v26 = vmax.f32 %v2008_v54, %v4210_v46  ;;  %v1629_v15 = vmax.f32 %v1597_v4, 0.0  ;;  %v4215_v57 = vmax.f32 %v4214_v47, 0.0  ;;  %v1979_v28 = vmax.f32 %v1947_v29, %v4216_v23 }
 0x183   : > { %v2042_v55 = vmax.f32 %v2010_v11, %v4213_v20  ;;  %v3846_v2 = vadd.f32 %v3726_v6, %v2549_v32  ;;  %v2137_v13 = vmax.f32 %v2105_v12, %v1628_v21  ;;  %v3849_v50 = vsel %vm1672_vm3, %v1834_v38, %v1835_v25  ;;  %v2550_v21 = vpop.f32.mrf.mxu0  ;;  %v2586_v11 = vpop.f32.mrf.mxu1  ;;  %v4225_v20 = vld [vmem:[#allocation62_spill] sm:$0xff] }
 0x184   : > { %v2072_v52 = vmax.f32 %v2040_v26, %v3781_v9  ;;  %v2013_v44 = vmax.f32 %v1981_v0, %v4215_v57  ;;  %v1832_v19 = vrot.slane %v1629_v15, 7  ;;  %v1602_v61 = vadd.f32 %v3726_v6, %v2585_v36 }
 0x185   : > { %v4218_v9 = vmax.f32 %v4217_v34, 0.0  ;;  %v1920_v16 = vmax.f32 %v3849_v50, %v1310_v37  ;;  %v1313_v39 = vmax.f32 %v3846_v2, 0.0  ;;  %2169 = vst [vmem:[%s3515_s26 + $0xa0] sm:$0xff] %v2137_v13  ;;  %v1279_v45 = vadd.f32 %v3726_v6, %v1224_v40  ;;  %v1227_v42 = vpop.f32.mrf.mxu0  ;;  %v1548_v46 = vpop.f32.mrf.mxu1  ;;  %v4227_v40 = vld [vmem:[#allocation30_spill] sm:$0xff] }
 0x186   : > { %v2104_v60 = vmax.f32 %v2072_v52, %v1306_v22  ;;  %v1833_v38 = vsel %vm1672_vm3, %v1831_v49, %v1832_v19  ;;  %v3862_v3 = vmax.f32 %v1602_v61, 0.0  ;;  %v1600_v22 = vadd.f32 %v3726_v6, %v1545_v33 }
 0x187   : > { %v2011_v24 = vmax.f32 %v1979_v28, %v4218_v9  ;;  %v4220_v32 = vmax.f32 %v4219_v18, 0.0  ;;  %v1950_v35 = vmax.f32 %v1920_v16, %v3830_v5  ;;  %v1918_v7 = vmax.f32 %v1833_v38, %v1308_v17  ;;  %v3898_v13 = vpop.f32.mrf.mxu0  ;;  %v2589_v19 = vpop.f32.mrf.mxu1  ;;  %v4230_v9 = vld [vmem:[#allocation22_spill] sm:$0xff] }
 0x188   : > { %v2136_v10 = vmax.f32 %v2104_v60, %v3762_v8  ;;  %v1767_v43 = vsel %vm1672_vm3, 0.0, %v4221_v1  ;;  %v2074_v48 = vmax.f32 %v2042_v55, %v1833_v38  ;;  %v1840_v49 = vrot.slane %v3862_v3, 7  ;;  %v4223_v8 = vld [vmem:[#allocation31_spill] sm:$0xff] }
 0x189   : > { %v2043_v36 = vmax.f32 %v2011_v24, %v4220_v32  ;;  %v1632_v14 = vmax.f32 %v1600_v22, 0.0  ;;  %v1982_v56 = vmax.f32 %v1950_v35, %v4222_v63  ;;  %v1948_v59 = vmax.f32 %v1918_v7, %v1629_v15  ;;  %v4234_v22 = vld [vmem:[#allocation42_spill] sm:$0xff]  ;;  %v4235_v7 = vld [vmem:[#allocation63_spill] sm:$0xff]  ;;  %v1240_v63 = vpop.f32.mrf.mxu0 }
 0x18a   : > { %2168 = vst [vmem:[%s3515_s26 + $0x98] sm:$0xff] %v2136_v10  ;;  %v4224_v62 = vmax.f32 %v4223_v8, 0.0  ;;  %v2106_v26 = vmax.f32 %v2074_v48, %v1308_v17  ;;  %v3879_v41 = vsel %vm1672_vm3, 0.0, %v1840_v49  ;;  %v1311_v0 = vmax.f32 %v1279_v45, 0.0 }
 0x18b   : > { %v2075_v54 = vmax.f32 %v2043_v36, %v3809_v53  ;;  %v1837_v29 = vrot.slane %v1632_v14, 7  ;;  %v4226_v53 = vmax.f32 %v4225_v20, 0.0  ;;  %v1980_v33 = vmax.f32 %v1948_v59, %v4227_v40  ;;  %v4237_v59 = vld [vmem:[#allocation56_spill] sm:$0xff] }
 0x18c   : > { %v2045_v4 = vmax.f32 %v2013_v44, %v4224_v62  ;;  %v1923_v12 = vmax.f32 %v3879_v41, %v1313_v39  ;;  %v2138_v25 = vmax.f32 %v2106_v26, %v1629_v15  ;;  %v3891_v52 = vadd.f32 %v3726_v6, %v2550_v21  ;;  %v4238_v26 = vld [vmem:[#allocation54_spill] sm:$0xff] }
 0x18d   : > { %v2107_v31 = vmax.f32 %v2075_v54, %v1309_v51  ;;  %v2014_v55 = vmax.f32 %v1982_v56, %v4226_v53  ;;  %v1893_v17 = vsel %vm1672_vm3, 0.0, %v1837_v29  ;;  %v1603_v47 = vadd.f32 %v3726_v6, %v2586_v11  ;;  %v4228_v51 = vld [vmem:[#allocation47_spill] sm:$0xff]  ;;  %v1561_v56 = vpop.f32.mrf.mxu1  ;;  %v4240_v53 = vld [vmem:[#allocation32_spill] sm:$0xff] }
 0x18e   : > { %v4229_v57 = vmax.f32 %v4228_v51, 0.0  ;;  %v1953_v23 = vmax.f32 %v1923_v12, %v3862_v3  ;;  %v1921_v28 = vmax.f32 %v1893_v17, %v1311_v0  ;;  %2170 = vst [vmem:[%s3515_s26 + $0xa8] sm:$0xff] %v2138_v25  ;;  %v2077_v15 = vmax.f32 %v2045_v4, %v1893_v17  ;;  %v4232_v11 = vld [vmem:[#allocation39_spill] sm:$0xff] }
 0x18f   : > { %v2139_v58 = vmax.f32 %v2107_v31, %v3794_v30  ;;  %v3901_v61 = vmax.f32 %v1603_v47, 0.0  ;;  %v1280_v60 = vadd.f32 %v3726_v6, %v1227_v42  ;;  %v1601_v34 = vadd.f32 %v3726_v6, %v1548_v46  ;;  %v2590_v47 = vpop.f32.mrf.mxu1 }
 0x190   : > { %v2012_v44 = vmax.f32 %v1980_v33, %v4229_v57  ;;  %v4231_v30 = vmax.f32 %v4230_v9, 0.0  ;;  %v1985_v16 = vmax.f32 %v1953_v23, %v1767_v43  ;;  %v1951_v21 = vmax.f32 %v1921_v28, %v1632_v14  ;;  %v4243_v23 = vld [vmem:[#allocation67_spill] sm:$0xff] }
 0x191   : > { %2171 = vst [vmem:[%s3515_s26 + $0xb0] sm:$0xff] %v2139_v58  ;;  %v4233_v38 = vmax.f32 %v4232_v11, 0.0  ;;  %v1766_v10 = vsel %vm1672_vm3, 0.0, %v4234_v22  ;;  %v2109_v18 = vmax.f32 %v2077_v15, %v1311_v0  ;;  %v1841_v32 = vrot.slane %v3901_v61, 7  ;;  %v1564_v22 = vpop.f32.mrf.mxu1 }
 0x192   : > { %v2044_v24 = vmax.f32 %v2012_v44, %v4231_v30  ;;  %v1633_v36 = vmax.f32 %v1601_v34, 0.0  ;;  %v4236_v1 = vmax.f32 %v4235_v7, 0.0  ;;  %v1983_v54 = vmax.f32 %v1951_v21, %v1766_v10  ;;  %v3936_v44 = vpop.f32.mrf.mxu0  ;;  %v4247_v10 = vld [vmem:[#allocation40_spill] sm:$0xff] }
 0x193   : > { %v2046_v45 = vmax.f32 %v2014_v55, %v4233_v38  ;;  %v1314_v43 = vmax.f32 %v3891_v52, 0.0  ;;  %v642_v8 = vadd.f32 %v3726_v6, %v4237_v59  ;;  %v2141_v62 = vmax.f32 %v2109_v18, %v1632_v14  ;;  %v4246_v38 = vld [vmem:[#allocation48_spill] sm:$0xff] }
 0x194   : > { %v2076_v35 = vmax.f32 %v2044_v24, %v3849_v50  ;;  %v2017_v48 = vmax.f32 %v1985_v16, %v4236_v1  ;;  %v1842_v4 = vsel %vm1672_vm3, %v1840_v49, %v1841_v32  ;;  %v1838_v42 = vrot.slane %v1633_v36, 7  ;;  %v1243_v7 = vpop.f32.mrf.mxu0 }
 0x195   : > { %v4239_v50 = vmax.f32 %v4238_v26, 0.0  ;;  %v1924_v31 = vmax.f32 %v1842_v4, %v1314_v43  ;;  %v1312_v20 = vmax.f32 %v1280_v60, 0.0  ;;  %v640_v55 = vadd.f32 %v3726_v6, %v4240_v53  ;;  %2173 = vst [vmem:[%s3515_s26 + $0xc0] sm:$0xff] %v2141_v62  ;;  %v4244_v60 = vld [vmem:[#allocation50_spill] sm:$0xff] }
 0x196   : > { %v2108_v46 = vmax.f32 %v2076_v35, %v1310_v37  ;;  %v1839_v14 = vsel %vm1672_vm3, %v1837_v29, %v1838_v42  ;;  %v1283_v49 = vadd.f32 %v3726_v6, %v1240_v63  ;;  %v1604_v40 = vadd.f32 %v3726_v6, %v1561_v56  ;;  %v4241_v37 = vld [vmem:[#allocation27_spill] sm:$0xff] }
 0x197   : > { %v2015_v0 = vmax.f32 %v1983_v54, %v4239_v50  ;;  %v4242_v33 = vmax.f32 %v4241_v37, 0.0  ;;  %v1954_v25 = vmax.f32 %v1924_v31, %v3901_v61  ;;  %v1922_v17 = vmax.f32 %v1839_v14, %v1312_v20  ;;  %v4248_v63 = vld [vmem:[#allocation59_spill] sm:$0xff] }
 0x198   : > { %v2140_v27 = vmax.f32 %v2108_v46, %v3830_v5  ;;  %v674_v58 = vmax.f32 %v642_v8, 0.0  ;;  %v2078_v51 = vmax.f32 %v2046_v45, %v1839_v14  ;;  %v1636_v57 = vmax.f32 %v1604_v40, 0.0  ;;  %v4250_v8 = vld [vmem:[#allocation33_spill] sm:$0xff] }
 0x199   : > { %v2047_v12 = vmax.f32 %v2015_v0, %v4242_v33  ;;  %v1986_v28 = vmax.f32 %v1954_v25, %v4243_v23  ;;  %v1952_v15 = vmax.f32 %v1922_v17, %v1633_v36  ;;  %v4245_v5 = vmax.f32 %v4244_v60, 0.0  ;;  %v4253_v25 = vld [vmem:[#allocation51_spill] sm:$0xff] }
 0x19a   : > { %2172 = vst [vmem:[%s3515_s26 + $0xb8] sm:$0xff] %v2140_v27  ;;  %v672_v9 = vmax.f32 %v640_v55, 0.0  ;;  %v2110_v30 = vmax.f32 %v2078_v51, %v1312_v20  ;;  %v1606_v24 = vadd.f32 %v3726_v6, %v2589_v19  ;;  %v1843_v16 = vrot.slane %v1636_v57, 7  ;;  %v4254_v51 = vld [vmem:[#allocation43_spill] sm:$0xff] }
 0x19b   : > { %v2079_v29 = vmax.f32 %v2047_v12, %v3879_v41  ;;  %v2049_v34 = vmax.f32 %v2017_v48, %v4245_v5  ;;  %v2018_v11 = vmax.f32 %v1986_v28, %v674_v58  ;;  %v1984_v45 = vmax.f32 %v1952_v15, %v4246_v38  ;;  %v4257_v38 = vld [vmem:[#allocation52_spill] sm:$0xff] }
 0x19c   : > { %v1315_v41 = vmax.f32 %v1283_v49, 0.0  ;;  %v643_v18 = vadd.f32 %v3726_v6, %v4247_v10  ;;  %v2142_v32 = vmax.f32 %v2110_v30, %v1633_v36  ;;  %v1895_v35 = vsel %vm1672_vm3, 0.0, %v1843_v16 }
 0x19d   : > { %v2111_v21 = vmax.f32 %v2079_v29, %v1313_v39  ;;  %v2016_v19 = vmax.f32 %v1984_v45, %v672_v9  ;;  %v2081_v54 = vmax.f32 %v2049_v34, %v1895_v35  ;;  %v1638_v2 = vmax.f32 %v1606_v24, 0.0  ;;  %v4256_v9 = vld [vmem:[#allocation65_spill] sm:$0xff] }
 0x19e   : > { %v1925_v48 = vmax.f32 %v1895_v35, %v1315_v41  ;;  %2174 = vst [vmem:[%s3515_s26 + $0xc8] sm:$0xff] %v2142_v32  ;;  %v1605_v39 = vadd.f32 %v3726_v6, %v1564_v22  ;;  %v4249_v56 = vmax.f32 %v4248_v63, 0.0  ;;  %v4251_v62 = vmax.f32 %v4250_v8, 0.0 }
 0x19f   : > { %v2143_v1 = vmax.f32 %v2111_v21, %v3862_v3  ;;  %v2113_v46 = vmax.f32 %v2081_v54, %v1315_v41  ;;  %v1284_v26 = vadd.f32 %v3726_v6, %v1243_v7  ;;  %v4252_v3 = vld [vmem:[#allocation60_spill] sm:$0xff]  ;;  %v675_v31 = vmax.f32 %v643_v18, 0.0 }
 0x1a0   : > { %v2050_v59 = vmax.f32 %v2018_v11, %v4249_v56  ;;  %v2048_v42 = vmax.f32 %v2016_v19, %v4251_v62  ;;  %v1955_v36 = vmax.f32 %v1925_v48, %v1636_v57  ;;  %v1768_v50 = vsel %vm1672_vm3, 0.0, %v4252_v3 }
 0x1a1   : > { %2175 = vst [vmem:[%s3515_s26 + $0xd0] sm:$0xff] %v2143_v1  ;;  %v1637_v0 = vmax.f32 %v1605_v39, 0.0  ;;  %v2145_v55 = vmax.f32 %v2113_v46, %v1636_v57  ;;  %v1846_v14 = vrot.slane %v1638_v2, 7  ;;  %v1607_v49 = vadd.f32 %v3726_v6, %v2590_v47 }
 0x1a2   : > { %v2080_v20 = vmax.f32 %v2048_v42, %v1842_v4  ;;  %v1987_v53 = vmax.f32 %v1955_v36, %v1768_v50  ;;  %v1285_v37 = vadd.f32 %v3726_v6, %v3898_v13  ;;  %v1316_v12 = vmax.f32 %v1284_v26, 0.0 }
 0x1a3   : > { %v1844_v40 = vrot.slane %v1637_v0, 7  ;;  %2177 = vst [vmem:[%s3515_s26 + $0xe0] sm:$0xff] %v2145_v55  ;;  %v644_v17 = vadd.f32 %v3726_v6, %v4253_v25  ;;  %v4255_v57 = vmax.f32 %v4254_v51, 0.0  ;;  %v1896_v52 = vsel %vm1672_vm3, 0.0, %v1846_v14 }
 0x1a4   : > { %v2112_v27 = vmax.f32 %v2080_v20, %v1314_v43  ;;  %v2019_v33 = vmax.f32 %v1987_v53, %v675_v31  ;;  %v1639_v13 = vmax.f32 %v1607_v49, 0.0  ;;  %v1317_v43 = vmax.f32 %v1285_v37, 0.0 }
 0x1a5   : > { %v1845_v4 = vsel %vm1672_vm3, %v1843_v16, %v1844_v40  ;;  %v676_v5 = vmax.f32 %v644_v17, 0.0  ;;  %v1286_v21 = vadd.f32 %v3726_v6, %v3936_v44  ;;  %v4258_v45 = vmax.f32 %v4257_v38, 0.0 }
 0x1a6   : > { %v2144_v58 = vmax.f32 %v2112_v27, %v3901_v61  ;;  %v2051_v47 = vmax.f32 %v2019_v33, %v4255_v57  ;;  %v1926_v29 = vmax.f32 %v1845_v4, %v1316_v12  ;;  %v2082_v23 = vmax.f32 %v2050_v59, %v1845_v4 }
 0x1a7   : > { %v1847_v24 = vrot.slane %v1639_v13, 7  ;;  %v1318_v10 = vmax.f32 %v1286_v21, 0.0 }
 0x1a8   : > { %2176 = vst [vmem:[%s3515_s26 + $0xd8] sm:$0xff] %v2144_v58  ;;  %v2083_v28 = vmax.f32 %v2051_v47, %v1896_v52  ;;  %v1956_v15 = vmax.f32 %v1926_v29, %v1637_v0  ;;  %v2114_v60 = vmax.f32 %v2082_v23, %v1316_v12 }
 0x1a9   : > { %v1848_v22 = vsel %vm1672_vm3, %v1846_v14, %v1847_v24 }
 0x1aa   : > { %v2115_v34 = vmax.f32 %v2083_v28, %v1317_v43  ;;  %v1988_v61 = vmax.f32 %v1956_v15, %v4256_v9  ;;  %v2146_v30 = vmax.f32 %v2114_v60, %v1637_v0 }
 0x1ac   : > { %v2147_v16 = vmax.f32 %v2115_v34, %v1638_v2  ;;  %v2020_v11 = vmax.f32 %v1988_v61, %v676_v5  ;;  %2178 = vst [vmem:[%s3515_s26 + $0xe8] sm:$0xff] %v2146_v30 }
 0x1ae   : > { %2179 = vst [vmem:[%s3515_s26 + $0xf0] sm:$0xff] %v2147_v16  ;;  %v2052_v41 = vmax.f32 %v2020_v11, %v4258_v45 }
 0x1b0   : > { %v2084_v18 = vmax.f32 %v2052_v41, %v1848_v22 }
 0x1b2   : > { %v2116_v32 = vmax.f32 %v2084_v18, %v1318_v10 }
 0x1b4   : > { %v2148_v35 = vmax.f32 %v2116_v32, %v1639_v13 }
 0x1b6   : > { %2180 = vst [vmem:[%s3515_s26 + $0xf8] sm:$0xff] %v2148_v35 }
 0x1b7 PF: > { %s17_s21 = sadd.s32 1, %s2650_s21  }
 0x1b8   : > { %p14_p1 = scmp.ge.s32.totalorder %s17_s21, 4  }
 0x1ba   :  { %16 = sbr.rel (!%p14_p1) target bundleno = 1 (0x1), region = 88 }
 0x1bf   :  { %2202 = vsyncpa [#allocation3], 1 }
 0x1c0   :  { %2204 = vsyncpa [#allocation3 + $0x1], 1 }

// kernel: _lambda_.5
= control target key start
LH: loop header
LB: loop body
LE: loop exit
PB: predicated region body
PF: predicated region fallthrough
CT: control target
= control target key end

     0   :  { %s4951_s0 = inlined_call_operand.vmem [shape: f32[2,8,8,128], index: 0, kind: input, shape index: {}]   ;;  %s4952_s1 = inlined_call_operand.vmem [shape: f32[2,8,8,128], index: 1, kind: input, shape index: {}]   ;;  %s4953_s2 = inlined_call_operand.vmem [shape: f32[2,8,8,128], index: 2, kind: input, shape index: {}]   ;;  %s4954_s3 = inlined_call_operand.vmem [shape: f32[2,8,8,128], index: 3, kind: input, shape index: {}]   ;;  %s4955_s4 = inlined_call_operand.vmem [shape: f32[3,3,128], index: 4, kind: input, shape index: {}]   ;;  %s4956_s5 = inlined_call_operand.hbm [shape: f32[1,128], index: 5, kind: input, shape index: {}]   ;;  %s4957_s6 = inlined_call_operand.vmem [shape: bf16[128,128], index: 6, kind: input, shape index: {}]   ;;  %s4958_s7 = inlined_call_operand.hbm [shape: f32[1,128], index: 7, kind: input, shape index: {}]   ;;  %s4959_s8 = inlined_call_operand.vmem [shape: bf16[128,128], index: 8, kind: input, shape index: {}]   ;;  %s4960_s9 = inlined_call_operand.hbm [shape: f32[1,128], index: 9, kind: input, shape index: {}]   ;;  %s4961_s10 = inlined_call_operand.vmem [shape: f32[3,3,128], index: 10, kind: input, shape index: {}]   ;;  %s4962_s11 = inlined_call_operand.hbm [shape: f32[1,128], index: 11, kind: input, shape index: {}]   ;;  %s4963_s12 = inlined_call_operand.vmem [shape: bf16[128,128], index: 12, kind: input, shape index: {}]   ;;  %s4964_s13 = inlined_call_operand.hbm [shape: f32[1,128], index: 13, kind: input, shape index: {}]   ;;  %s4965_s14 = inlined_call_operand.vmem [shape: bf16[128,128], index: 14, kind: input, shape index: {}]   ;;  %s4966_s15 = inlined_call_operand.hbm [shape: f32[1,128], index: 15, kind: input, shape index: {}]   ;;  %s4967_s16 = inlined_call_operand.vmem [shape: f32[3,3,128], index: 16, kind: input, shape index: {}]   ;;  %s4968_s17 = inlined_call_operand.hbm [shape: f32[1,128], index: 17, kind: input, shape index: {}]   ;;  %s4969_s18 = inlined_call_operand.vmem [shape: bf16[128,128], index: 18, kind: input, shape index: {}]   ;;  %s4970_s19 = inlined_call_operand.vmem [shape: f32[1,128], index: 19, kind: input, shape index: {}]   ;;  %s4971_s20 = inlined_call_operand.vmem [shape: f32[1,128], index: 20, kind: input, shape index: {}]   ;;  %s4972_s21 = inlined_call_operand.vmem [shape: f32[2,8,8,128], index: 21, kind: output, shape index: {}]  }
   0x1   :  { %4995 = sst [smem:[#allocation31_spill]] %s4951_s0 }
   0x2   :  { %4996 = sst [smem:[#allocation32_spill]] %s4952_s1 }
   0x3   :  { %4997 = sst [smem:[#allocation33_spill]] %s4953_s2 }
   0x4   :  { %4998 = sst [smem:[#allocation34_spill]] %s4954_s3 }
   0x5   :  { %4999 = sst [smem:[#allocation35_spill]] %s4955_s4 }
   0x6   :  { %5000 = sst [smem:[#allocation36_spill]] %s4956_s5 }
   0x7   :  { %5001 = sst [smem:[#allocation37_spill]] %s4958_s7 }
   0x8   :  { %26 = vsyncpa [#allocation3], 0 }
   0x9   :  { %27 = vsyncpa [#allocation5], 0 }
   0xa   :  { %28 = vsyncpa [#allocation8], 0 }
   0xb   :  { %29 = vsyncpa [#allocation11], 0  ;;  %s3643_s2 = smov 0  }
   0xc LB: > { %s3526_s25 = smov [#allocation4]   ;;  %s3649_s27 = sadd.s32 4294967295, %s3524_s2   ;;  %s3524_s2 = sphi %s3643_s2, %s35_s2  }
   0xd   : > { %s557_s26 = sshll.u32 %s3526_s25, 4  ;;  %p2830_p0 = scmp.ge.s32.totalorder %s3524_s2, 1  ;;  %s558_s26 = int_to_ptr.vmem [resolvable:$true] %s557_s26 }
   0xe   : > { %p527_p1 = scmp.lt.s32.totalorder %s3524_s2, 3  ;;  %p4974_p2 = scmp.eq.s32.totalorder %s3649_s27, 0 }
   0xf   : > { %s3527_s28 = smov [#allocation7]   ;;  %s3528_s0 = smov [#allocation10]  }
  0x10   : > { %p3654_p3 = pnand %p2830_p0, %p527_p1  ;;  %s585_s29 = sshll.u32 %s3527_s28, 4  ;;  %s3660_s29 = int_to_ptr.vmem [resolvable:$true] %s585_s29 }
  0x11   : > { %s613_s4 = sshll.u32 %s3528_s0, 4  ;;  %s3529_s5 = smov [#allocation2]   ;;  %s3668_s4 = int_to_ptr.vmem [resolvable:$true] %s613_s4 }
  0x12   : > { %p3229_p4 = pneg %p3654_p3  ;;  %s543_s22 = sshll.u32 %s3529_s5, 4  ;;  %s3670_s22 = int_to_ptr.vmem [resolvable:$true] %s543_s22 }
  0x13   : > { %s3331_s1 = scalar_lea.vmem %s558_s26, 16  ;;  %s3338_s24 = scalar_lea.vmem %s558_s26, 32 }
  0x14   : > { %p3664_p5 = pnand %p4974_p2, %p3229_p4  ;;  %p3332_p7 = scmp.ne.s32.totalorder %s558_s26, %s3331_s1 }
  0x15   : > { %p3339_p10 = scmp.lt.s32.totalorder %s558_s26, %s558_s26  ;;  %p3340_p11 = scmp.lt.s32.totalorder %s3338_s24, %s3331_s1 }
  0x16   : > { %p3674_p6 = pneg %p3664_p5 }
  0x17   : > { %p3341_p12 = por %p3340_p11, %p3339_p10 }
  0x18   : > { %p3334_p8 = pnand %p3332_p7, %p3674_p6 }
  0x1a   : > { %p3335_p9 = pneg %p3334_p8 }
  0x1c   : > { %p3342_p13 = pnand %p3341_p12, %p3335_p9 }
  0x1e   : > { %3345 = shalt.err (!%p3342_p13)
}
  0x1f   : > { %s5005_s7 = sld [smem:[#allocation37_spill]]  ;;  %s3357_s0 = scalar_lea.vmem %s3660_s29, 16 }
  0x20   : > { %p3358_p0 = scmp.ne.s32.totalorder %s3660_s29, %s3357_s0  ;;  %s3364_s5 = scalar_lea.vmem %s3660_s29, 32 }
  0x21   : > { %p3365_p7 = scmp.lt.s32.totalorder %s3660_s29, %s3660_s29  ;;  %p3366_p8 = scmp.lt.s32.totalorder %s3364_s5, %s3357_s0 }
  0x22   : > { %p3360_p1 = pnand %p3358_p0, %p3674_p6 }
  0x23   : > { %p3367_p9 = por %p3366_p8, %p3365_p7 }
  0x24   : > { %p3361_p4 = pneg %p3360_p1 }
  0x25   : > { %3235 = dma.hbm_to_vmem [thread:$0]  (!%p3664_p5), %s5005_s7, 16, %s558_s26, [#allocation5]  }
  0x26   : > { %p3368_p10 = pnand %p3367_p9, %p3361_p4 }
  0x28   : > { %3371 = shalt.err (!%p3368_p10)
}
  0x29   : > { %3241 = dma.hbm_to_vmem [thread:$0]  (!%p3664_p5), %s4962_s11, 16, %s3660_s29, [#allocation8]  }
  0x2a   : > { %s3383_s26 = scalar_lea.vmem %s3668_s4, 16  ;;  %s3390_s25 = scalar_lea.vmem %s3668_s4, 32 }
  0x2b   : > { %p3384_p11 = scmp.ne.s32.totalorder %s3668_s4, %s3383_s26  ;;  %p3391_p0 = scmp.lt.s32.totalorder %s3668_s4, %s3668_s4 }
  0x2c   : > { %p3392_p1 = scmp.lt.s32.totalorder %s3390_s25, %s3383_s26 }
  0x2d   : > { %p3386_p12 = pnand %p3384_p11, %p3674_p6 }
  0x2e   : > { %p3393_p4 = por %p3392_p1, %p3391_p0 }
  0x2f   : > { %p3387_p13 = pneg %p3386_p12 }
  0x31   : > { %p3394_p7 = pnand %p3393_p4, %p3387_p13 }
  0x33   : > { %3397 = shalt.err (!%p3394_p7)
}
  0x34   : > { %3247 = dma.hbm_to_vmem [thread:$0]  (!%p3664_p5), %s4966_s15, 16, %s3668_s4, [#allocation11]  }
  0x35   : > { %s3409_s29 = scalar_lea.vmem %s3670_s22, 16  ;;  %s3416_s5 = scalar_lea.vmem %s3670_s22, 32 }
  0x36   : > { %p3410_p8 = scmp.ne.s32.totalorder %s3670_s22, %s3409_s29  ;;  %p3417_p11 = scmp.lt.s32.totalorder %s3670_s22, %s3670_s22 }
  0x37   : > { %p3418_p12 = scmp.lt.s32.totalorder %s3416_s5, %s3409_s29 }
  0x38   : > { %p3412_p9 = pnand %p3410_p8, %p3674_p6 }
  0x39   : > { %p3419_p13 = por %p3418_p12, %p3417_p11 }
  0x3a   : > { %p3413_p10 = pneg %p3412_p9 }
  0x3c   : > { %p3420_p0 = pnand %p3419_p13, %p3413_p10 }
  0x3e   : > { %3423 = shalt.err (!%p3420_p0)
}
  0x3f   : > { %s5006_s26 = sld [smem:[#allocation36_spill]]  ;;  %s3530_s4 = smov [#allocation6]  }
  0x40   : > { %s571_s25 = sshll.u32 %s3530_s4, 4  ;;  %s3531_s28 = smov [#allocation9]   ;;  %s572_s25 = int_to_ptr.vmem [resolvable:$true] %s571_s25 }
  0x41   : > { %s599_s0 = sshll.u32 %s3531_s28, 4  ;;  %s3435_s7 = scalar_lea.vmem %s572_s25, 16  ;;  %s600_s0 = int_to_ptr.vmem [resolvable:$true] %s599_s0 }
  0x42   : > { %p3436_p1 = scmp.ne.s32.totalorder %s572_s25, %s3435_s7  ;;  %s3442_s29 = scalar_lea.vmem %s572_s25, 32 }
  0x43   : > { %p3443_p8 = scmp.lt.s32.totalorder %s572_s25, %s572_s25  ;;  %p3444_p9 = scmp.lt.s32.totalorder %s3442_s29, %s3435_s7 }
  0x44   : > { %p3438_p4 = pnand %p3436_p1, %p3674_p6 }
  0x45   : > { %3232 = dma.hbm_to_vmem [thread:$0]  (!%p3664_p5), %s5006_s26, 16, %s3670_s22, [#allocation3]  }
  0x46   : > { %p3439_p7 = pneg %p3438_p4  ;;  %p3445_p10 = por %p3444_p9, %p3443_p8 }
  0x48   : > { %p3446_p11 = pnand %p3445_p10, %p3439_p7 }
  0x4a   : > { %3449 = shalt.err (!%p3446_p11)
}
  0x4b   : > { %3238 = dma.hbm_to_vmem [thread:$0]  (!%p3664_p5), %s4960_s9, 16, %s572_s25, [#allocation5]  }
  0x4c   : > { %s3461_s1 = scalar_lea.vmem %s600_s0, 16  ;;  %s3468_s24 = scalar_lea.vmem %s600_s0, 32 }
  0x4d   : > { %p3462_p12 = scmp.ne.s32.totalorder %s600_s0, %s3461_s1  ;;  %p3469_p1 = scmp.lt.s32.totalorder %s600_s0, %s600_s0 }
  0x4e   : > { %p3470_p4 = scmp.lt.s32.totalorder %s3468_s24, %s3461_s1 }
  0x4f   : > { %p3464_p13 = pnand %p3462_p12, %p3674_p6 }
  0x50   : > { %p3471_p2 = por %p3470_p4, %p3469_p1 }
  0x51   : > { %p3465_p0 = pneg %p3464_p13 }
  0x53   : > { %p3472_p8 = pnand %p3471_p2, %p3465_p0 }
  0x55   : > { %3475 = shalt.err (!%p3472_p8)
}
  0x56   : > { %3244 = dma.hbm_to_vmem [thread:$0]  (!%p3664_p5), %s4964_s13, 16, %s600_s0, [#allocation8]  }
  0x57   : > { %s3532_s4 = smov [#allocation12]  }
  0x58   : > { %s627_s25 = sshll.u32 %s3532_s4, 4  ;;  %s628_s25 = int_to_ptr.vmem [resolvable:$true] %s627_s25 }
  0x59   : > { %s3487_s28 = scalar_lea.vmem %s628_s25, 16  ;;  %s3494_s29 = scalar_lea.vmem %s628_s25, 32 }
  0x5a   : > { %p3488_p7 = scmp.ne.s32.totalorder %s628_s25, %s3487_s28  ;;  %p3495_p11 = scmp.lt.s32.totalorder %s628_s25, %s628_s25 }
  0x5b   : > { %p3496_p12 = scmp.lt.s32.totalorder %s3494_s29, %s3487_s28 }
  0x5c   : > { %p3490_p9 = pnand %p3488_p7, %p3674_p6 }
  0x5d   : > { %p3497_p2 = por %p3496_p12, %p3495_p11 }
  0x5e   : > { %p3491_p10 = pneg %p3490_p9 }
  0x60   : > { %p3498_p13 = pnand %p3497_p2, %p3491_p10 }
  0x62   : > { %3501 = shalt.err (!%p3498_p13)
}
  0x63   : > { %3250 = dma.hbm_to_vmem [thread:$0]  (!%p3664_p5), %s4968_s17, 16, %s628_s25, [#allocation11]  }
  0x64   : > { %681 = sbr.rel (%p3654_p3) target bundleno = 1124 (0x464), region = 104 }
  0x69   : > { %p5007_p0 = scmp.eq.s32.totalorder %s3649_s27, 0 }
  0x6b   : > { %3507 = dma.done.wait (%p5007_p0), [#allocation3], 16   ;;  %p5008_p6 = pmov %p5007_p0 }
  0x6c   : > { %p5009_p1 = pmov %p5007_p0 }
  0x6d   : > { %3509 = vsyncadd (%p5008_p6), [#allocation3], 4294967280 }
  0x6e   : > { %3511 = dma.done.wait (%p5009_p1), [#allocation5], 32   ;;  %p5010_p4 = pmov %p5007_p0 }
  0x6f   : > { %p5011_p8 = pmov %p5007_p0 }
  0x70   : > { %3513 = vsyncadd (%p5010_p4), [#allocation5], 4294967264 }
  0x71   : > { %3515 = dma.done.wait (%p5011_p8), [#allocation8], 32   ;;  %p5012_p5 = pmov %p5007_p0 }
  0x72   : > { %p5013_p3 = pmov %p5007_p0 }
  0x73   : > { %3517 = vsyncadd (%p5012_p5), [#allocation8], 4294967264 }
  0x74   : > { %3519 = dma.done.wait (%p5013_p3), [#allocation11], 32   ;;  %p5014_p7 = pmov %p5007_p0 }
  0x75   : > { %p780_p9 = scmp.lt.s32.totalorder %s3649_s27, 1  ;;  %v907_v0 = vlaneseq  ;;  %v3280_v1 = vld [vmem:[%s4957_s6 + $0x38] sm:$0xff]   ;;  %v3281_v2 = vld [vmem:[%s4957_s6 + $0x30] sm:$0xff]   ;;  %v3282_v4 = vld [vmem:[%s4957_s6 + $0x28] sm:$0xff]   ;;  %s5015_s25 = sld [smem:[#allocation31_spill]]  ;;  %vm866_vm0 = vcmask 1040384  }
  0x76   : > { %3521 = vsyncadd (%p5014_p7), [#allocation11], 4294967264  ;;  %3009 = vmatprep.subr.bf16.mxu0 %v3280_v1  ;;  %s5016_s22 = sld [smem:[#allocation32_spill]]  ;;  %v3283_v6 = vld [vmem:[%s4957_s6 + $0x20] sm:$0xff]   ;;  %v3804_v8 = vld [vmem:[%s4959_s8 + $0x38] sm:$0xff]   ;;  %vm2286_vm1 = vcmask 1046528  }
  0x77   : > { %s5073_s27 = smov (!%p780_p9, %s3649_s27), 1  ;;  %v908_v3 = vshrl.u32 %v907_v0, 7  ;;  %3010 = vmatpush3.bf16.msra.mxu0 %v3280_v1  ;;  %s5018_s1 = sld [smem:[#allocation33_spill]]  ;;  %3033 = vmatprep.subr.bf16.mxu1 %v3804_v8  ;;  %v3284_v22 = vld [vmem:[%s4957_s6 + $0x18] sm:$0xff]   ;;  %v3285_v36 = vld [vmem:[%s4957_s6 + $0x10] sm:$0xff]   ;;  %v3286_v51 = vld [vmem:[%s4957_s6 + $0x8] sm:$0xff]  }
  0x78   : > { %3011 = vmatprep.subr.bf16.mxu0 %v3281_v2  ;;  %s3774_s7 = sshll.u32 %s5073_s27, 6  ;;  %s5020_s5 = sld [smem:[#allocation34_spill]]  ;;  %3034 = vmatpush3.bf16.msra.mxu1 %v3804_v8  ;;  %v3887_v45 = vld [vmem:[%s4959_s8 + $0x30] sm:$0xff]   ;;  %v3917_v57 = vld [vmem:[%s4959_s8 + $0x28] sm:$0xff]  }
  0x79   : > { %v3788_v5 = vsub.s32 0, %v908_v3  ;;  %v3799_v7 = vsub.s32 1, %v908_v3  ;;  %v3812_v9 = vsub.s32 2, %v908_v3  ;;  %s5022_s23 = sld [smem:[#allocation35_spill]]  ;;  %3035 = vmatprep.subr.bf16.mxu1 %v3887_v45 }
  0x7b   : > { %s3780_s28 = scalar_lea.vmem %s5015_s25, %s3774_s7  ;;  %5017 = vst [vmem:[#allocation17_spill] sm:$0xff] %v3788_v5  ;;  %3012 = vmatpush3.bf16.msra.mxu0 %v3281_v2  ;;  %5019 = vst [vmem:[#allocation18_spill] sm:$0xff] %v3799_v7 }
  0x7c   : > { %s3786_s3 = scalar_lea.vmem %s5016_s22, %s3774_s7  ;;  %3013 = vmatprep.subr.bf16.mxu0 %v3282_v4  ;;  %5021 = vst [vmem:[#allocation19_spill] sm:$0xff] %v3812_v9  ;;  %v806_v10 = vld [vmem:[%s3780_s28] sm:$0xff]  ;;  %v3816_v11 = vld [vmem:[%s3780_s28 + $0x8] sm:$0xff]  ;;  %3036 = vmatpush3.bf16.msra.mxu1 %v3887_v45 }
  0x7d   : > { %s3797_s24 = scalar_lea.vmem %s5018_s1, %s3774_s7  ;;  %v3819_v12 = vld [vmem:[%s3786_s3] sm:$0xff]  ;;  %v3823_v13 = vld [vmem:[%s3786_s3 + $0x8] sm:$0xff]  ;;  %v1265_v17 = vpack.c.bf16 %v3816_v11, %v806_v10  ;;  %v3902_v50 = vld [vmem:[%s3786_s3 + $0x10] sm:$0xff]  ;;  %3037 = vmatprep.subr.bf16.mxu1 %v3917_v57 }
  0x7e   : > { %s3810_s22 = scalar_lea.vmem %s5020_s5, %s3774_s7  ;;  %v3826_v14 = vld [vmem:[%s3797_s24] sm:$0xff]  ;;  %v3829_v15 = vld [vmem:[%s3797_s24 + $0x8] sm:$0xff]  ;;  %v850_v16 = vrot.slane %v3819_v12, 7  ;;  %v851_v21 = vrot.slane %v3823_v13, 7  ;;  %v3911_v56 = vld [vmem:[%s3786_s3 + $0x18] sm:$0xff] }
  0x7f   : > { %3014 = vmatpush3.bf16.msra.mxu0 %v3282_v4  ;;  %v3835_v18 = vld [vmem:[%s3810_s22] sm:$0xff]  ;;  %v3838_v19 = vld [vmem:[%s3810_s22 + $0x8] sm:$0xff]  ;;  %3049 = vmatprep.mubr.bf16.mxu1 %v1265_v17  ;;  %v3923_v61 = vld [vmem:[%s3810_s22 + $0x10] sm:$0xff] }
  0x80   : > { %v838_v20 = vld [vmem:[%s5022_s23] sm:$0x7]  ;;  %3015 = vmatprep.subr.bf16.mxu0 %v3283_v6  ;;  %v867_v26 = vsel %vm866_vm0, 0.0, %v850_v16  ;;  %v868_v27 = vsel %vm866_vm0, 0.0, %v851_v21  ;;  %v883_v28 = vrot.slane %v3835_v18, 7  ;;  %v884_v29 = vrot.slane %v3838_v19, 7  ;;  %3038 = vmatpush3.bf16.msra.mxu1 %v3917_v57 }
  0x81   : > { %v3848_v23 = vrot.slane %v838_v20, %v3788_v5  ;;  %v3851_v24 = vrot.slane %v838_v20, %v3799_v7  ;;  %v3854_v25 = vrot.slane %v838_v20, %v3812_v9  ;;  %v839_v30 = vld [vmem:[%s5022_s23 + $0x4] sm:$0x7]  ;;  %v840_v31 = vld [vmem:[%s5022_s23 + $0x8] sm:$0x7]  ;;  %v3930_v2 = vld [vmem:[%s3810_s22 + $0x18] sm:$0xff]  ;;  %v852_v20 = vrot.slane %v3902_v50, 7 }
  0x82   : > { %v899_v37 = vsel %vm866_vm0, 0.0, %v883_v28  ;;  %v900_v38 = vsel %vm866_vm0, 0.0, %v884_v29  ;;  %v3890_v46 = vrot.slane %v839_v30, %v3788_v5  ;;  %v3893_v47 = vrot.slane %v839_v30, %v3799_v7  ;;  %v3947_v21 = vld [vmem:[%s4959_s8 + $0x20] sm:$0xff]  }
  0x83   : > { %v911_v32 = vmul.f32 0.0, %v3848_v23  ;;  %v923_v33 = vmul.f32 0.0, %v3851_v24  ;;  %v924_v34 = vmul.f32 %v3851_v24, %v3826_v14  ;;  %v925_v35 = vmul.f32 %v3851_v24, %v3829_v15  ;;  %3016 = vmatpush3.bf16.msra.mxu0 %v3283_v6  ;;  %3039 = vmatprep.subr.bf16.mxu1 %v3947_v21 }
  0x84   : > { %v943_v39 = vmul.f32 0.0, %v3854_v25  ;;  %v944_v40 = vmul.f32 %v3854_v25, %v3835_v18  ;;  %3017 = vmatprep.subr.bf16.mxu0 %v3284_v22  ;;  %v912_v41 = vmul.f32 %v3848_v23, %v899_v37  ;;  %v913_v42 = vmul.f32 %v3848_v23, %v900_v38  ;;  %3040 = vmatpush3.bf16.msra.mxu1 %v3947_v21 }
  0x85   : > { %v931_v43 = vadd.f32 %v923_v33, %v911_v32  ;;  %v945_v44 = vmul.f32 %v3854_v25, %v3838_v19  ;;  %v3896_v48 = vrot.slane %v839_v30, %v3812_v9  ;;  %v3899_v49 = vrot.slane %v840_v31, %v3788_v5  ;;  %v3287_v30 = vld [vmem:[%s4957_s6] sm:$0xff]  }
  0x86   : > { %v932_v52 = vadd.f32 %v924_v34, %v912_v41  ;;  %v933_v53 = vadd.f32 %v925_v35, %v913_v42  ;;  %v3908_v55 = vrot.slane %v840_v31, %v3799_v7  ;;  %v963_v58 = vmul.f32 %v3890_v46, %v867_v26  ;;  %v3950_v26 = vld [vmem:[%s3797_s24 + $0x10] sm:$0xff] }
  0x87   : > { %v951_v54 = vadd.f32 %v943_v39, %v931_v43  ;;  %3018 = vmatpush3.bf16.msra.mxu0 %v3284_v22  ;;  %v964_v59 = vmul.f32 %v3890_v46, %v868_v27  ;;  %v983_v60 = vmul.f32 %v3893_v47, %v806_v10  ;;  %v984_v0 = vmul.f32 %v3893_v47, %v3816_v11 }
  0x88   : > { %3019 = vmatprep.subr.bf16.mxu0 %v3285_v36  ;;  %v952_v62 = vadd.f32 %v944_v40, %v932_v52  ;;  %v953_v63 = vadd.f32 %v945_v44, %v933_v53  ;;  %v1003_v1 = vmul.f32 %v3896_v48, %v3819_v12  ;;  %v1004_v4 = vmul.f32 %v3896_v48, %v3823_v13  ;;  %v3985_v53 = vld [vmem:[%s4959_s8 + $0x18] sm:$0xff]  }
  0x89   : > { %v971_v3 = vadd.f32 %v963_v58, %v951_v54  ;;  %v1023_v6 = vmul.f32 %v3899_v49, %v899_v37  ;;  %v1024_v10 = vmul.f32 %v3899_v49, %v900_v38  ;;  %v1043_v11 = vmul.f32 %v3908_v55, %v3826_v14  ;;  %5023 = vst [vmem:[#allocation20_spill] sm:$0xff] %v3950_v26  ;;  %v3968_v37 = vld [vmem:[%s3780_s28 + $0x18] sm:$0xff] }
  0x8a   : > { %v972_v16 = vadd.f32 %v964_v59, %v952_v62  ;;  %v3940_v17 = vrot.slane %v840_v31, %v3812_v9  ;;  %v853_v27 = vrot.slane %v3911_v56, 7  ;;  %v885_v28 = vrot.slane %v3923_v61, 7  ;;  %v3971_v38 = vld [vmem:[%s3797_s24 + $0x18] sm:$0xff]  ;;  %v3992_v62 = vld [vmem:[#allocation2] ss:$0 sm:$0xff]  ;;  %3041 = vmatprep.subr.bf16.mxu1 %v3985_v53 }
  0x8b   : > { %3020 = vmatpush3.bf16.msra.mxu0 %v3285_v36  ;;  %v991_v22 = vadd.f32 %v983_v60, %v971_v3  ;;  %v886_v29 = vrot.slane %v3930_v2, 7  ;;  %v1044_v32 = vmul.f32 %v3908_v55, %v3829_v15  ;;  %v3965_v36 = vld [vmem:[%s3780_s28 + $0x10] sm:$0xff]  ;;  %5024 = vst [vmem:[#allocation21_spill] sm:$0xff] %v3971_v38  ;;  %v869_v39 = vsel %vm866_vm0, 0.0, %v852_v20  ;;  %3042 = vmatpush3.bf16.msra.mxu1 %v3985_v53 }
  0x8c   : > { %3021 = vmatprep.subr.bf16.mxu0 %v3286_v51  ;;  %v992_v31 = vadd.f32 %v984_v0, %v972_v16  ;;  %v1063_v33 = vmul.f32 %v3940_v17, %v3835_v18  ;;  %v1064_v34 = vmul.f32 %v3940_v17, %v3838_v19  ;;  %v870_v40 = vsel %vm866_vm0, 0.0, %v853_v27 }
  0x8d   : > { %v1011_v35 = vadd.f32 %v1003_v1, %v991_v22  ;;  %v901_v41 = vsel %vm866_vm0, 0.0, %v885_v28  ;;  %v902_v43 = vsel %vm866_vm0, 0.0, %v886_v29  ;;  %v926_v52 = vmul.f32 %v3851_v24, %v3950_v26  ;;  %v4009_v22 = vld [vmem:[%s3786_s3 + $0x20] sm:$0xff] }
  0x8e   : > { %v1012_v42 = vadd.f32 %v1004_v4, %v992_v31  ;;  %v914_v44 = vmul.f32 %v3848_v23, %v901_v41  ;;  %v915_v58 = vmul.f32 %v3848_v23, %v902_v43  ;;  %v927_v59 = vmul.f32 %v3851_v24, %v3971_v38  ;;  %v3999_v4 = vld [vmem:[%s4959_s8 + $0x10] sm:$0xff]  }
  0x8f   : > { %3022 = vmatpush3.bf16.msra.mxu0 %v3286_v51  ;;  %v1031_v54 = vadd.f32 %v1023_v6, %v1011_v35  ;;  %v946_v60 = vmul.f32 %v3854_v25, %v3923_v61  ;;  %v965_v3 = vmul.f32 %v3890_v46, %v869_v39  ;;  %v966_v51 = vmul.f32 %v3890_v46, %v870_v40  ;;  %v4018_v35 = vld [vmem:[%s3797_s24 + $0x20] sm:$0xff]  ;;  %v4024_v40 = vld [vmem:[%s3810_s22 + $0x28] sm:$0xff] }
  0x90   : > { %3023 = vmatprep.subr.bf16.mxu0 %v3287_v30  ;;  %v1032_v0 = vadd.f32 %v1024_v10, %v1012_v42  ;;  %v934_v1 = vadd.f32 %v926_v52, %v914_v44  ;;  %v947_v16 = vmul.f32 %v3854_v25, %v3930_v2  ;;  %v985_v10 = vmul.f32 %v3893_v47, %v3965_v36  ;;  %v4021_v39 = vld [vmem:[%s3810_s22 + $0x20] sm:$0xff] }
  0x91   : > { %v1051_v6 = vadd.f32 %v1043_v11, %v1031_v54  ;;  %v986_v20 = vmul.f32 %v3893_v47, %v3968_v37  ;;  %v973_v29 = vadd.f32 %v965_v3, %v953_v63  ;;  %v1005_v31 = vmul.f32 %v3896_v48, %v3902_v50  ;;  %v4015_v11 = vld [vmem:[%s3786_s3 + $0x28] sm:$0xff]  ;;  %5025 = vst [vmem:[#allocation22_spill] sm:$0xff] %v4018_v35 }
  0x92   : > { %v1052_v27 = vadd.f32 %v1044_v32, %v1032_v0  ;;  %v954_v28 = vadd.f32 %v946_v60, %v934_v1  ;;  %v935_v44 = vadd.f32 %v927_v59, %v915_v58  ;;  %v1006_v32 = vmul.f32 %v3896_v48, %v3911_v56  ;;  %3043 = vmatprep.subr.bf16.mxu1 %v3999_v4  ;;  %v4042_v59 = vld [vmem:[%s3797_s24 + $0x28] sm:$0xff] }
  0x93   : > { %3024 = vmatpush3.bf16.msra.mxu0 %v3287_v30  ;;  %v1071_v42 = vadd.f32 %v1063_v33, %v1051_v6  ;;  %v1025_v63 = vmul.f32 %v3899_v49, %v901_v41  ;;  %v993_v60 = vadd.f32 %v985_v10, %v973_v29  ;;  %v1026_v0 = vmul.f32 %v3899_v49, %v902_v43 }
  0x94   : > { %v1072_v52 = vadd.f32 %v1064_v34, %v1052_v27  ;;  %v974_v54 = vadd.f32 %v966_v51, %v954_v28  ;;  %3057 = vmatprep.subr.bf16.mxu0 %v3804_v8  ;;  %v1045_v30 = vmul.f32 %v3908_v55, %v3950_v26  ;;  %v1046_v33 = vmul.f32 %v3908_v55, %v3971_v38 }
  0x95   : > { %v1085_v1 = vadd.f32 %v3992_v62, %v1071_v42  ;;  %v1065_v58 = vmul.f32 %v3940_v17, %v3923_v61  ;;  %v1013_v43 = vadd.f32 %v1005_v31, %v993_v60  ;;  %5026 = vst [vmem:[#allocation23_spill] sm:$0xff] %v4042_v59  ;;  %v854_v3 = vrot.slane %v4009_v22, 7  ;;  %v4056_v42 = vld [vmem:[%s3780_s28 + $0x20] sm:$0xff]  ;;  %3044 = vmatpush3.bf16.msra.mxu1 %v3999_v4 }
  0x96   : > { %v1086_v34 = vadd.f32 %v3992_v62, %v1072_v52  ;;  %v994_v41 = vadd.f32 %v986_v20, %v974_v54  ;;  %v855_v51 = vrot.slane %v4015_v11, 7  ;;  %v887_v6 = vrot.slane %v4021_v39, 7  ;;  %v4053_v20 = vld [vmem:[%s4959_s8 + $0x8] sm:$0xff]  }
  0x97   : > { %v888_v10 = vrot.slane %v4024_v40, 7  ;;  %v928_v27 = vmul.f32 %v3851_v24, %v4018_v35  ;;  %v1033_v31 = vadd.f32 %v1025_v63, %v1013_v43  ;;  %v4059_v52 = vld [vmem:[%s3780_s28 + $0x28] sm:$0xff]  ;;  %v871_v54 = vsel %vm866_vm0, 0.0, %v854_v3  ;;  %3045 = vmatprep.subr.bf16.mxu1 %v4053_v20 }
  0x98   : > { %v1109_v28 = vpack.c.bf16 %v1086_v34, %v1085_v1  ;;  %v1014_v29 = vadd.f32 %v1006_v32, %v994_v41  ;;  %v1066_v60 = vmul.f32 %v3940_v17, %v3930_v2  ;;  %v872_v9 = vsel %vm866_vm0, 0.0, %v855_v51  ;;  %v4071_v32 = vld [vmem:[%s4959_s8] sm:$0xff]  }
  0x99   : > { %v903_v7 = vsel %vm866_vm0, 0.0, %v887_v6  ;;  %v904_v5 = vsel %vm866_vm0, 0.0, %v888_v10  ;;  %v1053_v1 = vadd.f32 %v1045_v30, %v1033_v31  ;;  %v929_v41 = vmul.f32 %v3851_v24, %v4042_v59  ;;  %3046 = vmatpush3.bf16.msra.mxu1 %v4053_v20 }
  0x9a   : > { %3025 = vmatprep.mubr.bf16.mxu0 %v1109_v28  ;;  %v1034_v63 = vadd.f32 %v1026_v0, %v1014_v29  ;;  %v916_v34 = vmul.f32 %v3848_v23, %v903_v7  ;;  %v917_v43 = vmul.f32 %v3848_v23, %v904_v5  ;;  %v948_v3 = vmul.f32 %v3854_v25, %v4021_v39  ;;  %v4082_v28 = vld [vmem:[%s3786_s3 + $0x30] sm:$0xff] }
  0x9b   : > { %v955_v51 = vadd.f32 %v947_v16, %v935_v44  ;;  %v967_v6 = vmul.f32 %v3890_v46, %v871_v54  ;;  %v1073_v30 = vadd.f32 %v1065_v58, %v1053_v1  ;;  %v968_v29 = vmul.f32 %v3890_v46, %v872_v9  ;;  %v4090_v16 = vld [vmem:[%s3786_s3 + $0x38] sm:$0xff]  ;;  %v4093_v44 = vld [vmem:[%s3810_s22 + $0x30] sm:$0xff]  ;;  %3047 = vmatprep.subr.bf16.mxu1 %v4071_v32  ;;  %s4931_s3 = scalar_lea.vmem %s4972_s21, %s3774_s7 }
  0x9c   : > { %v1054_v0 = vadd.f32 %v1046_v33, %v1034_v63  ;;  %v936_v10 = vadd.f32 %v928_v27, %v916_v34  ;;  %v987_v38 = vmul.f32 %v3893_v47, %v4056_v42  ;;  %v988_v26 = vmul.f32 %v3893_v47, %v4059_v52  ;;  %v4100_v54 = vld [vmem:[%s3797_s24 + $0x30] sm:$0xff] }
  0x9d   : > { %v975_v31 = vadd.f32 %v967_v6, %v955_v51  ;;  %v1087_v58 = vadd.f32 %v3992_v62, %v1073_v30  ;;  %v1007_v9 = vmul.f32 %v3896_v48, %v4009_v22  ;;  %v937_v63 = vadd.f32 %v929_v41, %v917_v43  ;;  %v4115_v43 = vld [vmem:[%s3810_s22 + $0x38] sm:$0xff]  ;;  %3048 = vmatpush3.bf16.msra.mxu1 %v4071_v32 }
  0x9e   : > { %v1074_v33 = vadd.f32 %v1066_v60, %v1054_v0  ;;  %v956_v27 = vadd.f32 %v948_v3, %v936_v10  ;;  %v949_v1 = vmul.f32 %v3854_v25, %v4024_v40  ;;  %v1027_v51 = vmul.f32 %v3899_v49, %v903_v7  ;;  %3081 = vmatprep.subr.bf16.mxu1 %v3804_v8 }
  0x9f   : > { %v995_v34 = vadd.f32 %v987_v38, %v975_v31  ;;  %v1008_v3 = vmul.f32 %v3896_v48, %v4015_v11  ;;  %v1028_v0 = vmul.f32 %v3899_v49, %v904_v5  ;;  %v1047_v10 = vmul.f32 %v3908_v55, %v4018_v35 }
  0xa0   : > { %v1088_v60 = vadd.f32 %v3992_v62, %v1074_v33  ;;  %v976_v6 = vadd.f32 %v968_v29, %v956_v27  ;;  %v1048_v41 = vmul.f32 %v3908_v55, %v4042_v59  ;;  %v856_v7 = vrot.slane %v4082_v28, 7 }
  0xa1   : > { %v1015_v30 = vadd.f32 %v1007_v9, %v995_v34  ;;  %v857_v31 = vrot.slane %v4090_v16, 7  ;;  %v889_v33 = vrot.slane %v4093_v44, 7  ;;  %v1067_v27 = vmul.f32 %v3940_v17, %v4021_v39  ;;  %v4125_v9 = vld [vmem:[%s3780_s28 + $0x30] sm:$0xff] }
  0xa2   : > { %v1110_v38 = vpack.c.bf16 %v1088_v60, %v1087_v58  ;;  %v996_v29 = vadd.f32 %v988_v26, %v976_v6  ;;  %v873_v34 = vsel %vm866_vm0, 0.0, %v856_v7  ;;  %v930_v59 = vmul.f32 %v3851_v24, %v4100_v54 }
  0xa3   : > { %v1035_v5 = vadd.f32 %v1027_v51, %v1015_v30  ;;  %v874_v58 = vsel %vm866_vm0, 0.0, %v857_v31  ;;  %v890_v60 = vrot.slane %v4115_v43, 7  ;;  %v905_v6 = vsel %vm866_vm0, 0.0, %v889_v33 }
  0xa4   : > { %3026 = vmatmul.mubr.bf16.vlgmr.msra.gmra.mxu0 %v1110_v38  ;;  %v1016_v26 = vadd.f32 %v1008_v3, %v996_v29  ;;  %v918_v30 = vmul.f32 %v3848_v23, %v905_v6  ;;  %v950_v35 = vmul.f32 %v3854_v25, %v4093_v44  ;;  %v957_v7 = vadd.f32 %v949_v1, %v937_v63  ;;  %v813_v38 = vld [vmem:[%s3780_s28 + $0x38] sm:$0xff] }
  0xa5   : > { %3058 = vmatpush3.bf16.msra.mxu0 %v3804_v8  ;;  %v1055_v51 = vadd.f32 %v1047_v10, %v1035_v5  ;;  %v1068_v3 = vmul.f32 %v3940_v17, %v4024_v40  ;;  %v969_v29 = vmul.f32 %v3890_v46, %v873_v34  ;;  %v989_v31 = vmul.f32 %v3893_v47, %v4125_v9 }
  0xa6   : > { %3059 = vmatprep.subr.bf16.mxu0 %v3887_v45  ;;  %v1036_v24 = vadd.f32 %v1028_v0, %v1016_v26  ;;  %v938_v33 = vadd.f32 %v930_v59, %v918_v30  ;;  %v970_v23 = vmul.f32 %v3890_v46, %v874_v58  ;;  %v1009_v63 = vmul.f32 %v3896_v48, %v4082_v28  ;;  %v4153_v59 = vld [vmem:[%s3797_s24 + $0x38] sm:$0xff] }
  0xa7   : > { %v1075_v10 = vadd.f32 %v1067_v27, %v1055_v51  ;;  %v977_v25 = vadd.f32 %v969_v29, %v957_v7  ;;  %v906_v1 = vsel %vm866_vm0, 0.0, %v890_v60  ;;  %v990_v26 = vmul.f32 %v3893_v47, %v813_v38 }
  0xa8   : > { %v1056_v5 = vadd.f32 %v1048_v41, %v1036_v24  ;;  %v958_v0 = vadd.f32 %v950_v35, %v938_v33  ;;  %v1029_v41 = vmul.f32 %v3899_v49, %v905_v6  ;;  %v1010_v51 = vmul.f32 %v3896_v48, %v4090_v16 }
  0xa9   : > { %3060 = vmatpush3.bf16.msra.mxu0 %v3887_v45  ;;  %v1089_v27 = vadd.f32 %v3992_v62, %v1075_v10  ;;  %v997_v46 = vadd.f32 %v989_v31, %v977_v25  ;;  %v1266_v60 = vpack.c.bf16 %v3968_v37, %v3965_v36  ;;  %v1030_v30 = vmul.f32 %v3899_v49, %v906_v1 }
  0xaa   : > { %3061 = vmatprep.subr.bf16.mxu0 %v3917_v57  ;;  %v1076_v34 = vadd.f32 %v1068_v3, %v1056_v5  ;;  %v978_v58 = vadd.f32 %v970_v23, %v958_v0  ;;  %v1049_v7 = vmul.f32 %v3908_v55, %v4100_v54  ;;  %v1050_v6 = vmul.f32 %v3908_v55, %v4153_v59 }
  0xab   : > { %v1017_v47 = vadd.f32 %v1009_v63, %v997_v46  ;;  %3050 = vmatmul.mubr.bf16.vlgmr.msra.gmra.mxu1 %v1266_v60  ;;  %v1267_v48 = vpack.c.bf16 %v4059_v52, %v4056_v42  ;;  %v1069_v49 = vmul.f32 %v3940_v17, %v4093_v44  ;;  %v1575_v55 = vpack.c.bf16 %v3838_v19, %v3835_v18 }
  0xac   : > { %v1090_v35 = vadd.f32 %v3992_v62, %v1076_v34  ;;  %v998_v24 = vadd.f32 %v990_v26, %v978_v58  ;;  %3082 = vmatpush3.bf16.msra.mxu1 %v3804_v8  ;;  %v1576_v29 = vpack.c.bf16 %v3930_v2, %v3923_v61  ;;  %v1577_v52 = vpack.c.bf16 %v4024_v40, %v4021_v39  ;;  %v3298_v61 = vld [vmem:[%s4963_s12 + $0x28] sm:$0xff]   ;;  %v3299_v2 = vld [vmem:[%s4963_s12 + $0x20] sm:$0xff]  }
  0xad   : > { %3062 = vmatpush3.bf16.msra.mxu0 %v3917_v57  ;;  %v1037_v37 = vadd.f32 %v1029_v41, %v1017_v47  ;;  %3083 = vmatprep.subr.bf16.mxu1 %v3887_v45  ;;  %v1070_v10 = vmul.f32 %v3940_v17, %v4115_v43  ;;  %v1268_v33 = vpack.c.bf16 %v813_v38, %v4125_v9  ;;  %v3302_v39 = vld [vmem:[%s4963_s12 + $0x8] sm:$0xff]   ;;  %v3303_v40 = vld [vmem:[%s4963_s12] sm:$0xff]  }
  0xae   : > { %3063 = vmatprep.subr.bf16.mxu0 %v3947_v21  ;;  %v1111_v36 = vpack.c.bf16 %v1090_v35, %v1089_v27  ;;  %v1018_v3 = vadd.f32 %v1010_v51, %v998_v24  ;;  %3053 = vmatprep.mubr.bf16.mxu1 %v1267_v48  ;;  %v1490_v19 = vpack.c.bf16 %v3829_v15, %v3826_v14  ;;  %v5027_v15 = vld [vmem:[#allocation20_spill] sm:$0xff]  ;;  %v4299_v35 = vld [vmem:[#allocation6] ss:$0 sm:$0xff]  ;;  %v5039_v48 = vld [vmem:[#allocation17_spill] sm:$0xff] }
  0xaf   : > { %v1057_v42 = vadd.f32 %v1049_v7, %v1037_v37  ;;  %v1405_v9 = vpack.c.bf16 %v3823_v13, %v3819_v12  ;;  %v1406_v12 = vpack.c.bf16 %v3911_v56, %v3902_v50  ;;  %v1407_v13 = vpack.c.bf16 %v4015_v11, %v4009_v22  ;;  %v5028_v50 = vld [vmem:[#allocation21_spill] sm:$0xff]  ;;  %v5040_v37 = vld [vmem:[#allocation18_spill] sm:$0xff] }
  0xb0   : > { %3029 = vmatprep.mubr.bf16.mxu0 %v1111_v36  ;;  %v1038_v31 = vadd.f32 %v1030_v30, %v1018_v3  ;;  %3084 = vmatpush3.bf16.msra.mxu1 %v3887_v45  ;;  %v1408_v14 = vpack.c.bf16 %v4090_v16, %v4082_v28  ;;  %v1491_v56 = vpack.c.bf16 %v5028_v50, %v5027_v15  ;;  %v3301_v11 = vld [vmem:[%s4963_s12 + $0x10] sm:$0xff]   ;;  %v3306_v28 = vld [vmem:[%s4965_s14 + $0x28] sm:$0xff]   ;;  %v3307_v16 = vld [vmem:[%s4965_s14 + $0x20] sm:$0xff]  }
  0xb1   : > { %3064 = vmatpush3.bf16.msra.mxu0 %v3947_v21  ;;  %v1077_v23 = vadd.f32 %v1069_v49, %v1057_v42  ;;  %3085 = vmatprep.subr.bf16.mxu1 %v3917_v57  ;;  %v1660_v30 = vld [vmem:[%s4961_s10] sm:$0x7] }
  0xb2   : > { %3065 = vmatprep.subr.bf16.mxu0 %v3985_v53  ;;  %v1058_v18 = vadd.f32 %v1050_v6, %v1038_v31  ;;  %v4308_v36 = vrot.slane %v1660_v30, %v5039_v48  ;;  %v4311_v49 = vrot.slane %v1660_v30, %v5040_v37  ;;  %v5041_v31 = vld [vmem:[#allocation19_spill] sm:$0xff] }
  0xb3   : > { %v1091_v25 = vadd.f32 %v3992_v62, %v1077_v23  ;;  %3054 = vmatmul.mubr.bf16.gmra.mxu1 %v1268_v33 }
  0xb4   : > { %v1078_v5 = vadd.f32 %v1070_v10, %v1058_v18  ;;  %3086 = vmatpush3.bf16.msra.mxu1 %v3917_v57  ;;  %3097 = vmatprep.mubr.bf16.mxu1 %v1490_v19  ;;  %v1732_v42 = vmul.f32 0.0, %v4308_v36  ;;  %v4317_v10 = vrot.slane %v1660_v30, %v5041_v31  ;;  %v1661_v18 = vld [vmem:[%s4961_s10 + $0x4] sm:$0x7] }
  0xb5   : > { %3066 = vmatpush3.bf16.msra.mxu0 %v3985_v53  ;;  %3087 = vmatprep.subr.bf16.mxu1 %v3947_v21  ;;  %v4335_v15 = vrot.slane %v1661_v18, %v5041_v31 }
  0xb6   : > { %3067 = vmatprep.subr.bf16.mxu0 %v3999_v4  ;;  %v1092_v17 = vadd.f32 %v3992_v62, %v1078_v5  ;;  %v5030_v62 = vld [vmem:[#allocation23_spill] sm:$0xff] }
  0xb8   : > { %v1112_v38 = vpack.c.bf16 %v1092_v17, %v1091_v25  ;;  %3088 = vmatpush3.bf16.msra.mxu1 %v3947_v21  ;;  %v1764_v25 = vmul.f32 0.0, %v4317_v10 }
  0xb9   : > { %3068 = vmatpush3.bf16.msra.mxu0 %v3999_v4  ;;  %3089 = vmatprep.subr.bf16.mxu1 %v3985_v53 }
  0xba   : > { %3069 = vmatprep.subr.bf16.mxu0 %v4053_v20  ;;  %3030 = vmatmul.mubr.bf16.gmra.mxu0 %v1112_v38  ;;  %v4327_v38 = vrot.slane %v1661_v18, %v5040_v37 }
  0xbb   : > { %3073 = vmatprep.mubr.bf16.mxu0 %v1405_v9 }
  0xbc   : > { %3090 = vmatpush3.bf16.msra.mxu1 %v3985_v53 }
  0xbd   : > { %3070 = vmatpush3.bf16.msra.mxu0 %v4053_v20  ;;  %3091 = vmatprep.subr.bf16.mxu1 %v3999_v4 }
  0xbe   : > { %3071 = vmatprep.subr.bf16.mxu0 %v4071_v32 }
  0xc0   : > { %3092 = vmatpush3.bf16.msra.mxu1 %v3999_v4 }
  0xc1   : > { %3072 = vmatpush3.bf16.msra.mxu0 %v4071_v32  ;;  %3093 = vmatprep.subr.bf16.mxu1 %v4053_v20 }
  0xc2   : > { %3105 = vmatprep.subr.bf16.mxu0 %v3804_v8 }
  0xc4   : > { %3074 = vmatmul.mubr.bf16.vlgmr.msra.gmra.mxu0 %v1406_v12  ;;  %3094 = vmatpush3.bf16.msra.mxu1 %v4053_v20 }
  0xc5   : > { %3106 = vmatpush3.bf16.msra.mxu0 %v3804_v8  ;;  %3077 = vmatprep.mubr.bf16.mxu0 %v1407_v13  ;;  %v5029_v8 = vld [vmem:[#allocation22_spill] sm:$0xff] }
  0xc6   : > { %3107 = vmatprep.subr.bf16.mxu0 %v3887_v45  ;;  %3095 = vmatprep.subr.bf16.mxu1 %v4071_v32  ;;  %v1492_v22 = vpack.c.bf16 %v5030_v62, %v5029_v8 }
  0xc8   : > { %3096 = vmatpush3.bf16.msra.mxu1 %v4071_v32 }
  0xc9   : > { %3108 = vmatpush3.bf16.msra.mxu0 %v3887_v45  ;;  %v1493_v45 = vpack.c.bf16 %v4153_v59, %v4100_v54 }
  0xca   : > { %3109 = vmatprep.subr.bf16.mxu0 %v3917_v57 }
  0xcb   : > { %3098 = vmatmul.mubr.bf16.vlgmr.msra.gmra.mxu1 %v1491_v56 }
  0xcc   : > { %3078 = vmatmul.mubr.bf16.gmra.mxu0 %v1408_v14  ;;  %3101 = vmatprep.mubr.bf16.mxu1 %v1492_v22  ;;  %v4332_v14 = vrot.slane %v1661_v18, %v5039_v48 }
  0xcd   : > { %3110 = vmatpush3.bf16.msra.mxu0 %v3917_v57  ;;  %3121 = vmatprep.mubr.bf16.mxu0 %v1575_v55  ;;  %v1578_v57 = vpack.c.bf16 %v4115_v43, %v4093_v44 }
  0xce   : > { %3111 = vmatprep.subr.bf16.mxu0 %v3947_v21 }
  0xd1   : > { %3112 = vmatpush3.bf16.msra.mxu0 %v3947_v21  ;;  %v3296_v21 = vld [vmem:[%s4963_s12 + $0x38] sm:$0xff]  }
  0xd2   : > { %3113 = vmatprep.subr.bf16.mxu0 %v3985_v53  ;;  %3129 = vmatprep.subr.bf16.mxu1 %v3296_v21 }
  0xd3   : > { %3102 = vmatmul.mubr.bf16.gmra.mxu1 %v1493_v45 }
  0xd4   : > { %3130 = vmatpush3.bf16.msra.mxu1 %v3296_v21 }
  0xd5   : > { %3114 = vmatpush3.bf16.msra.mxu0 %v3985_v53  ;;  %v3297_v53 = vld [vmem:[%s4963_s12 + $0x30] sm:$0xff]  }
  0xd6   : > { %3115 = vmatprep.subr.bf16.mxu0 %v3999_v4  ;;  %3131 = vmatprep.subr.bf16.mxu1 %v3297_v53 }
  0xd8   : > { %3132 = vmatpush3.bf16.msra.mxu1 %v3297_v53 }
  0xd9   : > { %3116 = vmatpush3.bf16.msra.mxu0 %v3999_v4  ;;  %3133 = vmatprep.subr.bf16.mxu1 %v3298_v61  ;;  %v3300_v4 = vld [vmem:[%s4963_s12 + $0x18] sm:$0xff]  }
  0xda   : > { %3117 = vmatprep.subr.bf16.mxu0 %v4053_v20 }
  0xdc   : > { %3134 = vmatpush3.bf16.msra.mxu1 %v3298_v61 }
  0xdd   : > { %3118 = vmatpush3.bf16.msra.mxu0 %v4053_v20  ;;  %3135 = vmatprep.subr.bf16.mxu1 %v3299_v2  ;;  %v3304_v20 = vld [vmem:[%s4965_s14 + $0x38] sm:$0xff]  }
  0xde   : > { %3119 = vmatprep.subr.bf16.mxu0 %v4071_v32 }
  0xe0   : > { %3136 = vmatpush3.bf16.msra.mxu1 %v3299_v2 }
  0xe1   : > { %3120 = vmatpush3.bf16.msra.mxu0 %v4071_v32  ;;  %3137 = vmatprep.subr.bf16.mxu1 %v3300_v4  ;;  %v3305_v32 = vld [vmem:[%s4965_s14 + $0x30] sm:$0xff]  }
  0xe2   : > { %3153 = vmatprep.subr.bf16.mxu0 %v3304_v20 }
  0xe4   : > { %3122 = vmatmul.mubr.bf16.vlgmr.msra.gmra.mxu0 %v1576_v29  ;;  %3138 = vmatpush3.bf16.msra.mxu1 %v3300_v4 }
  0xe5   : > { %3125 = vmatprep.mubr.bf16.mxu0 %v1577_v52  ;;  %3139 = vmatprep.subr.bf16.mxu1 %v3301_v11  ;;  %v1744_v52 = vmul.f32 0.0, %v4311_v49 }
  0xe6   : > { %3154 = vmatpush3.bf16.msra.mxu0 %v3304_v20 }
  0xe7   : > { %3155 = vmatprep.subr.bf16.mxu0 %v3305_v32  ;;  %v1752_v5 = vadd.f32 %v1744_v52, %v1732_v42 }
  0xe8   : > { %3140 = vmatpush3.bf16.msra.mxu1 %v3301_v11 }
  0xe9   : > { %3141 = vmatprep.subr.bf16.mxu1 %v3302_v39  ;;  %v1772_v22 = vadd.f32 %v1764_v25, %v1752_v5 }
  0xea   : > { %3156 = vmatpush3.bf16.msra.mxu0 %v3305_v32 }
  0xeb   : > { %3157 = vmatprep.subr.bf16.mxu0 %v3306_v28 }
  0xec   : > { %3126 = vmatmul.mubr.bf16.gmra.mxu0 %v1578_v57  ;;  %3142 = vmatpush3.bf16.msra.mxu1 %v3302_v39  ;;  %v1662_v57 = vld [vmem:[%s4961_s10 + $0x8] sm:$0x7] }
  0xed   : > { %3143 = vmatprep.subr.bf16.mxu1 %v3303_v40  ;;  %v4349_v4 = vrot.slane %v1662_v57, %v5039_v48  ;;  %v4356_v20 = vrot.slane %v1662_v57, %v5040_v37 }
  0xee   : > { %3158 = vmatpush3.bf16.msra.mxu0 %v3306_v28 }
  0xef   : > { %3159 = vmatprep.subr.bf16.mxu0 %v3307_v16 }
  0xf0   : > { %3144 = vmatpush3.bf16.msra.mxu1 %v3303_v40 }
  0xf2   : > { %3160 = vmatpush3.bf16.msra.mxu0 %v3307_v16 }
 0x164   : > { %v4283_v44 = vpop.f32.mrf.mxu0 }
 0x165   : > { %5031 = vst [vmem:[#allocation20_spill] sm:$0xff] %v4283_v44 }
 0x166   : > { %v4285_v54 = vpop.f32.mrf.mxu0 }
 0x167   : > { %5032 = vst [vmem:[#allocation21_spill] sm:$0xff] %v4285_v54 }
 0x168   : > { %v4287_v63 = vpop.f32.mrf.mxu0 }
 0x169   : > { %5033 = vst [vmem:[#allocation22_spill] sm:$0xff] %v4287_v63 }
 0x16a   : > { %v4289_v0 = vpop.f32.mrf.mxu0 }
 0x16b   : > { %v3051_v43 = vpop.f32.mrf.mxu1  ;;  %5034 = vst [vmem:[#allocation23_spill] sm:$0xff] %v4289_v0 }
 0x16c   : > { %v1391_v17 = vadd.f32 %v3051_v43, %v4299_v35 }
 0x16d   : > { %v1351_v1 = vpop.f32.mrf.mxu1 }
 0x16e   : > { %v1389_v13 = vadd.f32 %v4299_v35, %v1351_v1  ;;  %v1399_v21 = vmax.f32 %v1391_v17, 0.0 }
 0x16f   : > { %v3052_v26 = vpop.f32.mrf.mxu1 }
 0x170   : > { %v1392_v8 = vadd.f32 %v3052_v26, %v4299_v35  ;;  %v1397_v32 = vmax.f32 %v1389_v13, 0.0 }
 0x171   : > { %v1354_v59 = vpop.f32.mrf.mxu1 }
 0x172   : > { %v1390_v53 = vadd.f32 %v4299_v35, %v1354_v59  ;;  %v1400_v26 = vmax.f32 %v1392_v8, 0.0  ;;  %v1804_v18 = vmul.f32 %v4327_v38, %v1397_v32 }
 0x173   : > { %v3055_v41 = vpop.f32.mrf.mxu1 }
 0x174   : > { %v1398_v30 = vmax.f32 %v1390_v53, 0.0 }
 0x175   : > { %v1367_v60 = vpop.f32.mrf.mxu1 }
 0x176   : > { %v1393_v2 = vadd.f32 %v4299_v35, %v1367_v60  ;;  %v4363_v60 = vrot.slane %v1662_v57, %v5041_v31 }
 0x177   : > { %v3056_v24 = vpop.f32.mrf.mxu1 }
 0x178   : > { %v1396_v40 = vadd.f32 %v3056_v24, %v4299_v35  ;;  %v1401_v24 = vmax.f32 %v1393_v2, 0.0 }
 0x179   : > { %v1370_v55 = vpop.f32.mrf.mxu1 }
 0x17a   : > { %v4291_v34 = vpop.f32.mrf.mxu0  ;;  %v1394_v43 = vadd.f32 %v4299_v35, %v1370_v55 }
 0x17b   : > { %5035 = vst [vmem:[#allocation24_spill] sm:$0xff] %v4291_v34 }
 0x17c   : > { %v4293_v27 = vpop.f32.mrf.mxu0  ;;  %v1402_v25 = vmax.f32 %v1394_v43, 0.0 }
 0x17d   : > { %5036 = vst [vmem:[#allocation25_spill] sm:$0xff] %v4293_v27 }
 0x17e   : > { %v4295_v46 = vpop.f32.mrf.mxu0 }
 0x17f   : > { %5037 = vst [vmem:[#allocation26_spill] sm:$0xff] %v4295_v46 }
 0x180   : > { %v4297_v58 = vpop.f32.mrf.mxu0 }
 0x181   : > { %5038 = vst [vmem:[#allocation27_spill] sm:$0xff] %v4297_v58 }
 0x184   : > { %v3075_v51 = vpop.f32.mrf.mxu0 }
 0x185   : > { %v1476_v12 = vadd.f32 %v3075_v51, %v4299_v35 }
 0x186   : > { %v1443_v47 = vpop.f32.mrf.mxu0 }
 0x187   : > { %v4305_v6 = vadd.f32 %v4299_v35, %v1443_v47  ;;  %v1484_v11 = vmax.f32 %v1476_v12, 0.0  ;;  %v4366_v47 = vmul.f32 %v4327_v38, %v1399_v21 }
 0x188   : > { %v3076_v7 = vpop.f32.mrf.mxu0 }
 0x189   : > { %v1482_v29 = vmax.f32 %v4305_v6, 0.0  ;;  %v4338_v50 = vadd.f32 %v3076_v7, %v4299_v35  ;;  %v4369_v7 = vadd.f32 %v3055_v41, %v4299_v35  ;;  %v1674_v42 = vrot.slane %v1484_v11, 7 }
 0x18a   : > { %v1446_v3 = vpop.f32.mrf.mxu0 }
 0x18b   : > { %v3099_v23 = vpop.f32.mrf.mxu1  ;;  %v1672_v19 = vrot.slane %v1482_v29, 7  ;;  %v1475_v45 = vadd.f32 %v4299_v35, %v1446_v3  ;;  %v1485_v16 = vmax.f32 %v4338_v50, 0.0  ;;  %v4381_v50 = vmul.f32 %v4327_v38, %v1398_v30 }
 0x18c   : > { %v3079_v33 = vpop.f32.mrf.mxu0 }
 0x18d   : > { %v1528_v56 = vpop.f32.mrf.mxu1  ;;  %v1688_v62 = vsel %vm866_vm0, 0.0, %v1672_v19  ;;  %v4352_v39 = vadd.f32 %v3079_v33, %v4299_v35  ;;  %v1483_v59 = vmax.f32 %v1475_v45, 0.0  ;;  %v1404_v33 = vmax.f32 %v1396_v40, 0.0 }
 0x18e   : > { %v1459_v9 = vpop.f32.mrf.mxu0  ;;  %v1784_v28 = vmul.f32 %v4332_v14, %v1688_v62  ;;  %v1675_v5 = vrot.slane %v1485_v16, 7  ;;  %v4385_v62 = vmul.f32 %v4327_v38, %v1401_v24  ;;  %v1690_v45 = vsel %vm866_vm0, 0.0, %v1674_v42 }
 0x18f   : > { %5042 = vst [vmem:[#allocation28_spill] sm:$0xff] %v4352_v39  ;;  %v3100_v1 = vpop.f32.mrf.mxu1  ;;  %v1478_v51 = vadd.f32 %v4299_v35, %v1459_v9  ;;  %v4985_v55 = vmax.f32 %v4352_v39, 0.0  ;;  %v4375_v9 = vmul.f32 %v4327_v38, %v1400_v26  ;;  %v1673_v12 = vrot.slane %v1483_v59, 7 }
 0x190   : > { %v3080_v61 = vpop.f32.mrf.mxu0  ;;  %v1792_v19 = vadd.f32 %v1784_v28, %v1772_v22  ;;  %v1561_v22 = vadd.f32 %v3099_v23, %v4299_v35  ;;  %v4392_v53 = vmul.f32 %v4327_v38, %v1404_v33  ;;  %v1691_v2 = vsel %vm866_vm0, 0.0, %v1675_v5 }
 0x191   : > { %v1481_v52 = vadd.f32 %v3080_v61, %v4299_v35  ;;  %v1531_v17 = vpop.f32.mrf.mxu1  ;;  %v1486_v41 = vmax.f32 %v1478_v51, 0.0  ;;  %v1678_v57 = vrot.slane %v4985_v55, 7  ;;  %v4396_v40 = vmul.f32 %v4327_v38, %v1402_v25 }
 0x192   : > { %v1462_v3 = vpop.f32.mrf.mxu0  ;;  %v1812_v61 = vadd.f32 %v1804_v18, %v1792_v19  ;;  %v1559_v32 = vadd.f32 %v4299_v35, %v1528_v56  ;;  %v4400_v23 = vmul.f32 %v4335_v15, %v1484_v11  ;;  %v1689_v43 = vsel %vm866_vm0, 0.0, %v1673_v12 }
 0x193   : > { %v4378_v13 = vadd.f32 %v4299_v35, %v1462_v3  ;;  %v1489_v21 = vmax.f32 %v1481_v52, 0.0  ;;  %v3103_v28 = vpop.f32.mrf.mxu1  ;;  %v1676_v26 = vrot.slane %v1486_v41, 7  ;;  %v4405_v30 = vmul.f32 %v4332_v14, %v1690_v45 }
 0x194   : > { %v1824_v24 = vmul.f32 %v4335_v15, %v1482_v29  ;;  %v4411_v3 = vmul.f32 %v4335_v15, %v1485_v16  ;;  %v1569_v56 = vmax.f32 %v1561_v22, 0.0  ;;  %v4414_v42 = vmul.f32 %v4332_v14, %v1691_v2 }
 0x195   : > { %v4986_v51 = vmax.f32 %v4378_v13, 0.0  ;;  %v4417_v11 = vmul.f32 %v4335_v15, %v1483_v59  ;;  %v1694_v52 = vsel %vm866_vm0, 0.0, %v1678_v57  ;;  %v1679_v33 = vrot.slane %v1489_v21, 7  ;;  %v1544_v5 = vpop.f32.mrf.mxu1 }
 0x196   : > { %v4420_v18 = vadd.f32 %v1824_v24, %v1812_v61  ;;  %v4423_v19 = vmul.f32 %v4332_v14, %v1689_v43  ;;  %v4426_v6 = vmul.f32 %v4335_v15, %v1486_v41  ;;  %v1567_v29 = vmax.f32 %v1559_v32, 0.0 }
 0x197   : > { %v1692_v25 = vsel %vm866_vm0, 0.0, %v1676_v26  ;;  %v1677_v59 = vrot.slane %v4986_v51, 7  ;;  %v1562_v22 = vadd.f32 %v3100_v1, %v4299_v35  ;;  %v4434_v45 = vmul.f32 %v4332_v14, %v1694_v52 }
 0x198   : > { %v1747_v57 = vmul.f32 %v4311_v49, %v1569_v56  ;;  %v4438_v41 = vmul.f32 %v4356_v20, %v1569_v56  ;;  %v1560_v2 = vadd.f32 %v4299_v35, %v1531_v17  ;;  %v1695_v32 = vsel %vm866_vm0, 0.0, %v1679_v33  ;;  %v3104_v33 = vpop.f32.mrf.mxu1 }
 0x199   : > { %5043 = vst [vmem:[#allocation29_spill] sm:$0xff] %v4434_v45  ;;  %v4446_v24 = vadd.f32 %v3103_v28, %v4299_v35  ;;  %v4449_v1 = vmul.f32 %v4332_v14, %v1692_v25  ;;  %v4452_v52 = vmul.f32 %v4335_v15, %v1489_v21  ;;  %v1745_v56 = vmul.f32 %v4311_v49, %v1567_v29 }
 0x19a   : > { %v1570_v55 = vmax.f32 %v1562_v22, 0.0  ;;  %v4463_v25 = vmul.f32 %v4332_v14, %v1695_v32  ;;  %v1568_v8 = vmax.f32 %v1560_v2, 0.0  ;;  %v4467_v31 = vadd.f32 %v4299_v35, %v1544_v5 }
 0x19b   : > { %5044 = vst [vmem:[#allocation30_spill] sm:$0xff] %v4446_v24  ;;  %v4475_v22 = vadd.f32 %v3104_v33, %v4299_v35 }
 0x19c   : > { %v1748_v48 = vmul.f32 %v4311_v49, %v1570_v55  ;;  %v4487_v58 = vmul.f32 %v4356_v20, %v1570_v55  ;;  %v1746_v46 = vmul.f32 %v4311_v49, %v1568_v8  ;;  %v1865_v63 = vmul.f32 %v4356_v20, %v1568_v8 }
 0x1a4   : > { %v3123_v16 = vpop.f32.mrf.mxu0 }
 0x1a5   : > { %v1646_v12 = vadd.f32 %v3123_v16, %v4299_v35  ;;  %v4456_v16 = vmul.f32 %v4356_v20, %v1567_v29 }
 0x1a6   : > { %v1613_v61 = vpop.f32.mrf.mxu0 }
 0x1a7   : > { %v4442_v43 = vmax.f32 %v1646_v12, 0.0  ;;  %v1644_v26 = vadd.f32 %v4299_v35, %v1613_v61  ;;  %v1693_v12 = vsel %vm866_vm0, 0.0, %v1677_v59 }
 0x1a8   : > { %v3124_v17 = vpop.f32.mrf.mxu0  ;;  %v4478_v32 = vmul.f32 %v4332_v14, %v1693_v12 }
 0x1a9   : > { %v1706_v61 = vrot.slane %v4442_v43, 7  ;;  %v4460_v28 = vmax.f32 %v1644_v26, 0.0  ;;  %v1647_v21 = vadd.f32 %v3124_v17, %v4299_v35  ;;  %v1767_v12 = vmul.f32 %v4317_v10, %v4442_v43 }
 0x1aa   : > { %v1616_v51 = vpop.f32.mrf.mxu0 }
 0x1ab   : > { %v4470_v29 = vsel %vm866_vm0, 0.0, %v1706_v61  ;;  %v1704_v59 = vrot.slane %v4460_v28, 7  ;;  %v4482_v26 = vmax.f32 %v1647_v21, 0.0  ;;  %v1645_v5 = vadd.f32 %v4299_v35, %v1616_v51  ;;  %v1547_v61 = vpop.f32.mrf.mxu1 }
 0x1ac   : > { %v1735_v2 = vmul.f32 %v4308_v36, %v4470_v29  ;;  %v3127_v17 = vpop.f32.mrf.mxu0  ;;  %v4499_v55 = vadd.f32 %v4299_v35, %v1547_v61  ;;  %v5045_v61 = vmax.f32 %v4446_v24, 0.0 }
 0x1ad   : > { %v1720_v33 = vsel %vm866_vm0, 0.0, %v1704_v59  ;;  %v1650_v37 = vadd.f32 %v3127_v17, %v4299_v35  ;;  %v1707_v27 = vrot.slane %v4482_v26, 7  ;;  %v1653_v34 = vmax.f32 %v1645_v5, 0.0 }
 0x1ae   : > { %v1755_v14 = vadd.f32 %v1747_v57, %v1735_v2  ;;  %v1733_v21 = vmul.f32 %v4308_v36, %v1720_v33  ;;  %v1629_v51 = vpop.f32.mrf.mxu0  ;;  %v1765_v57 = vmul.f32 %v4317_v10, %v4460_v28  ;;  %v1844_v17 = vmul.f32 %v4349_v4, %v1720_v33 }
 0x1af   : > { %v4496_v0 = vmax.f32 %v1650_v37, 0.0  ;;  %v1723_v2 = vsel %vm866_vm0, 0.0, %v1707_v27  ;;  %v1705_v39 = vrot.slane %v1653_v34, 7  ;;  %v1768_v27 = vmul.f32 %v4317_v10, %v4482_v26 }
 0x1b0   : > { %v1775_v59 = vadd.f32 %v1767_v12, %v1755_v14  ;;  %v1753_v54 = vadd.f32 %v1745_v56, %v1733_v21  ;;  %v1736_v44 = vmul.f32 %v4308_v36, %v1723_v2  ;;  %v1751_v14 = vmul.f32 %v4311_v49, %v5045_v61  ;;  %v3128_v12 = vpop.f32.mrf.mxu0 }
 0x1b1   : > { %v1721_v33 = vsel %vm866_vm0, 0.0, %v1705_v39  ;;  %v1710_v8 = vrot.slane %v4496_v0, 7 }
 0x1b2   : > { %v1795_v37 = vadd.f32 %v4414_v42, %v1775_v59  ;;  %v1773_v5 = vadd.f32 %v1765_v57, %v1753_v54  ;;  %v1756_v21 = vadd.f32 %v1748_v48, %v1736_v44  ;;  %v1734_v54 = vmul.f32 %v4308_v36, %v1721_v33 }
 0x1b3   : > { %v1572_v59 = vmax.f32 %v4499_v55, 0.0  ;;  %v1852_v57 = vadd.f32 %v1844_v17, %v4420_v18  ;;  %v1766_v44 = vmul.f32 %v4317_v10, %v1653_v34  ;;  %v4523_v48 = vsel %vm866_vm0, 0.0, %v1710_v8 }
 0x1b4   : > { %v1815_v45 = vadd.f32 %v4375_v9, %v1795_v37  ;;  %v1793_v42 = vadd.f32 %v4423_v19, %v1773_v5  ;;  %v1776_v61 = vadd.f32 %v1768_v27, %v1756_v21  ;;  %v1754_v24 = vadd.f32 %v1746_v46, %v1734_v54  ;;  %v1632_v19 = vpop.f32.mrf.mxu0 }
 0x1b5   : > { %v1739_v9 = vmul.f32 %v4308_v36, %v4523_v48  ;;  %v1847_v37 = vmul.f32 %v4349_v4, %v1723_v2  ;;  %v1771_v18 = vmul.f32 %v4317_v10, %v4496_v0  ;;  %v1648_v17 = vadd.f32 %v4299_v35, %v1629_v51 }
 0x1b6   : > { %v1813_v39 = vadd.f32 %v4381_v50, %v1793_v42  ;;  %v1835_v56 = vadd.f32 %v4411_v3, %v1815_v45  ;;  %v4534_v5 = vadd.f32 %v3128_v12, %v4299_v35  ;;  %v1774_v21 = vadd.f32 %v1766_v44, %v1754_v24 }
 0x1b7   : > { %v1845_v3 = vmul.f32 %v4349_v4, %v1721_v33  ;;  %v1759_v46 = vadd.f32 %v1751_v14, %v1739_v9  ;;  %v1872_v45 = vadd.f32 %v4456_v16, %v1852_v57  ;;  %v1796_v27 = vadd.f32 %v4449_v1, %v1776_v61 }
 0x1b8   : > { %v1833_v50 = vadd.f32 %v4417_v11, %v1813_v39  ;;  %v4540_v8 = vmax.f32 %v1648_v17, 0.0  ;;  %v1649_v2 = vadd.f32 %v4299_v35, %v1632_v19  ;;  %v1855_v42 = vadd.f32 %v1847_v37, %v1835_v56 }
 0x1b9   : > { %v1794_v51 = vadd.f32 %v4405_v30, %v1774_v21  ;;  %v1779_v12 = vadd.f32 %v1771_v18, %v1759_v46  ;;  %v5046_v24 = vmax.f32 %v4467_v31, 0.0  ;;  %v1750_v16 = vmul.f32 %v4311_v49, %v1572_v59 }
 0x1ba   : > { %v1853_v54 = vadd.f32 %v1845_v3, %v1833_v50  ;;  %v1708_v33 = vrot.slane %v4540_v8, 7  ;;  %v1659_v1 = vmax.f32 %v4534_v5, 0.0  ;;  %v1884_v35 = vmul.f32 %v4363_v60, %v4460_v28 }
 0x1bb   : > { %v1749_v11 = vmul.f32 %v4311_v49, %v5046_v24  ;;  %v1814_v14 = vadd.f32 %v4366_v47, %v1794_v51  ;;  %v1799_v56 = vadd.f32 %v4463_v25, %v1779_v12  ;;  %v1816_v57 = vadd.f32 %v4385_v62, %v1796_v27  ;;  %v4568_v25 = vld [vmem:[#allocation7] ss:$0 sm:$0xff] }
 0x1bc   : > { %v1873_v30 = vadd.f32 %v1865_v63, %v1853_v54  ;;  %v1885_v61 = vmul.f32 %v4363_v60, %v1653_v34  ;;  %v1724_v44 = vsel %vm866_vm0, 0.0, %v1708_v33  ;;  %v1657_v39 = vmax.f32 %v1649_v2, 0.0 }
 0x1bd   : > { %v1846_v49 = vmul.f32 %v4349_v4, %v4470_v29  ;;  %v1892_v9 = vadd.f32 %v1884_v35, %v1872_v45  ;;  %v1875_v19 = vadd.f32 %v4487_v58, %v1855_v42  ;;  %v1834_v28 = vadd.f32 %v4400_v23, %v1814_v14 }
 0x1be   : > { %v1893_v37 = vadd.f32 %v1885_v61, %v1873_v30  ;;  %v1737_v63 = vmul.f32 %v4308_v36, %v1724_v44  ;;  %v1711_v47 = vrot.slane %v1659_v1, 7  ;;  %v1709_v62 = vrot.slane %v1657_v39, 7  ;;  %v5050_v61 = vld [vmem:[#allocation29_spill] sm:$0xff] }
 0x1bf   : > { %v1886_v34 = vmul.f32 %v4363_v60, %v4442_v43  ;;  %v1887_v29 = vmul.f32 %v4363_v60, %v4482_v26  ;;  %v1854_v18 = vadd.f32 %v1846_v49, %v1834_v28  ;;  %v1819_v58 = vadd.f32 %v4392_v53, %v1799_v56  ;;  %v5051_v28 = vld [vmem:[#allocation28_spill] sm:$0xff] }
 0x1c0   : > { %v1757_v17 = vadd.f32 %v1749_v11, %v1737_v63  ;;  %v1769_v23 = vmul.f32 %v4317_v10, %v4540_v8  ;;  %v1836_v21 = vadd.f32 %v4426_v6, %v1816_v57  ;;  %v1725_v50 = vsel %vm866_vm0, 0.0, %v1709_v62 }
 0x1c1   : > { %v1895_v3 = vadd.f32 %v1887_v29, %v1875_v19  ;;  %v1874_v46 = vadd.f32 %v4438_v41, %v1854_v18  ;;  %v1848_v43 = vmul.f32 %v4349_v4, %v1724_v44  ;;  %v1738_v45 = vmul.f32 %v4308_v36, %v1725_v50 }
 0x1c2   : > { %v1777_v27 = vadd.f32 %v1769_v23, %v1757_v17  ;;  %v1727_v26 = vsel %vm866_vm0, 0.0, %v1711_v47  ;;  %v1906_v53 = vadd.f32 %v4568_v25, %v1892_v9  ;;  %v1907_v2 = vadd.f32 %v4568_v25, %v1893_v37  ;;  %v5053_v17 = vld [vmem:[#allocation30_spill] sm:$0xff] }
 0x1c3   : > { %v1839_v42 = vadd.f32 %v4452_v52, %v1819_v58  ;;  %v1758_v51 = vadd.f32 %v1750_v16, %v1738_v45  ;;  %v1770_v6 = vmul.f32 %v4317_v10, %v1657_v39  ;;  %v1894_v54 = vadd.f32 %v1886_v34, %v1874_v46 }
 0x1c4   : > { %v1574_v12 = vmax.f32 %v4475_v22, 0.0  ;;  %v1797_v41 = vadd.f32 %v4478_v32, %v1777_v27  ;;  %v1856_v24 = vadd.f32 %v1848_v43, %v1836_v21  ;;  %v1930_v11 = vpack.c.bf16 %v1907_v2, %v1906_v53  ;;  %v2885_v27 = vld [vmem:[#allocation9] ss:$0 sm:$0xff] }
 0x1c5   : > { %v1909_v36 = vadd.f32 %v4568_v25, %v1895_v3  ;;  %v1851_v33 = vmul.f32 %v4349_v4, %v1727_v26  ;;  %v1778_v35 = vadd.f32 %v1770_v6, %v1758_v51  ;;  %v1908_v14 = vadd.f32 %v4568_v25, %v1894_v54  ;;  %v2866_v26 = vld [vmem:[#allocation4] ss:$0 sm:$0xff]  ;;  %v5056_v54 = vld [vmem:[#allocation22_spill] sm:$0xff] }
 0x1c6   : > { %v5047_v30 = vmax.f32 %v4378_v13, 0.0  ;;  %v5048_v10 = vmax.f32 %v4467_v31, 0.0  ;;  %v1817_v22 = vadd.f32 %v4396_v40, %v1797_v41  ;;  %3145 = vmatprep.mubr.bf16.mxu1 %v1930_v11  ;;  %v5049_v32 = vmax.f32 %v4369_v7, 0.0 }
 0x1c7   : > { %v1859_v57 = vadd.f32 %v1851_v33, %v1839_v42  ;;  %v1798_v44 = vadd.f32 %v5050_v61, %v1778_v35  ;;  %v1931_v49 = vpack.c.bf16 %v1909_v36, %v1908_v14  ;;  %v1849_v13 = vmul.f32 %v4349_v4, %v1725_v50  ;;  %v5055_v42 = vld [vmem:[#allocation20_spill] sm:$0xff]  ;;  %v5058_v33 = vld [vmem:[#allocation23_spill] sm:$0xff] }
 0x1c8   : > { %v1829_v52 = vmul.f32 %v4335_v15, %v5047_v30  ;;  %v1868_v16 = vmul.f32 %v4356_v20, %v5048_v10  ;;  %v1810_v56 = vmul.f32 %v4327_v38, %v5049_v32  ;;  %v5052_v37 = vmax.f32 %v5051_v28, 0.0 }
 0x1c9   : > { %v1871_v63 = vmul.f32 %v4356_v20, %v1574_v12  ;;  %3146 = vmatmul.mubr.bf16.vlgmr.msra.gmra.mxu1 %v1931_v49  ;;  %v1888_v7 = vmul.f32 %v4363_v60, %v4540_v8  ;;  %v1869_v38 = vmul.f32 %v4356_v20, %v1572_v59  ;;  %v1850_v62 = vmul.f32 %v4349_v4, %v4523_v48 }
 0x1ca   : > { %v1876_v9 = vadd.f32 %v1868_v16, %v1856_v24  ;;  %v1837_v19 = vadd.f32 %v1829_v52, %v1817_v22  ;;  %v1830_v31 = vmul.f32 %v4335_v15, %v5052_v37  ;;  %v1818_v40 = vadd.f32 %v1810_v56, %v1798_v44  ;;  %v5057_v24 = vld [vmem:[#allocation21_spill] sm:$0xff] }
 0x1cb   : > { %v1879_v34 = vadd.f32 %v1871_v63, %v1859_v57  ;;  %v1889_v15 = vmul.f32 %v4363_v60, %v1657_v39  ;;  %v5054_v23 = vmax.f32 %v5053_v17, 0.0  ;;  %v1891_v55 = vmul.f32 %v4363_v60, %v1659_v1  ;;  %v3308_v1 = vld [vmem:[%s4965_s14 + $0x18] sm:$0xff]  }
 0x1cc   : > { %v1857_v47 = vadd.f32 %v1849_v13, %v1837_v19  ;;  %v1838_v29 = vadd.f32 %v1830_v31, %v1818_v40  ;;  %v1896_v18 = vadd.f32 %v1888_v7, %v1876_v9  ;;  %v1890_v50 = vmul.f32 %v4363_v60, %v4496_v0  ;;  %3161 = vmatprep.subr.bf16.mxu0 %v3308_v1  ;;  %v3309_v0 = vld [vmem:[%s4965_s14 + $0x10] sm:$0xff]   ;;  %v3310_v60 = vld [vmem:[%s4965_s14 + $0x8] sm:$0xff]  }
 0x1cd   : > { %v1870_v21 = vmul.f32 %v4356_v20, %v5054_v23  ;;  %v1899_v4 = vadd.f32 %v1891_v55, %v1879_v34  ;;  %3162 = vmatpush3.bf16.msra.mxu0 %v3308_v1  ;;  %v1235_v51 = vadd.f32 %v5055_v42, %v2866_v26  ;;  %v1236_v12 = vadd.f32 %v5056_v54, %v2866_v26  ;;  %v5059_v40 = vld [vmem:[#allocation24_spill] sm:$0xff]  ;;  %v5066_v54 = vld [vmem:[#allocation17_spill] sm:$0xff] }
 0x1ce   : > { %v1877_v58 = vadd.f32 %v1869_v38, %v1857_v47  ;;  %v1858_v8 = vadd.f32 %v1850_v62, %v1838_v29  ;;  %v1910_v3 = vadd.f32 %v4568_v25, %v1896_v18  ;;  %3163 = vmatprep.subr.bf16.mxu0 %v3309_v0  ;;  %v1233_v11 = vadd.f32 %v2866_v26, %v5057_v24  ;;  %v5060_v47 = vld [vmem:[#allocation26_spill] sm:$0xff]  ;;  %v5061_v29 = vld [vmem:[#allocation25_spill] sm:$0xff] }
 0x1cf   : > { %v1913_v20 = vadd.f32 %v4568_v25, %v1899_v4  ;;  %v1234_v35 = vadd.f32 %v2866_v26, %v5058_v33  ;;  %v1243_v52 = vmax.f32 %v1235_v51, 0.0  ;;  %v1244_v16 = vmax.f32 %v1236_v12, 0.0  ;;  %v3318_v42 = vld [vmem:[%s4969_s18 + $0x8] sm:$0xff]   ;;  %v3319_v51 = vld [vmem:[%s4969_s18] sm:$0xff]  }
 0x1d0   : > { %v1897_v59 = vadd.f32 %v1889_v15, %v1877_v58  ;;  %v1878_v48 = vadd.f32 %v1870_v21, %v1858_v8  ;;  %v1241_v57 = vmax.f32 %v1233_v11, 0.0  ;;  %v1239_v7 = vadd.f32 %v5059_v40, %v2866_v26  ;;  %v5062_v15 = vld [vmem:[#allocation27_spill] sm:$0xff]  ;;  %v4703_v11 = vld [vmem:[#allocation10] ss:$0 sm:$0xff] }
 0x1d1   : > { %3164 = vmatpush3.bf16.msra.mxu0 %v3309_v0  ;;  %v1242_v61 = vmax.f32 %v1234_v35, 0.0  ;;  %v1240_v62 = vadd.f32 %v5060_v47, %v2866_v26  ;;  %v1237_v18 = vadd.f32 %v2866_v26, %v5061_v29  ;;  %v1238_v17 = vadd.f32 %v2866_v26, %v5062_v15  ;;  %v3315_v26 = vld [vmem:[%s4969_s18 + $0x20] sm:$0xff]  }
 0x1d2   : > { %v1911_v46 = vadd.f32 %v4568_v25, %v1897_v59  ;;  %v1898_v39 = vadd.f32 %v1890_v50, %v1878_v48  ;;  %3165 = vmatprep.subr.bf16.mxu0 %v3310_v60  ;;  %v1247_v55 = vmax.f32 %v1239_v7, 0.0  ;;  %v5068_v35 = vld [vmem:[#allocation19_spill] sm:$0xff] }
 0x1d3   : > { %v1248_v59 = vmax.f32 %v1240_v62, 0.0 }
 0x1d4   : > { %v1932_v43 = vpack.c.bf16 %v1911_v46, %v1910_v3  ;;  %v1912_v45 = vadd.f32 %v4568_v25, %v1898_v39  ;;  %v3311_v25 = vld [vmem:[%s4965_s14] sm:$0xff]   ;;  %v1245_v3 = vmax.f32 %v1237_v18, 0.0  ;;  %v1246_v46 = vmax.f32 %v1238_v17, 0.0 }
 0x1d5   : > { %3166 = vmatpush3.bf16.msra.mxu0 %v3310_v60  ;;  %v3312_v60 = vld [vmem:[%s4969_s18 + $0x38] sm:$0xff]  }
 0x1d6   : > { %3149 = vmatprep.mubr.bf16.mxu1 %v1932_v43  ;;  %v1933_v5 = vpack.c.bf16 %v1913_v20, %v1912_v45  ;;  %3167 = vmatprep.subr.bf16.mxu0 %v3311_v25 }
 0x1d7   : > { %3177 = vmatprep.subr.bf16.mxu1 %v3312_v60 }
 0x1d8   : > { %3150 = vmatmul.mubr.bf16.gmra.mxu1 %v1933_v5 }
 0x1d9   : > { %3168 = vmatpush3.bf16.msra.mxu0 %v3311_v25  ;;  %3178 = vmatpush3.bf16.msra.mxu1 %v3312_v60  ;;  %v3313_v25 = vld [vmem:[%s4969_s18 + $0x30] sm:$0xff]  }
 0x1da   : > { %3179 = vmatprep.subr.bf16.mxu1 %v3313_v25 }
 0x1dd   : > { %3180 = vmatpush3.bf16.msra.mxu1 %v3313_v25 }
 0x289   : > { %v3147_v53 = vpop.f32.mrf.mxu1 }
 0x28a   : > { %v2056_v2 = vadd.f32 %v3147_v53, %v2885_v27  ;;  %v3316_v53 = vld [vmem:[%s4969_s18 + $0x18] sm:$0xff]  }
 0x28b   : > { %v2016_v6 = vpop.f32.mrf.mxu1 }
 0x28c   : > { %v2054_v41 = vadd.f32 %v2885_v27, %v2016_v6  ;;  %v2064_v14 = vmax.f32 %v2056_v2, 0.0  ;;  %v3317_v2 = vld [vmem:[%s4969_s18 + $0x10] sm:$0xff]   ;;  %v2234_v6 = vld [vmem:[%s4967_s16] sm:$0x7] }
 0x28d   : > { %v3148_v36 = vpop.f32.mrf.mxu1  ;;  %v4698_v12 = vrot.slane %v2234_v6, %v5066_v54 }
 0x28e   : > { %v2057_v30 = vadd.f32 %v3148_v36, %v2885_v27  ;;  %v2062_v22 = vmax.f32 %v2054_v41, 0.0  ;;  %v4642_v44 = vadd.f32 %v2064_v14, %v1243_v52  ;;  %v5067_v41 = vld [vmem:[#allocation18_spill] sm:$0xff]  ;;  %v4708_v14 = vrot.slane %v2234_v6, %v5068_v35 }
 0x28f   : > { %v2019_v10 = vpop.f32.mrf.mxu1  ;;  %v4701_v24 = vrot.slane %v2234_v6, %v5067_v41  ;;  %v2299_v36 = vmul.f32 0.0, %v4698_v12 }
 0x290   : > { %v2065_v32 = vmax.f32 %v2057_v30, 0.0  ;;  %v2055_v56 = vadd.f32 %v2885_v27, %v2019_v10  ;;  %v4646_v19 = vadd.f32 %v2062_v22, %v1241_v57  ;;  %v2235_v10 = vld [vmem:[%s4967_s16 + $0x4] sm:$0x7] }
 0x291   : > { %v2311_v33 = vmul.f32 0.0, %v4701_v24  ;;  %v4729_v7 = vrot.slane %v2235_v10, %v5068_v35 }
 0x292   : > { %v4644_v49 = vadd.f32 %v2065_v32, %v1244_v16  ;;  %v2063_v9 = vmax.f32 %v2055_v56, 0.0  ;;  %v2236_v16 = vld [vmem:[%s4967_s16 + $0x8] sm:$0x7]  ;;  %v2331_v56 = vmul.f32 0.0, %v4708_v14 }
 0x293   : > { %v2319_v32 = vadd.f32 %v2311_v33, %v2299_v36  ;;  %v4736_v29 = vrot.slane %v2236_v16, %v5068_v35 }
 0x294   : > { %v2095_v13 = vpack.c.bf16 %v4644_v49, %v4642_v44  ;;  %v4650_v28 = vadd.f32 %v2063_v9, %v1242_v61  ;;  %v4720_v9 = vrot.slane %v2235_v10, %v5066_v54 }
 0x295   : > { %v2339_v62 = vadd.f32 %v2331_v56, %v2319_v32 }
 0x296   : > { %v2094_v37 = vpack.c.bf16 %v4650_v28, %v4646_v19 }
 0x298   : > { %v3151_v31 = vpop.f32.mrf.mxu1  ;;  %3169 = vmatprep.mubr.bf16.mxu0 %v2094_v37 }
 0x299   : > { %v2060_v63 = vadd.f32 %v3151_v31, %v2885_v27  ;;  %3170 = vmatmul.mubr.bf16.vlgmr.msra.gmra.mxu0 %v2095_v13  ;;  %v4723_v13 = vrot.slane %v2235_v10, %v5067_v41  ;;  %v4726_v31 = vrot.slane %v2236_v16, %v5067_v41 }
 0x29a   : > { %v2032_v38 = vpop.f32.mrf.mxu1 }
 0x29b   : > { %v2058_v34 = vadd.f32 %v2885_v27, %v2032_v38  ;;  %v2068_v23 = vmax.f32 %v2060_v63, 0.0  ;;  %v4732_v38 = vrot.slane %v2236_v16, %v5066_v54 }
 0x29c   : > { %v3152_v58 = vpop.f32.mrf.mxu1 }
 0x29d   : > { %v2061_v21 = vadd.f32 %v3152_v58, %v2885_v27  ;;  %v2066_v50 = vmax.f32 %v2058_v34, 0.0  ;;  %v4658_v39 = vadd.f32 %v2068_v23, %v1247_v55  ;;  %v4744_v23 = vmul.f32 0.0, %v4732_v38 }
 0x29e   : > { %v2035_v8 = vpop.f32.mrf.mxu1 }
 0x29f   : > { %v2069_v4 = vmax.f32 %v2061_v21, 0.0  ;;  %v2059_v48 = vadd.f32 %v2885_v27, %v2035_v8  ;;  %v4662_v20 = vadd.f32 %v2066_v50, %v1245_v3  ;;  %v3314_v27 = vld [vmem:[%s4969_s18 + $0x28] sm:$0xff]  }
 0x2a0   : > { %3181 = vmatprep.subr.bf16.mxu1 %v3314_v27 }
 0x2a1   : > { %v4660_v43 = vadd.f32 %v2069_v4, %v1248_v59  ;;  %v2067_v45 = vmax.f32 %v2059_v48, 0.0  ;;  %5064 = vst [vmem:[#allocation28_spill] sm:$0xff] %v4662_v20  ;;  %3182 = vmatpush3.bf16.msra.mxu1 %v3314_v27 }
 0x2a2   : > { %3183 = vmatprep.subr.bf16.mxu1 %v3315_v26 }
 0x2a3   : > { %5063 = vst [vmem:[#allocation29_spill] sm:$0xff] %v4660_v43  ;;  %v4664_v5 = vadd.f32 %v2067_v45, %v1246_v46  ;;  %v2097_v1 = vpack.c.bf16 %v4660_v43, %v4658_v39 }
 0x2a5   : > { %5065 = vst [vmem:[#allocation30_spill] sm:$0xff] %v4664_v5  ;;  %v2096_v0 = vpack.c.bf16 %v4664_v5, %v4662_v20  ;;  %3184 = vmatpush3.bf16.msra.mxu1 %v3315_v26 }
 0x2a6   : > { %3185 = vmatprep.subr.bf16.mxu1 %v3316_v53 }
 0x2a7   : > { %3173 = vmatprep.mubr.bf16.mxu0 %v2096_v0 }
 0x2a8   : > { %3174 = vmatmul.mubr.bf16.gmra.mxu0 %v2097_v1 }
 0x2a9   : > { %3186 = vmatpush3.bf16.msra.mxu1 %v3316_v53 }
 0x2aa   : > { %3187 = vmatprep.subr.bf16.mxu1 %v3317_v2 }
 0x2ad   : > { %3188 = vmatpush3.bf16.msra.mxu1 %v3317_v2 }
 0x2ae   : > { %3189 = vmatprep.subr.bf16.mxu1 %v3318_v42 }
 0x2b1   : > { %3190 = vmatpush3.bf16.msra.mxu1 %v3318_v42 }
 0x2b2   : > { %3191 = vmatprep.subr.bf16.mxu1 %v3319_v51 }
 0x2b5   : > { %3192 = vmatpush3.bf16.msra.mxu1 %v3319_v51 }
 0x359   : > { %v3171_v30 = vpop.f32.mrf.mxu0 }
 0x35a   : > { %v2220_v52 = vadd.f32 %v3171_v30, %v4703_v11 }
 0x35b   : > { %v2180_v22 = vpop.f32.mrf.mxu0 }
 0x35c   : > { %v2228_v57 = vmax.f32 %v2220_v52, 0.0  ;;  %v2218_v61 = vadd.f32 %v4703_v11, %v2180_v22 }
 0x35d   : > { %v3172_v37 = vpop.f32.mrf.mxu0 }
 0x35e   : > { %v2248_v63 = vrot.slane %v2228_v57, 7  ;;  %v2272_v40 = vrot.slane %v2228_v57, 1  ;;  %v2226_v47 = vmax.f32 %v2218_v61, 0.0  ;;  %v2221_v34 = vadd.f32 %v3172_v37, %v4703_v11 }
 0x35f   : > { %v2183_v18 = vpop.f32.mrf.mxu0  ;;  %v2314_v15 = vmul.f32 %v4701_v24, %v2228_v57  ;;  %v4749_v55 = vmul.f32 %v4723_v13, %v2228_v57  ;;  %v4757_v3 = vmul.f32 %v4726_v31, %v2228_v57 }
 0x360   : > { %v4739_v58 = vsel %vm866_vm0, 0.0, %v2248_v63  ;;  %v2219_v17 = vadd.f32 %v4703_v11, %v2183_v18  ;;  %v2246_v8 = vrot.slane %v2226_v47, 7  ;;  %v2270_v59 = vrot.slane %v2226_v47, 1 }
 0x361   : > { %v2302_v21 = vmul.f32 %v4698_v12, %v4739_v58  ;;  %v2229_v50 = vmax.f32 %v2221_v34, 0.0  ;;  %v4754_v48 = vsel %vm2286_vm1, %v2272_v40, 0.0  ;;  %v4761_v46 = vmul.f32 %v4720_v9, %v4739_v58 }
 0x362   : > { %v4751_v4 = vmax.f32 %v2219_v17, 0.0  ;;  %v2262_v45 = vsel %vm866_vm0, 0.0, %v2246_v8  ;;  %v2287_v1 = vsel %vm2286_vm1, %v2270_v59, 0.0  ;;  %v2312_v0 = vmul.f32 %v4701_v24, %v2226_v47 }
 0x363   : > { %v2322_v60 = vadd.f32 %v2314_v15, %v2302_v21  ;;  %v2300_v25 = vmul.f32 %v4698_v12, %v2262_v45  ;;  %v2351_v27 = vmul.f32 %v4720_v9, %v2262_v45  ;;  %v2371_v26 = vmul.f32 %v4723_v13, %v2226_v47 }
 0x364   : > { %v2332_v53 = vmul.f32 %v4708_v14, %v2287_v1  ;;  %v2249_v2 = vrot.slane %v2229_v50, 7  ;;  %v2273_v42 = vrot.slane %v2229_v50, 1  ;;  %v2334_v51 = vmul.f32 %v4708_v14, %v4754_v48 }
 0x365   : > { %v2320_v6 = vadd.f32 %v2312_v0, %v2300_v25  ;;  %v2359_v54 = vadd.f32 %v2351_v27, %v2339_v62  ;;  %v2391_v41 = vmul.f32 %v4729_v7, %v2287_v1  ;;  %v2247_v36 = vrot.slane %v4751_v4, 7 }
 0x366   : > { %v2265_v33 = vsel %vm866_vm0, 0.0, %v2249_v2  ;;  %v2290_v35 = vsel %vm2286_vm1, %v2273_v42, 0.0  ;;  %v2315_v30 = vmul.f32 %v4701_v24, %v2229_v50  ;;  %v4778_v52 = vmul.f32 %v4723_v13, %v2229_v50 }
 0x367   : > { %v2303_v16 = vmul.f32 %v4698_v12, %v2265_v33  ;;  %v4782_v22 = vmul.f32 %v4726_v31, %v2229_v50  ;;  %v2271_v32 = vrot.slane %v4751_v4, 1  ;;  %v2313_v56 = vmul.f32 %v4701_v24, %v4751_v4 }
 0x368   : > { %v3175_v10 = vpop.f32.mrf.mxu0  ;;  %v2340_v57 = vadd.f32 %v2332_v53, %v2320_v6  ;;  %v2379_v61 = vadd.f32 %v2371_v26, %v2359_v54  ;;  %v2335_v37 = vmul.f32 %v4708_v14, %v2290_v35  ;;  %v2354_v63 = vmul.f32 %v4720_v9, %v2265_v33 }
 0x369   : > { %v2323_v47 = vadd.f32 %v2315_v30, %v2303_v16  ;;  %v4790_v62 = vmul.f32 %v4729_v7, %v2290_v35  ;;  %v4793_v34 = vmul.f32 %v4732_v38, %v2265_v33  ;;  %v4796_v18 = vsel %vm866_vm0, 0.0, %v2247_v36 }
 0x36a   : > { %v2196_v40 = vpop.f32.mrf.mxu0  ;;  %v2301_v15 = vmul.f32 %v4698_v12, %v4796_v18  ;;  %v2352_v17 = vmul.f32 %v4720_v9, %v4796_v18  ;;  %v2224_v21 = vadd.f32 %v3175_v10, %v4703_v11  ;;  %v4805_v50 = vmul.f32 %v4736_v29, %v2290_v35 }
 0x36b   : > { %v2222_v8 = vadd.f32 %v4703_v11, %v2196_v40  ;;  %v4809_v1 = vsel %vm2286_vm1, %v2271_v32, 0.0  ;;  %v2342_v0 = vadd.f32 %v2334_v51, %v2322_v60  ;;  %v4811_v25 = vadd.f32 %v2391_v41, %v2379_v61 }
 0x36c   : > { %v3176_v59 = vpop.f32.mrf.mxu0  ;;  %v2360_v27 = vadd.f32 %v2352_v17, %v2340_v57  ;;  %v4813_v26 = vmax.f32 %v2224_v21, 0.0  ;;  %v2343_v42 = vadd.f32 %v2335_v37, %v2323_v47  ;;  %v2321_v6 = vadd.f32 %v2313_v56, %v2301_v15 }
 0x36d   : > { %v2225_v45 = vadd.f32 %v3176_v59, %v4703_v11  ;;  %v2230_v53 = vmax.f32 %v2222_v8, 0.0  ;;  %v2372_v54 = vmul.f32 %v4723_v13, %v4751_v4  ;;  %v2333_v51 = vmul.f32 %v4708_v14, %v4809_v1 }
 0x36e   : > { %v2199_v2 = vpop.f32.mrf.mxu0  ;;  %v2252_v33 = vrot.slane %v4813_v26, 7  ;;  %v2276_v35 = vrot.slane %v4813_v26, 1  ;;  %v2362_v16 = vadd.f32 %v2354_v63, %v2342_v0  ;;  %v2318_v56 = vmul.f32 %v4701_v24, %v4813_v26 }
 0x36f   : > { %v4817_v36 = vmax.f32 %v2225_v45, 0.0  ;;  %v2223_v60 = vadd.f32 %v4703_v11, %v2199_v2  ;;  %v2380_v41 = vadd.f32 %v2372_v54, %v2360_v27  ;;  %v2250_v30 = vrot.slane %v2230_v53, 7 }
 0x370   : > { %v2274_v10 = vrot.slane %v2230_v53, 1  ;;  %v4825_v32 = vsel %vm866_vm0, 0.0, %v2252_v33  ;;  %v4831_v57 = vmul.f32 %v4723_v13, %v4813_v26  ;;  %v2316_v61 = vmul.f32 %v4701_v24, %v2230_v53 }
 0x371   : > { %v4835_v11 = vsel %vm2286_vm1, %v2276_v35, 0.0  ;;  %v2306_v37 = vmul.f32 %v4698_v12, %v4825_v32  ;;  %v2266_v63 = vsel %vm866_vm0, 0.0, %v2250_v30  ;;  %v2375_v17 = vmul.f32 %v4723_v13, %v2230_v53 }
 0x372   : > { %v2291_v40 = vsel %vm2286_vm1, %v2274_v10, 0.0  ;;  %v2304_v47 = vmul.f32 %v4698_v12, %v2266_v63  ;;  %v2355_v15 = vmul.f32 %v4720_v9, %v2266_v63  ;;  %v2434_v21 = vmul.f32 %v4726_v31, %v2230_v53 }
 0x373   : > { %v2326_v8 = vadd.f32 %v2318_v56, %v2306_v37  ;;  %v4847_v59 = vmul.f32 %v4720_v9, %v4825_v32  ;;  %v2336_v45 = vmul.f32 %v4708_v14, %v2291_v40  ;;  %v2253_v0 = vrot.slane %v4817_v36, 7 }
 0x374   : > { %v2324_v27 = vadd.f32 %v2316_v61, %v2304_v47  ;;  %v2363_v2 = vadd.f32 %v2355_v15, %v2343_v42  ;;  %v2414_v54 = vmul.f32 %v4732_v38, %v2266_v63  ;;  %v2338_v33 = vmul.f32 %v4708_v14, %v4835_v11 }
 0x375   : > { %v2454_v35 = vmul.f32 %v4736_v29, %v2291_v40  ;;  %v4856_v53 = vsel %vm866_vm0, 0.0, %v2253_v0  ;;  %v2231_v30 = vmax.f32 %v2223_v60, 0.0  ;;  %v2341_v10 = vadd.f32 %v2333_v51, %v2321_v6 }
 0x376   : > { %v2277_v56 = vrot.slane %v4817_v36, 1  ;;  %v2346_v37 = vadd.f32 %v2338_v33, %v2326_v8  ;;  %v2358_v5 = vmul.f32 %v4720_v9, %v4856_v53  ;;  %v2378_v42 = vmul.f32 %v4723_v13, %v4817_v36 }
 0x377   : > { %v2344_v61 = vadd.f32 %v2336_v45, %v2324_v27  ;;  %v2383_v63 = vadd.f32 %v2375_v17, %v2363_v2  ;;  %v2251_v47 = vrot.slane %v2231_v30, 7  ;;  %v2275_v15 = vrot.slane %v2231_v30, 1 }
 0x378   : > { %v2366_v43 = vadd.f32 %v2358_v5, %v2346_v37  ;;  %v2317_v20 = vmul.f32 %v4701_v24, %v2231_v30  ;;  %v2376_v0 = vmul.f32 %v4723_v13, %v2231_v30  ;;  %v2361_v6 = vadd.f32 %v4761_v46, %v2341_v10 }
 0x379   : > { %v2267_v60 = vsel %vm866_vm0, 0.0, %v2251_v47  ;;  %v2382_v51 = vadd.f32 %v4778_v52, %v2362_v16  ;;  %v2392_v8 = vmul.f32 %v4729_v7, %v4809_v1  ;;  %v2411_v45 = vmul.f32 %v4732_v38, %v4796_v18 }
 0x37a   : > { %v2305_v17 = vmul.f32 %v4698_v12, %v2267_v60  ;;  %v2356_v5 = vmul.f32 %v4720_v9, %v2267_v60  ;;  %v2381_v24 = vadd.f32 %v4749_v55, %v2361_v6  ;;  %v2393_v13 = vmul.f32 %v4729_v7, %v4754_v48  ;;  %v2895_v6 = vld [vmem:[#allocation12] ss:$0 sm:$0xff] }
 0x37b   : > { %v2400_v46 = vadd.f32 %v2392_v8, %v2380_v41  ;;  %v2412_v27 = vmul.f32 %v4732_v38, %v4739_v58  ;;  %v2419_v52 = vadd.f32 %v2411_v45, %v4811_v25  ;;  %v2431_v16 = vmul.f32 %v4726_v31, %v4751_v4 }
 0x37c   : > { %v2325_v2 = vadd.f32 %v2317_v20, %v2305_v17  ;;  %v2364_v18 = vadd.f32 %v2356_v5, %v2344_v61  ;;  %v2401_v33 = vadd.f32 %v2393_v13, %v2381_v24  ;;  %v2451_v12 = vmul.f32 %v4736_v29, %v4809_v1 }
 0x37d   : > { %v2420_v9 = vadd.f32 %v2412_v27, %v2400_v46  ;;  %v2439_v55 = vadd.f32 %v2431_v16, %v2419_v52  ;;  %v2452_v10 = vmul.f32 %v4736_v29, %v4754_v48  ;;  %v2402_v41 = vadd.f32 %v4790_v62, %v2382_v51 }
 0x37e   : > { %v2384_v37 = vadd.f32 %v2376_v0, %v2364_v18  ;;  %v2421_v58 = vadd.f32 %v4793_v34, %v2401_v33  ;;  %v2292_v25 = vsel %vm2286_vm1, %v2275_v15, 0.0  ;;  %v2395_v4 = vmul.f32 %v4729_v7, %v2291_v40 }
 0x37f   : > { %v2440_v20 = vadd.f32 %v4757_v3, %v2420_v9  ;;  %v2459_v61 = vadd.f32 %v2451_v12, %v2439_v55  ;;  %v2422_v47 = vadd.f32 %v2414_v54, %v2402_v41  ;;  %v2337_v1 = vmul.f32 %v4708_v14, %v2292_v25 }
 0x380   : > { %v2441_v8 = vadd.f32 %v4782_v22, %v2421_v58  ;;  %v2396_v48 = vmul.f32 %v4729_v7, %v2292_v25  ;;  %v2403_v45 = vadd.f32 %v2395_v4, %v2383_v63  ;;  %v2415_v62 = vmul.f32 %v4732_v38, %v2267_v60 }
 0x381   : > { %v2386_v0 = vadd.f32 %v2378_v42, %v2366_v43  ;;  %v2460_v34 = vadd.f32 %v2452_v10, %v2440_v20  ;;  %v2442_v51 = vadd.f32 %v2434_v21, %v2422_v47  ;;  %v2345_v15 = vadd.f32 %v2337_v1, %v2325_v2 }
 0x382   : > { %v2461_v40 = vadd.f32 %v4805_v50, %v2441_v8  ;;  %v2404_v17 = vadd.f32 %v2396_v48, %v2384_v37  ;;  %v2416_v3 = vmul.f32 %v4732_v38, %v4825_v32  ;;  %v2423_v54 = vadd.f32 %v2415_v62, %v2403_v45 }
 0x383   : > { %v2473_v14 = vadd.f32 %v2895_v6, %v2459_v61  ;;  %v2474_v5 = vadd.f32 %v2895_v6, %v2460_v34  ;;  %v2462_v24 = vadd.f32 %v2454_v35, %v2442_v51  ;;  %v2435_v22 = vmul.f32 %v4726_v31, %v2231_v30 }
 0x384   : > { %v2475_v13 = vadd.f32 %v2895_v6, %v2461_v40  ;;  %v2424_v63 = vadd.f32 %v2416_v3, %v2404_v17  ;;  %v2436_v43 = vmul.f32 %v4726_v31, %v4813_v26  ;;  %v2455_v21 = vmul.f32 %v4736_v29, %v2292_v25 }
 0x385   : > { %v2512_v42 = vpack.c.bf16 %v2474_v5, %v2473_v14  ;;  %v2476_v60 = vadd.f32 %v2895_v6, %v2462_v24  ;;  %v2443_v50 = vadd.f32 %v2435_v22, %v2423_v54  ;;  %v2294_v32 = vsel %vm2286_vm1, %v2277_v56, 0.0 }
 0x386   : > { %v2444_v46 = vadd.f32 %v2436_v43, %v2424_v63  ;;  %v2456_v35 = vmul.f32 %v4736_v29, %v4835_v11  ;;  %v2365_v30 = vadd.f32 %v4847_v59, %v2345_v15  ;;  %v2398_v27 = vmul.f32 %v4729_v7, %v2294_v32 }
 0x387   : > { %3193 = vmatprep.mubr.bf16.mxu1 %v2512_v42  ;;  %v2513_v52 = vpack.c.bf16 %v2476_v60, %v2475_v13  ;;  %v2463_v26 = vadd.f32 %v2455_v21, %v2443_v50  ;;  %v2438_v16 = vmul.f32 0.0, %v4726_v31  ;;  %v2397_v33 = vmul.f32 %v4729_v7, %v4835_v11  ;;  %v5069_v42 = vld [vmem:[#allocation28_spill] sm:$0xff] }
 0x388   : > { %v2464_v2 = vadd.f32 %v2456_v35, %v2444_v46  ;;  %v2385_v18 = vadd.f32 %v4831_v57, %v2365_v30  ;;  %v2406_v56 = vadd.f32 %v2398_v27, %v2386_v0  ;;  %v2417_v12 = vmul.f32 %v4732_v38, %v4856_v53  ;;  %v5070_v35 = vld [vmem:[#allocation29_spill] sm:$0xff] }
 0x389   : > { %3194 = vmatmul.mubr.bf16.vlgmr.msra.gmra.mxu1 %v2513_v52  ;;  %v2458_v59 = vmul.f32 0.0, %v4736_v29  ;;  %v2477_v9 = vadd.f32 %v2895_v6, %v2463_v26  ;;  %v2437_v37 = vmul.f32 %v4726_v31, %v4817_v36  ;;  %v2457_v11 = vmul.f32 %v4736_v29, %v2294_v32  ;;  %v2896_v31 = vld [vmem:[%s4971_s20] ss:$0 sm:$0xff] }
 0x38a   : > { %v2478_v55 = vadd.f32 %v2895_v6, %v2464_v2  ;;  %v2405_v10 = vadd.f32 %v2397_v33, %v2385_v18  ;;  %v2426_v41 = vadd.f32 %v4744_v23, %v2406_v56  ;;  %v2905_v23 = vld [vmem:[%s4970_s19] ss:$0 sm:$0xff]  ;;  %v2490_v8 = vmul.f32 %v2896_v31, %v4642_v44 }
 0x38b   : > { %v2488_v62 = vmul.f32 %v2896_v31, %v4646_v19  ;;  %v2491_v15 = vmul.f32 %v2896_v31, %v4644_v49  ;;  %v2489_v54 = vmul.f32 %v2896_v31, %v4650_v28  ;;  %v2494_v13 = vmul.f32 %v2896_v31, %v4658_v39  ;;  %v5071_v39 = vld [vmem:[#allocation30_spill] sm:$0xff] }
 0x38c   : > { %v2514_v58 = vpack.c.bf16 %v2478_v55, %v2477_v9  ;;  %v2425_v57 = vadd.f32 %v2417_v12, %v2405_v10  ;;  %v2446_v25 = vadd.f32 %v2438_v16, %v2426_v41  ;;  %v2492_v60 = vmul.f32 %v2896_v31, %v5069_v42 }
 0x38d   : > { %v2495_v30 = vmul.f32 %v2896_v31, %v5070_v35  ;;  %v2493_v16 = vmul.f32 %v2896_v31, %v5071_v39 }
 0x38e   : > { %3197 = vmatprep.mubr.bf16.mxu1 %v2514_v58  ;;  %v2445_v7 = vadd.f32 %v2437_v37, %v2425_v57  ;;  %v2466_v38 = vadd.f32 %v2458_v59, %v2446_v25 }
 0x390   : > { %v2465_v53 = vadd.f32 %v2457_v11, %v2445_v7  ;;  %v2480_v20 = vadd.f32 %v2895_v6, %v2466_v38 }
 0x392   : > { %v2479_v4 = vadd.f32 %v2895_v6, %v2465_v53 }
 0x394   : > { %v2515_v61 = vpack.c.bf16 %v2480_v20, %v2479_v4 }
 0x396   : > { %3198 = vmatmul.mubr.bf16.gmra.mxu1 %v2515_v61 }
 0x449   : > { %v3195_v36 = vpop.f32.mrf.mxu1 }
 0x44a   : > { %v2638_v47 = vadd.f32 %v3195_v36, %v2905_v23 }
 0x44b   : > { %v2598_v1 = vpop.f32.mrf.mxu1 }
 0x44c   : > { %v2646_v29 = vmax.f32 %v2638_v47, 0.0  ;;  %v2636_v48 = vadd.f32 %v2905_v23, %v2598_v1 }
 0x44d   : > { %v3196_v6 = vpop.f32.mrf.mxu1 }
 0x44e   : > { %v2654_v45 = vadd.f32 %v2646_v29, %v2490_v8  ;;  %v2644_v0 = vmax.f32 %v2636_v48, 0.0  ;;  %v2639_v34 = vadd.f32 %v3196_v6, %v2905_v23 }
 0x44f   : > { %v2601_v51 = vpop.f32.mrf.mxu1 }
 0x450   : > { %2662 = vst [vmem:[%s4931_s3 + $0x10] sm:$0xff] %v2654_v45  ;;  %v2652_v44 = vadd.f32 %v2644_v0, %v2488_v62  ;;  %v2647_v40 = vmax.f32 %v2639_v34, 0.0  ;;  %v2637_v17 = vadd.f32 %v2905_v23, %v2601_v51 }
 0x452   : > { %2660 = vst [vmem:[%s4931_s3] sm:$0xff] %v2652_v44  ;;  %v2655_v3 = vadd.f32 %v2647_v40, %v2491_v15  ;;  %v2645_v14 = vmax.f32 %v2637_v17, 0.0 }
 0x454   : > { %2663 = vst [vmem:[%s4931_s3 + $0x18] sm:$0xff] %v2655_v3  ;;  %v2653_v5 = vadd.f32 %v2645_v14, %v2489_v54 }
 0x456   : > { %2661 = vst [vmem:[%s4931_s3 + $0x8] sm:$0xff] %v2653_v5  ;;  %v3199_v24 = vpop.f32.mrf.mxu1 }
 0x457   : > { %v2642_v19 = vadd.f32 %v3199_v24, %v2905_v23 }
 0x458   : > { %v2614_v22 = vpop.f32.mrf.mxu1 }
 0x459   : > { %v2650_v63 = vmax.f32 %v2642_v19, 0.0  ;;  %v2640_v43 = vadd.f32 %v2905_v23, %v2614_v22 }
 0x45a   : > { %v3200_v49 = vpop.f32.mrf.mxu1 }
 0x45b   : > { %v2658_v21 = vadd.f32 %v2650_v63, %v2494_v13  ;;  %v2648_v28 = vmax.f32 %v2640_v43, 0.0  ;;  %v2643_v50 = vadd.f32 %v3200_v49, %v2905_v23 }
 0x45c   : > { %v2617_v32 = vpop.f32.mrf.mxu1 }
 0x45d   : > { %2666 = vst [vmem:[%s4931_s3 + $0x30] sm:$0xff] %v2658_v21  ;;  %v2656_v46 = vadd.f32 %v2648_v28, %v2492_v60  ;;  %v2651_v27 = vmax.f32 %v2643_v50, 0.0  ;;  %v2641_v52 = vadd.f32 %v2905_v23, %v2617_v32 }
 0x45f   : > { %2664 = vst [vmem:[%s4931_s3 + $0x20] sm:$0xff] %v2656_v46  ;;  %v2659_v26 = vadd.f32 %v2651_v27, %v2495_v30  ;;  %v2649_v2 = vmax.f32 %v2641_v52, 0.0 }
 0x461   : > { %2667 = vst [vmem:[%s4931_s3 + $0x38] sm:$0xff] %v2659_v26  ;;  %v2657_v18 = vadd.f32 %v2649_v2, %v2493_v16 }
 0x463   : > { %2665 = vst [vmem:[%s4931_s3 + $0x28] sm:$0xff] %v2657_v18 }
 0x464 PF: > { %s35_s2 = sadd.s32 1, %s3524_s2  }
 0x465   : > { %p32_p10 = scmp.ge.s32.totalorder %s35_s2, 4  }
 0x467   :  { %34 = sbr.rel (!%p32_p10) target bundleno = 12 (0xc), region = 172 }
 0x46c   :  { %2689 = vsyncpa [#allocation3], 1 }
 0x46d   :  { %2691 = vsyncpa [#allocation3 + $0x1], 1 }
 0x46e   :  { %2692 = vsyncpa [#allocation5], 1 }
 0x46f   :  { %2693 = vsyncpa [#allocation8], 1 }
 0x470   :  { %2694 = vsyncpa [#allocation11], 1 }

// kernel: _lambda_.6
= control target key start
LH: loop header
LB: loop body
LE: loop exit
PB: predicated region body
PF: predicated region fallthrough
CT: control target
= control target key end

     0   :  { %s6200_s0 = inlined_call_operand.vmem [shape: f32[2,4,4,128], index: 0, kind: input, shape index: {}]   ;;  %s6201_s1 = inlined_call_operand.vmem [shape: f32[2,4,4,128], index: 1, kind: input, shape index: {}]   ;;  %s6202_s2 = inlined_call_operand.vmem [shape: f32[2,4,4,128], index: 2, kind: input, shape index: {}]   ;;  %s6203_s3 = inlined_call_operand.vmem [shape: f32[2,4,4,128], index: 3, kind: input, shape index: {}]   ;;  %s6204_s4 = inlined_call_operand.vmem [shape: f32[3,3,128], index: 4, kind: input, shape index: {}]   ;;  %s6205_s5 = inlined_call_operand.hbm [shape: f32[1,128], index: 5, kind: input, shape index: {}]   ;;  %s6206_s6 = inlined_call_operand.vmem [shape: bf16[128,128], index: 6, kind: input, shape index: {}]   ;;  %s6207_s7 = inlined_call_operand.hbm [shape: f32[1,128], index: 7, kind: input, shape index: {}]   ;;  %s6208_s8 = inlined_call_operand.vmem [shape: bf16[128,128], index: 8, kind: input, shape index: {}]   ;;  %s6209_s9 = inlined_call_operand.hbm [shape: f32[1,128], index: 9, kind: input, shape index: {}]   ;;  %s6210_s10 = inlined_call_operand.vmem [shape: f32[3,3,128], index: 10, kind: input, shape index: {}]   ;;  %s6211_s11 = inlined_call_operand.hbm [shape: f32[1,128], index: 11, kind: input, shape index: {}]   ;;  %s6212_s12 = inlined_call_operand.vmem [shape: bf16[128,128], index: 12, kind: input, shape index: {}]   ;;  %s6213_s13 = inlined_call_operand.hbm [shape: f32[1,128], index: 13, kind: input, shape index: {}]   ;;  %s6214_s14 = inlined_call_operand.vmem [shape: bf16[128,128], index: 14, kind: input, shape index: {}]   ;;  %s6215_s15 = inlined_call_operand.hbm [shape: f32[1,128], index: 15, kind: input, shape index: {}]   ;;  %s6216_s16 = inlined_call_operand.vmem [shape: f32[3,3,128], index: 16, kind: input, shape index: {}]   ;;  %s6217_s17 = inlined_call_operand.hbm [shape: f32[1,128], index: 17, kind: input, shape index: {}]   ;;  %s6218_s18 = inlined_call_operand.vmem [shape: bf16[128,128], index: 18, kind: input, shape index: {}]   ;;  %s6219_s19 = inlined_call_operand.hbm [shape: f32[1,128], index: 19, kind: input, shape index: {}]   ;;  %s6220_s20 = inlined_call_operand.hbm [shape: f32[1,128], index: 20, kind: input, shape index: {}]   ;;  %s6221_s21 = inlined_call_operand.vmem [shape: f32[2,4,4,128], index: 21, kind: output, shape index: {}]  }
   0x1   :  { %6224 = sst [smem:[#allocation21_spill]] %s6200_s0 }
   0x2   :  { %6225 = sst [smem:[#allocation22_spill]] %s6201_s1 }
   0x3   :  { %6226 = sst [smem:[#allocation23_spill]] %s6202_s2 }
   0x4   :  { %6227 = sst [smem:[#allocation24_spill]] %s6203_s3 }
   0x5   :  { %6228 = sst [smem:[#allocation25_spill]] %s6204_s4 }
   0x6   :  { %6229 = sst [smem:[#allocation26_spill]] %s6205_s5 }
   0x7   :  { %6230 = sst [smem:[#allocation27_spill]] %s6207_s7 }
   0x8   :  { %26 = vsyncpa [#allocation3], 0 }
   0x9   :  { %27 = vsyncpa [#allocation5], 0 }
   0xa   :  { %28 = vsyncpa [#allocation8], 0 }
   0xb   :  { %29 = vsyncpa [#allocation11], 0 }
   0xc   :  { %30 = vsyncpa [#allocation14], 0  ;;  %s4772_s2 = smov 0  }
   0xd LB: > { %s4651_s25 = smov [#allocation4]   ;;  %s4778_s27 = sadd.s32 4294967295, %s4649_s2   ;;  %s4649_s2 = sphi %s4772_s2, %s36_s2  }
   0xe   : > { %s558_s26 = sshll.u32 %s4651_s25, 4  ;;  %p3230_p0 = scmp.ge.s32.totalorder %s4649_s2, 1  ;;  %s559_s26 = int_to_ptr.vmem [resolvable:$true] %s558_s26 }
   0xf   : > { %p528_p1 = scmp.lt.s32.totalorder %s4649_s2, 3  ;;  %p6223_p2 = scmp.eq.s32.totalorder %s4778_s27, 0 }
  0x10   : > { %s4652_s28 = smov [#allocation7]   ;;  %s4653_s0 = smov [#allocation10]  }
  0x11   : > { %p4783_p3 = pnand %p3230_p0, %p528_p1  ;;  %s586_s29 = sshll.u32 %s4652_s28, 4  ;;  %s4789_s29 = int_to_ptr.vmem [resolvable:$true] %s586_s29 }
  0x12   : > { %s614_s4 = sshll.u32 %s4653_s0, 4  ;;  %s4654_s5 = smov [#allocation13]   ;;  %s4797_s4 = int_to_ptr.vmem [resolvable:$true] %s614_s4 }
  0x13   : > { %p4281_p4 = pneg %p4783_p3  ;;  %s642_s22 = sshll.u32 %s4654_s5, 4  ;;  %s4799_s22 = int_to_ptr.vmem [resolvable:$true] %s642_s22 }
  0x14   : > { %s4400_s1 = scalar_lea.vmem %s559_s26, 16  ;;  %s4407_s24 = scalar_lea.vmem %s559_s26, 32 }
  0x15   : > { %p4793_p5 = pnand %p6223_p2, %p4281_p4  ;;  %p4401_p7 = scmp.ne.s32.totalorder %s559_s26, %s4400_s1 }
  0x16   : > { %p4408_p10 = scmp.lt.s32.totalorder %s559_s26, %s559_s26  ;;  %p4409_p11 = scmp.lt.s32.totalorder %s4407_s24, %s4400_s1 }
  0x17   : > { %p4803_p6 = pneg %p4793_p5 }
  0x18   : > { %p4410_p12 = por %p4409_p11, %p4408_p10 }
  0x19   : > { %p4403_p8 = pnand %p4401_p7, %p4803_p6 }
  0x1b   : > { %p4404_p9 = pneg %p4403_p8 }
  0x1d   : > { %p4411_p13 = pnand %p4410_p12, %p4404_p9 }
  0x1f   : > { %4414 = shalt.err (!%p4411_p13)
}
  0x20   : > { %s6234_s7 = sld [smem:[#allocation27_spill]]  ;;  %s4426_s0 = scalar_lea.vmem %s4789_s29, 16 }
  0x21   : > { %p4427_p0 = scmp.ne.s32.totalorder %s4789_s29, %s4426_s0  ;;  %s4433_s5 = scalar_lea.vmem %s4789_s29, 32 }
  0x22   : > { %p4434_p7 = scmp.lt.s32.totalorder %s4789_s29, %s4789_s29  ;;  %p4435_p8 = scmp.lt.s32.totalorder %s4433_s5, %s4426_s0 }
  0x23   : > { %p4429_p1 = pnand %p4427_p0, %p4803_p6 }
  0x24   : > { %p4436_p9 = por %p4435_p8, %p4434_p7 }
  0x25   : > { %p4430_p4 = pneg %p4429_p1 }
  0x26   : > { %4287 = dma.hbm_to_vmem [thread:$0]  (!%p4793_p5), %s6234_s7, 16, %s559_s26, [#allocation5]  }
  0x27   : > { %p4437_p10 = pnand %p4436_p9, %p4430_p4 }
  0x29   : > { %4440 = shalt.err (!%p4437_p10)
}
  0x2a   : > { %4293 = dma.hbm_to_vmem [thread:$0]  (!%p4793_p5), %s6211_s11, 16, %s4789_s29, [#allocation8]  }
  0x2b   : > { %s4452_s26 = scalar_lea.vmem %s4797_s4, 16  ;;  %s4459_s25 = scalar_lea.vmem %s4797_s4, 32 }
  0x2c   : > { %p4453_p11 = scmp.ne.s32.totalorder %s4797_s4, %s4452_s26  ;;  %p4460_p0 = scmp.lt.s32.totalorder %s4797_s4, %s4797_s4 }
  0x2d   : > { %p4461_p1 = scmp.lt.s32.totalorder %s4459_s25, %s4452_s26 }
  0x2e   : > { %p4455_p12 = pnand %p4453_p11, %p4803_p6 }
  0x2f   : > { %p4462_p4 = por %p4461_p1, %p4460_p0 }
  0x30   : > { %p4456_p13 = pneg %p4455_p12 }
  0x32   : > { %p4463_p7 = pnand %p4462_p4, %p4456_p13 }
  0x34   : > { %4466 = shalt.err (!%p4463_p7)
}
  0x35   : > { %4299 = dma.hbm_to_vmem [thread:$0]  (!%p4793_p5), %s6215_s15, 16, %s4797_s4, [#allocation11]  }
  0x36   : > { %s4478_s29 = scalar_lea.vmem %s4799_s22, 16  ;;  %s4485_s5 = scalar_lea.vmem %s4799_s22, 32 }
  0x37   : > { %p4479_p8 = scmp.ne.s32.totalorder %s4799_s22, %s4478_s29  ;;  %p4486_p11 = scmp.lt.s32.totalorder %s4799_s22, %s4799_s22 }
  0x38   : > { %p4487_p12 = scmp.lt.s32.totalorder %s4485_s5, %s4478_s29 }
  0x39   : > { %p4481_p9 = pnand %p4479_p8, %p4803_p6 }
  0x3a   : > { %p4488_p13 = por %p4487_p12, %p4486_p11 }
  0x3b   : > { %p4482_p10 = pneg %p4481_p9 }
  0x3d   : > { %p4489_p0 = pnand %p4488_p13, %p4482_p10 }
  0x3f   : > { %4492 = shalt.err (!%p4489_p0)
}
  0x40   : > { %4305 = dma.hbm_to_vmem [thread:$0]  (!%p4793_p5), %s6219_s19, 16, %s4799_s22, [#allocation14]  }
  0x41   : > { %s4655_s4 = smov [#allocation2]   ;;  %s4656_s25 = smov [#allocation6]  }
  0x42   : > { %s544_s26 = sshll.u32 %s4655_s4, 4  ;;  %s572_s28 = sshll.u32 %s4656_s25, 4  ;;  %s545_s26 = int_to_ptr.vmem [resolvable:$true] %s544_s26  ;;  %s573_s28 = int_to_ptr.vmem [resolvable:$true] %s572_s28 }
  0x43   : > { %s4504_s0 = scalar_lea.vmem %s545_s26, 16  ;;  %s4511_s29 = scalar_lea.vmem %s545_s26, 32 }
  0x44   : > { %p4505_p1 = scmp.ne.s32.totalorder %s545_s26, %s4504_s0  ;;  %p4512_p8 = scmp.lt.s32.totalorder %s545_s26, %s545_s26 }
  0x45   : > { %p4513_p9 = scmp.lt.s32.totalorder %s4511_s29, %s4504_s0 }
  0x46   : > { %p4507_p4 = pnand %p4505_p1, %p4803_p6 }
  0x47   : > { %p4514_p10 = por %p4513_p9, %p4512_p8 }
  0x48   : > { %p4508_p7 = pneg %p4507_p4 }
  0x4a   : > { %p4515_p11 = pnand %p4514_p10, %p4508_p7 }
  0x4c   : > { %4518 = shalt.err (!%p4515_p11)
}
  0x4d   : > { %s6235_s1 = sld [smem:[#allocation26_spill]]  ;;  %s4530_s24 = scalar_lea.vmem %s573_s28, 16 }
  0x4e   : > { %p4531_p12 = scmp.ne.s32.totalorder %s573_s28, %s4530_s24  ;;  %s4537_s4 = scalar_lea.vmem %s573_s28, 32 }
  0x4f   : > { %p4538_p1 = scmp.lt.s32.totalorder %s573_s28, %s573_s28  ;;  %p4539_p4 = scmp.lt.s32.totalorder %s4537_s4, %s4530_s24 }
  0x50   : > { %p4533_p13 = pnand %p4531_p12, %p4803_p6 }
  0x51   : > { %p4540_p2 = por %p4539_p4, %p4538_p1 }
  0x52   : > { %p4534_p0 = pneg %p4533_p13 }
  0x53   : > { %4284 = dma.hbm_to_vmem [thread:$0]  (!%p4793_p5), %s6235_s1, 16, %s545_s26, [#allocation3]  }
  0x54   : > { %p4541_p8 = pnand %p4540_p2, %p4534_p0 }
  0x56   : > { %4544 = shalt.err (!%p4541_p8)
}
  0x57   : > { %4290 = dma.hbm_to_vmem [thread:$0]  (!%p4793_p5), %s6209_s9, 16, %s573_s28, [#allocation5]  }
  0x58   : > { %s4657_s26 = smov [#allocation9]   ;;  %s4658_s5 = smov [#allocation12]  }
  0x59   : > { %s600_s29 = sshll.u32 %s4657_s26, 4  ;;  %s628_s22 = sshll.u32 %s4658_s5, 4  ;;  %s601_s29 = int_to_ptr.vmem [resolvable:$true] %s600_s29  ;;  %s629_s22 = int_to_ptr.vmem [resolvable:$true] %s628_s22 }
  0x5a   : > { %s4556_s1 = scalar_lea.vmem %s601_s29, 16  ;;  %s4563_s24 = scalar_lea.vmem %s601_s29, 32 }
  0x5b   : > { %p4557_p7 = scmp.ne.s32.totalorder %s601_s29, %s4556_s1  ;;  %p4564_p2 = scmp.lt.s32.totalorder %s601_s29, %s601_s29 }
  0x5c   : > { %p4565_p11 = scmp.lt.s32.totalorder %s4563_s24, %s4556_s1 }
  0x5d   : > { %p4559_p9 = pnand %p4557_p7, %p4803_p6 }
  0x5e   : > { %p4566_p12 = por %p4565_p11, %p4564_p2 }
  0x5f   : > { %p4560_p10 = pneg %p4559_p9 }
  0x61   : > { %p4567_p13 = pnand %p4566_p12, %p4560_p10 }
  0x63   : > { %4570 = shalt.err (!%p4567_p13)
}
  0x64   : > { %4296 = dma.hbm_to_vmem [thread:$0]  (!%p4793_p5), %s6213_s13, 16, %s601_s29, [#allocation8]  }
  0x65   : > { %s4582_s25 = scalar_lea.vmem %s629_s22, 16  ;;  %s4589_s0 = scalar_lea.vmem %s629_s22, 32 }
  0x66   : > { %p4583_p0 = scmp.ne.s32.totalorder %s629_s22, %s4582_s25  ;;  %p4590_p8 = scmp.lt.s32.totalorder %s629_s22, %s629_s22 }
  0x67   : > { %p4591_p7 = scmp.lt.s32.totalorder %s4589_s0, %s4582_s25 }
  0x68   : > { %p4585_p1 = pnand %p4583_p0, %p4803_p6 }
  0x69   : > { %p4592_p9 = por %p4591_p7, %p4590_p8 }
  0x6a   : > { %p4586_p4 = pneg %p4585_p1 }
  0x6c   : > { %p4593_p2 = pnand %p4592_p9, %p4586_p4 }
  0x6e   : > { %4596 = shalt.err (!%p4593_p2)
}
  0x6f   : > { %4302 = dma.hbm_to_vmem [thread:$0]  (!%p4793_p5), %s6217_s17, 16, %s629_s22, [#allocation11]  }
  0x70   : > { %s4659_s29 = smov [#allocation15]  }
  0x71   : > { %s653_s1 = sshll.u32 %s4659_s29, 4  ;;  %s654_s1 = int_to_ptr.vmem [resolvable:$true] %s653_s1 }
  0x72   : > { %s4608_s24 = scalar_lea.vmem %s654_s1, 16  ;;  %s4615_s4 = scalar_lea.vmem %s654_s1, 32 }
  0x73   : > { %p4609_p10 = scmp.ne.s32.totalorder %s654_s1, %s4608_s24  ;;  %p4616_p13 = scmp.lt.s32.totalorder %s654_s1, %s654_s1 }
  0x74   : > { %p4617_p0 = scmp.lt.s32.totalorder %s4615_s4, %s4608_s24 }
  0x75   : > { %p4611_p11 = pnand %p4609_p10, %p4803_p6 }
  0x76   : > { %p4618_p1 = por %p4617_p0, %p4616_p13 }
  0x77   : > { %p4612_p12 = pneg %p4611_p11 }
  0x79   : > { %p4619_p4 = pnand %p4618_p1, %p4612_p12 }
  0x7b   : > { %4622 = shalt.err (!%p4619_p4)
}
  0x7c   : > { %4308 = dma.hbm_to_vmem [thread:$0]  (!%p4793_p5), %s6220_s20, 16, %s654_s1, [#allocation14]  }
  0x7d   : > { %698 = sbr.rel (%p4783_p3) target bundleno = 1323 (0x52b), region = 104  ;;  %p6236_p8 = scmp.eq.s32.totalorder (!%p4783_p3), %s4778_s27, 0 }
  0x82   : > { %4628 = dma.done.wait (%p6236_p8), [#allocation3], 16   ;;  %p6237_p6 = pmov %p6236_p8 }
  0x84   : > { %4630 = vsyncadd (%p6237_p6), [#allocation3], 4294967280  ;;  %p6238_p7 = pmov %p6237_p6 }
  0x85   : > { %p6239_p9 = pmov %p6237_p6 }
  0x86   : > { %4632 = dma.done.wait (%p6238_p7), [#allocation5], 32  }
  0x87   : > { %4634 = vsyncadd (%p6239_p9), [#allocation5], 4294967264  ;;  %p6240_p2 = pmov %p6237_p6 }
  0x89   : > { %4636 = dma.done.wait (%p6240_p2), [#allocation8], 32   ;;  %p6241_p5 = pmov %p6240_p2 }
  0x8a   : > { %p6242_p3 = pmov %p6240_p2 }
  0x8b   : > { %4638 = vsyncadd (%p6241_p5), [#allocation8], 4294967264 }
  0x8c   : > { %4640 = dma.done.wait (%p6242_p3), [#allocation11], 32   ;;  %p6243_p10 = pmov %p6240_p2 }
  0x8d   : > { %p6244_p11 = pmov %p6240_p2 }
  0x8e   : > { %4642 = vsyncadd (%p6243_p10), [#allocation11], 4294967264 }
  0x8f   : > { %4644 = dma.done.wait (%p6244_p11), [#allocation14], 32   ;;  %p6245_p12 = pmov %p6240_p2 }
  0x90   : > { %v4660_v0 = vmov 0.0   ;;  %vm4661_vm0 = vmmov 0   ;;  %p805_p13 = scmp.lt.s32.totalorder %s4778_s27, 1  ;;  %v884_v1 = vlaneseq  ;;  %v4921_v2 = vld [vmem:[%s6206_s6 + $0x38] sm:$0xff]   ;;  %v4928_v4 = vld [vmem:[%s6206_s6 + $0x30] sm:$0xff]   ;;  %s6246_s29 = sld [smem:[#allocation22_spill]] }
  0x91   : > { %4646 = vsyncadd (%p6245_p12), [#allocation14], 4294967264  ;;  %3605 = vmatprep.subr.bf16.mxu0 %v4660_v0  ;;  %3625 = vmatprep.subr.bf16.mxu1 %v4660_v0  ;;  %v4947_v6 = vld [vmem:[%s6206_s6 + $0x28] sm:$0xff]   ;;  %s6247_s25 = sld [smem:[#allocation24_spill]]  ;;  %vm863_vm1 = vcmask 1040384   ;;  %v4984_v13 = vld [vmem:[%s6206_s6 + $0x20] sm:$0xff]  }
  0x92   : > { %3621 = vmatprep.mubr.msk.bf16.mxu0 %vm4661_vm0, %v4660_v0  ;;  %3641 = vmatprep.mubr.msk.bf16.mxu1 %vm4661_vm0, %v4660_v0  ;;  %s6252_s27 = smov (!%p805_p13, %s4778_s27), 1  ;;  %v885_v3 = vshrl.u32 %v884_v1, 7  ;;  %s6248_s22 = sld [smem:[#allocation23_spill]]  ;;  %v5039_v33 = vld [vmem:[%s6206_s6 + $0x18] sm:$0xff]   ;;  %v5080_v51 = vld [vmem:[%s6206_s6 + $0x10] sm:$0xff]   ;;  %vm2668_vm2 = vcmask 1042432  }
  0x93   : > { %3606 = vmatpush3.bf16.msra.mxu0 %v4921_v2  ;;  %3626 = vmatpush3.bf16.msra.mxu1 %v4921_v2  ;;  %s4932_s0 = sshll.u32 %s6252_s27, 4  ;;  %s6249_s24 = sld [smem:[#allocation25_spill]] }
  0x94   : > { %3607 = vmatprep.subr.bf16.mxu0 %v4660_v0  ;;  %3627 = vmatprep.subr.bf16.mxu1 %v4660_v0  ;;  %v4940_v5 = vsub.s32 0, %v885_v3  ;;  %v4955_v7 = vsub.s32 1, %v885_v3  ;;  %v4965_v8 = vsub.s32 2, %v885_v3 }
  0x96   : > { %s4938_s1 = scalar_lea.vmem %s6246_s29, %s4932_s0 }
  0x97   : > { %3608 = vmatpush3.bf16.msra.mxu0 %v4928_v4  ;;  %3628 = vmatpush3.bf16.msra.mxu1 %v4928_v4  ;;  %s4953_s3 = scalar_lea.vmem %s6247_s25, %s4932_s0  ;;  %v4968_v9 = vld [vmem:[%s4938_s1] sm:$0xf]  ;;  %v5018_v23 = vld [vmem:[%s4938_s1 + $0x4] sm:$0xf]  ;;  %v5063_v46 = vld [vmem:[%s4938_s1 + $0x8] sm:$0xf] }
  0x98   : > { %3609 = vmatprep.subr.bf16.mxu0 %v4660_v0  ;;  %3629 = vmatprep.subr.bf16.mxu1 %v4660_v0  ;;  %s4963_s26 = scalar_lea.vmem %s6248_s22, %s4932_s0  ;;  %v4971_v10 = vld [vmem:[%s4953_s3] sm:$0xf]  ;;  %s6250_s22 = sld [smem:[#allocation21_spill]]  ;;  %v855_v15 = vrot.slane %v4968_v9, 7  ;;  %v5025_v28 = vld [vmem:[%s4953_s3 + $0x4] sm:$0xf] }
  0x99   : > { %v847_v11 = vld [vmem:[%s6249_s24] sm:$0x7]  ;;  %v848_v12 = vld [vmem:[%s6249_s24 + $0x4] sm:$0x7]  ;;  %v872_v16 = vrot.slane %v4971_v10, 7  ;;  %v856_v37 = vrot.slane %v5018_v23, 7 }
  0x9a   : > { %v4993_v14 = vld [vmem:[%s4963_s26] sm:$0xf]  ;;  %v4998_v17 = vrot.slane %v847_v11, %v4940_v5  ;;  %v5001_v18 = vrot.slane %v847_v11, %v4955_v7  ;;  %v849_v19 = vld [vmem:[%s6249_s24 + $0x8] sm:$0x7]  ;;  %v5009_v20 = vrot.slane %v847_v11, %v4965_v8  ;;  %v5012_v21 = vrot.slane %v848_v12, %v4940_v5  ;;  %v5060_v45 = vld [vmem:[%s4963_s26 + $0x4] sm:$0xf] }
  0x9b   : > { %3610 = vmatpush3.bf16.msra.mxu0 %v4947_v6  ;;  %3630 = vmatpush3.bf16.msra.mxu1 %v4947_v6  ;;  %v5015_v22 = vrot.slane %v848_v12, %v4955_v7  ;;  %v864_v24 = vsel %vm863_vm1, 0.0, %v855_v15  ;;  %v880_v25 = vsel %vm863_vm1, 0.0, %v872_v16  ;;  %v5048_v39 = vrot.slane %v848_v12, %v4965_v8  ;;  %v5066_v47 = vld [vmem:[%s4953_s3 + $0x8] sm:$0xf]  ;;  %v5087_v56 = vld [vmem:[%s4938_s1 + $0xc] sm:$0xf] }
  0x9c   : > { %3611 = vmatprep.subr.bf16.mxu0 %v4660_v0  ;;  %3631 = vmatprep.subr.bf16.mxu1 %v4660_v0  ;;  %v888_v26 = vmul.f32 0.0, %v4998_v17  ;;  %v896_v27 = vmul.f32 0.0, %v5001_v18  ;;  %v889_v30 = vmul.f32 %v4998_v17, %v880_v25  ;;  %v897_v31 = vmul.f32 %v5001_v18, %v4993_v14  ;;  %v5102_v11 = vld [vmem:[%s4963_s26 + $0x8] sm:$0xf] }
  0x9d   : > { %v908_v32 = vmul.f32 0.0, %v5009_v20  ;;  %v909_v35 = vmul.f32 %v5009_v20, %v4971_v10  ;;  %v920_v36 = vmul.f32 %v5012_v21, %v864_v24  ;;  %v5051_v40 = vrot.slane %v849_v19, %v4940_v5  ;;  %v5109_v12 = vld [vmem:[%s6206_s6 + $0x8] sm:$0xff]  }
  0x9e   : > { %s4990_s7 = scalar_lea.vmem %s6250_s22, %s4932_s0  ;;  %v900_v34 = vadd.f32 %v896_v27, %v888_v26  ;;  %v901_v38 = vadd.f32 %v897_v31, %v889_v30  ;;  %v873_v42 = vrot.slane %v5025_v28, 7  ;;  %v5069_v48 = vrot.slane %v849_v19, %v4955_v7 }
  0x9f   : > { %v5028_v29 = vld [vmem:[%s4990_s7] sm:$0xf]  ;;  %3612 = vmatpush3.bf16.msra.mxu0 %v4984_v13  ;;  %3632 = vmatpush3.bf16.msra.mxu1 %v4984_v13  ;;  %v5054_v41 = vld [vmem:[%s4990_s7 + $0x4] sm:$0xf]  ;;  %v5072_v49 = vrot.slane %v849_v19, %v4965_v8  ;;  %v865_v50 = vsel %vm863_vm1, 0.0, %v856_v37  ;;  %v944_v53 = vmul.f32 %v5048_v39, %v4968_v9  ;;  %v956_v54 = vmul.f32 %v5051_v40, %v880_v25 }
  0xa0   : > { %3613 = vmatprep.subr.bf16.mxu0 %v4660_v0  ;;  %3633 = vmatprep.subr.bf16.mxu1 %v4660_v0  ;;  %v912_v43 = vadd.f32 %v908_v32, %v900_v34  ;;  %v932_v44 = vmul.f32 %v5015_v22, %v5028_v29  ;;  %v881_v55 = vsel %vm863_vm1, 0.0, %v873_v42  ;;  %v898_v57 = vmul.f32 %v5001_v18, %v5060_v45 }
  0xa1   : > { %v913_v58 = vadd.f32 %v909_v35, %v901_v38  ;;  %v857_v59 = vrot.slane %v5063_v46, 7  ;;  %v874_v60 = vrot.slane %v5066_v47, 7  ;;  %v890_v62 = vmul.f32 %v4998_v17, %v881_v55  ;;  %v5125_v35 = vld [vmem:[%s4953_s3 + $0xc] sm:$0xf] }
  0xa2   : > { %v924_v52 = vadd.f32 %v920_v36, %v912_v43  ;;  %v921_v63 = vmul.f32 %v5012_v21, %v865_v50  ;;  %v933_v1 = vmul.f32 %v5015_v22, %v5054_v41  ;;  %v968_v3 = vmul.f32 %v5069_v48, %v4993_v14 }
  0xa3   : > { %3614 = vmatpush3.bf16.msra.mxu0 %v5039_v33  ;;  %3634 = vmatpush3.bf16.msra.mxu1 %v5039_v33  ;;  %v945_v19 = vmul.f32 %v5048_v39, %v5018_v23  ;;  %v5114_v24 = vsel %vm863_vm1, 0.0, %v874_v60  ;;  %v980_v25 = vmul.f32 %v5072_v49, %v4971_v10  ;;  %v910_v26 = vmul.f32 %v5009_v20, %v5025_v28  ;;  %v5136_v10 = vld [vmem:[%s6206_s6] sm:$0xff]  }
  0xa4   : > { %3615 = vmatprep.subr.bf16.mxu0 %v4660_v0  ;;  %3635 = vmatprep.subr.bf16.mxu1 %v4660_v0  ;;  %v936_v61 = vadd.f32 %v932_v44, %v924_v52  ;;  %v925_v16 = vadd.f32 %v921_v63, %v913_v58  ;;  %v858_v27 = vrot.slane %v5087_v56, 7  ;;  %v902_v31 = vadd.f32 %v898_v57, %v890_v62 }
  0xa5   : > { %v957_v34 = vmul.f32 %v5051_v40, %v881_v55  ;;  %v969_v36 = vmul.f32 %v5069_v48, %v5060_v45  ;;  %v891_v37 = vmul.f32 %v4998_v17, %v5114_v24  ;;  %v866_v43 = vsel %vm863_vm1, 0.0, %v857_v59  ;;  %v5143_v17 = vld [vmem:[#allocation2] ss:$0 sm:$0xff]  ;;  %v5148_v55 = vld [vmem:[%s4990_s7 + $0x8] sm:$0xf] }
  0xa6   : > { %v948_v15 = vadd.f32 %v944_v53, %v936_v61  ;;  %v937_v32 = vadd.f32 %v933_v1, %v925_v16  ;;  %v899_v44 = vmul.f32 %v5001_v18, %v5102_v11  ;;  %v914_v52 = vadd.f32 %v910_v26, %v902_v31  ;;  %v5163_v1 = vld [vmem:[%s4990_s7 + $0xc] sm:$0xf] }
  0xa7   : > { %3616 = vmatpush3.bf16.msra.mxu0 %v5080_v51  ;;  %3636 = vmatpush3.bf16.msra.mxu1 %v5080_v51  ;;  %v911_v57 = vmul.f32 %v5009_v20, %v5066_v47  ;;  %v922_v18 = vmul.f32 %v5012_v21, %v866_v43  ;;  %v867_v58 = vsel %vm863_vm1, 0.0, %v858_v27  ;;  %v875_v59 = vrot.slane %v5125_v35, 7 }
  0xa8   : > { %3617 = vmatprep.subr.bf16.mxu0 %v4660_v0  ;;  %3637 = vmatprep.subr.bf16.mxu1 %v4660_v0  ;;  %v960_v30 = vadd.f32 %v956_v54, %v948_v15  ;;  %v949_v42 = vadd.f32 %v945_v19, %v937_v32  ;;  %v981_v54 = vmul.f32 %v5072_v49, %v5025_v28 }
  0xa9   : > { %v903_v28 = vadd.f32 %v899_v44, %v891_v37  ;;  %v934_v63 = vmul.f32 %v5015_v22, %v5148_v55  ;;  %v926_v15 = vadd.f32 %v922_v18, %v914_v52  ;;  %v923_v19 = vmul.f32 %v5012_v21, %v867_v58  ;;  %v5265_v52 = vld [vmem:[%s6208_s8 + $0x18] sm:$0xff]  }
  0xaa   : > { %v972_v38 = vadd.f32 %v968_v3, %v960_v30  ;;  %v961_v53 = vadd.f32 %v957_v34, %v949_v42  ;;  %v946_v27 = vmul.f32 %v5048_v39, %v5063_v46  ;;  %v935_v31 = vmul.f32 %v5015_v22, %v5163_v1 }
  0xab   : > { %3618 = vmatpush3.bf16.msra.mxu0 %v5109_v12  ;;  %3638 = vmatpush3.bf16.msra.mxu1 %v5109_v12  ;;  %v915_v16 = vadd.f32 %v911_v57, %v903_v28  ;;  %v938_v26 = vadd.f32 %v934_v63, %v926_v15  ;;  %v958_v32 = vmul.f32 %v5051_v40, %v5114_v24  ;;  %v5292_v57 = vld [vmem:[%s6208_s8] sm:$0xff]  }
  0xac   : > { %3619 = vmatprep.subr.bf16.mxu0 %v4660_v0  ;;  %3639 = vmatprep.subr.bf16.mxu1 %v4660_v0  ;;  %v984_v50 = vadd.f32 %v980_v25, %v972_v38  ;;  %v973_v61 = vadd.f32 %v969_v36, %v961_v53  ;;  %v947_v22 = vmul.f32 %v5048_v39, %v5087_v56  ;;  %v5274_v53 = vld [vmem:[%s6208_s8 + $0x10] sm:$0xff]  }
  0xad   : > { %v927_v30 = vadd.f32 %v923_v19, %v915_v16  ;;  %v950_v21 = vadd.f32 %v946_v27, %v938_v26  ;;  %v970_v37 = vmul.f32 %v5069_v48, %v5102_v11  ;;  %v982_v42 = vmul.f32 %v5072_v49, %v5066_v47 }
  0xae   : > { %v994_v60 = vadd.f32 %v5143_v17, %v984_v50  ;;  %v985_v20 = vadd.f32 %v981_v54, %v973_v61  ;;  %v983_v50 = vmul.f32 %v5072_v49, %v5125_v35  ;;  %v5225_v49 = vld [vmem:[%s6208_s8 + $0x38] sm:$0xff]   ;;  %v5283_v54 = vld [vmem:[%s6208_s8 + $0x8] sm:$0xff]   ;;  %v1257_v18 = vpack.c.bf16 %v5028_v29, %v5028_v29 }
  0xaf   : > { %3620 = vmatpush3.bf16.msra.mxu0 %v5136_v10  ;;  %3640 = vmatpush3.bf16.msra.mxu1 %v5136_v10  ;;  %v939_v34 = vadd.f32 %v935_v31, %v927_v30  ;;  %v962_v36 = vadd.f32 %v958_v32, %v950_v21  ;;  %v1258_v58 = vpack.c.bf16 %v5054_v41, %v5054_v41  ;;  %v4386_v31 = vld [vmem:[%s4953_s3] sm:$0xf] }
  0xb0   : > { %3645 = vmatprep.subr.bf16.mxu0 %v4660_v0  ;;  %3665 = vmatprep.subr.bf16.mxu1 %v4660_v0  ;;  %v1014_v62 = vpack.c.bf16 %v994_v60, %v994_v60  ;;  %v995_v3 = vadd.f32 %v5143_v17, %v985_v20  ;;  %v1259_v29 = vpack.c.bf16 %v5148_v55, %v5148_v55 }
  0xb1   : > { %v951_v38 = vadd.f32 %v947_v22, %v939_v34  ;;  %v974_v39 = vadd.f32 %v970_v37, %v962_v36  ;;  %v1260_v41 = vpack.c.bf16 %v5163_v1, %v5163_v1  ;;  %v1484_v55 = vpack.c.bf16 %v4968_v9, %v4968_v9  ;;  %v4387_v34 = vld [vmem:[%s4953_s3 + $0x4] sm:$0xf] }
  0xb2   : > { %3622 = vmatmul.mubr.bf16.vlgmr.msra.gmra.mxu0 %v1014_v62  ;;  %v1015_v25 = vpack.c.bf16 %v995_v3, %v995_v3  ;;  %v1486_v9 = vpack.c.bf16 %v5063_v46, %v5063_v46  ;;  %v1656_v46 = vpack.c.bf16 %v4993_v14, %v4993_v14  ;;  %v1657_v60 = vpack.c.bf16 %v5060_v45, %v5060_v45 }
  0xb3   : > { %3646 = vmatpush3.bf16.msra.mxu0 %v4921_v2  ;;  %3661 = vmatprep.mubr.msk.bf16.mxu0 %vm4661_vm0, %v4660_v0  ;;  %v1658_v1 = vpack.c.bf16 %v5102_v11, %v5102_v11  ;;  %v1828_v21 = vpack.c.bf16 %v4386_v31, %v4386_v31  ;;  %v1829_v22 = vpack.c.bf16 %v4387_v34, %v4387_v34  ;;  %v5688_v34 = vld [vmem:[%s6212_s12 + $0x10] sm:$0xff]  }
  0xb4   : > { %3647 = vmatprep.subr.bf16.mxu0 %v4660_v0  ;;  %3642 = vmatmul.mubr.bf16.vlgmr.msra.gmra.mxu1 %v1015_v25 }
  0xb5   : > { %3666 = vmatpush3.bf16.msra.mxu1 %v4921_v2  ;;  %3681 = vmatprep.mubr.msk.bf16.mxu1 %vm4661_vm0, %v4660_v0  ;;  %v883_v2 = vsel %vm863_vm1, 0.0, %v875_v59  ;;  %v1485_v59 = vpack.c.bf16 %v5018_v23, %v5018_v23  ;;  %v1487_v23 = vpack.c.bf16 %v5087_v56, %v5087_v56 }
  0xb6   : > { %3667 = vmatprep.subr.bf16.mxu1 %v4660_v0  ;;  %v959_v24 = vmul.f32 %v5051_v40, %v883_v2 }
  0xb7   : > { %3648 = vmatpush3.bf16.msra.mxu0 %v4928_v4 }
  0xb8   : > { %3649 = vmatprep.subr.bf16.mxu0 %v4660_v0  ;;  %v963_v43 = vadd.f32 %v959_v24, %v951_v38 }
  0xb9   : > { %3668 = vmatpush3.bf16.msra.mxu1 %v4928_v4  ;;  %v5196_v4 = vld [vmem:[%s4963_s26 + $0xc] sm:$0xf]  ;;  %s6188_s26 = scalar_lea.vmem %s6221_s21, %s4932_s0 }
  0xba   : > { %3669 = vmatprep.subr.bf16.mxu1 %v4660_v0  ;;  %v971_v44 = vmul.f32 %v5069_v48, %v5196_v4  ;;  %v1659_v15 = vpack.c.bf16 %v5196_v4, %v5196_v4 }
  0xbb   : > { %3650 = vmatpush3.bf16.msra.mxu0 %v4947_v6 }
  0xbc   : > { %3651 = vmatprep.subr.bf16.mxu0 %v4660_v0  ;;  %v975_v40 = vadd.f32 %v971_v44, %v963_v43 }
  0xbd   : > { %3670 = vmatpush3.bf16.msra.mxu1 %v4947_v6  ;;  %v986_v6 = vadd.f32 %v982_v42, %v974_v39  ;;  %v4388_v42 = vld [vmem:[%s4953_s3 + $0x8] sm:$0xf] }
  0xbe   : > { %3671 = vmatprep.subr.bf16.mxu1 %v4660_v0  ;;  %v987_v47 = vadd.f32 %v983_v50, %v975_v40  ;;  %v1830_v43 = vpack.c.bf16 %v4388_v42, %v4388_v42 }
  0xbf   : > { %3652 = vmatpush3.bf16.msra.mxu0 %v4984_v13 }
  0xc0   : > { %3653 = vmatprep.subr.bf16.mxu0 %v4660_v0 }
  0xc1   : > { %3672 = vmatpush3.bf16.msra.mxu1 %v4984_v13  ;;  %v996_v13 = vadd.f32 %v5143_v17, %v986_v6  ;;  %v1831_v6 = vpack.c.bf16 %v5125_v35, %v5125_v35  ;;  %v5606_v35 = vld [vmem:[%s6212_s12 + $0x38] sm:$0xff]  }
  0xc2   : > { %3673 = vmatprep.subr.bf16.mxu1 %v4660_v0 }
  0xc3   : > { %3654 = vmatpush3.bf16.msra.mxu0 %v5039_v33  ;;  %v1016_v48 = vpack.c.bf16 %v996_v13, %v996_v13 }
  0xc4   : > { %3655 = vmatprep.subr.bf16.mxu0 %v4660_v0 }
  0xc5   : > { %3674 = vmatpush3.bf16.msra.mxu1 %v5039_v33  ;;  %v997_v33 = vadd.f32 %v5143_v17, %v987_v47  ;;  %v5256_v17 = vld [vmem:[%s6208_s8 + $0x20] sm:$0xff]  }
  0xc6   : > { %3675 = vmatprep.subr.bf16.mxu1 %v4660_v0 }
  0xc7   : > { %3656 = vmatpush3.bf16.msra.mxu0 %v5080_v51 }
  0xc8   : > { %3657 = vmatprep.subr.bf16.mxu0 %v4660_v0 }
  0xc9   : > { %3676 = vmatpush3.bf16.msra.mxu1 %v5080_v51  ;;  %v1017_v51 = vpack.c.bf16 %v997_v33, %v997_v33 }
  0xca   : > { %3677 = vmatprep.subr.bf16.mxu1 %v4660_v0 }
  0xcb   : > { %3658 = vmatpush3.bf16.msra.mxu0 %v5109_v12 }
  0xcc   : > { %3659 = vmatprep.subr.bf16.mxu0 %v4660_v0 }
  0xcd   : > { %3678 = vmatpush3.bf16.msra.mxu1 %v5109_v12  ;;  %v5234_v12 = vld [vmem:[%s6208_s8 + $0x30] sm:$0xff]  }
  0xce   : > { %3679 = vmatprep.subr.bf16.mxu1 %v4660_v0 }
  0xcf   : > { %3660 = vmatpush3.bf16.msra.mxu0 %v5136_v10 }
  0xd0   : > { %3685 = vmatprep.subr.bf16.mxu0 %v4660_v0 }
  0xd1   : > { %3680 = vmatpush3.bf16.msra.mxu1 %v5136_v10  ;;  %v5245_v10 = vld [vmem:[%s6208_s8 + $0x28] sm:$0xff]  }
  0xd2   : > { %3662 = vmatmul.mubr.bf16.vlgmr.msra.gmra.mxu0 %v1016_v48  ;;  %3705 = vmatprep.subr.bf16.mxu1 %v4660_v0 }
  0xd3   : > { %3686 = vmatpush3.bf16.msra.mxu0 %v5225_v49  ;;  %3701 = vmatprep.mubr.msk.bf16.mxu0 %vm4661_vm0, %v4660_v0 }
  0xd4   : > { %3687 = vmatprep.subr.bf16.mxu0 %v4660_v0  ;;  %3682 = vmatmul.mubr.bf16.vlgmr.msra.gmra.mxu1 %v1017_v51  ;;  %v5612_v51 = vld [vmem:[%s6212_s12 + $0x30] sm:$0xff]  }
  0xd5   : > { %3706 = vmatpush3.bf16.msra.mxu1 %v5225_v49  ;;  %3721 = vmatprep.mubr.msk.bf16.mxu1 %vm4661_vm0, %v4660_v0 }
  0xd6   : > { %3707 = vmatprep.subr.bf16.mxu1 %v4660_v0 }
  0xd7   : > { %3688 = vmatpush3.bf16.msra.mxu0 %v5234_v12 }
  0xd8   : > { %3689 = vmatprep.subr.bf16.mxu0 %v4660_v0 }
  0xd9   : > { %3708 = vmatpush3.bf16.msra.mxu1 %v5234_v12 }
  0xda   : > { %3709 = vmatprep.subr.bf16.mxu1 %v4660_v0 }
  0xdb   : > { %3690 = vmatpush3.bf16.msra.mxu0 %v5245_v10 }
  0xdc   : > { %3691 = vmatprep.subr.bf16.mxu0 %v4660_v0 }
  0xdd   : > { %3710 = vmatpush3.bf16.msra.mxu1 %v5245_v10 }
  0xde   : > { %3711 = vmatprep.subr.bf16.mxu1 %v4660_v0 }
  0xdf   : > { %3692 = vmatpush3.bf16.msra.mxu0 %v5256_v17 }
  0xe0   : > { %3693 = vmatprep.subr.bf16.mxu0 %v4660_v0 }
  0xe1   : > { %3712 = vmatpush3.bf16.msra.mxu1 %v5256_v17 }
  0xe2   : > { %3713 = vmatprep.subr.bf16.mxu1 %v4660_v0 }
  0xe3   : > { %3694 = vmatpush3.bf16.msra.mxu0 %v5265_v52 }
  0xe4   : > { %3695 = vmatprep.subr.bf16.mxu0 %v4660_v0 }
  0xe5   : > { %3714 = vmatpush3.bf16.msra.mxu1 %v5265_v52 }
  0xe6   : > { %3715 = vmatprep.subr.bf16.mxu1 %v4660_v0 }
  0xe7   : > { %3696 = vmatpush3.bf16.msra.mxu0 %v5274_v53 }
  0xe8   : > { %3697 = vmatprep.subr.bf16.mxu0 %v4660_v0 }
  0xe9   : > { %3716 = vmatpush3.bf16.msra.mxu1 %v5274_v53 }
  0xea   : > { %3717 = vmatprep.subr.bf16.mxu1 %v4660_v0 }
  0xeb   : > { %3698 = vmatpush3.bf16.msra.mxu0 %v5283_v54 }
  0xec   : > { %3699 = vmatprep.subr.bf16.mxu0 %v4660_v0 }
  0xed   : > { %3718 = vmatpush3.bf16.msra.mxu1 %v5283_v54 }
  0xee   : > { %3719 = vmatprep.subr.bf16.mxu1 %v4660_v0 }
  0xef   : > { %3700 = vmatpush3.bf16.msra.mxu0 %v5292_v57 }
  0xf0   : > { %3725 = vmatprep.subr.bf16.mxu0 %v4660_v0 }
  0xf1   : > { %3720 = vmatpush3.bf16.msra.mxu1 %v5292_v57 }
  0xf2   : > { %3702 = vmatmul.mubr.bf16.vlgmr.msra.gmra.mxu0 %v1257_v18  ;;  %3745 = vmatprep.subr.bf16.mxu1 %v4660_v0  ;;  %v5644_v18 = vld [vmem:[#allocation6] ss:$0 sm:$0xff] }
  0xf3   : > { %3726 = vmatpush3.bf16.msra.mxu0 %v5225_v49  ;;  %3741 = vmatprep.mubr.msk.bf16.mxu0 %vm4661_vm0, %v4660_v0 }
  0xf4   : > { %3727 = vmatprep.subr.bf16.mxu0 %v4660_v0  ;;  %3722 = vmatmul.mubr.bf16.vlgmr.msra.gmra.mxu1 %v1258_v58 }
  0xf5   : > { %3746 = vmatpush3.bf16.msra.mxu1 %v5225_v49  ;;  %3761 = vmatprep.mubr.msk.bf16.mxu1 %vm4661_vm0, %v4660_v0 }
  0xf6   : > { %3747 = vmatprep.subr.bf16.mxu1 %v4660_v0 }
  0xf7   : > { %3728 = vmatpush3.bf16.msra.mxu0 %v5234_v12 }
  0xf8   : > { %3729 = vmatprep.subr.bf16.mxu0 %v4660_v0 }
  0xf9   : > { %3748 = vmatpush3.bf16.msra.mxu1 %v5234_v12 }
  0xfa   : > { %3749 = vmatprep.subr.bf16.mxu1 %v4660_v0 }
  0xfb   : > { %3730 = vmatpush3.bf16.msra.mxu0 %v5245_v10 }
  0xfc   : > { %3731 = vmatprep.subr.bf16.mxu0 %v4660_v0 }
  0xfd   : > { %3750 = vmatpush3.bf16.msra.mxu1 %v5245_v10 }
  0xfe   : > { %3751 = vmatprep.subr.bf16.mxu1 %v4660_v0 }
  0xff   : > { %3732 = vmatpush3.bf16.msra.mxu0 %v5256_v17 }
 0x100   : > { %3733 = vmatprep.subr.bf16.mxu0 %v4660_v0 }
 0x101   : > { %3752 = vmatpush3.bf16.msra.mxu1 %v5256_v17 }
 0x102   : > { %3753 = vmatprep.subr.bf16.mxu1 %v4660_v0 }
 0x103   : > { %3734 = vmatpush3.bf16.msra.mxu0 %v5265_v52 }
 0x104   : > { %3735 = vmatprep.subr.bf16.mxu0 %v4660_v0 }
 0x105   : > { %3754 = vmatpush3.bf16.msra.mxu1 %v5265_v52 }
 0x106   : > { %3755 = vmatprep.subr.bf16.mxu1 %v4660_v0 }
 0x107   : > { %3736 = vmatpush3.bf16.msra.mxu0 %v5274_v53 }
 0x108   : > { %3737 = vmatprep.subr.bf16.mxu0 %v4660_v0 }
 0x109   : > { %3756 = vmatpush3.bf16.msra.mxu1 %v5274_v53 }
 0x10a   : > { %3757 = vmatprep.subr.bf16.mxu1 %v4660_v0 }
 0x10b   : > { %3738 = vmatpush3.bf16.msra.mxu0 %v5283_v54 }
 0x10c   : > { %3739 = vmatprep.subr.bf16.mxu0 %v4660_v0 }
 0x10d   : > { %3758 = vmatpush3.bf16.msra.mxu1 %v5283_v54 }
 0x10e   : > { %3759 = vmatprep.subr.bf16.mxu1 %v4660_v0 }
 0x10f   : > { %3740 = vmatpush3.bf16.msra.mxu0 %v5292_v57 }
 0x110   : > { %3765 = vmatprep.subr.bf16.mxu0 %v4660_v0 }
 0x111   : > { %3760 = vmatpush3.bf16.msra.mxu1 %v5292_v57 }
 0x112   : > { %3742 = vmatmul.mubr.bf16.vlgmr.msra.gmra.mxu0 %v1259_v29  ;;  %3785 = vmatprep.subr.bf16.mxu1 %v4660_v0 }
 0x113   : > { %3766 = vmatpush3.bf16.msra.mxu0 %v5225_v49  ;;  %3781 = vmatprep.mubr.msk.bf16.mxu0 %vm4661_vm0, %v4660_v0 }
 0x114   : > { %3767 = vmatprep.subr.bf16.mxu0 %v4660_v0  ;;  %3762 = vmatmul.mubr.bf16.vlgmr.msra.gmra.mxu1 %v1260_v41 }
 0x115   : > { %3786 = vmatpush3.bf16.msra.mxu1 %v5225_v49  ;;  %3801 = vmatprep.mubr.msk.bf16.mxu1 %vm4661_vm0, %v4660_v0 }
 0x116   : > { %3787 = vmatprep.subr.bf16.mxu1 %v4660_v0 }
 0x117   : > { %3768 = vmatpush3.bf16.msra.mxu0 %v5234_v12 }
 0x118   : > { %3769 = vmatprep.subr.bf16.mxu0 %v4660_v0 }
 0x119   : > { %3788 = vmatpush3.bf16.msra.mxu1 %v5234_v12 }
 0x11a   : > { %3789 = vmatprep.subr.bf16.mxu1 %v4660_v0 }
 0x11b   : > { %3770 = vmatpush3.bf16.msra.mxu0 %v5245_v10 }
 0x11c   : > { %3771 = vmatprep.subr.bf16.mxu0 %v4660_v0 }
 0x11d   : > { %3790 = vmatpush3.bf16.msra.mxu1 %v5245_v10 }
 0x11e   : > { %3791 = vmatprep.subr.bf16.mxu1 %v4660_v0 }
 0x11f   : > { %3772 = vmatpush3.bf16.msra.mxu0 %v5256_v17 }
 0x120   : > { %3773 = vmatprep.subr.bf16.mxu0 %v4660_v0 }
 0x121   : > { %3792 = vmatpush3.bf16.msra.mxu1 %v5256_v17 }
 0x122   : > { %3793 = vmatprep.subr.bf16.mxu1 %v4660_v0 }
 0x123   : > { %3774 = vmatpush3.bf16.msra.mxu0 %v5265_v52 }
 0x124   : > { %3775 = vmatprep.subr.bf16.mxu0 %v4660_v0 }
 0x125   : > { %3794 = vmatpush3.bf16.msra.mxu1 %v5265_v52 }
 0x126   : > { %3795 = vmatprep.subr.bf16.mxu1 %v4660_v0 }
 0x127   : > { %3776 = vmatpush3.bf16.msra.mxu0 %v5274_v53 }
 0x128   : > { %3777 = vmatprep.subr.bf16.mxu0 %v4660_v0 }
 0x129   : > { %3796 = vmatpush3.bf16.msra.mxu1 %v5274_v53 }
 0x12a   : > { %3797 = vmatprep.subr.bf16.mxu1 %v4660_v0 }
 0x12b   : > { %3778 = vmatpush3.bf16.msra.mxu0 %v5283_v54 }
 0x12c   : > { %3779 = vmatprep.subr.bf16.mxu0 %v4660_v0 }
 0x12d   : > { %3798 = vmatpush3.bf16.msra.mxu1 %v5283_v54 }
 0x12e   : > { %3799 = vmatprep.subr.bf16.mxu1 %v4660_v0 }
 0x12f   : > { %3780 = vmatpush3.bf16.msra.mxu0 %v5292_v57 }
 0x130   : > { %3805 = vmatprep.subr.bf16.mxu0 %v4660_v0 }
 0x131   : > { %3800 = vmatpush3.bf16.msra.mxu1 %v5292_v57 }
 0x132   : > { %3782 = vmatmul.mubr.bf16.vlgmr.msra.gmra.mxu0 %v1484_v55  ;;  %3825 = vmatprep.subr.bf16.mxu1 %v4660_v0 }
 0x133   : > { %3806 = vmatpush3.bf16.msra.mxu0 %v5225_v49  ;;  %3821 = vmatprep.mubr.msk.bf16.mxu0 %vm4661_vm0, %v4660_v0 }
 0x134   : > { %3807 = vmatprep.subr.bf16.mxu0 %v4660_v0  ;;  %3802 = vmatmul.mubr.bf16.vlgmr.msra.gmra.mxu1 %v1485_v59 }
 0x135   : > { %3826 = vmatpush3.bf16.msra.mxu1 %v5225_v49  ;;  %3841 = vmatprep.mubr.msk.bf16.mxu1 %vm4661_vm0, %v4660_v0 }
 0x136   : > { %3827 = vmatprep.subr.bf16.mxu1 %v4660_v0 }
 0x137   : > { %3808 = vmatpush3.bf16.msra.mxu0 %v5234_v12 }
 0x138   : > { %3809 = vmatprep.subr.bf16.mxu0 %v4660_v0 }
 0x139   : > { %3828 = vmatpush3.bf16.msra.mxu1 %v5234_v12 }
 0x13a   : > { %3829 = vmatprep.subr.bf16.mxu1 %v4660_v0 }
 0x13b   : > { %3810 = vmatpush3.bf16.msra.mxu0 %v5245_v10 }
 0x13c   : > { %3811 = vmatprep.subr.bf16.mxu0 %v4660_v0 }
 0x13d   : > { %3830 = vmatpush3.bf16.msra.mxu1 %v5245_v10 }
 0x13e   : > { %3831 = vmatprep.subr.bf16.mxu1 %v4660_v0 }
 0x13f   : > { %3812 = vmatpush3.bf16.msra.mxu0 %v5256_v17 }
 0x140   : > { %3813 = vmatprep.subr.bf16.mxu0 %v4660_v0 }
 0x141   : > { %3832 = vmatpush3.bf16.msra.mxu1 %v5256_v17 }
 0x142   : > { %3833 = vmatprep.subr.bf16.mxu1 %v4660_v0 }
 0x143   : > { %3814 = vmatpush3.bf16.msra.mxu0 %v5265_v52 }
 0x144   : > { %3815 = vmatprep.subr.bf16.mxu0 %v4660_v0 }
 0x145   : > { %3834 = vmatpush3.bf16.msra.mxu1 %v5265_v52 }
 0x146   : > { %3835 = vmatprep.subr.bf16.mxu1 %v4660_v0 }
 0x147   : > { %3816 = vmatpush3.bf16.msra.mxu0 %v5274_v53 }
 0x148   : > { %3817 = vmatprep.subr.bf16.mxu0 %v4660_v0 }
 0x149   : > { %3836 = vmatpush3.bf16.msra.mxu1 %v5274_v53 }
 0x14a   : > { %3837 = vmatprep.subr.bf16.mxu1 %v4660_v0 }
 0x14b   : > { %3818 = vmatpush3.bf16.msra.mxu0 %v5283_v54 }
 0x14c   : > { %3819 = vmatprep.subr.bf16.mxu0 %v4660_v0 }
 0x14d   : > { %3838 = vmatpush3.bf16.msra.mxu1 %v5283_v54 }
 0x14e   : > { %3839 = vmatprep.subr.bf16.mxu1 %v4660_v0 }
 0x14f   : > { %3820 = vmatpush3.bf16.msra.mxu0 %v5292_v57 }
 0x150   : > { %3845 = vmatprep.subr.bf16.mxu0 %v4660_v0 }
 0x151   : > { %3840 = vmatpush3.bf16.msra.mxu1 %v5292_v57 }
 0x152   : > { %3822 = vmatmul.mubr.bf16.vlgmr.msra.gmra.mxu0 %v1486_v9  ;;  %3865 = vmatprep.subr.bf16.mxu1 %v4660_v0 }
 0x153   : > { %3846 = vmatpush3.bf16.msra.mxu0 %v5225_v49  ;;  %3861 = vmatprep.mubr.msk.bf16.mxu0 %vm4661_vm0, %v4660_v0 }
 0x154   : > { %3847 = vmatprep.subr.bf16.mxu0 %v4660_v0  ;;  %3842 = vmatmul.mubr.bf16.vlgmr.msra.gmra.mxu1 %v1487_v23  ;;  %v2001_v23 = vld [vmem:[%s6210_s10 + $0x4] sm:$0x7] }
 0x155   : > { %3866 = vmatpush3.bf16.msra.mxu1 %v5225_v49  ;;  %3881 = vmatprep.mubr.msk.bf16.mxu1 %vm4661_vm0, %v4660_v0 }
 0x156   : > { %3867 = vmatprep.subr.bf16.mxu1 %v4660_v0 }
 0x157   : > { %3848 = vmatpush3.bf16.msra.mxu0 %v5234_v12 }
 0x158   : > { %3849 = vmatprep.subr.bf16.mxu0 %v4660_v0 }
 0x159   : > { %3868 = vmatpush3.bf16.msra.mxu1 %v5234_v12 }
 0x15a   : > { %3869 = vmatprep.subr.bf16.mxu1 %v4660_v0 }
 0x15b   : > { %3850 = vmatpush3.bf16.msra.mxu0 %v5245_v10 }
 0x15c   : > { %3851 = vmatprep.subr.bf16.mxu0 %v4660_v0 }
 0x15d   : > { %3870 = vmatpush3.bf16.msra.mxu1 %v5245_v10 }
 0x15e   : > { %3871 = vmatprep.subr.bf16.mxu1 %v4660_v0 }
 0x15f   : > { %3852 = vmatpush3.bf16.msra.mxu0 %v5256_v17 }
 0x160   : > { %3853 = vmatprep.subr.bf16.mxu0 %v4660_v0 }
 0x161   : > { %3872 = vmatpush3.bf16.msra.mxu1 %v5256_v17 }
 0x162   : > { %3873 = vmatprep.subr.bf16.mxu1 %v4660_v0 }
 0x163   : > { %3854 = vmatpush3.bf16.msra.mxu0 %v5265_v52 }
 0x164   : > { %3855 = vmatprep.subr.bf16.mxu0 %v4660_v0 }
 0x165   : > { %3874 = vmatpush3.bf16.msra.mxu1 %v5265_v52 }
 0x166   : > { %3875 = vmatprep.subr.bf16.mxu1 %v4660_v0 }
 0x167   : > { %3856 = vmatpush3.bf16.msra.mxu0 %v5274_v53 }
 0x168   : > { %3857 = vmatprep.subr.bf16.mxu0 %v4660_v0 }
 0x169   : > { %3876 = vmatpush3.bf16.msra.mxu1 %v5274_v53 }
 0x16a   : > { %3877 = vmatprep.subr.bf16.mxu1 %v4660_v0 }
 0x16b   : > { %3858 = vmatpush3.bf16.msra.mxu0 %v5283_v54 }
 0x16c   : > { %3859 = vmatprep.subr.bf16.mxu0 %v4660_v0 }
 0x16d   : > { %3878 = vmatpush3.bf16.msra.mxu1 %v5283_v54 }
 0x16e   : > { %3879 = vmatprep.subr.bf16.mxu1 %v4660_v0 }
 0x16f   : > { %3860 = vmatpush3.bf16.msra.mxu0 %v5292_v57 }
 0x170   : > { %3885 = vmatprep.subr.bf16.mxu0 %v4660_v0 }
 0x171   : > { %3880 = vmatpush3.bf16.msra.mxu1 %v5292_v57 }
 0x172   : > { %v5462_v56 = vpop.f32.mrf.mxu0  ;;  %3862 = vmatmul.mubr.bf16.vlgmr.msra.gmra.mxu0 %v1656_v46  ;;  %3905 = vmatprep.subr.bf16.mxu1 %v4660_v0 }
 0x173   : > { %3886 = vmatpush3.bf16.msra.mxu0 %v5225_v49  ;;  %3901 = vmatprep.mubr.msk.bf16.mxu0 %vm4661_vm0, %v4660_v0 }
 0x174   : > { %v3623_v14 = vpop.f32.mrf.mxu0  ;;  %3887 = vmatprep.subr.bf16.mxu0 %v4660_v0  ;;  %3882 = vmatmul.mubr.bf16.vlgmr.msra.gmra.mxu1 %v1657_v60  ;;  %v5472_v28 = vpop.f32.mrf.mxu1  ;;  %v5656_v60 = vld [vmem:[%s6212_s12 + $0x20] sm:$0xff]  }
 0x175   : > { %3906 = vmatpush3.bf16.msra.mxu1 %v5225_v49  ;;  %3921 = vmatprep.mubr.msk.bf16.mxu1 %vm4661_vm0, %v4660_v0  ;;  %v5659_v14 = vrot.slane %v2001_v23, %v4940_v5 }
 0x176   : > { %v1103_v61 = vpop.f32.mrf.mxu0  ;;  %3907 = vmatprep.subr.bf16.mxu1 %v4660_v0  ;;  %v3643_v62 = vpop.f32.mrf.mxu1 }
 0x177   : > { %3888 = vmatpush3.bf16.msra.mxu0 %v5234_v12 }
 0x178   : > { %v3624_v45 = vpop.f32.mrf.mxu0  ;;  %3889 = vmatprep.subr.bf16.mxu0 %v4660_v0  ;;  %v1143_v20 = vpop.f32.mrf.mxu1 }
 0x179   : > { %3908 = vmatpush3.bf16.msra.mxu1 %v5234_v12 }
 0x17a   : > { %3909 = vmatprep.subr.bf16.mxu1 %v4660_v0  ;;  %v3644_v63 = vpop.f32.mrf.mxu1 }
 0x17b   : > { %3890 = vmatpush3.bf16.msra.mxu0 %v5245_v10  ;;  %v5666_v63 = vrot.slane %v2001_v23, %v4955_v7 }
 0x17c   : > { %3891 = vmatprep.subr.bf16.mxu0 %v4660_v0 }
 0x17d   : > { %3910 = vmatpush3.bf16.msra.mxu1 %v5245_v10 }
 0x17e   : > { %3911 = vmatprep.subr.bf16.mxu1 %v4660_v0 }
 0x17f   : > { %3892 = vmatpush3.bf16.msra.mxu0 %v5256_v17 }
 0x180   : > { %3893 = vmatprep.subr.bf16.mxu0 %v4660_v0 }
 0x181   : > { %3912 = vmatpush3.bf16.msra.mxu1 %v5256_v17 }
 0x182   : > { %3913 = vmatprep.subr.bf16.mxu1 %v4660_v0 }
 0x183   : > { %3894 = vmatpush3.bf16.msra.mxu0 %v5265_v52 }
 0x184   : > { %3895 = vmatprep.subr.bf16.mxu0 %v4660_v0 }
 0x185   : > { %3914 = vmatpush3.bf16.msra.mxu1 %v5265_v52 }
 0x186   : > { %3915 = vmatprep.subr.bf16.mxu1 %v4660_v0 }
 0x187   : > { %3896 = vmatpush3.bf16.msra.mxu0 %v5274_v53 }
 0x188   : > { %3897 = vmatprep.subr.bf16.mxu0 %v4660_v0 }
 0x189   : > { %3916 = vmatpush3.bf16.msra.mxu1 %v5274_v53 }
 0x18a   : > { %3917 = vmatprep.subr.bf16.mxu1 %v4660_v0 }
 0x18b   : > { %3898 = vmatpush3.bf16.msra.mxu0 %v5283_v54 }
 0x18c   : > { %3899 = vmatprep.subr.bf16.mxu0 %v4660_v0 }
 0x18d   : > { %3918 = vmatpush3.bf16.msra.mxu1 %v5283_v54 }
 0x18e   : > { %3919 = vmatprep.subr.bf16.mxu1 %v4660_v0 }
 0x18f   : > { %3900 = vmatpush3.bf16.msra.mxu0 %v5292_v57 }
 0x190   : > { %3925 = vmatprep.subr.bf16.mxu0 %v4660_v0 }
 0x191   : > { %3920 = vmatpush3.bf16.msra.mxu1 %v5292_v57 }
 0x192   : > { %v5506_v3 = vpop.f32.mrf.mxu0  ;;  %3902 = vmatmul.mubr.bf16.vlgmr.msra.gmra.mxu0 %v1658_v1  ;;  %3945 = vmatprep.subr.bf16.mxu1 %v4660_v0 }
 0x193   : > { %3926 = vmatpush3.bf16.msra.mxu0 %v5225_v49  ;;  %3941 = vmatprep.mubr.msk.bf16.mxu0 %vm4661_vm0, %v4660_v0 }
 0x194   : > { %v3663_v11 = vpop.f32.mrf.mxu0  ;;  %3927 = vmatprep.subr.bf16.mxu0 %v4660_v0  ;;  %3922 = vmatmul.mubr.bf16.vlgmr.msra.gmra.mxu1 %v1659_v15  ;;  %v5516_v19 = vpop.f32.mrf.mxu1 }
 0x195   : > { %3946 = vmatpush3.bf16.msra.mxu1 %v5225_v49  ;;  %3961 = vmatprep.mubr.msk.bf16.mxu1 %vm4661_vm0, %v4660_v0 }
 0x196   : > { %v1183_v16 = vpop.f32.mrf.mxu0  ;;  %3947 = vmatprep.subr.bf16.mxu1 %v4660_v0  ;;  %v3683_v26 = vpop.f32.mrf.mxu1 }
 0x197   : > { %3928 = vmatpush3.bf16.msra.mxu0 %v5234_v12 }
 0x198   : > { %v3664_v25 = vpop.f32.mrf.mxu0  ;;  %3929 = vmatprep.subr.bf16.mxu0 %v4660_v0  ;;  %v1223_v27 = vpop.f32.mrf.mxu1 }
 0x199   : > { %3948 = vmatpush3.bf16.msra.mxu1 %v5234_v12  ;;  %v5674_v25 = vld [vmem:[%s6212_s12 + $0x18] sm:$0xff]   ;;  %v5678_v27 = vrot.slane %v2001_v23, %v4965_v8 }
 0x19a   : > { %3949 = vmatprep.subr.bf16.mxu1 %v4660_v0  ;;  %v3684_v30 = vpop.f32.mrf.mxu1 }
 0x19b   : > { %3930 = vmatpush3.bf16.msra.mxu0 %v5245_v10 }
 0x19c   : > { %3931 = vmatprep.subr.bf16.mxu0 %v4660_v0 }
 0x19d   : > { %3950 = vmatpush3.bf16.msra.mxu1 %v5245_v10 }
 0x19e   : > { %3951 = vmatprep.subr.bf16.mxu1 %v4660_v0 }
 0x19f   : > { %3932 = vmatpush3.bf16.msra.mxu0 %v5256_v17 }
 0x1a0   : > { %3933 = vmatprep.subr.bf16.mxu0 %v4660_v0 }
 0x1a1   : > { %3952 = vmatpush3.bf16.msra.mxu1 %v5256_v17 }
 0x1a2   : > { %3953 = vmatprep.subr.bf16.mxu1 %v4660_v0 }
 0x1a3   : > { %3934 = vmatpush3.bf16.msra.mxu0 %v5265_v52 }
 0x1a4   : > { %3935 = vmatprep.subr.bf16.mxu0 %v4660_v0 }
 0x1a5   : > { %3954 = vmatpush3.bf16.msra.mxu1 %v5265_v52 }
 0x1a6   : > { %3955 = vmatprep.subr.bf16.mxu1 %v4660_v0 }
 0x1a7   : > { %3936 = vmatpush3.bf16.msra.mxu0 %v5274_v53 }
 0x1a8   : > { %3937 = vmatprep.subr.bf16.mxu0 %v4660_v0 }
 0x1a9   : > { %3956 = vmatpush3.bf16.msra.mxu1 %v5274_v53 }
 0x1aa   : > { %3957 = vmatprep.subr.bf16.mxu1 %v4660_v0 }
 0x1ab   : > { %3938 = vmatpush3.bf16.msra.mxu0 %v5283_v54 }
 0x1ac   : > { %3939 = vmatprep.subr.bf16.mxu0 %v4660_v0 }
 0x1ad   : > { %3958 = vmatpush3.bf16.msra.mxu1 %v5283_v54 }
 0x1ae   : > { %3959 = vmatprep.subr.bf16.mxu1 %v4660_v0 }
 0x1af   : > { %3940 = vmatpush3.bf16.msra.mxu0 %v5292_v57 }
 0x1b0   : > { %3965 = vmatprep.subr.bf16.mxu0 %v4660_v0 }
 0x1b1   : > { %3960 = vmatpush3.bf16.msra.mxu1 %v5292_v57 }
 0x1b2   : > { %v5549_v32 = vpop.f32.mrf.mxu0  ;;  %3942 = vmatmul.mubr.bf16.vlgmr.msra.gmra.mxu0 %v1828_v21  ;;  %3985 = vmatprep.subr.bf16.mxu1 %v4660_v0 }
 0x1b3   : > { %3966 = vmatpush3.bf16.msra.mxu0 %v5225_v49  ;;  %3981 = vmatprep.mubr.msk.bf16.mxu0 %vm4661_vm0, %v4660_v0  ;;  %v1476_v41 = vadd.f32 %v5644_v18, %v5549_v32 }
 0x1b4   : > { %v3703_v2 = vpop.f32.mrf.mxu0  ;;  %3967 = vmatprep.subr.bf16.mxu0 %v4660_v0  ;;  %3962 = vmatmul.mubr.bf16.vlgmr.msra.gmra.mxu1 %v1829_v22  ;;  %v5558_v37 = vpop.f32.mrf.mxu1 }
 0x1b5   : > { %3986 = vmatpush3.bf16.msra.mxu1 %v5225_v49  ;;  %4001 = vmatprep.mubr.msk.bf16.mxu1 %vm4661_vm0, %v4660_v0  ;;  %v1480_v20 = vmax.f32 %v1476_v41, 0.0 }
 0x1b6   : > { %v1346_v36 = vpop.f32.mrf.mxu0  ;;  %3987 = vmatprep.subr.bf16.mxu1 %v4660_v0  ;;  %v3723_v24 = vpop.f32.mrf.mxu1 }
 0x1b7   : > { %3968 = vmatpush3.bf16.msra.mxu0 %v5234_v12  ;;  %v2084_v31 = vmul.f32 %v5666_v63, %v1480_v20  ;;  %v5709_v24 = vld [vmem:[%s6212_s12] sm:$0xff]  }
 0x1b8   : > { %v3704_v38 = vpop.f32.mrf.mxu0  ;;  %3969 = vmatprep.subr.bf16.mxu0 %v4660_v0  ;;  %v1386_v4 = vpop.f32.mrf.mxu1 }
 0x1b9   : > { %3988 = vmatpush3.bf16.msra.mxu1 %v5234_v12  ;;  %v5621_v12 = vld [vmem:[%s6212_s12 + $0x28] sm:$0xff]  }
 0x1ba   : > { %3989 = vmatprep.subr.bf16.mxu1 %v4660_v0  ;;  %v3724_v39 = vpop.f32.mrf.mxu1  ;;  %v5700_v38 = vld [vmem:[%s6212_s12 + $0x8] sm:$0xff]  }
 0x1bb   : > { %3970 = vmatpush3.bf16.msra.mxu0 %v5245_v10 }
 0x1bc   : > { %3971 = vmatprep.subr.bf16.mxu0 %v4660_v0 }
 0x1bd   : > { %3990 = vmatpush3.bf16.msra.mxu1 %v5245_v10  ;;  %v2000_v10 = vld [vmem:[%s6210_s10] sm:$0x7] }
 0x1be   : > { %3991 = vmatprep.subr.bf16.mxu1 %v4660_v0 }
 0x1bf   : > { %3972 = vmatpush3.bf16.msra.mxu0 %v5256_v17 }
 0x1c0   : > { %3973 = vmatprep.subr.bf16.mxu0 %v4660_v0 }
 0x1c1   : > { %3992 = vmatpush3.bf16.msra.mxu1 %v5256_v17  ;;  %v5634_v17 = vrot.slane %v2000_v10, %v4940_v5 }
 0x1c2   : > { %3993 = vmatprep.subr.bf16.mxu1 %v4660_v0 }
 0x1c3   : > { %3974 = vmatpush3.bf16.msra.mxu0 %v5265_v52 }
 0x1c4   : > { %3975 = vmatprep.subr.bf16.mxu0 %v4660_v0 }
 0x1c5   : > { %3994 = vmatpush3.bf16.msra.mxu1 %v5265_v52  ;;  %v5637_v52 = vrot.slane %v2000_v10, %v4955_v7 }
 0x1c6   : > { %3995 = vmatprep.subr.bf16.mxu1 %v4660_v0 }
 0x1c7   : > { %3976 = vmatpush3.bf16.msra.mxu0 %v5274_v53 }
 0x1c8   : > { %3977 = vmatprep.subr.bf16.mxu0 %v4660_v0 }
 0x1c9   : > { %3996 = vmatpush3.bf16.msra.mxu1 %v5274_v53  ;;  %v2040_v53 = vmul.f32 0.0, %v5634_v17 }
 0x1ca   : > { %3997 = vmatprep.subr.bf16.mxu1 %v4660_v0 }
 0x1cb   : > { %3978 = vmatpush3.bf16.msra.mxu0 %v5283_v54 }
 0x1cc   : > { %3979 = vmatprep.subr.bf16.mxu0 %v4660_v0 }
 0x1cd   : > { %3998 = vmatpush3.bf16.msra.mxu1 %v5283_v54  ;;  %v2048_v54 = vmul.f32 0.0, %v5637_v52 }
 0x1ce   : > { %3999 = vmatprep.subr.bf16.mxu1 %v4660_v0 }
 0x1cf   : > { %3980 = vmatpush3.bf16.msra.mxu0 %v5292_v57  ;;  %v2052_v55 = vadd.f32 %v2048_v54, %v2040_v53 }
 0x1d0   : > { %4005 = vmatprep.subr.bf16.mxu0 %v4660_v0 }
 0x1d1   : > { %4000 = vmatpush3.bf16.msra.mxu1 %v5292_v57  ;;  %v5642_v57 = vrot.slane %v2000_v10, %v4965_v8 }
 0x1d2   : > { %v5591_v44 = vpop.f32.mrf.mxu0  ;;  %3982 = vmatmul.mubr.bf16.vlgmr.msra.gmra.mxu0 %v1830_v43  ;;  %4025 = vmatprep.subr.bf16.mxu1 %v4660_v0 }
 0x1d3   : > { %4021 = vmatprep.mubr.msk.bf16.mxu0 %vm4661_vm0, %v4660_v0  ;;  %4006 = vmatpush3.bf16.msra.mxu0 %v5606_v35  ;;  %v2060_v59 = vmul.f32 0.0, %v5642_v57 }
 0x1d4   : > { %v3743_v40 = vpop.f32.mrf.mxu0  ;;  %4002 = vmatmul.mubr.bf16.vlgmr.msra.gmra.mxu1 %v1831_v6  ;;  %v5599_v13 = vpop.f32.mrf.mxu1  ;;  %4007 = vmatprep.subr.bf16.mxu0 %v4660_v0 }
 0x1d5   : > { %4041 = vmatprep.mubr.msk.bf16.mxu1 %vm4661_vm0, %v4660_v0  ;;  %4026 = vmatpush3.bf16.msra.mxu1 %v5606_v35  ;;  %v2064_v1 = vadd.f32 %v2060_v59, %v2052_v55 }
 0x1d6   : > { %v1426_v50 = vpop.f32.mrf.mxu0  ;;  %v3763_v48 = vpop.f32.mrf.mxu1  ;;  %4027 = vmatprep.subr.bf16.mxu1 %v4660_v0 }
 0x1d7   : > { %4008 = vmatpush3.bf16.msra.mxu0 %v5612_v51 }
 0x1d8   : > { %v3744_v47 = vpop.f32.mrf.mxu0  ;;  %v1466_v33 = vpop.f32.mrf.mxu1  ;;  %4009 = vmatprep.subr.bf16.mxu0 %v4660_v0 }
 0x1d9   : > { %4028 = vmatpush3.bf16.msra.mxu1 %v5612_v51 }
 0x1da   : > { %v3764_v49 = vpop.f32.mrf.mxu1  ;;  %4029 = vmatprep.subr.bf16.mxu1 %v4660_v0 }
 0x1db   : > { %4010 = vmatpush3.bf16.msra.mxu0 %v5621_v12 }
 0x1dc   : > { %4011 = vmatprep.subr.bf16.mxu0 %v4660_v0 }
 0x1dd   : > { %4030 = vmatpush3.bf16.msra.mxu1 %v5621_v12 }
 0x1de   : > { %4031 = vmatprep.subr.bf16.mxu1 %v4660_v0 }
 0x1df   : > { %4012 = vmatpush3.bf16.msra.mxu0 %v5656_v60 }
 0x1e0   : > { %4013 = vmatprep.subr.bf16.mxu0 %v4660_v0 }
 0x1e1   : > { %4032 = vmatpush3.bf16.msra.mxu1 %v5656_v60 }
 0x1e2   : > { %4033 = vmatprep.subr.bf16.mxu1 %v4660_v0 }
 0x1e3   : > { %4014 = vmatpush3.bf16.msra.mxu0 %v5674_v25 }
 0x1e4   : > { %4015 = vmatprep.subr.bf16.mxu0 %v4660_v0 }
 0x1e5   : > { %4034 = vmatpush3.bf16.msra.mxu1 %v5674_v25 }
 0x1e6   : > { %4035 = vmatprep.subr.bf16.mxu1 %v4660_v0 }
 0x1e7   : > { %4016 = vmatpush3.bf16.msra.mxu0 %v5688_v34 }
 0x1e8   : > { %4017 = vmatprep.subr.bf16.mxu0 %v4660_v0 }
 0x1e9   : > { %4036 = vmatpush3.bf16.msra.mxu1 %v5688_v34 }
 0x1ea   : > { %4037 = vmatprep.subr.bf16.mxu1 %v4660_v0 }
 0x1eb   : > { %4018 = vmatpush3.bf16.msra.mxu0 %v5700_v38 }
 0x1ec   : > { %4019 = vmatprep.subr.bf16.mxu0 %v4660_v0 }
 0x1ed   : > { %4038 = vmatpush3.bf16.msra.mxu1 %v5700_v38 }
 0x1ee   : > { %4039 = vmatprep.subr.bf16.mxu1 %v4660_v0 }
 0x1ef   : > { %4020 = vmatpush3.bf16.msra.mxu0 %v5709_v24 }
 0x1f0   : > { %4045 = vmatprep.subr.bf16.mxu0 %v4660_v0 }
 0x1f1   : > { %4040 = vmatpush3.bf16.msra.mxu1 %v5709_v24 }
 0x1f2   : > { %v1522_v58 = vpop.f32.mrf.mxu0  ;;  %4065 = vmatprep.subr.bf16.mxu1 %v4660_v0 }
 0x1f3   : > { %v1648_v29 = vadd.f32 %v5644_v18, %v1522_v58 }
 0x1f4   : > { %v3783_v9 = vpop.f32.mrf.mxu0  ;;  %v5661_v45 = vpop.f32.mrf.mxu1 }
 0x1f5   : > { %v1652_v46 = vmax.f32 %v1648_v29, 0.0  ;;  %v1649_v20 = vadd.f32 %v5644_v18, %v5661_v45 }
 0x1f6   : > { %v1525_v61 = vpop.f32.mrf.mxu0  ;;  %v3803_v11 = vpop.f32.mrf.mxu1 }
 0x1f7   : > { %v2008_v62 = vrot.slane %v1652_v46, 7  ;;  %v2096_v2 = vmul.f32 %v5678_v27, %v1652_v46 }
 0x1f8   : > { %v3784_v15 = vpop.f32.mrf.mxu0  ;;  %v1565_v30 = vpop.f32.mrf.mxu1 }
 0x1f9   : > { %v2016_v16 = vsel %vm863_vm1, 0.0, %v2008_v62 }
 0x1fa   : > { %v2072_v26 = vmul.f32 %v5659_v14, %v2016_v16  ;;  %v3804_v32 = vpop.f32.mrf.mxu1 }
 0x1fb   : > { %v2002_v32 = vld [vmem:[%s6210_s10 + $0x8] sm:$0x7] }
 0x1fc   : > { %v2076_v21 = vadd.f32 %v2072_v26, %v2064_v1  ;;  %v1653_v1 = vmax.f32 %v1649_v20, 0.0 }
 0x1fe   : > { %v2088_v22 = vadd.f32 %v2084_v31, %v2076_v21  ;;  %v2009_v30 = vrot.slane %v1653_v1, 7 }
 0x200   : > { %v5693_v36 = vadd.f32 %v2096_v2, %v2088_v22 }
 0x212   : > { %v1602_v4 = vpop.f32.mrf.mxu0 }
 0x213   : > { %v5724_v15 = vadd.f32 %v5644_v18, %v1602_v4  ;;  %v5734_v4 = vrot.slane %v2002_v32, %v4940_v5 }
 0x214   : > { %v3823_v39 = vpop.f32.mrf.mxu0  ;;  %v5715_v43 = vpop.f32.mrf.mxu1 }
 0x215   : > { %v1654_v21 = vmax.f32 %v5724_v15, 0.0 }
 0x216   : > { %v1605_v42 = vpop.f32.mrf.mxu0  ;;  %v3843_v40 = vpop.f32.mrf.mxu1 }
 0x218   : > { %v3824_v6 = vpop.f32.mrf.mxu0  ;;  %v1645_v50 = vpop.f32.mrf.mxu1 }
 0x219   : > { %v1477_v6 = vadd.f32 %v5644_v18, %v5558_v37 }
 0x21a   : > { %v3844_v47 = vpop.f32.mrf.mxu1 }
 0x21b   : > { %v2017_v47 = vsel %vm863_vm1, 0.0, %v2009_v30 }
 0x232   : > { %v1694_v48 = vpop.f32.mrf.mxu0 }
 0x233   : > { %v1820_v11 = vadd.f32 %v5644_v18, %v1694_v48  ;;  %v5741_v48 = vrot.slane %v2002_v32, %v4955_v7 }
 0x234   : > { %v3863_v33 = vpop.f32.mrf.mxu0  ;;  %v1734_v10 = vpop.f32.mrf.mxu1 }
 0x235   : > { %v1821_v22 = vadd.f32 %v5644_v18, %v1734_v10  ;;  %v1824_v2 = vmax.f32 %v1820_v11, 0.0  ;;  %v5744_v33 = vrot.slane %v2002_v32, %v4965_v8 }
 0x236   : > { %v1697_v49 = vpop.f32.mrf.mxu0  ;;  %v3883_v54 = vpop.f32.mrf.mxu1 }
 0x237   : > { %v1825_v54 = vmax.f32 %v1821_v22, 0.0  ;;  %v2049_v37 = vmul.f32 %v5637_v52, %v1824_v2  ;;  %v2120_v15 = vmul.f32 %v5741_v48, %v1824_v2 }
 0x238   : > { %v3864_v53 = vpop.f32.mrf.mxu0  ;;  %v1737_v58 = vpop.f32.mrf.mxu1 }
 0x239   : > { %v2010_v53 = vrot.slane %v1654_v21, 7  ;;  %v2050_v32 = vmul.f32 %v5637_v52, %v1825_v54 }
 0x23a   : > { %v3884_v29 = vpop.f32.mrf.mxu1 }
 0x252   : > { %v5717_v41 = vpop.f32.mrf.mxu0 }
 0x254   : > { %v3903_v55 = vpop.f32.mrf.mxu0  ;;  %v5719_v9 = vpop.f32.mrf.mxu1 }
 0x256   : > { %v1777_v59 = vpop.f32.mrf.mxu0  ;;  %v3923_v46 = vpop.f32.mrf.mxu1 }
 0x257   : > { %v1481_v46 = vmax.f32 %v1477_v6, 0.0 }
 0x258   : > { %v3904_v23 = vpop.f32.mrf.mxu0  ;;  %v1817_v61 = vpop.f32.mrf.mxu1 }
 0x259   : > { %v1478_v61 = vadd.f32 %v5644_v18, %v5591_v44 }
 0x25a   : > { %v3924_v62 = vpop.f32.mrf.mxu1 }
 0x25b   : > { %v2073_v62 = vmul.f32 %v5659_v14, %v2017_v47 }
 0x272   : > { %v1866_v16 = vpop.f32.mrf.mxu0 }
 0x273   : > { %v1992_v26 = vadd.f32 %v5644_v18, %v1866_v16 }
 0x274   : > { %v3943_v31 = vpop.f32.mrf.mxu0  ;;  %v1906_v39 = vpop.f32.mrf.mxu1 }
 0x275   : > { %v1996_v45 = vmax.f32 %v1992_v26, 0.0  ;;  %v1993_v50 = vadd.f32 %v5644_v18, %v1906_v39  ;;  %v2018_v31 = vsel %vm863_vm1, 0.0, %v2010_v53  ;;  %v2097_v53 = vmul.f32 %v5678_v27, %v1653_v1 }
 0x276   : > { %v1869_v42 = vpop.f32.mrf.mxu0  ;;  %v3963_v10 = vpop.f32.mrf.mxu1 }
 0x277   : > { %v2024_v40 = vrot.slane %v1996_v45, 7  ;;  %v1997_v29 = vmax.f32 %v1993_v50, 0.0  ;;  %v2061_v16 = vmul.f32 %v5642_v57, %v1996_v45  ;;  %v2132_v22 = vmul.f32 %v5744_v33, %v1996_v45  ;;  %v5763_v50 = vld [vmem:[#allocation7] ss:$0 sm:$0xff] }
 0x278   : > { %v3944_v49 = vpop.f32.mrf.mxu0  ;;  %v1909_v23 = vpop.f32.mrf.mxu1  ;;  %v2074_v45 = vmul.f32 %v5659_v14, %v2018_v31 }
 0x279   : > { %v2032_v58 = vsel %vm863_vm1, 0.0, %v2024_v40  ;;  %v2025_v20 = vrot.slane %v1997_v29, 7  ;;  %v2062_v2 = vmul.f32 %v5642_v57, %v1997_v29  ;;  %v2085_v40 = vmul.f32 %v5666_v63, %v1481_v46 }
 0x27a   : > { %v2041_v55 = vmul.f32 %v5634_v17, %v2032_v58  ;;  %v2108_v59 = vmul.f32 %v5734_v4, %v2032_v58  ;;  %v3964_v30 = vpop.f32.mrf.mxu1  ;;  %v2133_v1 = vmul.f32 %v5744_v33, %v1997_v29 }
 0x27b   : > { %v2033_v39 = vsel %vm863_vm1, 0.0, %v2025_v20 }
 0x27c   : > { %v2053_v11 = vadd.f32 %v2049_v37, %v2041_v55  ;;  %v2112_v26 = vadd.f32 %v2108_v59, %v5693_v36  ;;  %v2042_v6 = vmul.f32 %v5634_v17, %v2033_v39  ;;  %v1482_v36 = vmax.f32 %v1478_v61, 0.0 }
 0x27d   : > { %v2109_v55 = vmul.f32 %v5734_v4, %v2033_v39  ;;  %v2098_v61 = vmul.f32 %v5678_v27, %v1654_v21 }
 0x27e   : > { %v2065_v44 = vadd.f32 %v2061_v16, %v2053_v11  ;;  %v2124_v42 = vadd.f32 %v2120_v15, %v2112_v26  ;;  %v2054_v10 = vadd.f32 %v2050_v32, %v2042_v6  ;;  %v2086_v23 = vmul.f32 %v5666_v63, %v1482_v36 }
 0x280   : > { %v2077_v47 = vadd.f32 %v2073_v62, %v2065_v44  ;;  %v2136_v49 = vadd.f32 %v2132_v22, %v2124_v42  ;;  %v2066_v37 = vadd.f32 %v2062_v2, %v2054_v10  ;;  %v2121_v62 = vmul.f32 %v5741_v48, %v1825_v54 }
 0x281   : > { %v1651_v54 = vadd.f32 %v5644_v18, %v5715_v43  ;;  %v1822_v22 = vadd.f32 %v5644_v18, %v5717_v41  ;;  %v1479_v41 = vadd.f32 %v5644_v18, %v5599_v13 }
 0x282   : > { %v2089_v58 = vadd.f32 %v2085_v40, %v2077_v47  ;;  %v2146_v59 = vadd.f32 %v5763_v50, %v2136_v49  ;;  %v2078_v20 = vadd.f32 %v2074_v45, %v2066_v37 }
 0x283   : > { %v1655_v32 = vmax.f32 %v1651_v54, 0.0  ;;  %v1826_v6 = vmax.f32 %v1822_v22, 0.0 }
 0x284   : > { %v2101_v46 = vadd.f32 %v2097_v53, %v2089_v58  ;;  %v2166_v15 = vpack.c.bf16 %v2146_v59, %v2146_v59  ;;  %v2090_v11 = vadd.f32 %v2086_v23, %v2078_v20  ;;  %v1483_v59 = vmax.f32 %v1479_v41, 0.0 }
 0x285   : > { %v2051_v58 = vmul.f32 %v5637_v52, %v1826_v6  ;;  %v2122_v20 = vmul.f32 %v5741_v48, %v1826_v6 }
 0x286   : > { %v2113_v16 = vadd.f32 %v2109_v55, %v2101_v46  ;;  %4022 = vmatmul.mubr.bf16.vlgmr.msra.gmra.mxu0 %v2166_v15  ;;  %v2102_v30 = vadd.f32 %v2098_v61, %v2090_v11  ;;  %v1823_v61 = vadd.f32 %v5644_v18, %v5719_v9 }
 0x287   : > { %4046 = vmatpush3.bf16.msra.mxu0 %v5606_v35  ;;  %4061 = vmatprep.mubr.msk.bf16.mxu0 %vm4661_vm0, %v4660_v0 }
 0x288   : > { %v2125_v26 = vadd.f32 %v2121_v62, %v2113_v16  ;;  %4047 = vmatprep.subr.bf16.mxu0 %v4660_v0 }
 0x28a   : > { %v2137_v31 = vadd.f32 %v2133_v1, %v2125_v26 }
 0x28b   : > { %4048 = vmatpush3.bf16.msra.mxu0 %v5612_v51 }
 0x28c   : > { %4049 = vmatprep.subr.bf16.mxu0 %v4660_v0  ;;  %v2147_v21 = vadd.f32 %v5763_v50, %v2137_v31 }
 0x28e   : > { %v2167_v29 = vpack.c.bf16 %v2147_v21, %v2147_v21 }
 0x28f   : > { %4050 = vmatpush3.bf16.msra.mxu0 %v5621_v12 }
 0x290   : > { %4042 = vmatmul.mubr.bf16.vlgmr.msra.gmra.mxu1 %v2167_v29  ;;  %4051 = vmatprep.subr.bf16.mxu0 %v4660_v0  ;;  %v5841_v29 = vld [vmem:[%s6214_s14 + $0x30] sm:$0xff]  }
 0x291   : > { %4066 = vmatpush3.bf16.msra.mxu1 %v5606_v35  ;;  %4081 = vmatprep.mubr.msk.bf16.mxu1 %vm4661_vm0, %v4660_v0  ;;  %v2011_v35 = vrot.slane %v1655_v32, 7 }
 0x292   : > { %v1946_v39 = vpop.f32.mrf.mxu0  ;;  %4067 = vmatprep.subr.bf16.mxu1 %v4660_v0 }
 0x293   : > { %v1994_v43 = vadd.f32 %v5644_v18, %v1946_v39  ;;  %4052 = vmatpush3.bf16.msra.mxu0 %v5656_v60  ;;  %v2019_v45 = vsel %vm863_vm1, 0.0, %v2011_v35  ;;  %v5898_v39 = vld [vmem:[%s6214_s14 + $0x8] sm:$0xff]  }
 0x294   : > { %v3983_v44 = vpop.f32.mrf.mxu0  ;;  %4053 = vmatprep.subr.bf16.mxu0 %v4660_v0  ;;  %v1986_v40 = vpop.f32.mrf.mxu1 }
 0x295   : > { %v1998_v42 = vmax.f32 %v1994_v43, 0.0  ;;  %4068 = vmatpush3.bf16.msra.mxu1 %v5612_v51  ;;  %v1995_v47 = vadd.f32 %v5644_v18, %v1986_v40  ;;  %v1827_v18 = vmax.f32 %v1823_v61, 0.0  ;;  %v5906_v43 = vld [vmem:[%s6214_s14] sm:$0xff]  }
 0x296   : > { %v1949_v2 = vpop.f32.mrf.mxu0  ;;  %4069 = vmatprep.subr.bf16.mxu1 %v4660_v0  ;;  %v4003_v10 = vpop.f32.mrf.mxu1  ;;  %v5913_v44 = vld [vmem:[#allocation4] ss:$0 sm:$0xff] }
 0x297   : > { %v2026_v36 = vrot.slane %v1998_v42, 7  ;;  %4054 = vmatpush3.bf16.msra.mxu0 %v5674_v25  ;;  %v1999_v53 = vmax.f32 %v1995_v47, 0.0  ;;  %v2134_v16 = vmul.f32 %v5744_v33, %v1998_v42  ;;  %v1233_v35 = vadd.f32 %v5913_v44, %v5462_v56 }
 0x298   : > { %v3984_v49 = vpop.f32.mrf.mxu0  ;;  %4055 = vmatprep.subr.bf16.mxu0 %v4660_v0  ;;  %v1989_v55 = vpop.f32.mrf.mxu1 }
 0x299   : > { %v2034_v51 = vsel %vm863_vm1, 0.0, %v2026_v36  ;;  %4070 = vmatpush3.bf16.msra.mxu1 %v5621_v12  ;;  %v2027_v23 = vrot.slane %v1999_v53, 7  ;;  %v2063_v12 = vmul.f32 %v5642_v57, %v1998_v42  ;;  %v2087_v57 = vmul.f32 %v5666_v63, %v1483_v59  ;;  %v5830_v63 = vld [vmem:[%s6214_s14 + $0x38] sm:$0xff]   ;;  %v5915_v42 = vld [vmem:[#allocation9] ss:$0 sm:$0xff] }
 0x29a   : > { %v2043_v13 = vmul.f32 %v5634_v17, %v2034_v51  ;;  %v2110_v37 = vmul.f32 %v5734_v4, %v2034_v51  ;;  %4071 = vmatprep.subr.bf16.mxu1 %v4660_v0  ;;  %v4004_v52 = vpop.f32.mrf.mxu1  ;;  %v2075_v17 = vmul.f32 %v5659_v14, %v2019_v45  ;;  %v1237_v41 = vmax.f32 %v1233_v35, 0.0 }
 0x29b   : > { %4056 = vmatpush3.bf16.msra.mxu0 %v5688_v34  ;;  %v2035_v1 = vsel %vm863_vm1, 0.0, %v2027_v23 }
 0x29c   : > { %v2055_v46 = vadd.f32 %v2051_v58, %v2043_v13  ;;  %v2114_v15 = vadd.f32 %v2110_v37, %v2102_v30  ;;  %4057 = vmatprep.subr.bf16.mxu0 %v4660_v0  ;;  %v2111_v9 = vmul.f32 %v5734_v4, %v2035_v1  ;;  %v2135_v4 = vmul.f32 %v5744_v33, %v1999_v53 }
 0x29d   : > { %4072 = vmatpush3.bf16.msra.mxu1 %v5656_v60  ;;  %v2099_v60 = vmul.f32 %v5678_v27, %v1655_v32  ;;  %v1234_v53 = vadd.f32 %v5913_v44, %v5472_v28  ;;  %v1236_v1 = vadd.f32 %v5913_v44, %v5516_v19 }
 0x29e   : > { %v2067_v62 = vadd.f32 %v2063_v12, %v2055_v46  ;;  %v2126_v11 = vadd.f32 %v2122_v20, %v2114_v15  ;;  %4073 = vmatprep.subr.bf16.mxu1 %v4660_v0  ;;  %v1235_v20 = vadd.f32 %v5913_v44, %v5506_v3 }
 0x29f   : > { %4058 = vmatpush3.bf16.msra.mxu0 %v5700_v38  ;;  %v1238_v13 = vmax.f32 %v1234_v53, 0.0 }
 0x2a0   : > { %v2079_v26 = vadd.f32 %v2075_v17, %v2067_v62  ;;  %v2138_v30 = vadd.f32 %v2134_v16, %v2126_v11  ;;  %4059 = vmatprep.subr.bf16.mxu0 %v4660_v0  ;;  %v1239_v52 = vmax.f32 %v1235_v20, 0.0  ;;  %v5968_v11 = vld [vmem:[%s6218_s18 + $0x38] sm:$0xff]  }
 0x2a1   : > { %4074 = vmatpush3.bf16.msra.mxu1 %v5674_v25  ;;  %v2123_v25 = vmul.f32 %v5741_v48, %v1827_v18  ;;  %v5852_v48 = vld [vmem:[%s6214_s14 + $0x28] sm:$0xff]  }
 0x2a2   : > { %v2091_v14 = vadd.f32 %v2087_v57, %v2079_v26  ;;  %4075 = vmatprep.subr.bf16.mxu1 %v4660_v0  ;;  %v2148_v31 = vadd.f32 %v5763_v50, %v2138_v30 }
 0x2a3   : > { %4060 = vmatpush3.bf16.msra.mxu0 %v5709_v24 }
 0x2a4   : > { %v2103_v21 = vadd.f32 %v2099_v60, %v2091_v14  ;;  %v2168_v54 = vpack.c.bf16 %v2148_v31, %v2148_v31  ;;  %4085 = vmatprep.subr.bf16.mxu0 %v4660_v0  ;;  %v1240_v60 = vmax.f32 %v1236_v1, 0.0 }
 0x2a5   : > { %4076 = vmatpush3.bf16.msra.mxu1 %v5688_v34 }
 0x2a6   : > { %v2115_v27 = vadd.f32 %v2111_v9, %v2103_v21  ;;  %4062 = vmatmul.mubr.bf16.vlgmr.msra.gmra.mxu0 %v2168_v54  ;;  %4077 = vmatprep.subr.bf16.mxu1 %v4660_v0  ;;  %v6006_v21 = vld [vmem:[%s6218_s18 + $0x28] sm:$0xff]   ;;  %v6015_v54 = vld [vmem:[%s6218_s18 + $0x20] sm:$0xff]  }
 0x2a7   : > { %4086 = vmatpush3.bf16.msra.mxu0 %v5830_v63  ;;  %4101 = vmatprep.mubr.msk.bf16.mxu0 %vm4661_vm0, %v4660_v0 }
 0x2a8   : > { %v2127_v32 = vadd.f32 %v2123_v25, %v2115_v27  ;;  %4087 = vmatprep.subr.bf16.mxu0 %v4660_v0  ;;  %v6024_v25 = vld [vmem:[%s6218_s18 + $0x18] sm:$0xff]   ;;  %v6033_v27 = vld [vmem:[%s6218_s18 + $0x10] sm:$0xff]  }
 0x2a9   : > { %4078 = vmatpush3.bf16.msra.mxu1 %v5700_v38  ;;  %v5862_v38 = vld [vmem:[%s6214_s14 + $0x20] sm:$0xff]  }
 0x2aa   : > { %v2139_v34 = vadd.f32 %v2135_v4, %v2127_v32  ;;  %4079 = vmatprep.subr.bf16.mxu1 %v4660_v0  ;;  %v6039_v4 = vld [vmem:[%s6218_s18 + $0x8] sm:$0xff]   ;;  %v2640_v32 = vld [vmem:[%s6216_s16] sm:$0x7] }
 0x2ab   : > { %4088 = vmatpush3.bf16.msra.mxu0 %v5841_v29 }
 0x2ac   : > { %v2149_v33 = vadd.f32 %v5763_v50, %v2139_v34  ;;  %4089 = vmatprep.subr.bf16.mxu0 %v4660_v0  ;;  %v5882_v50 = vld [vmem:[%s6214_s14 + $0x10] sm:$0xff]   ;;  %v6061_v34 = vrot.slane %v2640_v32, %v4940_v5 }
 0x2ad   : > { %4080 = vmatpush3.bf16.msra.mxu1 %v5709_v24  ;;  %v5873_v24 = vld [vmem:[%s6214_s14 + $0x18] sm:$0xff]  }
 0x2ae   : > { %v2169_v22 = vpack.c.bf16 %v2149_v33, %v2149_v33  ;;  %4105 = vmatprep.subr.bf16.mxu1 %v4660_v0  ;;  %v6066_v33 = vld [vmem:[#allocation10] ss:$0 sm:$0xff] }
 0x2af   : > { %4090 = vmatpush3.bf16.msra.mxu0 %v5852_v48 }
 0x2b0   : > { %4082 = vmatmul.mubr.bf16.vlgmr.msra.gmra.mxu1 %v2169_v22  ;;  %4091 = vmatprep.subr.bf16.mxu0 %v4660_v0  ;;  %v2677_v22 = vmul.f32 0.0, %v6061_v34 }
 0x2b1   : > { %4106 = vmatpush3.bf16.msra.mxu1 %v5830_v63  ;;  %4121 = vmatprep.mubr.msk.bf16.mxu1 %vm4661_vm0, %v4660_v0 }
 0x2b2   : > { %4107 = vmatprep.subr.bf16.mxu1 %v4660_v0 }
 0x2b3   : > { %4092 = vmatpush3.bf16.msra.mxu0 %v5862_v38 }
 0x2b4   : > { %4093 = vmatprep.subr.bf16.mxu0 %v4660_v0 }
 0x2b5   : > { %4108 = vmatpush3.bf16.msra.mxu1 %v5841_v29 }
 0x2b6   : > { %4109 = vmatprep.subr.bf16.mxu1 %v4660_v0 }
 0x2b7   : > { %4094 = vmatpush3.bf16.msra.mxu0 %v5873_v24 }
 0x2b8   : > { %4095 = vmatprep.subr.bf16.mxu0 %v4660_v0 }
 0x2b9   : > { %4110 = vmatpush3.bf16.msra.mxu1 %v5852_v48 }
 0x2ba   : > { %4111 = vmatprep.subr.bf16.mxu1 %v4660_v0 }
 0x2bb   : > { %4096 = vmatpush3.bf16.msra.mxu0 %v5882_v50 }
 0x2bc   : > { %4097 = vmatprep.subr.bf16.mxu0 %v4660_v0 }
 0x2bd   : > { %4112 = vmatpush3.bf16.msra.mxu1 %v5862_v38 }
 0x2be   : > { %4113 = vmatprep.subr.bf16.mxu1 %v4660_v0 }
 0x2bf   : > { %4098 = vmatpush3.bf16.msra.mxu0 %v5898_v39 }
 0x2c0   : > { %4099 = vmatprep.subr.bf16.mxu0 %v4660_v0 }
 0x2c1   : > { %4114 = vmatpush3.bf16.msra.mxu1 %v5873_v24 }
 0x2c2   : > { %4115 = vmatprep.subr.bf16.mxu1 %v4660_v0 }
 0x2c3   : > { %4100 = vmatpush3.bf16.msra.mxu0 %v5906_v43 }
 0x2c4   : > { %4125 = vmatprep.subr.bf16.mxu0 %v4660_v0 }
 0x2c5   : > { %4116 = vmatpush3.bf16.msra.mxu1 %v5882_v50 }
 0x2c6   : > { %4117 = vmatprep.subr.bf16.mxu1 %v4660_v0 }
 0x2c9   : > { %4118 = vmatpush3.bf16.msra.mxu1 %v5898_v39 }
 0x2ca   : > { %4119 = vmatprep.subr.bf16.mxu1 %v4660_v0 }
 0x2cd   : > { %4120 = vmatpush3.bf16.msra.mxu1 %v5906_v43 }
 0x2ce   : > { %4145 = vmatprep.subr.bf16.mxu1 %v4660_v0 }
 0x346   : > { %v2252_v6 = vpop.f32.mrf.mxu0 }
 0x347   : > { %v2385_v2 = vadd.f32 %v5915_v42, %v2252_v6 }
 0x348   : > { %v4023_v40 = vpop.f32.mrf.mxu0 }
 0x349   : > { %v2389_v36 = vmax.f32 %v2385_v2, 0.0 }
 0x34a   : > { %v2255_v47 = vpop.f32.mrf.mxu0 }
 0x34b   : > { %v5920_v49 = vadd.f32 %v2389_v36, %v1237_v41 }
 0x34c   : > { %v4024_v10 = vpop.f32.mrf.mxu0 }
 0x34d   : > { %v2413_v51 = vpack.c.bf16 %v5920_v49, %v5920_v49 }
 0x34f   : > { %4102 = vmatmul.mubr.bf16.vlgmr.msra.gmra.mxu0 %v2413_v51 }
 0x350   : > { %v2292_v45 = vpop.f32.mrf.mxu1  ;;  %4126 = vmatpush3.bf16.msra.mxu0 %v5830_v63  ;;  %4141 = vmatprep.mubr.msk.bf16.mxu0 %vm4661_vm0, %v4660_v0 }
 0x351   : > { %v2386_v56 = vadd.f32 %v5915_v42, %v2292_v45  ;;  %4127 = vmatprep.subr.bf16.mxu0 %v4660_v0 }
 0x352   : > { %v4043_v58 = vpop.f32.mrf.mxu1 }
 0x353   : > { %v2390_v37 = vmax.f32 %v2386_v56, 0.0 }
 0x354   : > { %v2295_v55 = vpop.f32.mrf.mxu1  ;;  %4128 = vmatpush3.bf16.msra.mxu0 %v5841_v29 }
 0x355   : > { %v5932_v59 = vadd.f32 %v2390_v37, %v1238_v13  ;;  %4129 = vmatprep.subr.bf16.mxu0 %v4660_v0 }
 0x356   : > { %v4044_v28 = vpop.f32.mrf.mxu1 }
 0x357   : > { %v2414_v23 = vpack.c.bf16 %v5932_v59, %v5932_v59 }
 0x358   : > { %4130 = vmatpush3.bf16.msra.mxu0 %v5852_v48 }
 0x359   : > { %4122 = vmatmul.mubr.bf16.vlgmr.msra.gmra.mxu1 %v2414_v23  ;;  %4131 = vmatprep.subr.bf16.mxu0 %v4660_v0 }
 0x35a   : > { %4146 = vmatpush3.bf16.msra.mxu1 %v5830_v63  ;;  %4161 = vmatprep.mubr.msk.bf16.mxu1 %vm4661_vm0, %v4660_v0  ;;  %v5997_v63 = vld [vmem:[%s6218_s18 + $0x30] sm:$0xff]  }
 0x35b   : > { %4147 = vmatprep.subr.bf16.mxu1 %v4660_v0 }
 0x35c   : > { %4132 = vmatpush3.bf16.msra.mxu0 %v5862_v38 }
 0x35d   : > { %4133 = vmatprep.subr.bf16.mxu0 %v4660_v0 }
 0x35e   : > { %4148 = vmatpush3.bf16.msra.mxu1 %v5841_v29  ;;  %v6048_v29 = vld [vmem:[%s6218_s18] sm:$0xff]  }
 0x35f   : > { %4149 = vmatprep.subr.bf16.mxu1 %v4660_v0 }
 0x360   : > { %4134 = vmatpush3.bf16.msra.mxu0 %v5873_v24 }
 0x361   : > { %4135 = vmatprep.subr.bf16.mxu0 %v4660_v0 }
 0x362   : > { %4150 = vmatpush3.bf16.msra.mxu1 %v5852_v48  ;;  %v6064_v48 = vrot.slane %v2640_v32, %v4955_v7 }
 0x363   : > { %4151 = vmatprep.subr.bf16.mxu1 %v4660_v0 }
 0x364   : > { %4136 = vmatpush3.bf16.msra.mxu0 %v5882_v50 }
 0x365   : > { %4137 = vmatprep.subr.bf16.mxu0 %v4660_v0 }
 0x366   : > { %v2332_v46 = vpop.f32.mrf.mxu0  ;;  %4152 = vmatpush3.bf16.msra.mxu1 %v5862_v38  ;;  %v2685_v38 = vmul.f32 0.0, %v6064_v48 }
 0x367   : > { %v2387_v12 = vadd.f32 %v5915_v42, %v2332_v46  ;;  %4153 = vmatprep.subr.bf16.mxu1 %v4660_v0  ;;  %v2642_v46 = vld [vmem:[%s6216_s16 + $0x8] sm:$0x7] }
 0x368   : > { %v4063_v15 = vpop.f32.mrf.mxu0  ;;  %4138 = vmatpush3.bf16.msra.mxu0 %v5898_v39  ;;  %v2689_v35 = vadd.f32 %v2685_v38, %v2677_v22  ;;  %v6111_v22 = vld [vmem:[#allocation12] ss:$0 sm:$0xff] }
 0x369   : > { %v2391_v17 = vmax.f32 %v2387_v12, 0.0  ;;  %4139 = vmatprep.subr.bf16.mxu0 %v4660_v0 }
 0x36a   : > { %v2335_v61 = vpop.f32.mrf.mxu0  ;;  %4154 = vmatpush3.bf16.msra.mxu1 %v5873_v24  ;;  %v6071_v24 = vrot.slane %v2640_v32, %v4965_v8 }
 0x36b   : > { %v5961_v3 = vadd.f32 %v2391_v17, %v1239_v52  ;;  %4155 = vmatprep.subr.bf16.mxu1 %v4660_v0  ;;  %v6096_v17 = vrot.slane %v2642_v46, %v4940_v5 }
 0x36c   : > { %v4064_v62 = vpop.f32.mrf.mxu0  ;;  %4140 = vmatpush3.bf16.msra.mxu0 %v5906_v43  ;;  %v2697_v6 = vmul.f32 0.0, %v6071_v24 }
 0x36d   : > { %v2415_v16 = vpack.c.bf16 %v5961_v3, %v5961_v3  ;;  %4165 = vmatprep.subr.bf16.mxu0 %v4660_v0 }
 0x36e   : > { %4156 = vmatpush3.bf16.msra.mxu1 %v5882_v50  ;;  %v2701_v10 = vadd.f32 %v2697_v6, %v2689_v35 }
 0x36f   : > { %4142 = vmatmul.mubr.bf16.vlgmr.msra.gmra.mxu0 %v2415_v16  ;;  %4157 = vmatprep.subr.bf16.mxu1 %v4660_v0 }
 0x370   : > { %v2372_v57 = vpop.f32.mrf.mxu1  ;;  %4166 = vmatpush3.bf16.msra.mxu0 %v5968_v11  ;;  %4181 = vmatprep.mubr.msk.bf16.mxu0 %vm4661_vm0, %v4660_v0 }
 0x371   : > { %v2388_v26 = vadd.f32 %v5915_v42, %v2372_v57  ;;  %4167 = vmatprep.subr.bf16.mxu0 %v4660_v0  ;;  %v2641_v42 = vld [vmem:[%s6216_s16 + $0x4] sm:$0x7]  ;;  %v6101_v57 = vrot.slane %v2642_v46, %v4955_v7 }
 0x372   : > { %v4083_v30 = vpop.f32.mrf.mxu1  ;;  %4158 = vmatpush3.bf16.msra.mxu1 %v5898_v39  ;;  %v6079_v2 = vrot.slane %v2641_v42, %v4940_v5  ;;  %v6084_v53 = vrot.slane %v2641_v42, %v4955_v7  ;;  %v6089_v28 = vrot.slane %v2641_v42, %v4965_v8 }
 0x373   : > { %v2392_v18 = vmax.f32 %v2388_v26, 0.0  ;;  %4159 = vmatprep.subr.bf16.mxu1 %v4660_v0 }
 0x374   : > { %v2375_v19 = vpop.f32.mrf.mxu1  ;;  %4168 = vmatpush3.bf16.msra.mxu0 %v5997_v63 }
 0x375   : > { %v5984_v14 = vadd.f32 %v2392_v18, %v1240_v60  ;;  %4169 = vmatprep.subr.bf16.mxu0 %v4660_v0  ;;  %v6105_v60 = vrot.slane %v2642_v46, %v4965_v8 }
 0x376   : > { %v4084_v9 = vpop.f32.mrf.mxu1  ;;  %4160 = vmatpush3.bf16.msra.mxu1 %v5906_v43 }
 0x377   : > { %v2416_v31 = vpack.c.bf16 %v5984_v14, %v5984_v14  ;;  %4185 = vmatprep.subr.bf16.mxu1 %v4660_v0 }
 0x378   : > { %4170 = vmatpush3.bf16.msra.mxu0 %v6006_v21 }
 0x379   : > { %4162 = vmatmul.mubr.bf16.vlgmr.msra.gmra.mxu1 %v2416_v31  ;;  %4171 = vmatprep.subr.bf16.mxu0 %v4660_v0 }
 0x37a   : > { %4186 = vmatpush3.bf16.msra.mxu1 %v5968_v11  ;;  %4201 = vmatprep.mubr.msk.bf16.mxu1 %vm4661_vm0, %v4660_v0 }
 0x37b   : > { %4187 = vmatprep.subr.bf16.mxu1 %v4660_v0 }
 0x37c   : > { %4172 = vmatpush3.bf16.msra.mxu0 %v6015_v54 }
 0x37d   : > { %4173 = vmatprep.subr.bf16.mxu0 %v4660_v0 }
 0x37e   : > { %4188 = vmatpush3.bf16.msra.mxu1 %v5997_v63 }
 0x37f   : > { %4189 = vmatprep.subr.bf16.mxu1 %v4660_v0 }
 0x380   : > { %4174 = vmatpush3.bf16.msra.mxu0 %v6024_v25 }
 0x381   : > { %4175 = vmatprep.subr.bf16.mxu0 %v4660_v0 }
 0x382   : > { %4190 = vmatpush3.bf16.msra.mxu1 %v6006_v21 }
 0x383   : > { %4191 = vmatprep.subr.bf16.mxu1 %v4660_v0 }
 0x384   : > { %4176 = vmatpush3.bf16.msra.mxu0 %v6033_v27 }
 0x385   : > { %4177 = vmatprep.subr.bf16.mxu0 %v4660_v0 }
 0x386   : > { %4192 = vmatpush3.bf16.msra.mxu1 %v6015_v54 }
 0x387   : > { %4193 = vmatprep.subr.bf16.mxu1 %v4660_v0 }
 0x388   : > { %4178 = vmatpush3.bf16.msra.mxu0 %v6039_v4 }
 0x389   : > { %4179 = vmatprep.subr.bf16.mxu0 %v4660_v0 }
 0x38a   : > { %4194 = vmatpush3.bf16.msra.mxu1 %v6024_v25 }
 0x38b   : > { %4195 = vmatprep.subr.bf16.mxu1 %v4660_v0 }
 0x38c   : > { %4180 = vmatpush3.bf16.msra.mxu0 %v6048_v29 }
 0x38d   : > { %4205 = vmatprep.subr.bf16.mxu0 %v4660_v0 }
 0x38e   : > { %4196 = vmatpush3.bf16.msra.mxu1 %v6033_v27 }
 0x38f   : > { %4197 = vmatprep.subr.bf16.mxu1 %v4660_v0 }
 0x392   : > { %4198 = vmatpush3.bf16.msra.mxu1 %v6039_v4 }
 0x393   : > { %4199 = vmatprep.subr.bf16.mxu1 %v4660_v0 }
 0x396   : > { %4200 = vmatpush3.bf16.msra.mxu1 %v6048_v29 }
 0x397   : > { %4225 = vmatprep.subr.bf16.mxu1 %v4660_v0 }
 0x40f   : > { %v2499_v50 = vpop.f32.mrf.mxu0 }
 0x410   : > { %v2632_v39 = vadd.f32 %v6066_v33, %v2499_v50 }
 0x411   : > { %v4103_v43 = vpop.f32.mrf.mxu0 }
 0x412   : > { %v2636_v44 = vmax.f32 %v2632_v39, 0.0 }
 0x413   : > { %v2502_v40 = vpop.f32.mrf.mxu0 }
 0x414   : > { %v2648_v41 = vrot.slane %v2636_v44, 7  ;;  %v2660_v45 = vrot.slane %v2636_v44, 1  ;;  %v2721_v55 = vmul.f32 %v6084_v53, %v2636_v44  ;;  %v2686_v7 = vmul.f32 %v6064_v48, %v2636_v44 }
 0x415   : > { %v4104_v36 = vpop.f32.mrf.mxu0 }
 0x416   : > { %v2656_v47 = vsel %vm863_vm1, 0.0, %v2648_v41  ;;  %v2669_v20 = vsel %vm2668_vm2, %v2660_v45, 0.0 }
 0x417   : > { %v2709_v51 = vmul.f32 %v6079_v2, %v2656_v47  ;;  %v2733_v16 = vmul.f32 %v6089_v28, %v2669_v20  ;;  %v2678_v9 = vmul.f32 %v6061_v34, %v2656_v47  ;;  %v2698_v8 = vmul.f32 %v6071_v24, %v2669_v20 }
 0x419   : > { %v2539_v56 = vpop.f32.mrf.mxu1  ;;  %v2713_v58 = vadd.f32 %v2709_v51, %v2701_v10  ;;  %v2690_v50 = vadd.f32 %v2686_v7, %v2678_v9 }
 0x41a   : > { %v2633_v13 = vadd.f32 %v6066_v33, %v2539_v56 }
 0x41b   : > { %v4123_v37 = vpop.f32.mrf.mxu1  ;;  %v2725_v15 = vadd.f32 %v2721_v55, %v2713_v58  ;;  %v2702_v35 = vadd.f32 %v2698_v8, %v2690_v50 }
 0x41c   : > { %v2637_v23 = vmax.f32 %v2633_v13, 0.0 }
 0x41d   : > { %v2542_v12 = vpop.f32.mrf.mxu1  ;;  %v2737_v26 = vadd.f32 %v2733_v16, %v2725_v15 }
 0x41e   : > { %v2649_v52 = vrot.slane %v2637_v23, 7  ;;  %v2661_v61 = vrot.slane %v2637_v23, 1  ;;  %v2757_v5 = vmul.f32 %v6101_v57, %v2637_v23  ;;  %v2687_v36 = vmul.f32 %v6064_v48, %v2637_v23 }
 0x41f   : > { %v4124_v62 = vpop.f32.mrf.mxu1  ;;  %v2722_v10 = vmul.f32 %v6084_v53, %v2637_v23 }
 0x420   : > { %v2657_v1 = vsel %vm863_vm1, 0.0, %v2649_v52  ;;  %v2670_v18 = vsel %vm2668_vm2, %v2661_v61, 0.0 }
 0x421   : > { %v2745_v30 = vmul.f32 %v6096_v17, %v2657_v1  ;;  %v2769_v32 = vmul.f32 %v6105_v60, %v2670_v18  ;;  %v2710_v43 = vmul.f32 %v6079_v2, %v2657_v1  ;;  %v2679_v6 = vmul.f32 %v6061_v34, %v2657_v1 }
 0x422   : > { %v2699_v37 = vmul.f32 %v6071_v24, %v2670_v18  ;;  %v2734_v20 = vmul.f32 %v6089_v28, %v2670_v18 }
 0x423   : > { %v2749_v19 = vadd.f32 %v2745_v30, %v2737_v26  ;;  %v2714_v44 = vadd.f32 %v2710_v43, %v2702_v35  ;;  %v2691_v45 = vadd.f32 %v2687_v36, %v2679_v6 }
 0x425   : > { %v2761_v31 = vadd.f32 %v2757_v5, %v2749_v19  ;;  %v2726_v58 = vadd.f32 %v2722_v10, %v2714_v44  ;;  %v2703_v15 = vadd.f32 %v2699_v37, %v2691_v45 }
 0x427   : > { %v2773_v38 = vadd.f32 %v2769_v32, %v2761_v31  ;;  %v2738_v52 = vadd.f32 %v2734_v20, %v2726_v58 }
 0x429   : > { %v2783_v39 = vadd.f32 %v6111_v22, %v2773_v38 }
 0x42b   : > { %v2814_v42 = vpack.c.bf16 %v2783_v39, %v2783_v39 }
 0x42d   : > { %4182 = vmatmul.mubr.bf16.vlgmr.msra.gmra.mxu0 %v2814_v42 }
 0x42e   : > { %4206 = vmatpush3.bf16.msra.mxu0 %v5968_v11  ;;  %4221 = vmatprep.mubr.msk.bf16.mxu0 %vm4661_vm0, %v4660_v0 }
 0x42f   : > { %v2579_v40 = vpop.f32.mrf.mxu0  ;;  %4207 = vmatprep.subr.bf16.mxu0 %v4660_v0 }
 0x430   : > { %v2634_v41 = vadd.f32 %v6066_v33, %v2579_v40 }
 0x431   : > { %v4143_v47 = vpop.f32.mrf.mxu0 }
 0x432   : > { %v2638_v51 = vmax.f32 %v2634_v41, 0.0  ;;  %4208 = vmatpush3.bf16.msra.mxu0 %v5997_v63 }
 0x433   : > { %v2582_v56 = vpop.f32.mrf.mxu0  ;;  %4209 = vmatprep.subr.bf16.mxu0 %v4660_v0 }
 0x434   : > { %v2650_v13 = vrot.slane %v2638_v51, 7  ;;  %v2662_v12 = vrot.slane %v2638_v51, 1  ;;  %v2758_v26 = vmul.f32 %v6101_v57, %v2638_v51  ;;  %v2723_v5 = vmul.f32 %v6084_v53, %v2638_v51 }
 0x435   : > { %v4144_v55 = vpop.f32.mrf.mxu0 }
 0x436   : > { %v2658_v46 = vsel %vm863_vm1, 0.0, %v2650_v13  ;;  %4210 = vmatpush3.bf16.msra.mxu0 %v6006_v21  ;;  %v2671_v1 = vsel %vm2668_vm2, %v2662_v12, 0.0 }
 0x437   : > { %v2711_v23 = vmul.f32 %v6079_v2, %v2658_v46  ;;  %4211 = vmatprep.subr.bf16.mxu0 %v4660_v0  ;;  %v2746_v61 = vmul.f32 %v6096_v17, %v2658_v46  ;;  %v2680_v32 = vmul.f32 %v6061_v34, %v2658_v46  ;;  %v2770_v50 = vmul.f32 %v6105_v60, %v2671_v1 }
 0x438   : > { %v2735_v43 = vmul.f32 %v6089_v28, %v2671_v1 }
 0x439   : > { %v2715_v62 = vadd.f32 %v2711_v23, %v2703_v15  ;;  %v2619_v16 = vpop.f32.mrf.mxu1  ;;  %v2750_v18 = vadd.f32 %v2746_v61, %v2738_v52  ;;  %v2760_v15 = vmul.f32 0.0, %v6101_v57  ;;  %v3300_v23 = vld [vmem:[#allocation15] ss:$0 sm:$0xff] }
 0x43a   : > { %v2635_v30 = vadd.f32 %v6066_v33, %v2619_v16  ;;  %4212 = vmatpush3.bf16.msra.mxu0 %v6015_v54  ;;  %v2688_v33 = vmul.f32 %v6064_v48, %v2638_v51  ;;  %v2700_v48 = vmul.f32 %v6071_v24, %v2671_v1 }
 0x43b   : > { %v4163_v19 = vpop.f32.mrf.mxu1  ;;  %4213 = vmatprep.subr.bf16.mxu0 %v4660_v0  ;;  %v2762_v31 = vadd.f32 %v2758_v26, %v2750_v18  ;;  %v2727_v7 = vadd.f32 %v2723_v5, %v2715_v62  ;;  %v2795_v26 = vmul.f32 %v3300_v23, %v5932_v59  ;;  %v2797_v59 = vmul.f32 %v3300_v23, %v5984_v14 }
 0x43c   : > { %v2639_v9 = vmax.f32 %v2635_v30, 0.0  ;;  %v2692_v40 = vadd.f32 %v2688_v33, %v2680_v32  ;;  %v2796_v32 = vmul.f32 %v3300_v23, %v5961_v3 }
 0x43d   : > { %v2622_v38 = vpop.f32.mrf.mxu1  ;;  %v2774_v35 = vadd.f32 %v2770_v50, %v2762_v31  ;;  %v2739_v34 = vadd.f32 %v2735_v43, %v2727_v7 }
 0x43e   : > { %v2651_v39 = vrot.slane %v2639_v9, 7  ;;  %v2663_v8 = vrot.slane %v2639_v9, 1  ;;  %4214 = vmatpush3.bf16.msra.mxu0 %v6024_v25  ;;  %v2759_v51 = vmul.f32 %v6101_v57, %v2639_v9  ;;  %v2704_v56 = vadd.f32 %v2700_v48, %v2692_v40  ;;  %v3309_v57 = vld [vmem:[#allocation13] ss:$0 sm:$0xff] }
 0x43f   : > { %v4164_v42 = vpop.f32.mrf.mxu1  ;;  %4215 = vmatprep.subr.bf16.mxu0 %v4660_v0  ;;  %v2784_v41 = vadd.f32 %v6111_v22, %v2774_v35  ;;  %v2724_v37 = vmul.f32 %v6084_v53, %v2639_v9  ;;  %v2748_v53 = vmul.f32 0.0, %v6096_v17 }
 0x440   : > { %v2659_v6 = vsel %vm863_vm1, 0.0, %v2651_v39  ;;  %v2672_v36 = vsel %vm2668_vm2, %v2663_v8, 0.0 }
 0x441   : > { %v2747_v44 = vmul.f32 %v6096_v17, %v2659_v6  ;;  %v2712_v47 = vmul.f32 %v6079_v2, %v2659_v6  ;;  %v2815_v45 = vpack.c.bf16 %v2784_v41, %v2784_v41  ;;  %v2771_v13 = vmul.f32 %v6105_v60, %v2672_v36 }
 0x442   : > { %4216 = vmatpush3.bf16.msra.mxu0 %v6033_v27  ;;  %v2736_v46 = vmul.f32 %v6089_v28, %v2672_v36 }
 0x443   : > { %v2751_v10 = vadd.f32 %v2747_v44, %v2739_v34  ;;  %4217 = vmatprep.subr.bf16.mxu0 %v4660_v0  ;;  %4202 = vmatmul.mubr.bf16.vlgmr.msra.gmra.mxu1 %v2815_v45  ;;  %v2716_v24 = vadd.f32 %v2712_v47, %v2704_v56 }
 0x444   : > { %4226 = vmatpush3.bf16.msra.mxu1 %v5968_v11  ;;  %4241 = vmatprep.mubr.msk.bf16.mxu1 %vm4661_vm0, %v4660_v0 }
 0x445   : > { %v2763_v58 = vadd.f32 %v2759_v51, %v2751_v10  ;;  %4227 = vmatprep.subr.bf16.mxu1 %v4660_v0  ;;  %v2728_v20 = vadd.f32 %v2724_v37, %v2716_v24 }
 0x446   : > { %4218 = vmatpush3.bf16.msra.mxu0 %v6039_v4 }
 0x447   : > { %v2775_v2 = vadd.f32 %v2771_v13, %v2763_v58  ;;  %4219 = vmatprep.subr.bf16.mxu0 %v4660_v0  ;;  %v2740_v12 = vadd.f32 %v2736_v46, %v2728_v20 }
 0x448   : > { %4228 = vmatpush3.bf16.msra.mxu1 %v5997_v63 }
 0x449   : > { %v2785_v55 = vadd.f32 %v6111_v22, %v2775_v2  ;;  %4229 = vmatprep.subr.bf16.mxu1 %v4660_v0  ;;  %v2752_v63 = vadd.f32 %v2748_v53, %v2740_v12 }
 0x44a   : > { %4220 = vmatpush3.bf16.msra.mxu0 %v6048_v29 }
 0x44b   : > { %v2816_v11 = vpack.c.bf16 %v2785_v55, %v2785_v55  ;;  %v2764_v28 = vadd.f32 %v2760_v15, %v2752_v63 }
 0x44c   : > { %4230 = vmatpush3.bf16.msra.mxu1 %v6006_v21  ;;  %v2772_v21 = vmul.f32 0.0, %v6105_v60 }
 0x44d   : > { %4222 = vmatmul.mubr.bf16.vlgmr.msra.gmra.mxu0 %v2816_v11  ;;  %4231 = vmatprep.subr.bf16.mxu1 %v4660_v0 }
 0x44e   : > { %v2776_v17 = vadd.f32 %v2772_v21, %v2764_v28 }
 0x450   : > { %4232 = vmatpush3.bf16.msra.mxu1 %v6015_v54  ;;  %v2786_v54 = vadd.f32 %v6111_v22, %v2776_v17 }
 0x451   : > { %4233 = vmatprep.subr.bf16.mxu1 %v4660_v0 }
 0x454   : > { %4234 = vmatpush3.bf16.msra.mxu1 %v6024_v25  ;;  %v2817_v25 = vpack.c.bf16 %v2786_v54, %v2786_v54 }
 0x455   : > { %4235 = vmatprep.subr.bf16.mxu1 %v4660_v0 }
 0x458   : > { %4236 = vmatpush3.bf16.msra.mxu1 %v6033_v27  ;;  %v2794_v27 = vmul.f32 %v3300_v23, %v5920_v49 }
 0x459   : > { %4237 = vmatprep.subr.bf16.mxu1 %v4660_v0 }
 0x45c   : > { %4238 = vmatpush3.bf16.msra.mxu1 %v6039_v4 }
 0x45d   : > { %4239 = vmatprep.subr.bf16.mxu1 %v4660_v0 }
 0x460   : > { %4240 = vmatpush3.bf16.msra.mxu1 %v6048_v29 }
 0x463   : > { %4242 = vmatmul.mubr.bf16.vlgmr.msra.gmra.mxu1 %v2817_v25 }
 0x4ed   : > { %v2900_v52 = vpop.f32.mrf.mxu0 }
 0x4ee   : > { %v3033_v60 = vadd.f32 %v3309_v57, %v2900_v52 }
 0x4ef   : > { %v4183_v61 = vpop.f32.mrf.mxu0 }
 0x4f0   : > { %v3037_v62 = vmax.f32 %v3033_v60, 0.0 }
 0x4f1   : > { %v2903_v0 = vpop.f32.mrf.mxu0 }
 0x4f2   : > { %v3041_v4 = vadd.f32 %v3037_v62, %v2794_v27 }
 0x4f3   : > { %v4184_v29 = vpop.f32.mrf.mxu0 }
 0x4f4   : > { %3045 = vst [vmem:[%s6188_s26] sm:$0xf] %v3041_v4 }
 0x503   : > { %v2940_v22 = vpop.f32.mrf.mxu1 }
 0x504   : > { %v3034_v16 = vadd.f32 %v3309_v57, %v2940_v22 }
 0x505   : > { %v4203_v1 = vpop.f32.mrf.mxu1 }
 0x506   : > { %v3038_v30 = vmax.f32 %v3034_v16, 0.0 }
 0x507   : > { %v2943_v49 = vpop.f32.mrf.mxu1 }
 0x508   : > { %v3042_v18 = vadd.f32 %v3038_v30, %v2795_v26 }
 0x509   : > { %v4204_v5 = vpop.f32.mrf.mxu1 }
 0x50a   : > { %3046 = vst [vmem:[%s6188_s26 + $0x4] sm:$0xf] %v3042_v18 }
 0x50d   : > { %v2980_v19 = vpop.f32.mrf.mxu0 }
 0x50e   : > { %v3035_v9 = vadd.f32 %v3309_v57, %v2980_v19 }
 0x50f   : > { %v4223_v31 = vpop.f32.mrf.mxu0 }
 0x510   : > { %v3039_v7 = vmax.f32 %v3035_v9, 0.0 }
 0x511   : > { %v2983_v38 = vpop.f32.mrf.mxu0 }
 0x512   : > { %v3043_v50 = vadd.f32 %v3039_v7, %v2796_v32 }
 0x513   : > { %v4224_v39 = vpop.f32.mrf.mxu0 }
 0x514   : > { %3047 = vst [vmem:[%s6188_s26 + $0x8] sm:$0xf] %v3043_v50 }
 0x523   : > { %v3020_v8 = vpop.f32.mrf.mxu1 }
 0x524   : > { %v3036_v33 = vadd.f32 %v3309_v57, %v3020_v8 }
 0x525   : > { %v4243_v43 = vpop.f32.mrf.mxu1 }
 0x526   : > { %v3040_v42 = vmax.f32 %v3036_v33, 0.0 }
 0x527   : > { %v3023_v35 = vpop.f32.mrf.mxu1 }
 0x528   : > { %v3044_v6 = vadd.f32 %v3040_v42, %v2797_v59 }
 0x529   : > { %v4244_v40 = vpop.f32.mrf.mxu1 }
 0x52a   : > { %3048 = vst [vmem:[%s6188_s26 + $0xc] sm:$0xf] %v3044_v6 }
 0x52b PF: > { %s36_s2 = sadd.s32 1, %s4649_s2  }
 0x52c   : > { %p33_p0 = scmp.ge.s32.totalorder %s36_s2, 4  }
 0x52e   :  { %35 = sbr.rel (!%p33_p0) target bundleno = 13 (0xd), region = 180 }
 0x533   :  { %3070 = vsyncpa [#allocation3], 1 }
 0x534   :  { %3072 = vsyncpa [#allocation3 + $0x1], 1 }
 0x535   :  { %3073 = vsyncpa [#allocation5], 1 }
 0x536   :  { %3074 = vsyncpa [#allocation8], 1 }
 0x537   :  { %3075 = vsyncpa [#allocation11], 1 }
 0x538   :  { %3076 = vsyncpa [#allocation14], 1 }

// kernel: _lambda_.7
= control target key start
LH: loop header
LB: loop body
LE: loop exit
PB: predicated region body
PF: predicated region fallthrough
CT: control target
= control target key end

     0   :  { %s3380_s29 = smov 0   ;;  %s4029_s0 = inlined_call_operand.vmem [shape: f32[2,2,2,128], index: 0, kind: input, shape index: {}]   ;;  %s4030_s1 = inlined_call_operand.vmem [shape: f32[2,2,2,128], index: 1, kind: input, shape index: {}]   ;;  %s4031_s2 = inlined_call_operand.vmem [shape: f32[2,2,2,128], index: 2, kind: input, shape index: {}]   ;;  %s4032_s3 = inlined_call_operand.vmem [shape: f32[2,2,2,128], index: 3, kind: input, shape index: {}]   ;;  %s4033_s4 = inlined_call_operand.vmem [shape: f32[3,3,128], index: 4, kind: input, shape index: {}]   ;;  %s4034_s5 = inlined_call_operand.vmem [shape: f32[1,128], index: 5, kind: input, shape index: {}]   ;;  %s4035_s6 = inlined_call_operand.vmem [shape: bf16[128,128], index: 6, kind: input, shape index: {}]   ;;  %s4036_s7 = inlined_call_operand.vmem [shape: f32[1,128], index: 7, kind: input, shape index: {}]   ;;  %s4037_s8 = inlined_call_operand.vmem [shape: bf16[128,128], index: 8, kind: input, shape index: {}]   ;;  %s4038_s9 = inlined_call_operand.vmem [shape: f32[1,128], index: 9, kind: input, shape index: {}]   ;;  %s4039_s10 = inlined_call_operand.vmem [shape: f32[3,3,128], index: 10, kind: input, shape index: {}]   ;;  %s4040_s11 = inlined_call_operand.vmem [shape: f32[1,128], index: 11, kind: input, shape index: {}]   ;;  %s4041_s12 = inlined_call_operand.vmem [shape: bf16[128,128], index: 12, kind: input, shape index: {}]   ;;  %s4042_s13 = inlined_call_operand.vmem [shape: f32[1,128], index: 13, kind: input, shape index: {}]   ;;  %s4043_s14 = inlined_call_operand.vmem [shape: bf16[128,128], index: 14, kind: input, shape index: {}]   ;;  %s4044_s15 = inlined_call_operand.vmem [shape: f32[1,128], index: 15, kind: input, shape index: {}]   ;;  %s4045_s16 = inlined_call_operand.vmem [shape: f32[3,3,128], index: 16, kind: input, shape index: {}]   ;;  %s4046_s17 = inlined_call_operand.vmem [shape: f32[1,128], index: 17, kind: input, shape index: {}]   ;;  %s4047_s18 = inlined_call_operand.vmem [shape: bf16[128,128], index: 18, kind: input, shape index: {}]   ;;  %s4048_s19 = inlined_call_operand.vmem [shape: f32[1,128], index: 19, kind: input, shape index: {}]   ;;  %s4049_s20 = inlined_call_operand.vmem [shape: f32[1,128], index: 20, kind: input, shape index: {}]   ;;  %s4050_s21 = inlined_call_operand.vmem [shape: bf16[128,128], index: 21, kind: input, shape index: {}]   ;;  %s4051_s22 = inlined_call_operand.vmem [shape: f32[1,128], index: 22, kind: input, shape index: {}]   ;;  %s4052_s23 = inlined_call_operand.vmem [shape: bf16[128,128], index: 23, kind: input, shape index: {}]   ;;  %s4053_s24 = inlined_call_operand.vmem [shape: f32[1,128], index: 24, kind: input, shape index: {}]   ;;  %s4054_s25 = inlined_call_operand.vmem [shape: f32[2,1,128], index: 25, kind: output, shape index: {}]  }
   0x1   :  { %4060 = sst [smem:[#allocation4_spill]] %s4029_s0 }
   0x2   :  { %4061 = sst [smem:[#allocation5_spill]] %s4030_s1 }
   0x3   :  { %4062 = sst [smem:[#allocation6_spill]] %s4031_s2 }
   0x4   :  { %4063 = sst [smem:[#allocation7_spill]] %s4032_s3 }
   0x5   :  { %4064 = sst [smem:[#allocation8_spill]] %s4033_s4 }
   0x6   :  { %4065 = sst [smem:[#allocation9_spill]] %s4034_s5 }
   0x7   :  { %4066 = sst [smem:[#allocation10_spill]] %s4035_s6 }
   0x8   :  { %4067 = sst [smem:[#allocation11_spill]] %s4036_s7 }
   0x9   :  { %4068 = sst [smem:[#allocation12_spill]] %s4037_s8 }
   0xa   :  { %4069 = sst [smem:[#allocation13_spill]] %s4038_s9 }
   0xb   :  { %4070 = sst [smem:[#allocation14_spill]] %s4053_s24 }
   0xc   :  { %4071 = sst [smem:[#allocation15_spill]] %s4054_s25 }
   0xd LB: > { %4072 = sst [smem:[#allocation2_spill]] %s3246_s29  ;;  %s2538_s2 = sadd.s32 4294967295, %s3246_s29   ;;  %s3246_s29 = sphi %s3380_s29, %s35_s29  }
   0xe   : > { %p2542_p0 = scmp.ge.s32.totalorder %s3246_s29, 1  ;;  %p717_p1 = scmp.lt.s32.totalorder %s3246_s29, 3 }
  0x10   : > { %p718_p2 = pnand %p2542_p0, %p717_p1 }
  0x12   : > { %721 = sbr.rel (%p718_p2) target bundleno = 1447 (0x5a7), region = 120 }
  0x17   : > { %s4073_s7 = sld [smem:[#allocation10_spill]]  ;;  %v3248_v1 = vmov 0.0   ;;  %v851_v2 = vlaneseq  ;;  %p798_p3 = scmp.lt.s32.totalorder %s2538_s2, 1  ;;  %vm3249_vm0 = vmmov 0   ;;  %vm840_vm1 = vcmask 1040384  }
  0x18   : > { %2794 = vmatprep.subr.bf16.mxu0 %v3248_v1  ;;  %2814 = vmatprep.subr.bf16.mxu1 %v3248_v1  ;;  %s4075_s9 = sld [smem:[#allocation5_spill]]  ;;  %vm2336_vm2 = vcmask 1041408  }
  0x19   : > { %2810 = vmatprep.mubr.msk.bf16.mxu0 %vm3249_vm0, %v3248_v1  ;;  %s4089_s2 = smov (!%p798_p3, %s2538_s2), 1  ;;  %2830 = vmatprep.mubr.msk.bf16.mxu1 %vm3249_vm0, %v3248_v1  ;;  %v852_v4 = vshrl.u32 %v851_v2, 7  ;;  %s4076_s30 = sld [smem:[#allocation7_spill]] }
  0x1a   : > { %4074 = sst [smem:[#allocation3_spill]] %s4089_s2  ;;  %s2619_s27 = sshll.u32 %s4089_s2, 2 }
  0x1b   : > { %v3413_v6 = vsub.s32 0, %v852_v4  ;;  %s4077_s8 = sld [smem:[#allocation8_spill]]  ;;  %v3446_v15 = vsub.s32 1, %v852_v4  ;;  %v3448_v16 = vsub.s32 2, %v852_v4 }
  0x1c   : > { %s4078_s24 = sld [smem:[#allocation6_spill]] }
  0x1d   : > { %v3184_v0 = vld [vmem:[%s4073_s7 + $0x38] sm:$0xff]   ;;  %v3185_v3 = vld [vmem:[%s4073_s7 + $0x30] sm:$0xff]   ;;  %v3186_v5 = vld [vmem:[%s4073_s7 + $0x28] sm:$0xff]   ;;  %s4080_s25 = sld [smem:[#allocation9_spill]] }
  0x1e   : > { %2795 = vmatpush3.bf16.msra.mxu0 %v3184_v0  ;;  %2815 = vmatpush3.bf16.msra.mxu1 %v3184_v0  ;;  %s807_s5 = scalar_lea.vmem %s4075_s9, %s2619_s27  ;;  %v3187_v12 = vld [vmem:[%s4073_s7 + $0x20] sm:$0xff]   ;;  %v3188_v29 = vld [vmem:[%s4073_s7 + $0x18] sm:$0xff]   ;;  %v3189_v39 = vld [vmem:[%s4073_s7 + $0x10] sm:$0xff]   ;;  %s4086_s28 = sld [smem:[#allocation15_spill]] }
  0x1f   : > { %2796 = vmatprep.subr.bf16.mxu0 %v3248_v1  ;;  %2816 = vmatprep.subr.bf16.mxu1 %v3248_v1  ;;  %s817_s3 = scalar_lea.vmem %s4076_s30, %s2619_s27  ;;  %v3418_v7 = vld [vmem:[%s807_s5] sm:$0x3]  ;;  %v3464_v27 = vld [vmem:[%s807_s5 + $0x2] sm:$0x3]  ;;  %v3190_v50 = vld [vmem:[%s4073_s7 + $0x8] sm:$0xff]   ;;  %s4083_s5 = sld [smem:[#allocation11_spill]] }
  0x20   : > { %v3428_v9 = vld [vmem:[%s817_s3] sm:$0x3]  ;;  %v836_v13 = vrot.slane %v3418_v7, 7  ;;  %v3466_v28 = vld [vmem:[%s817_s3 + $0x2] sm:$0x3]  ;;  %v837_v31 = vrot.slane %v3464_v27, 7 }
  0x21   : > { %v830_v8 = vld [vmem:[%s4077_s8] sm:$0x7]  ;;  %v831_v10 = vld [vmem:[%s4077_s8 + $0x4] sm:$0x7]  ;;  %v845_v14 = vrot.slane %v3428_v9, 7  ;;  %v846_v43 = vrot.slane %v3466_v28, 7 }
  0x22   : > { %2797 = vmatpush3.bf16.msra.mxu0 %v3185_v3  ;;  %2817 = vmatpush3.bf16.msra.mxu1 %v3185_v3  ;;  %s3426_s2 = scalar_lea.vmem %s4078_s24, %s2619_s27  ;;  %v854_v11 = vrot.slane %v830_v8, %v3413_v6  ;;  %s4079_s24 = sld [smem:[#allocation4_spill]]  ;;  %v876_v20 = vrot.slane %v831_v10, %v3413_v6  ;;  %v832_v22 = vld [vmem:[%s4077_s8 + $0x8] sm:$0x7]  ;;  %v841_v23 = vsel %vm840_vm1, 0.0, %v836_v13  ;;  %v860_v25 = vrot.slane %v830_v8, %v3446_v15  ;;  %v3191_v63 = vld [vmem:[%s4073_s7] sm:$0xff]  }
  0x23   : > { %2798 = vmatprep.subr.bf16.mxu0 %v3248_v1  ;;  %2818 = vmatprep.subr.bf16.mxu1 %v3248_v1  ;;  %v3451_v17 = vld [vmem:[%s3426_s2] sm:$0x3]  ;;  %v849_v18 = vsel %vm840_vm1, 0.0, %v845_v14  ;;  %v868_v26 = vrot.slane %v830_v8, %v3448_v16  ;;  %v884_v30 = vrot.slane %v831_v10, %v3446_v15  ;;  %v892_v37 = vrot.slane %v831_v10, %v3448_v16  ;;  %v3498_v55 = vld [vmem:[%s3426_s2 + $0x2] sm:$0x3]  ;;  %s4082_s3 = sld [smem:[#allocation13_spill]] }
  0x24   : > { %v855_v19 = vmul.f32 0.0, %v854_v11  ;;  %v856_v24 = vmul.f32 %v854_v11, %v849_v18  ;;  %v861_v32 = vmul.f32 0.0, %v860_v25  ;;  %v862_v33 = vmul.f32 %v860_v25, %v3451_v17  ;;  %s4084_s30 = sld [smem:[#allocation3_spill]] }
  0x25   : > { %v869_v34 = vmul.f32 0.0, %v868_v26  ;;  %v870_v35 = vmul.f32 %v868_v26, %v3428_v9  ;;  %v877_v36 = vmul.f32 %v876_v20, %v841_v23  ;;  %v842_v42 = vsel %vm840_vm1, 0.0, %v837_v31 }
  0x26   : > { %2799 = vmatpush3.bf16.msra.mxu0 %v3186_v5  ;;  %2819 = vmatpush3.bf16.msra.mxu1 %v3186_v5  ;;  %v863_v40 = vadd.f32 %v861_v32, %v855_v19  ;;  %v864_v41 = vadd.f32 %v862_v33, %v856_v24  ;;  %v900_v45 = vrot.slane %v832_v22, %v3413_v6  ;;  %v850_v52 = vsel %vm840_vm1, 0.0, %v846_v43 }
  0x27   : > { %2800 = vmatprep.subr.bf16.mxu0 %v3248_v1  ;;  %2820 = vmatprep.subr.bf16.mxu1 %v3248_v1  ;;  %v878_v46 = vmul.f32 %v876_v20, %v842_v42  ;;  %v893_v51 = vmul.f32 %v892_v37, %v3418_v7  ;;  %v908_v54 = vrot.slane %v832_v22, %v3446_v15 }
  0x28   : > { %s3440_s29 = scalar_lea.vmem %s4079_s24, %s2619_s27  ;;  %v871_v47 = vadd.f32 %v869_v34, %v863_v40  ;;  %v872_v48 = vadd.f32 %v870_v35, %v864_v41  ;;  %v894_v57 = vmul.f32 %v892_v37, %v3464_v27  ;;  %v901_v58 = vmul.f32 %v900_v45, %v849_v18  ;;  %s4081_s27 = sld [smem:[#allocation12_spill]]  ;;  %v3203_v40 = vld [vmem:[%s4041_s12 + $0x20] sm:$0xff]  }
  0x29   : > { %v3456_v21 = vld [vmem:[%s3440_s29] sm:$0x3]  ;;  %v3479_v38 = vld [vmem:[%s3440_s29 + $0x2] sm:$0x3]  ;;  %v916_v59 = vrot.slane %v832_v22, %v3448_v16  ;;  %v902_v62 = vmul.f32 %v900_v45, %v850_v52  ;;  %v909_v2 = vmul.f32 %v908_v54, %v3451_v17  ;;  %v910_v4 = vmul.f32 %v908_v54, %v3498_v55  ;;  %v3204_v45 = vld [vmem:[%s4041_s12 + $0x18] sm:$0xff]  }
  0x2a   : > { %2801 = vmatpush3.bf16.msra.mxu0 %v3187_v12  ;;  %2821 = vmatpush3.bf16.msra.mxu1 %v3187_v12  ;;  %v885_v44 = vmul.f32 %v884_v30, %v3456_v21  ;;  %v886_v49 = vmul.f32 %v884_v30, %v3479_v38  ;;  %v879_v53 = vadd.f32 %v877_v36, %v871_v47  ;;  %v2551_v12 = vld [vmem:[%s4080_s25] ss:$0 sm:$0xff]  ;;  %s820_s9 = scalar_lea.vmem %s4086_s28, %s4084_s30 }
  0x2b   : > { %2802 = vmatprep.subr.bf16.mxu0 %v3248_v1  ;;  %2822 = vmatprep.subr.bf16.mxu1 %v3248_v1  ;;  %v880_v56 = vadd.f32 %v878_v46, %v872_v48  ;;  %v917_v5 = vmul.f32 %v916_v59, %v3428_v9  ;;  %v918_v11 = vmul.f32 %v916_v59, %v3466_v28  ;;  %v3207_v52 = vld [vmem:[%s4041_s12] sm:$0xff]  }
  0x2c   : > { %v887_v60 = vadd.f32 %v885_v44, %v879_v53  ;;  %v1102_v35 = vpack.c.bf16 %v3456_v21, %v3456_v21  ;;  %v1103_v36 = vpack.c.bf16 %v3479_v38, %v3479_v38  ;;  %v1243_v21 = vpack.c.bf16 %v3418_v7, %v3418_v7 }
  0x2d   : > { %v888_v61 = vadd.f32 %v886_v49, %v880_v56  ;;  %v1244_v37 = vpack.c.bf16 %v3464_v27, %v3464_v27  ;;  %v1329_v7 = vpack.c.bf16 %v3451_v17, %v3451_v17  ;;  %v1330_v27 = vpack.c.bf16 %v3498_v55, %v3498_v55 }
  0x2e   : > { %2803 = vmatpush3.bf16.msra.mxu0 %v3188_v29  ;;  %2823 = vmatpush3.bf16.msra.mxu1 %v3188_v29  ;;  %v895_v0 = vadd.f32 %v893_v51, %v887_v60  ;;  %v3521_v20 = vld [vmem:[%s4081_s27 + $0x38] sm:$0xff]   ;;  %v3526_v26 = vld [vmem:[%s4081_s27 + $0x30] sm:$0xff]   ;;  %v3535_v29 = vld [vmem:[%s4081_s27 + $0x28] sm:$0xff]   ;;  %v1415_v17 = vpack.c.bf16 %v3428_v9, %v3428_v9  ;;  %v1416_v38 = vpack.c.bf16 %v3466_v28, %v3466_v28 }
  0x2f   : > { %2804 = vmatprep.subr.bf16.mxu0 %v3248_v1  ;;  %2824 = vmatprep.subr.bf16.mxu1 %v3248_v1  ;;  %v896_v3 = vadd.f32 %v894_v57, %v888_v61  ;;  %v3548_v30 = vld [vmem:[%s4081_s27 + $0x20] sm:$0xff]   ;;  %v3558_v31 = vld [vmem:[%s4081_s27 + $0x18] sm:$0xff]   ;;  %v3567_v32 = vld [vmem:[%s4081_s27 + $0x10] sm:$0xff]  }
  0x30   : > { %v903_v8 = vadd.f32 %v901_v58, %v895_v0  ;;  %v3576_v33 = vld [vmem:[%s4081_s27 + $0x8] sm:$0xff]   ;;  %v3585_v34 = vld [vmem:[%s4081_s27] sm:$0xff]   ;;  %v3200_v9 = vld [vmem:[%s4041_s12 + $0x38] sm:$0xff]  }
  0x31   : > { %v904_v10 = vadd.f32 %v902_v62, %v896_v3  ;;  %v3201_v28 = vld [vmem:[%s4041_s12 + $0x30] sm:$0xff]   ;;  %v3206_v51 = vld [vmem:[%s4041_s12 + $0x8] sm:$0xff]  }
  0x32   : > { %2805 = vmatpush3.bf16.msra.mxu0 %v3189_v39  ;;  %2825 = vmatpush3.bf16.msra.mxu1 %v3189_v39  ;;  %v911_v13 = vadd.f32 %v909_v2, %v903_v8  ;;  %v3202_v39 = vld [vmem:[%s4041_s12 + $0x28] sm:$0xff]  }
  0x33   : > { %2806 = vmatprep.subr.bf16.mxu0 %v3248_v1  ;;  %2826 = vmatprep.subr.bf16.mxu1 %v3248_v1  ;;  %v912_v14 = vadd.f32 %v910_v4, %v904_v10 }
  0x34   : > { %v919_v18 = vadd.f32 %v917_v5, %v911_v13 }
  0x35   : > { %v920_v19 = vadd.f32 %v918_v11, %v912_v14 }
  0x36   : > { %2807 = vmatpush3.bf16.msra.mxu0 %v3190_v50  ;;  %2827 = vmatpush3.bf16.msra.mxu1 %v3190_v50  ;;  %v927_v22 = vadd.f32 %v2551_v12, %v919_v18  ;;  %v3205_v50 = vld [vmem:[%s4041_s12 + $0x10] sm:$0xff]  }
  0x37   : > { %2808 = vmatprep.subr.bf16.mxu0 %v3248_v1  ;;  %2828 = vmatprep.subr.bf16.mxu1 %v3248_v1  ;;  %v928_v23 = vadd.f32 %v2551_v12, %v920_v19 }
  0x38   : > { %v945_v24 = vpack.c.bf16 %v927_v22, %v927_v22 }
  0x39   : > { %v946_v25 = vpack.c.bf16 %v928_v23, %v928_v23  ;;  %v1501_v23 = vld [vmem:[%s4039_s10] sm:$0x7] }
  0x3a   : > { %2809 = vmatpush3.bf16.msra.mxu0 %v3191_v63  ;;  %2829 = vmatpush3.bf16.msra.mxu1 %v3191_v63 }
  0x3b   : > { %2834 = vmatprep.subr.bf16.mxu0 %v3248_v1  ;;  %2854 = vmatprep.subr.bf16.mxu1 %v3248_v1 }
  0x3d   : > { %2811 = vmatmul.mubr.bf16.vlgmr.msra.gmra.mxu0 %v945_v24  ;;  %2831 = vmatmul.mubr.bf16.vlgmr.msra.gmra.mxu1 %v946_v25  ;;  %v1524_v24 = vrot.slane %v1501_v23, %v3413_v6  ;;  %v1530_v25 = vrot.slane %v1501_v23, %v3446_v15 }
  0x3e   : > { %2835 = vmatpush3.bf16.msra.mxu0 %v3521_v20  ;;  %2855 = vmatpush3.bf16.msra.mxu1 %v3521_v20 }
  0x3f   : > { %2836 = vmatprep.subr.bf16.mxu0 %v3248_v1  ;;  %2856 = vmatprep.subr.bf16.mxu1 %v3248_v1 }
  0x40   : > { %2850 = vmatprep.mubr.msk.bf16.mxu0 %vm3249_vm0, %v3248_v1  ;;  %2870 = vmatprep.mubr.msk.bf16.mxu1 %vm3249_vm0, %v3248_v1 }
  0x42   : > { %2837 = vmatpush3.bf16.msra.mxu0 %v3526_v26  ;;  %2857 = vmatpush3.bf16.msra.mxu1 %v3526_v26 }
  0x43   : > { %2838 = vmatprep.subr.bf16.mxu0 %v3248_v1  ;;  %2858 = vmatprep.subr.bf16.mxu1 %v3248_v1 }
  0x46   : > { %2839 = vmatpush3.bf16.msra.mxu0 %v3535_v29  ;;  %2859 = vmatpush3.bf16.msra.mxu1 %v3535_v29 }
  0x47   : > { %2840 = vmatprep.subr.bf16.mxu0 %v3248_v1  ;;  %2860 = vmatprep.subr.bf16.mxu1 %v3248_v1 }
  0x4a   : > { %2841 = vmatpush3.bf16.msra.mxu0 %v3548_v30  ;;  %2861 = vmatpush3.bf16.msra.mxu1 %v3548_v30 }
  0x4b   : > { %2842 = vmatprep.subr.bf16.mxu0 %v3248_v1  ;;  %2862 = vmatprep.subr.bf16.mxu1 %v3248_v1 }
  0x4e   : > { %2843 = vmatpush3.bf16.msra.mxu0 %v3558_v31  ;;  %2863 = vmatpush3.bf16.msra.mxu1 %v3558_v31 }
  0x4f   : > { %2844 = vmatprep.subr.bf16.mxu0 %v3248_v1  ;;  %2864 = vmatprep.subr.bf16.mxu1 %v3248_v1 }
  0x52   : > { %2845 = vmatpush3.bf16.msra.mxu0 %v3567_v32  ;;  %2865 = vmatpush3.bf16.msra.mxu1 %v3567_v32 }
  0x53   : > { %2846 = vmatprep.subr.bf16.mxu0 %v3248_v1  ;;  %2866 = vmatprep.subr.bf16.mxu1 %v3248_v1 }
  0x56   : > { %2847 = vmatpush3.bf16.msra.mxu0 %v3576_v33  ;;  %2867 = vmatpush3.bf16.msra.mxu1 %v3576_v33 }
  0x57   : > { %2848 = vmatprep.subr.bf16.mxu0 %v3248_v1  ;;  %2868 = vmatprep.subr.bf16.mxu1 %v3248_v1 }
  0x5a   : > { %2849 = vmatpush3.bf16.msra.mxu0 %v3585_v34  ;;  %2869 = vmatpush3.bf16.msra.mxu1 %v3585_v34 }
  0x5b   : > { %2874 = vmatprep.subr.bf16.mxu0 %v3248_v1  ;;  %2894 = vmatprep.subr.bf16.mxu1 %v3248_v1 }
  0x5d   : > { %2851 = vmatmul.mubr.bf16.vlgmr.msra.gmra.mxu0 %v1102_v35  ;;  %2871 = vmatmul.mubr.bf16.vlgmr.msra.gmra.mxu1 %v1103_v36 }
  0x5e   : > { %2875 = vmatpush3.bf16.msra.mxu0 %v3521_v20  ;;  %2895 = vmatpush3.bf16.msra.mxu1 %v3521_v20 }
  0x5f   : > { %2876 = vmatprep.subr.bf16.mxu0 %v3248_v1  ;;  %2896 = vmatprep.subr.bf16.mxu1 %v3248_v1 }
  0x60   : > { %2890 = vmatprep.mubr.msk.bf16.mxu0 %vm3249_vm0, %v3248_v1  ;;  %2910 = vmatprep.mubr.msk.bf16.mxu1 %vm3249_vm0, %v3248_v1 }
  0x62   : > { %2877 = vmatpush3.bf16.msra.mxu0 %v3526_v26  ;;  %2897 = vmatpush3.bf16.msra.mxu1 %v3526_v26 }
  0x63   : > { %2878 = vmatprep.subr.bf16.mxu0 %v3248_v1  ;;  %2898 = vmatprep.subr.bf16.mxu1 %v3248_v1 }
  0x66   : > { %2879 = vmatpush3.bf16.msra.mxu0 %v3535_v29  ;;  %2899 = vmatpush3.bf16.msra.mxu1 %v3535_v29 }
  0x67   : > { %2880 = vmatprep.subr.bf16.mxu0 %v3248_v1  ;;  %2900 = vmatprep.subr.bf16.mxu1 %v3248_v1 }
  0x6a   : > { %2881 = vmatpush3.bf16.msra.mxu0 %v3548_v30  ;;  %2901 = vmatpush3.bf16.msra.mxu1 %v3548_v30 }
  0x6b   : > { %2882 = vmatprep.subr.bf16.mxu0 %v3248_v1  ;;  %2902 = vmatprep.subr.bf16.mxu1 %v3248_v1 }
  0x6e   : > { %2883 = vmatpush3.bf16.msra.mxu0 %v3558_v31  ;;  %2903 = vmatpush3.bf16.msra.mxu1 %v3558_v31 }
  0x6f   : > { %2884 = vmatprep.subr.bf16.mxu0 %v3248_v1  ;;  %2904 = vmatprep.subr.bf16.mxu1 %v3248_v1 }
  0x72   : > { %2885 = vmatpush3.bf16.msra.mxu0 %v3567_v32  ;;  %2905 = vmatpush3.bf16.msra.mxu1 %v3567_v32 }
  0x73   : > { %2886 = vmatprep.subr.bf16.mxu0 %v3248_v1  ;;  %2906 = vmatprep.subr.bf16.mxu1 %v3248_v1 }
  0x76   : > { %2887 = vmatpush3.bf16.msra.mxu0 %v3576_v33  ;;  %2907 = vmatpush3.bf16.msra.mxu1 %v3576_v33 }
  0x77   : > { %2888 = vmatprep.subr.bf16.mxu0 %v3248_v1  ;;  %2908 = vmatprep.subr.bf16.mxu1 %v3248_v1 }
  0x7a   : > { %2889 = vmatpush3.bf16.msra.mxu0 %v3585_v34  ;;  %2909 = vmatpush3.bf16.msra.mxu1 %v3585_v34 }
  0x7b   : > { %2914 = vmatprep.subr.bf16.mxu0 %v3248_v1  ;;  %2934 = vmatprep.subr.bf16.mxu1 %v3248_v1 }
  0x7d   : > { %2891 = vmatmul.mubr.bf16.vlgmr.msra.gmra.mxu0 %v1243_v21  ;;  %2911 = vmatmul.mubr.bf16.vlgmr.msra.gmra.mxu1 %v1244_v37 }
  0x7e   : > { %2915 = vmatpush3.bf16.msra.mxu0 %v3521_v20  ;;  %2935 = vmatpush3.bf16.msra.mxu1 %v3521_v20 }
  0x7f   : > { %2916 = vmatprep.subr.bf16.mxu0 %v3248_v1  ;;  %2936 = vmatprep.subr.bf16.mxu1 %v3248_v1 }
  0x80   : > { %2930 = vmatprep.mubr.msk.bf16.mxu0 %vm3249_vm0, %v3248_v1  ;;  %2950 = vmatprep.mubr.msk.bf16.mxu1 %vm3249_vm0, %v3248_v1 }
  0x82   : > { %2917 = vmatpush3.bf16.msra.mxu0 %v3526_v26  ;;  %2937 = vmatpush3.bf16.msra.mxu1 %v3526_v26 }
  0x83   : > { %2918 = vmatprep.subr.bf16.mxu0 %v3248_v1  ;;  %2938 = vmatprep.subr.bf16.mxu1 %v3248_v1 }
  0x86   : > { %2919 = vmatpush3.bf16.msra.mxu0 %v3535_v29  ;;  %2939 = vmatpush3.bf16.msra.mxu1 %v3535_v29 }
  0x87   : > { %2920 = vmatprep.subr.bf16.mxu0 %v3248_v1  ;;  %2940 = vmatprep.subr.bf16.mxu1 %v3248_v1 }
  0x8a   : > { %2921 = vmatpush3.bf16.msra.mxu0 %v3548_v30  ;;  %2941 = vmatpush3.bf16.msra.mxu1 %v3548_v30 }
  0x8b   : > { %2922 = vmatprep.subr.bf16.mxu0 %v3248_v1  ;;  %2942 = vmatprep.subr.bf16.mxu1 %v3248_v1 }
  0x8e   : > { %2923 = vmatpush3.bf16.msra.mxu0 %v3558_v31  ;;  %2943 = vmatpush3.bf16.msra.mxu1 %v3558_v31 }
  0x8f   : > { %2924 = vmatprep.subr.bf16.mxu0 %v3248_v1  ;;  %2944 = vmatprep.subr.bf16.mxu1 %v3248_v1 }
  0x92   : > { %2925 = vmatpush3.bf16.msra.mxu0 %v3567_v32  ;;  %2945 = vmatpush3.bf16.msra.mxu1 %v3567_v32 }
  0x93   : > { %2926 = vmatprep.subr.bf16.mxu0 %v3248_v1  ;;  %2946 = vmatprep.subr.bf16.mxu1 %v3248_v1 }
  0x96   : > { %2927 = vmatpush3.bf16.msra.mxu0 %v3576_v33  ;;  %2947 = vmatpush3.bf16.msra.mxu1 %v3576_v33 }
  0x97   : > { %2928 = vmatprep.subr.bf16.mxu0 %v3248_v1  ;;  %2948 = vmatprep.subr.bf16.mxu1 %v3248_v1 }
  0x9a   : > { %2929 = vmatpush3.bf16.msra.mxu0 %v3585_v34  ;;  %2949 = vmatpush3.bf16.msra.mxu1 %v3585_v34 }
  0x9b   : > { %2954 = vmatprep.subr.bf16.mxu0 %v3248_v1  ;;  %2974 = vmatprep.subr.bf16.mxu1 %v3248_v1 }
  0x9d   : > { %2931 = vmatmul.mubr.bf16.vlgmr.msra.gmra.mxu0 %v1329_v7  ;;  %2951 = vmatmul.mubr.bf16.vlgmr.msra.gmra.mxu1 %v1330_v27 }
  0x9e   : > { %2955 = vmatpush3.bf16.msra.mxu0 %v3521_v20  ;;  %2975 = vmatpush3.bf16.msra.mxu1 %v3521_v20  ;;  %v2569_v20 = vld [vmem:[%s4082_s3] ss:$0 sm:$0xff] }
  0x9f   : > { %2956 = vmatprep.subr.bf16.mxu0 %v3248_v1  ;;  %2976 = vmatprep.subr.bf16.mxu1 %v3248_v1 }
  0xa0   : > { %2970 = vmatprep.mubr.msk.bf16.mxu0 %vm3249_vm0, %v3248_v1  ;;  %2990 = vmatprep.mubr.msk.bf16.mxu1 %vm3249_vm0, %v3248_v1 }
  0xa2   : > { %2957 = vmatpush3.bf16.msra.mxu0 %v3526_v26  ;;  %2977 = vmatpush3.bf16.msra.mxu1 %v3526_v26 }
  0xa3   : > { %2958 = vmatprep.subr.bf16.mxu0 %v3248_v1  ;;  %2978 = vmatprep.subr.bf16.mxu1 %v3248_v1 }
  0xa6   : > { %2959 = vmatpush3.bf16.msra.mxu0 %v3535_v29  ;;  %2979 = vmatpush3.bf16.msra.mxu1 %v3535_v29  ;;  %v1525_v29 = vmul.f32 0.0, %v1524_v24 }
  0xa7   : > { %2960 = vmatprep.subr.bf16.mxu0 %v3248_v1  ;;  %2980 = vmatprep.subr.bf16.mxu1 %v3248_v1 }
  0xaa   : > { %2961 = vmatpush3.bf16.msra.mxu0 %v3548_v30  ;;  %2981 = vmatpush3.bf16.msra.mxu1 %v3548_v30  ;;  %v1531_v30 = vmul.f32 0.0, %v1530_v25 }
  0xab   : > { %2962 = vmatprep.subr.bf16.mxu0 %v3248_v1  ;;  %2982 = vmatprep.subr.bf16.mxu1 %v3248_v1 }
  0xae   : > { %2963 = vmatpush3.bf16.msra.mxu0 %v3558_v31  ;;  %2983 = vmatpush3.bf16.msra.mxu1 %v3558_v31  ;;  %v1538_v31 = vrot.slane %v1501_v23, %v3448_v16 }
  0xaf   : > { %2964 = vmatprep.subr.bf16.mxu0 %v3248_v1  ;;  %2984 = vmatprep.subr.bf16.mxu1 %v3248_v1 }
  0xb0   : > { %v1539_v35 = vmul.f32 0.0, %v1538_v31 }
  0xb2   : > { %2965 = vmatpush3.bf16.msra.mxu0 %v3567_v32  ;;  %2985 = vmatpush3.bf16.msra.mxu1 %v3567_v32 }
  0xb3   : > { %2966 = vmatprep.subr.bf16.mxu0 %v3248_v1  ;;  %2986 = vmatprep.subr.bf16.mxu1 %v3248_v1 }
  0xb6   : > { %2967 = vmatpush3.bf16.msra.mxu0 %v3576_v33  ;;  %2987 = vmatpush3.bf16.msra.mxu1 %v3576_v33  ;;  %v1502_v33 = vld [vmem:[%s4039_s10 + $0x4] sm:$0x7] }
  0xb7   : > { %2968 = vmatprep.subr.bf16.mxu0 %v3248_v1  ;;  %2988 = vmatprep.subr.bf16.mxu1 %v3248_v1  ;;  %v1546_v36 = vrot.slane %v1502_v33, %v3413_v6 }
  0xba   : > { %2969 = vmatpush3.bf16.msra.mxu0 %v3585_v34  ;;  %2989 = vmatpush3.bf16.msra.mxu1 %v3585_v34  ;;  %v1533_v34 = vadd.f32 %v1531_v30, %v1525_v29 }
  0xbb   : > { %2994 = vmatprep.subr.bf16.mxu0 %v3248_v1  ;;  %3014 = vmatprep.subr.bf16.mxu1 %v3248_v1 }
  0xbc   : > { %v1541_v27 = vadd.f32 %v1539_v35, %v1533_v34  ;;  %v2570_v35 = vld [vmem:[%s4040_s11] ss:$0 sm:$0xff] }
  0xbd   : > { %2971 = vmatmul.mubr.bf16.vlgmr.msra.gmra.mxu0 %v1415_v17  ;;  %2991 = vmatmul.mubr.bf16.vlgmr.msra.gmra.mxu1 %v1416_v38 }
  0xbe   : > { %3010 = vmatprep.mubr.msk.bf16.mxu0 %vm3249_vm0, %v3248_v1  ;;  %3030 = vmatprep.mubr.msk.bf16.mxu1 %vm3249_vm0, %v3248_v1 }
  0xbf   : > { %2995 = vmatpush3.bf16.msra.mxu0 %v3200_v9  ;;  %3015 = vmatpush3.bf16.msra.mxu1 %v3200_v9  ;;  %v1554_v9 = vrot.slane %v1502_v33, %v3446_v15 }
  0xc0   : > { %2996 = vmatprep.subr.bf16.mxu0 %v3248_v1  ;;  %3016 = vmatprep.subr.bf16.mxu1 %v3248_v1 }
  0xc3   : > { %2997 = vmatpush3.bf16.msra.mxu0 %v3201_v28  ;;  %3017 = vmatpush3.bf16.msra.mxu1 %v3201_v28 }
  0xc4   : > { %2998 = vmatprep.subr.bf16.mxu0 %v3248_v1  ;;  %3018 = vmatprep.subr.bf16.mxu1 %v3248_v1 }
  0xc7   : > { %2999 = vmatpush3.bf16.msra.mxu0 %v3202_v39  ;;  %3019 = vmatpush3.bf16.msra.mxu1 %v3202_v39 }
  0xc8   : > { %3000 = vmatprep.subr.bf16.mxu0 %v3248_v1  ;;  %3020 = vmatprep.subr.bf16.mxu1 %v3248_v1 }
  0xcb   : > { %3001 = vmatpush3.bf16.msra.mxu0 %v3203_v40  ;;  %3021 = vmatpush3.bf16.msra.mxu1 %v3203_v40 }
  0xcc   : > { %3002 = vmatprep.subr.bf16.mxu0 %v3248_v1  ;;  %3022 = vmatprep.subr.bf16.mxu1 %v3248_v1 }
  0xcf   : > { %3003 = vmatpush3.bf16.msra.mxu0 %v3204_v45  ;;  %3023 = vmatpush3.bf16.msra.mxu1 %v3204_v45 }
  0xd0   : > { %3004 = vmatprep.subr.bf16.mxu0 %v3248_v1  ;;  %3024 = vmatprep.subr.bf16.mxu1 %v3248_v1 }
  0xd3   : > { %3005 = vmatpush3.bf16.msra.mxu0 %v3205_v50  ;;  %3025 = vmatpush3.bf16.msra.mxu1 %v3205_v50 }
  0xd4   : > { %3006 = vmatprep.subr.bf16.mxu0 %v3248_v1  ;;  %3026 = vmatprep.subr.bf16.mxu1 %v3248_v1 }
  0xd7   : > { %3007 = vmatpush3.bf16.msra.mxu0 %v3206_v51  ;;  %3027 = vmatpush3.bf16.msra.mxu1 %v3206_v51 }
  0xd8   : > { %3008 = vmatprep.subr.bf16.mxu0 %v3248_v1  ;;  %3028 = vmatprep.subr.bf16.mxu1 %v3248_v1 }
  0xdb   : > { %3009 = vmatpush3.bf16.msra.mxu0 %v3207_v52  ;;  %3029 = vmatpush3.bf16.msra.mxu1 %v3207_v52  ;;  %v1503_v52 = vld [vmem:[%s4039_s10 + $0x8] sm:$0x7] }
  0xdc   : > { %3034 = vmatprep.subr.bf16.mxu0 %v3248_v1  ;;  %3054 = vmatprep.subr.bf16.mxu1 %v3248_v1 }
  0xfd   : > { %v3740_v41 = vpop.f32.mrf.mxu0  ;;  %v3742_v42 = vpop.f32.mrf.mxu1 }
  0xff   : > { %v2812_v43 = vpop.f32.mrf.mxu0  ;;  %v2832_v44 = vpop.f32.mrf.mxu1 }
 0x101   : > { %v1032_v46 = vpop.f32.mrf.mxu0  ;;  %v1072_v47 = vpop.f32.mrf.mxu1 }
 0x103   : > { %v2813_v48 = vpop.f32.mrf.mxu0  ;;  %v2833_v49 = vpop.f32.mrf.mxu1 }
 0x104   : > { %v1562_v48 = vrot.slane %v1502_v33, %v3448_v16 }
 0x11d   : > { %v1186_v53 = vpop.f32.mrf.mxu0  ;;  %v3766_v54 = vpop.f32.mrf.mxu1 }
 0x11e   : > { %v1239_v37 = vadd.f32 %v2569_v20, %v1186_v53 }
 0x11f   : > { %v2852_v55 = vpop.f32.mrf.mxu0  ;;  %v2872_v56 = vpop.f32.mrf.mxu1 }
 0x120   : > { %v1241_v38 = vmax.f32 %v1239_v37, 0.0 }
 0x121   : > { %v1189_v57 = vpop.f32.mrf.mxu0  ;;  %v1229_v58 = vpop.f32.mrf.mxu1 }
 0x122   : > { %v1555_v47 = vmul.f32 %v1554_v9, %v1241_v38  ;;  %v1570_v58 = vrot.slane %v1503_v52, %v3413_v6 }
 0x123   : > { %v2853_v59 = vpop.f32.mrf.mxu0  ;;  %v2873_v60 = vpop.f32.mrf.mxu1 }
 0x124   : > { %v1240_v60 = vadd.f32 %v2569_v20, %v3766_v54 }
 0x13d   : > { %v1279_v61 = vpop.f32.mrf.mxu0  ;;  %v1319_v62 = vpop.f32.mrf.mxu1 }
 0x13e   : > { %v1325_v22 = vadd.f32 %v2569_v20, %v1279_v61  ;;  %v1326_v7 = vadd.f32 %v2569_v20, %v1319_v62 }
 0x13f   : > { %v2892_v63 = vpop.f32.mrf.mxu0  ;;  %v2912_v0 = vpop.f32.mrf.mxu1 }
 0x140   : > { %v1327_v26 = vmax.f32 %v1325_v22, 0.0  ;;  %v1328_v28 = vmax.f32 %v1326_v7, 0.0  ;;  %v1578_v0 = vrot.slane %v1503_v52, %v3446_v15 }
 0x141   : > { %v1282_v2 = vpop.f32.mrf.mxu0  ;;  %v1322_v3 = vpop.f32.mrf.mxu1 }
 0x142   : > { %v1507_v32 = vrot.slane %v1327_v26, 7  ;;  %v1508_v51 = vrot.slane %v1328_v28, 7  ;;  %v1563_v63 = vmul.f32 %v1562_v48, %v1327_v26  ;;  %v1564_v7 = vmul.f32 %v1562_v48, %v1328_v28  ;;  %v3211_v48 = vld [vmem:[%s4043_s14 + $0x20] sm:$0xff]  }
 0x143   : > { %v2893_v4 = vpop.f32.mrf.mxu0  ;;  %v2913_v5 = vpop.f32.mrf.mxu1 }
 0x144   : > { %v1511_v21 = vsel %vm840_vm1, 0.0, %v1507_v32  ;;  %v1512_v4 = vsel %vm840_vm1, 0.0, %v1508_v51  ;;  %v3214_v51 = vld [vmem:[%s4043_s14 + $0x8] sm:$0xff]  }
 0x145   : > { %v1547_v17 = vmul.f32 %v1546_v36, %v1511_v21  ;;  %v1548_v29 = vmul.f32 %v1546_v36, %v1512_v4 }
 0x147   : > { %v1549_v39 = vadd.f32 %v1547_v17, %v1541_v27 }
 0x149   : > { %v1557_v55 = vadd.f32 %v1555_v47, %v1549_v39 }
 0x15d   : > { %v1365_v8 = vpop.f32.mrf.mxu0  ;;  %v3768_v10 = vpop.f32.mrf.mxu1 }
 0x15e   : > { %v1411_v40 = vadd.f32 %v2569_v20, %v1365_v8  ;;  %v1586_v8 = vrot.slane %v1503_v52, %v3448_v16  ;;  %v1412_v30 = vadd.f32 %v2569_v20, %v3768_v10  ;;  %v3208_v10 = vld [vmem:[%s4043_s14 + $0x38] sm:$0xff]   ;;  %v3215_v52 = vld [vmem:[%s4043_s14] sm:$0xff]  }
 0x15f   : > { %v2932_v11 = vpop.f32.mrf.mxu0  ;;  %v2952_v12 = vpop.f32.mrf.mxu1 }
 0x160   : > { %v1413_v56 = vmax.f32 %v1411_v40, 0.0  ;;  %v1565_v11 = vadd.f32 %v1563_v63, %v1557_v55  ;;  %v1414_v27 = vmax.f32 %v1412_v30, 0.0  ;;  %v2579_v55 = vld [vmem:[%s4042_s13] ss:$0 sm:$0xff] }
 0x161   : > { %v1368_v13 = vpop.f32.mrf.mxu0  ;;  %v1408_v14 = vpop.f32.mrf.mxu1  ;;  %v3223_v30 = vld [vmem:[%s4047_s18] sm:$0xff]  }
 0x162   : > { %v1532_v12 = vmul.f32 %v1530_v25, %v1413_v56  ;;  %v1579_v54 = vmul.f32 %v1578_v0, %v1413_v56  ;;  %v1580_v39 = vmul.f32 %v1578_v0, %v1414_v27 }
 0x163   : > { %v2933_v18 = vpop.f32.mrf.mxu0  ;;  %v2953_v19 = vpop.f32.mrf.mxu1 }
 0x164   : > { %v1242_v18 = vmax.f32 %v1240_v60, 0.0 }
 0x17d   : > { %v1451_v43 = vpop.f32.mrf.mxu0  ;;  %v1491_v44 = vpop.f32.mrf.mxu1 }
 0x17e   : > { %v1497_v45 = vadd.f32 %v2569_v20, %v1451_v43  ;;  %v1498_v46 = vadd.f32 %v2569_v20, %v1491_v44 }
 0x17f   : > { %v2972_v49 = vpop.f32.mrf.mxu0  ;;  %v2992_v50 = vpop.f32.mrf.mxu1 }
 0x180   : > { %v1499_v53 = vmax.f32 %v1497_v45, 0.0  ;;  %v1500_v62 = vmax.f32 %v1498_v46, 0.0  ;;  %v3210_v45 = vld [vmem:[%s4043_s14 + $0x28] sm:$0xff]   ;;  %v3212_v49 = vld [vmem:[%s4043_s14 + $0x18] sm:$0xff]   ;;  %v3213_v50 = vld [vmem:[%s4043_s14 + $0x10] sm:$0xff]  }
 0x181   : > { %v1454_v57 = vpop.f32.mrf.mxu0  ;;  %v1494_v59 = vpop.f32.mrf.mxu1 }
 0x182   : > { %v1515_v61 = vrot.slane %v1499_v53, 7  ;;  %v1516_v19 = vrot.slane %v1500_v62, 7  ;;  %v1540_v23 = vmul.f32 %v1538_v31, %v1499_v53  ;;  %v1587_v34 = vmul.f32 %v1586_v8, %v1499_v53  ;;  %v2560_v53 = vld [vmem:[%s4083_s5] ss:$0 sm:$0xff]  ;;  %s4085_s5 = sld [smem:[#allocation14_spill]] }
 0x183   : > { %v2973_v2 = vpop.f32.mrf.mxu0  ;;  %v2993_v3 = vpop.f32.mrf.mxu1  ;;  %v1588_v43 = vmul.f32 %v1586_v8, %v1500_v62  ;;  %v1082_v56 = vadd.f32 %v2560_v53, %v3740_v41  ;;  %v1083_v4 = vadd.f32 %v2560_v53, %v3742_v42  ;;  %v3217_v42 = vld [vmem:[%s4047_s18 + $0x30] sm:$0xff]  }
 0x184   : > { %v1519_v5 = vsel %vm840_vm1, 0.0, %v1515_v61  ;;  %v1520_v25 = vsel %vm840_vm1, 0.0, %v1516_v19  ;;  %v3216_v2 = vld [vmem:[%s4047_s18 + $0x38] sm:$0xff]  }
 0x185   : > { %v1526_v13 = vmul.f32 %v1524_v24, %v1519_v5  ;;  %v1571_v14 = vmul.f32 %v1570_v58, %v1519_v5  ;;  %v1556_v24 = vmul.f32 %v1554_v9, %v1242_v18  ;;  %v1572_v31 = vmul.f32 %v1570_v58, %v1520_v25  ;;  %v3209_v9 = vld [vmem:[%s4043_s14 + $0x30] sm:$0xff]  }
 0x186   : > { %v1084_v60 = vmax.f32 %v1082_v56, 0.0 }
 0x187   : > { %v1534_v22 = vadd.f32 %v1532_v12, %v1526_v13  ;;  %v1573_v26 = vadd.f32 %v1571_v14, %v1565_v11  ;;  %v1085_v11 = vmax.f32 %v1083_v4, 0.0 }
 0x189   : > { %v1542_v32 = vadd.f32 %v1540_v23, %v1534_v22  ;;  %v1581_v33 = vadd.f32 %v1579_v54, %v1573_v26  ;;  %v3218_v54 = vld [vmem:[%s4047_s18 + $0x28] sm:$0xff]   ;;  %v3219_v22 = vld [vmem:[%s4047_s18 + $0x20] sm:$0xff]   ;;  %v3220_v23 = vld [vmem:[%s4047_s18 + $0x18] sm:$0xff]  }
 0x18a   : > { %v3221_v26 = vld [vmem:[%s4047_s18 + $0x10] sm:$0xff]  }
 0x18b   : > { %v1550_v21 = vadd.f32 %v1548_v29, %v1542_v32  ;;  %v1589_v37 = vadd.f32 %v1587_v34, %v1581_v33  ;;  %v3222_v29 = vld [vmem:[%s4047_s18 + $0x8] sm:$0xff]   ;;  %v1915_v32 = vld [vmem:[%s4045_s16] sm:$0x7] }
 0x18c   : > { %v1936_v33 = vrot.slane %v1915_v32, %v3413_v6  ;;  %v1942_v34 = vrot.slane %v1915_v32, %v3446_v15 }
 0x18d   : > { %v1558_v17 = vadd.f32 %v1556_v24, %v1550_v21  ;;  %v1597_v38 = vadd.f32 %v2570_v35, %v1589_v37  ;;  %v1950_v21 = vrot.slane %v1915_v32, %v3448_v16  ;;  %v2589_v32 = vld [vmem:[%s4046_s17] ss:$0 sm:$0xff] }
 0x18e   : > { %v1937_v25 = vmul.f32 0.0, %v1936_v33  ;;  %v1943_v24 = vmul.f32 0.0, %v1942_v34 }
 0x18f   : > { %v1566_v20 = vadd.f32 %v1564_v7, %v1558_v17  ;;  %v1615_v36 = vpack.c.bf16 %v1597_v38, %v1597_v38  ;;  %v1951_v17 = vmul.f32 0.0, %v1950_v21 }
 0x190   : > { %v1945_v27 = vadd.f32 %v1943_v24, %v1937_v25 }
 0x191   : > { %v1574_v40 = vadd.f32 %v1572_v31, %v1566_v20  ;;  %3011 = vmatmul.mubr.bf16.vlgmr.msra.gmra.mxu0 %v1615_v36 }
 0x192   : > { %3035 = vmatpush3.bf16.msra.mxu0 %v3208_v10  ;;  %3050 = vmatprep.mubr.msk.bf16.mxu0 %vm3249_vm0, %v3248_v1 }
 0x193   : > { %v1582_v28 = vadd.f32 %v1580_v39, %v1574_v40  ;;  %3036 = vmatprep.subr.bf16.mxu0 %v3248_v1  ;;  %v1953_v40 = vadd.f32 %v1951_v17, %v1945_v27  ;;  %v3225_v17 = vld [vmem:[%s4050_s21 + $0x30] sm:$0xff]  }
 0x195   : > { %v1590_v44 = vadd.f32 %v1588_v43, %v1582_v28 }
 0x196   : > { %3037 = vmatpush3.bf16.msra.mxu0 %v3209_v9 }
 0x197   : > { %v1598_v46 = vadd.f32 %v2570_v35, %v1590_v44  ;;  %3038 = vmatprep.subr.bf16.mxu0 %v3248_v1  ;;  %v2588_v35 = vld [vmem:[%s4044_s15] ss:$0 sm:$0xff] }
 0x199   : > { %v1616_v47 = vpack.c.bf16 %v1598_v46, %v1598_v46 }
 0x19a   : > { %3039 = vmatpush3.bf16.msra.mxu0 %v3210_v45 }
 0x19b   : > { %3031 = vmatmul.mubr.bf16.vlgmr.msra.gmra.mxu1 %v1616_v47  ;;  %3040 = vmatprep.subr.bf16.mxu0 %v3248_v1 }
 0x19c   : > { %3055 = vmatpush3.bf16.msra.mxu1 %v3208_v10  ;;  %3070 = vmatprep.mubr.msk.bf16.mxu1 %vm3249_vm0, %v3248_v1  ;;  %v1916_v10 = vld [vmem:[%s4045_s16 + $0x4] sm:$0x7] }
 0x19d   : > { %3056 = vmatprep.subr.bf16.mxu1 %v3248_v1  ;;  %v1958_v20 = vrot.slane %v1916_v10, %v3413_v6  ;;  %v1966_v44 = vrot.slane %v1916_v10, %v3446_v15 }
 0x19e   : > { %3041 = vmatpush3.bf16.msra.mxu0 %v3211_v48 }
 0x19f   : > { %3042 = vmatprep.subr.bf16.mxu0 %v3248_v1 }
 0x1a0   : > { %3057 = vmatpush3.bf16.msra.mxu1 %v3209_v9 }
 0x1a1   : > { %3058 = vmatprep.subr.bf16.mxu1 %v3248_v1 }
 0x1a2   : > { %3043 = vmatpush3.bf16.msra.mxu0 %v3212_v49 }
 0x1a3   : > { %3044 = vmatprep.subr.bf16.mxu0 %v3248_v1 }
 0x1a4   : > { %3059 = vmatpush3.bf16.msra.mxu1 %v3210_v45 }
 0x1a5   : > { %3060 = vmatprep.subr.bf16.mxu1 %v3248_v1 }
 0x1a6   : > { %3045 = vmatpush3.bf16.msra.mxu0 %v3213_v50 }
 0x1a7   : > { %3046 = vmatprep.subr.bf16.mxu0 %v3248_v1 }
 0x1a8   : > { %3061 = vmatpush3.bf16.msra.mxu1 %v3211_v48 }
 0x1a9   : > { %3062 = vmatprep.subr.bf16.mxu1 %v3248_v1 }
 0x1aa   : > { %3047 = vmatpush3.bf16.msra.mxu0 %v3214_v51 }
 0x1ab   : > { %3048 = vmatprep.subr.bf16.mxu0 %v3248_v1 }
 0x1ac   : > { %3063 = vmatpush3.bf16.msra.mxu1 %v3212_v49 }
 0x1ad   : > { %3064 = vmatprep.subr.bf16.mxu1 %v3248_v1 }
 0x1ae   : > { %3049 = vmatpush3.bf16.msra.mxu0 %v3215_v52 }
 0x1af   : > { %3074 = vmatprep.subr.bf16.mxu0 %v3248_v1 }
 0x1b0   : > { %3065 = vmatpush3.bf16.msra.mxu1 %v3213_v50 }
 0x1b1   : > { %3066 = vmatprep.subr.bf16.mxu1 %v3248_v1 }
 0x1b4   : > { %3067 = vmatpush3.bf16.msra.mxu1 %v3214_v51 }
 0x1b5   : > { %3068 = vmatprep.subr.bf16.mxu1 %v3248_v1 }
 0x1b8   : > { %3069 = vmatpush3.bf16.msra.mxu1 %v3215_v52  ;;  %v1974_v52 = vrot.slane %v1916_v10, %v3448_v16  ;;  %v3226_v10 = vld [vmem:[%s4050_s21 + $0x28] sm:$0xff]  }
 0x1b9   : > { %3094 = vmatprep.subr.bf16.mxu1 %v3248_v1 }
 0x251   : > { %v1699_v57 = vpop.f32.mrf.mxu0 }
 0x252   : > { %v1752_v58 = vadd.f32 %v2579_v55, %v1699_v57  ;;  %v1917_v57 = vld [vmem:[%s4045_s16 + $0x8] sm:$0x7] }
 0x253   : > { %v3012_v59 = vpop.f32.mrf.mxu0  ;;  %v1990_v4 = vrot.slane %v1917_v57, %v3446_v15 }
 0x254   : > { %v1754_v61 = vmax.f32 %v1752_v58, 0.0 }
 0x255   : > { %v1702_v62 = vpop.f32.mrf.mxu0 }
 0x256   : > { %v3851_v63 = vadd.f32 %v1754_v61, %v1084_v60  ;;  %v1982_v60 = vrot.slane %v1917_v57, %v3413_v6 }
 0x257   : > { %v3013_v0 = vpop.f32.mrf.mxu0 }
 0x258   : > { %v1774_v3 = vpack.c.bf16 %v3851_v63, %v3851_v63 }
 0x25a   : > { %3051 = vmatmul.mubr.bf16.vlgmr.msra.gmra.mxu0 %v1774_v3 }
 0x25b   : > { %v1739_v41 = vpop.f32.mrf.mxu1  ;;  %3075 = vmatpush3.bf16.msra.mxu0 %v3216_v2  ;;  %3090 = vmatprep.mubr.msk.bf16.mxu0 %vm3249_vm0, %v3248_v1 }
 0x25c   : > { %v1753_v5 = vadd.f32 %v2579_v55, %v1739_v41  ;;  %3076 = vmatprep.subr.bf16.mxu0 %v3248_v1 }
 0x25d   : > { %v3032_v8 = vpop.f32.mrf.mxu1 }
 0x25e   : > { %v1755_v12 = vmax.f32 %v1753_v5, 0.0  ;;  %v1998_v8 = vrot.slane %v1917_v57, %v3448_v16 }
 0x25f   : > { %v1742_v13 = vpop.f32.mrf.mxu1  ;;  %3077 = vmatpush3.bf16.msra.mxu0 %v3217_v42 }
 0x260   : > { %v3862_v14 = vadd.f32 %v1755_v12, %v1085_v11  ;;  %3078 = vmatprep.subr.bf16.mxu0 %v3248_v1  ;;  %v2000_v24 = vmul.f32 0.0, %v1998_v8 }
 0x261   : > { %v3033_v18 = vpop.f32.mrf.mxu1 }
 0x262   : > { %v1775_v19 = vpack.c.bf16 %v3862_v14, %v3862_v14 }
 0x263   : > { %3079 = vmatpush3.bf16.msra.mxu0 %v3218_v54 }
 0x264   : > { %3071 = vmatmul.mubr.bf16.vlgmr.msra.gmra.mxu1 %v1775_v19  ;;  %3080 = vmatprep.subr.bf16.mxu0 %v3248_v1 }
 0x265   : > { %3095 = vmatpush3.bf16.msra.mxu1 %v3216_v2  ;;  %3110 = vmatprep.mubr.msk.bf16.mxu1 %vm3249_vm0, %v3248_v1 }
 0x266   : > { %3096 = vmatprep.subr.bf16.mxu1 %v3248_v1 }
 0x267   : > { %3081 = vmatpush3.bf16.msra.mxu0 %v3219_v22 }
 0x268   : > { %3082 = vmatprep.subr.bf16.mxu0 %v3248_v1 }
 0x269   : > { %3097 = vmatpush3.bf16.msra.mxu1 %v3217_v42 }
 0x26a   : > { %3098 = vmatprep.subr.bf16.mxu1 %v3248_v1 }
 0x26b   : > { %3083 = vmatpush3.bf16.msra.mxu0 %v3220_v23 }
 0x26c   : > { %3084 = vmatprep.subr.bf16.mxu0 %v3248_v1 }
 0x26d   : > { %3099 = vmatpush3.bf16.msra.mxu1 %v3218_v54 }
 0x26e   : > { %3100 = vmatprep.subr.bf16.mxu1 %v3248_v1 }
 0x26f   : > { %3085 = vmatpush3.bf16.msra.mxu0 %v3221_v26 }
 0x270   : > { %3086 = vmatprep.subr.bf16.mxu0 %v3248_v1 }
 0x271   : > { %3101 = vmatpush3.bf16.msra.mxu1 %v3219_v22 }
 0x272   : > { %3102 = vmatprep.subr.bf16.mxu1 %v3248_v1 }
 0x273   : > { %3087 = vmatpush3.bf16.msra.mxu0 %v3222_v29 }
 0x274   : > { %3088 = vmatprep.subr.bf16.mxu0 %v3248_v1 }
 0x275   : > { %3103 = vmatpush3.bf16.msra.mxu1 %v3220_v23  ;;  %v1984_v23 = vmul.f32 0.0, %v1982_v60 }
 0x276   : > { %3104 = vmatprep.subr.bf16.mxu1 %v3248_v1 }
 0x277   : > { %3089 = vmatpush3.bf16.msra.mxu0 %v3223_v30 }
 0x278   : > { %3114 = vmatprep.subr.bf16.mxu0 %v3248_v1 }
 0x279   : > { %3105 = vmatpush3.bf16.msra.mxu1 %v3221_v26 }
 0x27a   : > { %3106 = vmatprep.subr.bf16.mxu1 %v3248_v1 }
 0x27d   : > { %3107 = vmatpush3.bf16.msra.mxu1 %v3222_v29 }
 0x27e   : > { %3108 = vmatprep.subr.bf16.mxu1 %v3248_v1 }
 0x281   : > { %3109 = vmatpush3.bf16.msra.mxu1 %v3223_v30 }
 0x282   : > { %3134 = vmatprep.subr.bf16.mxu1 %v3248_v1 }
 0x31a   : > { %v1858_v37 = vpop.f32.mrf.mxu0 }
 0x31b   : > { %v1911_v7 = vadd.f32 %v2588_v35, %v1858_v37 }
 0x31c   : > { %v3052_v31 = vpop.f32.mrf.mxu0 }
 0x31d   : > { %v1913_v38 = vmax.f32 %v1911_v7, 0.0 }
 0x31e   : > { %v1861_v36 = vpop.f32.mrf.mxu0 }
 0x31f   : > { %v1921_v39 = vrot.slane %v1913_v38, 7  ;;  %v1927_v45 = vrot.slane %v1913_v38, 1  ;;  %v1944_v50 = vmul.f32 %v1942_v34, %v1913_v38  ;;  %v1967_v51 = vmul.f32 %v1966_v44, %v1913_v38  ;;  %v3228_v36 = vld [vmem:[%s4050_s21 + $0x18] sm:$0xff]  }
 0x320   : > { %v3053_v9 = vpop.f32.mrf.mxu0 }
 0x321   : > { %v1925_v28 = vsel %vm840_vm1, 0.0, %v1921_v39  ;;  %v1931_v55 = vsel %vm840_vm1, %v1927_v45, 0.0  ;;  %v3229_v39 = vld [vmem:[%s4050_s21 + $0x10] sm:$0xff]   ;;  %v3231_v9 = vld [vmem:[%s4050_s21] sm:$0xff]  }
 0x322   : > { %v1959_v43 = vmul.f32 %v1958_v20, %v1925_v28  ;;  %v1938_v46 = vmul.f32 %v1936_v33, %v1925_v28  ;;  %v1952_v2 = vmul.f32 %v1950_v21, %v1931_v55  ;;  %v1975_v3 = vmul.f32 %v1974_v52, %v1931_v55  ;;  %v3224_v21 = vld [vmem:[%s4050_s21 + $0x38] sm:$0xff]   ;;  %v2599_v28 = vld [vmem:[%s4048_s19] ss:$0 sm:$0xff] }
 0x323   : > { %v1992_v33 = vmul.f32 0.0, %v1990_v4 }
 0x324   : > { %v1961_v47 = vadd.f32 %v1959_v43, %v1953_v40  ;;  %v1898_v48 = vpop.f32.mrf.mxu1  ;;  %v1946_v58 = vadd.f32 %v1944_v50, %v1938_v46  ;;  %v3230_v40 = vld [vmem:[%s4050_s21 + $0x8] sm:$0xff]   ;;  %v2590_v43 = vld [vmem:[%s4049_s20] ss:$0 sm:$0xff] }
 0x325   : > { %v1912_v49 = vadd.f32 %v2588_v35, %v1898_v48  ;;  %v2019_v57 = vmul.f32 %v2590_v43, %v3862_v14  ;;  %v3233_v14 = vld [vmem:[%s4052_s23 + $0x30] sm:$0xff]  }
 0x326   : > { %v3072_v53 = vpop.f32.mrf.mxu1  ;;  %v1969_v59 = vadd.f32 %v1967_v51, %v1961_v47  ;;  %v1954_v11 = vadd.f32 %v1952_v2, %v1946_v58  ;;  %v2018_v47 = vmul.f32 %v2590_v43, %v3851_v63  ;;  %v3232_v63 = vld [vmem:[%s4052_s23 + $0x38] sm:$0xff]   ;;  %v3235_v2 = vld [vmem:[%s4052_s23 + $0x20] sm:$0xff]  }
 0x327   : > { %v1914_v56 = vmax.f32 %v1912_v49, 0.0 }
 0x328   : > { %v1901_v61 = vpop.f32.mrf.mxu1  ;;  %v1977_v12 = vadd.f32 %v1975_v3, %v1969_v59  ;;  %v3236_v3 = vld [vmem:[%s4052_s23 + $0x18] sm:$0xff]  }
 0x329   : > { %v1922_v62 = vrot.slane %v1914_v56, 7  ;;  %v1928_v0 = vrot.slane %v1914_v56, 1  ;;  %v1968_v6 = vmul.f32 %v1966_v44, %v1914_v56  ;;  %v1991_v22 = vmul.f32 %v1990_v4, %v1914_v56  ;;  %v3237_v4 = vld [vmem:[%s4052_s23 + $0x10] sm:$0xff]  }
 0x32a   : > { %v3073_v41 = vpop.f32.mrf.mxu1 }
 0x32b   : > { %v1926_v5 = vsel %vm840_vm1, 0.0, %v1922_v62  ;;  %v1932_v19 = vsel %vm840_vm1, %v1928_v0, 0.0  ;;  %v3234_v0 = vld [vmem:[%s4052_s23 + $0x28] sm:$0xff]  }
 0x32c   : > { %v1960_v13 = vmul.f32 %v1958_v20, %v1926_v5  ;;  %v1983_v18 = vmul.f32 %v1982_v60, %v1926_v5  ;;  %v1976_v29 = vmul.f32 %v1974_v52, %v1932_v19  ;;  %v1999_v15 = vmul.f32 %v1998_v8, %v1932_v19  ;;  %v3227_v20 = vld [vmem:[%s4050_s21 + $0x20] sm:$0xff]   ;;  %v3238_v41 = vld [vmem:[%s4052_s23 + $0x8] sm:$0xff]  }
 0x32d   : > { %v3239_v5 = vld [vmem:[%s4052_s23] sm:$0xff]  }
 0x32e   : > { %v1962_v42 = vadd.f32 %v1960_v13, %v1954_v11  ;;  %v1985_v54 = vadd.f32 %v1983_v18, %v1977_v12  ;;  %v2608_v11 = vld [vmem:[%s4051_s22] ss:$0 sm:$0xff] }
 0x330   : > { %v1970_v26 = vadd.f32 %v1968_v6, %v1962_v42  ;;  %v1993_v30 = vadd.f32 %v1991_v22, %v1985_v54 }
 0x332   : > { %v1978_v16 = vadd.f32 %v1976_v29, %v1970_v26  ;;  %v2001_v34 = vadd.f32 %v1999_v15, %v1993_v30 }
 0x334   : > { %v2009_v35 = vadd.f32 %v2589_v32, %v2001_v34  ;;  %v1986_v25 = vadd.f32 %v1984_v23, %v1978_v16 }
 0x336   : > { %v2036_v37 = vpack.c.bf16 %v2009_v35, %v2009_v35  ;;  %v1994_v7 = vadd.f32 %v1992_v33, %v1986_v25 }
 0x338   : > { %3091 = vmatmul.mubr.bf16.vlgmr.msra.gmra.mxu0 %v2036_v37  ;;  %v2002_v27 = vadd.f32 %v2000_v24, %v1994_v7  ;;  %v2365_v7 = vld [vmem:[%s4085_s5] sm:$0x1] }
 0x339   : > { %3115 = vmatpush3.bf16.msra.mxu0 %v3224_v21  ;;  %3130 = vmatprep.mubr.msk.bf16.mxu0 %vm3249_vm0, %v3248_v1 }
 0x33a   : > { %v2010_v31 = vadd.f32 %v2589_v32, %v2002_v27  ;;  %3116 = vmatprep.subr.bf16.mxu0 %v3248_v1 }
 0x33c   : > { %v2037_v38 = vpack.c.bf16 %v2010_v31, %v2010_v31 }
 0x33d   : > { %3117 = vmatpush3.bf16.msra.mxu0 %v3225_v17 }
 0x33e   : > { %3111 = vmatmul.mubr.bf16.vlgmr.msra.gmra.mxu1 %v2037_v38  ;;  %3118 = vmatprep.subr.bf16.mxu0 %v3248_v1 }
 0x33f   : > { %3135 = vmatpush3.bf16.msra.mxu1 %v3224_v21  ;;  %3150 = vmatprep.mubr.msk.bf16.mxu1 %vm3249_vm0, %v3248_v1 }
 0x340   : > { %3136 = vmatprep.subr.bf16.mxu1 %v3248_v1 }
 0x341   : > { %3119 = vmatpush3.bf16.msra.mxu0 %v3226_v10 }
 0x342   : > { %3120 = vmatprep.subr.bf16.mxu0 %v3248_v1 }
 0x343   : > { %3137 = vmatpush3.bf16.msra.mxu1 %v3225_v17 }
 0x344   : > { %3138 = vmatprep.subr.bf16.mxu1 %v3248_v1 }
 0x345   : > { %3121 = vmatpush3.bf16.msra.mxu0 %v3227_v20 }
 0x346   : > { %3122 = vmatprep.subr.bf16.mxu0 %v3248_v1 }
 0x347   : > { %3139 = vmatpush3.bf16.msra.mxu1 %v3226_v10 }
 0x348   : > { %3140 = vmatprep.subr.bf16.mxu1 %v3248_v1 }
 0x349   : > { %3123 = vmatpush3.bf16.msra.mxu0 %v3228_v36 }
 0x34a   : > { %3124 = vmatprep.subr.bf16.mxu0 %v3248_v1 }
 0x34b   : > { %3141 = vmatpush3.bf16.msra.mxu1 %v3227_v20 }
 0x34c   : > { %3142 = vmatprep.subr.bf16.mxu1 %v3248_v1 }
 0x34d   : > { %3125 = vmatpush3.bf16.msra.mxu0 %v3229_v39 }
 0x34e   : > { %3126 = vmatprep.subr.bf16.mxu0 %v3248_v1 }
 0x34f   : > { %3143 = vmatpush3.bf16.msra.mxu1 %v3228_v36 }
 0x350   : > { %3144 = vmatprep.subr.bf16.mxu1 %v3248_v1 }
 0x351   : > { %3127 = vmatpush3.bf16.msra.mxu0 %v3230_v40 }
 0x352   : > { %3128 = vmatprep.subr.bf16.mxu0 %v3248_v1 }
 0x353   : > { %3145 = vmatpush3.bf16.msra.mxu1 %v3229_v39 }
 0x354   : > { %3146 = vmatprep.subr.bf16.mxu1 %v3248_v1 }
 0x355   : > { %3129 = vmatpush3.bf16.msra.mxu0 %v3231_v9 }
 0x356   : > { %3154 = vmatprep.subr.bf16.mxu0 %v3248_v1 }
 0x357   : > { %3147 = vmatpush3.bf16.msra.mxu1 %v3230_v40 }
 0x358   : > { %3148 = vmatprep.subr.bf16.mxu1 %v3248_v1 }
 0x35b   : > { %3149 = vmatpush3.bf16.msra.mxu1 %v3231_v9 }
 0x3f8   : > { %v2120_v44 = vpop.f32.mrf.mxu0 }
 0x3f9   : > { %v2173_v45 = vadd.f32 %v2599_v28, %v2120_v44 }
 0x3fa   : > { %v3092_v46 = vpop.f32.mrf.mxu0 }
 0x3fb   : > { %v2175_v48 = vmax.f32 %v2173_v45, 0.0 }
 0x3fc   : > { %v2123_v49 = vpop.f32.mrf.mxu0 }
 0x3fd   : > { %v2177_v50 = vadd.f32 %v2175_v48, %v2018_v47 }
 0x3fe   : > { %v3093_v51 = vpop.f32.mrf.mxu0  ;;  %v2160_v52 = vpop.f32.mrf.mxu1 }
 0x3ff   : > { %v2195_v53 = vpack.c.bf16 %v2177_v50, %v2177_v50  ;;  %v2174_v55 = vadd.f32 %v2599_v28, %v2160_v52 }
 0x400   : > { %v3112_v56 = vpop.f32.mrf.mxu1 }
 0x401   : > { %v2176_v58 = vmax.f32 %v2174_v55, 0.0  ;;  %3131 = vmatmul.mubr.bf16.vlgmr.msra.gmra.mxu0 %v2195_v53 }
 0x402   : > { %v2163_v59 = vpop.f32.mrf.mxu1  ;;  %3170 = vmatprep.mubr.msk.bf16.mxu0 %vm3249_vm0, %v3248_v1  ;;  %3155 = vmatpush3.bf16.msra.mxu0 %v3232_v63 }
 0x403   : > { %v2178_v60 = vadd.f32 %v2176_v58, %v2019_v57  ;;  %3156 = vmatprep.subr.bf16.mxu0 %v3248_v1 }
 0x404   : > { %v3113_v61 = vpop.f32.mrf.mxu1 }
 0x405   : > { %v2196_v62 = vpack.c.bf16 %v2178_v60, %v2178_v60 }
 0x406   : > { %3157 = vmatpush3.bf16.msra.mxu0 %v3233_v14 }
 0x407   : > { %3151 = vmatmul.mubr.bf16.vlgmr.msra.gmra.mxu1 %v2196_v62  ;;  %3158 = vmatprep.subr.bf16.mxu0 %v3248_v1 }
 0x40a   : > { %3159 = vmatpush3.bf16.msra.mxu0 %v3234_v0 }
 0x40b   : > { %3160 = vmatprep.subr.bf16.mxu0 %v3248_v1 }
 0x40e   : > { %3161 = vmatpush3.bf16.msra.mxu0 %v3235_v2 }
 0x40f   : > { %3162 = vmatprep.subr.bf16.mxu0 %v3248_v1 }
 0x412   : > { %3163 = vmatpush3.bf16.msra.mxu0 %v3236_v3 }
 0x413   : > { %3164 = vmatprep.subr.bf16.mxu0 %v3248_v1 }
 0x416   : > { %3165 = vmatpush3.bf16.msra.mxu0 %v3237_v4 }
 0x417   : > { %3166 = vmatprep.subr.bf16.mxu0 %v3248_v1 }
 0x41a   : > { %3167 = vmatpush3.bf16.msra.mxu0 %v3238_v41 }
 0x41b   : > { %3168 = vmatprep.subr.bf16.mxu0 %v3248_v1 }
 0x41e   : > { %3169 = vmatpush3.bf16.msra.mxu0 %v3239_v5 }
 0x4c1   : > { %v2279_v8 = vpop.f32.mrf.mxu0 }
 0x4c2   : > { %v2332_v13 = vadd.f32 %v2608_v11, %v2279_v8 }
 0x4c3   : > { %v3132_v12 = vpop.f32.mrf.mxu0 }
 0x4c4   : > { %v2334_v6 = vmax.f32 %v2332_v13, 0.0 }
 0x4c5   : > { %v2282_v18 = vpop.f32.mrf.mxu0 }
 0x4c6   : > { %v2337_v29 = vsel %vm2336_vm2, %v2334_v6, 0.0 }
 0x4c7   : > { %v3133_v19 = vpop.f32.mrf.mxu0  ;;  %v2319_v42 = vpop.f32.mrf.mxu1 }
 0x4c8   : > { %v2333_v54 = vadd.f32 %v2608_v11, %v2319_v42 }
 0x4c9   : > { %v3152_v22 = vpop.f32.mrf.mxu1 }
 0x4ca   : > { %v2335_v23 = vmax.f32 %v2333_v54, 0.0 }
 0x4cb   : > { %v2322_v26 = vpop.f32.mrf.mxu1 }
 0x4cc   : > { %v2338_v1 = vsel %vm2336_vm2, %v2335_v23, 0.0 }
 0x4cd   : > { %v2339_v30 = vadd.f32 %v2338_v1, %v2337_v29  ;;  %v3153_v15 = vpop.f32.mrf.mxu1 }
 0x4cf   : > { %v2340_v32 = vsel %vm2336_vm2, %v2339_v30, 0.0 }
 0x4d0   : > { %v2341_v16 = vrot.slane %v2340_v32, 4 }
 0x4d2   : > { %v2342_v33 = vadd.f32 %v2341_v16, %v2340_v32 }
 0x4d4   : > { %v2343_v34 = vrot.slane %v2342_v33, 2 }
 0x4d6   : > { %v2344_v35 = vadd.f32 %v2343_v34, %v2342_v33 }
 0x4d8   : > { %v2345_v25 = vrot.slane %v2344_v35, 1 }
 0x4da   : > { %v2346_v24 = vadd.f32 %v2345_v25, %v2344_v35 }
 0x4dc   : > { %v2347_v21 = vmul.f32 0.25, %v2346_v24 }
 0x4de   : > { %v2364_v37 = vpack.c.bf16 %v2347_v21, %v2347_v21 }
 0x4e0   : > { %3171 = vmatmul.mubr.bf16.vlgmr.msra.gmra.mxu0 %v2364_v37 }
 0x5a0   : > { %v2448_v27 = vpop.f32.mrf.mxu0 }
 0x5a1   : > { %v2449_v17 = vadd.f32 %v2448_v27, %v2365_v7 }
 0x5a2   : > { %v3172_v31 = vpop.f32.mrf.mxu0 }
 0x5a3   : > { %2454 = vst [vmem:[%s820_s9] sm:$0x1] %v2449_v17 }
 0x5a4   : > { %v2451_v38 = vpop.f32.mrf.mxu0 }
 0x5a6   : > { %v3173_v10 = vpop.f32.mrf.mxu0 }
 0x5a7 PF: > { %s4087_s0 = sld [smem:[#allocation2_spill]] }
 0x5ad   : > { %s35_s29 = sadd.s32 1, %s4087_s0  }
 0x5ae   : > { %p32_p4 = scmp.ge.s32.totalorder %s35_s29, 4  }
 0x5b0   :  { %34 = sbr.rel (!%p32_p4) target bundleno = 13 (0xd), region = 159 }

</bundles_post_ra>
